<compile_context>
chip_gen: v5e
topology: v5e:2x2
jax: 0.10.0
libtpu: 0.0.40
codegen_flags: <defaults>
</compile_context>

<pallas_src>
import jax
import jax.numpy as jnp
from jax.experimental import pallas as pl
from jax.experimental.pallas import tpu as pltpu

MATMUL_DTYPE = jnp.bfloat16   # bf16 MXU operands on v5e/v6e/v7x; f32 for parity tests
_EPS = 1e-5
_K = 3                        # kernel_size (module default); padding = 1


# --------------------------------------------------------------------------
# conv0 LHS preparation: stride-phase decomposition (done once in XLA; every
# conv tap becomes a *contiguous* row-slice inside the kernel, and no 9x
# im2col is materialized in HBM).
# --------------------------------------------------------------------------
def _conv_groups(stride, k=_K):
    """(row-phase a, col-phase b, col-offset j0) groups for the phase LHS."""
    groups = []
    for a in range(stride):
        for b in range(stride):
            for j0 in range((k - 1 - b) // stride + 1):
                groups.append((a, b, j0))
    return groups


def _build_conv0_lhs(xp, stride, groups, HE, Wf, dtype, k=_K):
    """xp is the *already zero-padded / framed* NHWC input (N, H+2, W+2, Cin).
    For each group build E with E[r, c] = phase[r-1, c-1+j0] (zero padded),
    flatten to (N, HE*Wf, Cin) and concatenate groups along rows."""
    N, Hp, Wp, Cin = xp.shape
    parts = []
    for (a, b, j0) in groups:
        ph = xp[:, a::stride, b::stride, :]              # (N, Rb, Cb, Cin)
        Rb, Cb = ph.shape[1], ph.shape[2]
        pad_bot = max(0, HE - (Rb + 1))
        pad_rgt = max(0, (j0 + Wf) - (Cb + 1))
        php = jnp.pad(ph, ((0, 0), (1, pad_bot), (1, pad_rgt), (0, 0)))
        e = php[:, :HE, j0:j0 + Wf, :]                   # E[r,c] = ph[r-1, c-1+j0]
        parts.append(e.reshape(N, HE * Wf, Cin))
    return jnp.concatenate(parts, axis=1).astype(dtype)  # (N, G*HE*Wf, Cin)


# --------------------------------------------------------------------------
# Capability probe: minor-dim (lane) concatenation of narrow tiles + value
# lane-slicing, needed for the single-dot K-packed conv path.  Falls back to
# per-tap dots (the previously validated path) if Mosaic rejects it.
# --------------------------------------------------------------------------
def _probe_fused_taps():
    rows, c, taps, cout = 104, 4, 9, 16

    def _k(x_ref, w_ref, o_ref):
        pieces = [x_ref[t * rows:(t + 1) * rows, :] for t in range(taps)]
        xx = jnp.concatenate(pieces, axis=-1)                    # (rows, 36)
        y = jnp.dot(xx, w_ref[...], preferred_element_type=jnp.float32)
        o_ref[...] = y[:, :cout // 2] + y[:, cout // 2:]

    try:
        x = jnp.ones((rows * taps, c), jnp.bfloat16)
        w = jnp.ones((taps * c, cout), jnp.bfloat16)
        out = pl.pallas_call(
            _k, out_shape=jax.ShapeDtypeStruct((rows, cout // 2), jnp.float32),
        )(x, w)
        jax.block_until_ready(out)
        return bool(jnp.all(out == float(2 * taps * c)))
    except Exception:                    # lowering unsupported -> per-tap dots
        return False


_FUSE_TAPS = _probe_fused_taps()


# --------------------------------------------------------------------------
# Fused per-stage kernel: conv0(+residual conv) -> IN -> PReLU -> conv1
#                         -> IN -> PReLU -> + residual      (one pallas_call)
# --------------------------------------------------------------------------
def _make_stage_kernel(stride, Ho, Wo, Hf, Wf, HE, Cin, Cout, groups,
                       frame_rows, fuse_taps, k=_K):
    gidx = {g: i for i, g in enumerate(groups)}
    L = Hf * Wf                      # flattened frame (1-px border) length
    inv_cnt = 1.0 / float(Ho * Wo)   # InstanceNorm uses only the valid pixels

    taps_off0 = []                   # conv0 tap row-offsets in the phase LHS
    for ki in range(k):
        for kj in range(k):
            a, b = ki % stride, kj % stride
            i0, j0 = ki // stride, kj // stride
            taps_off0.append(gidx[(a, b, j0)] * (HE * Wf) + i0 * Wf)
    taps_off1 = [ki * Wf + kj for ki in range(k) for kj in range(k)]

    def _inst_norm_prelu(y, mask, alpha):
        # masked two-pass InstanceNorm (affine=False, biased var) + PReLU, f32
        m1 = jnp.sum(y * mask, axis=0, keepdims=True) * inv_cnt
        d = (y - m1) * mask
        var = jnp.sum(d * d, axis=0, keepdims=True) * inv_cnt
        yn = (y - m1) * jax.lax.rsqrt(var + _EPS)
        return jnp.where(yn >= 0.0, yn, alpha * yn)

    def _packed_matmul(tap_vals, w_ref, n_cols, c_per_tap):
        if fuse_taps:
            x = jnp.concatenate(tap_vals, axis=-1)          # (L, 9*c_per_tap)
            return jnp.dot(x, w_ref[...], preferred_element_type=jnp.float32)
        acc = jnp.zeros((L, n_cols), jnp.float32)           # fallback path
        for t, xv in enumerate(tap_vals):
            acc = acc + jnp.dot(xv, w_ref[t * c_per_tap:(t + 1) * c_per_tap, :],
                                preferred_element_type=jnp.float32)
        return acc

    def kernel(a_ref, lhs_ref, w0r_ref, rb_ref, w1_ref, o_ref, frame_ref):
        # ---- valid-pixel mask generated in-kernel (no (L,1) HBM input) -----
        # float floor-div is exact for L < ~4M (well above any UNet stage).
        idx = jax.lax.broadcasted_iota(jnp.int32, (L, 1), 0).astype(jnp.float32)
        row = jnp.floor((idx + 0.5) * (1.0 / Wf))
        col = idx - row * Wf
        mask = ((row >= 1.0) & (row <= Hf - 2.0) &
                (col >= 1.0) & (col <= Wf - 2.0)).astype(jnp.float32)   # (L,1)

        # ---- conv0 + residual conv: one K=9*Cin dot, N=2*Cout fused RHS ----
        taps0 = [lhs_ref[0, off:off + L, :] for off in taps_off0]
        y = _packed_matmul(taps0, w0r_ref, 2 * Cout, Cin)    # (L, 2*Cout) f32
        res = y[:, Cout:] + rb_ref[...]
        # NOTE: branch conv bias omitted: InstanceNorm(affine=False) cancels it.
        y0 = _inst_norm_prelu(y[:, :Cout], mask, a_ref[0, 0]) * mask

        # ---- place y0 in the zero-bordered frame (== conv1 zero padding) ---
        # only the border rows are cleared; the interior is overwritten by y0.
        frame_ref[0:Wf + 1, :] = jnp.zeros((Wf + 1, Cout), frame_ref.dtype)
        frame_ref[Wf + 1 + L:frame_rows, :] = jnp.zeros(
            (frame_rows - (Wf + 1 + L), Cout), frame_ref.dtype)
        frame_ref[Wf + 1:Wf + 1 + L, :] = y0.astype(frame_ref.dtype)

        # ---- conv1: 9 shifted frame slices -> one K=9*Cout dot -------------
        taps1 = [frame_ref[off:off + L, :] for off in taps_off1]
        acc1 = _packed_matmul(taps1, w1_ref, Cout, Cout)
        y1 = _inst_norm_prelu(acc1, mask, a_ref[0, 1])

        # zero border -> framed output doubles as next stage's zero padding
        o_ref[0] = ((y1 + res) * mask).astype(o_ref.dtype)

    return kernel


def _stage_forward(xp, p, stride, mm_dtype):
    """One Down / ResidualUnit(subunits=2) stage as a single fused pallas_call.

    xp: framed (zero-bordered) NHWC input (N, H+2, W+2, Cin).
    Returns the framed NHWC output (N, Ho+2, Wo+2, Cout) in mm_dtype.
    """
    N, Hp, Wp, Cin = xp.shape
    H, W = Hp - 2, Wp - 2
    Cout = p["unit0"]["w"].shape[-1]
    k = _K
    Ho = (H - 1) // stride + 1
    Wo = (W - 1) // stride + 1
    Hf, Wf = Ho + 2, Wo + 2
    L = Hf * Wf
    HE = Hf + (k - 1) // stride
    groups = _conv_groups(stride, k)
    G = len(groups)

    # -------- operands (prepared once per call in XLA) ----------------------
    lhs = _build_conv0_lhs(xp, stride, groups, HE, Wf, mm_dtype, k)
    w0 = p["unit0"]["w"].reshape(k * k * Cin, Cout)
    if stride != 1:
        wr = p["res_w"].reshape(k * k * Cin, Cout)              # 3x3 residual
    else:                                                       # 1x1 residual:
        wr = jnp.zeros((k * k * Cin, Cout), jnp.float32).at[    # centre tap only
            (k * k // 2) * Cin:(k * k // 2 + 1) * Cin, :].set(
            p["res_w"].reshape(Cin, Cout))
    w0r = jnp.concatenate([w0, wr], axis=1).astype(mm_dtype)    # (9*Cin, 2*Cout)
    w1 = p["unit1"]["w"].reshape(k * k * Cout, Cout).astype(mm_dtype)
    rb = p["res_b"].reshape(1, Cout).astype(jnp.float32)
    alphas = jnp.stack([jnp.asarray(p["unit0"]["prelu_a"], jnp.float32),
                        jnp.asarray(p["unit1"]["prelu_a"], jnp.float32)]
                       ).reshape(1, 2)

    frame_rows = ((L + 2 * Wf + 2 + 7) // 8) * 8
    kernel = _make_stage_kernel(stride, Ho, Wo, Hf, Wf, HE, Cin, Cout, groups,
                                frame_rows, _FUSE_TAPS, k)

    out = pl.pallas_call(
        kernel,
        out_shape=jax.ShapeDtypeStruct((N, L, Cout), mm_dtype),
        grid=(N,),
        in_specs=[
            pl.BlockSpec((1, 2), lambda n: (0, 0),
                         memory_space=pltpu.MemorySpace.SMEM),         # PReLU a0,a1
            pl.BlockSpec((1, G * HE * Wf, Cin), lambda n: (n, 0, 0)),  # conv0 LHS
            pl.BlockSpec(w0r.shape, lambda n: (0, 0)),                 # conv0+res W
            pl.BlockSpec((1, Cout), lambda n: (0, 0)),                 # residual b
            pl.BlockSpec(w1.shape, lambda n: (0, 0)),                  # conv1 W
        ],
        out_specs=pl.BlockSpec((1, L, Cout), lambda n: (n, 0, 0)),
        scratch_shapes=[pltpu.VMEM((frame_rows, Cout), mm_dtype)],
        compiler_params=pltpu.CompilerParams(
            dimension_semantics=("parallel",),      # batch across v7x 2 TCs
            vmem_limit_bytes=48 * 1024 * 1024),     # <= 48 MiB: safe on v7x too
    )(alphas, lhs, w0r, rb, w1)

    return out.reshape(N, Hf, Wf, Cout)


# -------------------------- module-equivalent fwd ---------------------------
def encoder_forward(x_nchw, params, full_strides, matmul_dtype=MATMUL_DTYPE):
    """Matches Encoder.forward: returns the list of per-stage features (NCHW)."""
    # TODO(synk): Dropout(p=0.0) in this config is the identity (no kernel).
    # TODO(synk): the MONAI identity-residual case (stride==1, c_in==c_out) is
    #             not special-cased (channels change every stage here).
    x = jnp.transpose(x_nchw, (0, 2, 3, 1)).astype(jnp.float32)    # NCHW -> NHWC
    xp = jnp.pad(x, ((0, 0), (1, 1), (1, 1), (0, 0)))              # framed input
    feas = []
    for p, s in zip(params, full_strides):
        xp = _stage_forward(xp, p, s, matmul_dtype)   # framed output, zero border
        feas.append(jnp.transpose(xp[:, 1:-1, 1:-1, :], (0, 3, 1, 2))
                    .astype(jnp.float32))
    return feas


def init_encoder_params(key, in_channels, channels, strides, kernel_size=3):
    assert kernel_size == _K, "only kernel_size=3 implemented"
    c_ins = [in_channels] + list(channels[:-1])
    c_outs = list(channels)
    # zip_longest(..., fillvalue=1) semantics for strides
    full_strides = list(strides) + [1] * (len(channels) - len(strides))

    def w_init(k_, shape):
        return 0.1 * jax.random.normal(k_, shape, jnp.float32)

    params = []
    for c_in, c_out, s in zip(c_ins, c_outs, full_strides):
        key, *ks = jax.random.split(key, 7)
        rk = kernel_size if s != 1 else 1   # residual conv kernel (MONAI rule)
        params.append({
            "res_w": w_init(ks[0], (rk, rk, c_in, c_out)),
            "res_b": w_init(ks[1], (c_out,)),
            "unit0": {
                "w": w_init(ks[2], (kernel_size, kernel_size, c_in, c_out)),
                "b": w_init(ks[3], (c_out,)),      # kept for parity; cancelled by IN
                "prelu_a": jnp.float32(0.25),      # nn.PReLU() default init
            },
            "unit1": {
                "w": w_init(ks[4], (kernel_size, kernel_size, c_out, c_out)),
                "b": w_init(ks[5], (c_out,)),
                "prelu_a": jnp.float32(0.25),
            },
        })
    return params, full_strides


# --------------------------- pure-JAX reference -----------------------------
def _conv_ref(x, w, b, stride, padding):
    y = jax.lax.conv_general_dilated(
        x, w, window_strides=(stride, stride),
        padding=((padding, padding), (padding, padding)),
        dimension_numbers=("NHWC", "HWIO", "NHWC"),
        precision=jax.lax.Precision.HIGHEST)
    return y + b.reshape(1, 1, 1, -1)


def _inst_norm_prelu_ref(y, alpha):
    m = jnp.mean(y, axis=(1, 2), keepdims=True)
    v = jnp.mean((y - m) ** 2, axis=(1, 2), keepdims=True)
    yn = (y - m) * jax.lax.rsqrt(v + _EPS)
    return jnp.where(yn >= 0.0, yn, alpha * yn)


def encoder_reference(x_nchw, params, full_strides):
    x = jnp.transpose(x_nchw, (0, 2, 3, 1)).astype(jnp.float32)
    feas = []
    for p, s in zip(params, full_strides):
        if s != 1:
            res = _conv_ref(x, p["res_w"], p["res_b"], s, 1)
        else:
            res = _conv_ref(x, p["res_w"], p["res_b"], 1, 0)
        y = _inst_norm_prelu_ref(
            _conv_ref(x, p["unit0"]["w"], p["unit0"]["b"], s, 1),
            p["unit0"]["prelu_a"])
        y = _inst_norm_prelu_ref(
            _conv_ref(y, p["unit1"]["w"], p["unit1"]["b"], 1, 1),
            p["unit1"]["prelu_a"])
        x = y + res
        feas.append(jnp.transpose(x, (0, 3, 1, 2)))
    return feas


if __name__ == "__main__":
    key = jax.random.PRNGKey(0)
    kx, kp = jax.random.split(key)

    # Small config consistent with the module: spatial_dims=2, in_channels=4,
    # channels=[8, 16, 32], strides=[2, 2] (last stage stride 1 via zip_longest
    # fillvalue), kernel_size=3, num_res_units=2.
    x = jax.random.normal(kx, (2, 4, 16, 16), jnp.float32)      # NCHW like torch
    params, full_strides = init_encoder_params(kp, 4, [8, 16, 32], [2, 2])

    fwd = jax.jit(lambda xx: encoder_forward(xx, params, full_strides))
    feas = jax.block_until_ready(fwd(x))

    expected = [(2, 8, 8, 8), (2, 16, 4, 4), (2, 32, 4, 4)]
    assert [tuple(f.shape) for f in feas] == expected, \
        [tuple(f.shape) for f in feas]
    assert all(bool(jnp.all(jnp.isfinite(f))) for f in feas)

    # Correctness guard: exact-f32 matmul path vs a pure-JAX reference
    # (tolerance absorbs matmul pass-precision differences only).
    fwd32 = jax.jit(lambda xx: encoder_forward(xx, params, full_strides,
                                               matmul_dtype=jnp.float32))
    feas32 = jax.block_until_ready(fwd32(x))
    ref = jax.block_until_ready(
        jax.jit(lambda xx: encoder_reference(xx, params, full_strides))(x))
    for got, want in zip(feas32, ref):
        assert bool(jnp.allclose(got, want, atol=3e-2, rtol=3e-2)), \
            float(jnp.max(jnp.abs(got - want)))

    print("KERNEL_OK")
</pallas_src>

<mosaic_0001>
module attributes {stable_mosaic.version = 11 : i64} {
  func.func @_k(%arg0: memref<936x4xbf16, #tpu.memory_space<vmem>>, %arg1: memref<36x16xbf16, #tpu.memory_space<vmem>>, %arg2: memref<104x8xf32, #tpu.memory_space<vmem>>) attributes {dimension_semantics = [], scalar_prefetch = 0 : i64, scratch_operands = 0 : i64, tpu.core_type = #tpu.core_type<tc>} {
    %c0 = arith.constant 0 : index
    %c0_0 = arith.constant 0 : index
    %0 = vector.load %arg0[%c0, %c0_0] : memref<936x4xbf16, #tpu.memory_space<vmem>>, vector<104x4xbf16>
    %c104 = arith.constant 104 : index
    %c0_1 = arith.constant 0 : index
    %1 = vector.load %arg0[%c104, %c0_1] : memref<936x4xbf16, #tpu.memory_space<vmem>>, vector<104x4xbf16>
    %c208 = arith.constant 208 : index
    %c0_2 = arith.constant 0 : index
    %2 = vector.load %arg0[%c208, %c0_2] : memref<936x4xbf16, #tpu.memory_space<vmem>>, vector<104x4xbf16>
    %c312 = arith.constant 312 : index
    %c0_3 = arith.constant 0 : index
    %3 = vector.load %arg0[%c312, %c0_3] : memref<936x4xbf16, #tpu.memory_space<vmem>>, vector<104x4xbf16>
    %c416 = arith.constant 416 : index
    %c0_4 = arith.constant 0 : index
    %4 = vector.load %arg0[%c416, %c0_4] : memref<936x4xbf16, #tpu.memory_space<vmem>>, vector<104x4xbf16>
    %c520 = arith.constant 520 : index
    %c0_5 = arith.constant 0 : index
    %5 = vector.load %arg0[%c520, %c0_5] : memref<936x4xbf16, #tpu.memory_space<vmem>>, vector<104x4xbf16>
    %c624 = arith.constant 624 : index
    %c0_6 = arith.constant 0 : index
    %6 = vector.load %arg0[%c624, %c0_6] : memref<936x4xbf16, #tpu.memory_space<vmem>>, vector<104x4xbf16>
    %c728 = arith.constant 728 : index
    %c0_7 = arith.constant 0 : index
    %7 = vector.load %arg0[%c728, %c0_7] : memref<936x4xbf16, #tpu.memory_space<vmem>>, vector<104x4xbf16>
    %c832 = arith.constant 832 : index
    %c0_8 = arith.constant 0 : index
    %8 = vector.load %arg0[%c832, %c0_8] : memref<936x4xbf16, #tpu.memory_space<vmem>>, vector<104x4xbf16>
    %9 = tpu.concatenate %0, %1, %2, %3, %4, %5, %6, %7, %8 in 1 : vector<104x4xbf16>, vector<104x4xbf16>, vector<104x4xbf16>, vector<104x4xbf16>, vector<104x4xbf16>, vector<104x4xbf16>, vector<104x4xbf16>, vector<104x4xbf16>, vector<104x4xbf16> -> vector<104x36xbf16>
    %c0_9 = arith.constant 0 : index
    %c0_10 = arith.constant 0 : index
    %10 = vector.load %arg1[%c0_9, %c0_10] : memref<36x16xbf16, #tpu.memory_space<vmem>>, vector<36x16xbf16>
    %cst = arith.constant dense<0.000000e+00> : vector<104x16xf32>
    %11 = tpu.matmul %9, %10, %cst {dimension_numbers = #tpu.dot_dimension_numbers<[1], [0], [0], [1], [0, 0, 1, 1], [], []>} : vector<104x36xbf16>, vector<36x16xbf16>, vector<104x16xf32> -> vector<104x16xf32>
    %12 = vector.extract_strided_slice %11 {offsets = [0, 0], sizes = [104, 8], strides = [1, 1]} : vector<104x16xf32> to vector<104x8xf32>
    %13 = vector.extract_strided_slice %11 {offsets = [0, 8], sizes = [104, 8], strides = [1, 1]} : vector<104x16xf32> to vector<104x8xf32>
    %14 = arith.addf %12, %13 : vector<104x8xf32>
    %c0_11 = arith.constant 0 : index
    %c0_12 = arith.constant 0 : index
    %15 = vector.load %arg2[%c0_11, %c0_12] : memref<104x8xf32, #tpu.memory_space<vmem>>, vector<104x8xf32>
    tpu.vector_store %arg2[%c0_11, %c0_12], %14 {strides = array<i32>} : memref<104x8xf32, #tpu.memory_space<vmem>>, vector<104x8xf32>,
    return
  }
}

module attributes {stable_mosaic.version = 11 : i64} {
  func.func @kernel(%arg0: i32, %arg1: memref<1x2xf32, #tpu.memory_space<smem>>, %arg2: memref<1x660x4xbf16, #tpu.memory_space<vmem>>, %arg3: memref<36x16xbf16, #tpu.memory_space<vmem>>, %arg4: memref<1x8xf32, #tpu.memory_space<vmem>>, %arg5: memref<72x8xbf16, #tpu.memory_space<vmem>>, %arg6: memref<1x100x8xbf16, #tpu.memory_space<vmem>>, %arg7: memref<128x8xbf16, #tpu.memory_space<vmem>>) attributes {dimension_semantics = [#tpu.dimension_semantics<parallel>], iteration_bounds = array<i64: 2>, scalar_prefetch = 0 : i64, scratch_operands = 1 : i64, tpu.core_type = #tpu.core_type<tc>, window_params = [{transform_indices = @transform_0, window_bounds = array<i64: 1, 2>}, {transform_indices = @transform_1, window_bounds = array<i64: 1, 660, 4>}, {pipeline_mode = #tpu.pipeline_mode<synchronous>, transform_indices = @transform_2, window_bounds = array<i64: 36, 16>}, {pipeline_mode = #tpu.pipeline_mode<synchronous>, transform_indices = @transform_3, window_bounds = array<i64: 1, 8>}, {pipeline_mode = #tpu.pipeline_mode<synchronous>, transform_indices = @transform_4, window_bounds = array<i64: 72, 8>}, {transform_indices = @transform_5, window_bounds = array<i64: 1, 100, 8>}]} {
    %0 = tpu.iota {dimensions = array<i32: 0>} : vector<100x1xi32>
    %1 = arith.sitofp %0 : vector<100x1xi32> to vector<100x1xf32>
    %cst = arith.constant 5.000000e-01 : f32
    %2 = vector.broadcast %cst : f32 to vector<100x1xf32>
    %3 = arith.addf %1, %2 : vector<100x1xf32>
    %cst_0 = arith.constant 1.000000e-01 : f32
    %4 = vector.broadcast %cst_0 : f32 to vector<100x1xf32>
    %5 = arith.mulf %3, %4 : vector<100x1xf32>
    %6 = math.floor %5 : vector<100x1xf32>
    %cst_1 = arith.constant 1.000000e+01 : f32
    %7 = vector.broadcast %cst_1 : f32 to vector<100x1xf32>
    %8 = arith.mulf %6, %7 : vector<100x1xf32>
    %9 = arith.subf %1, %8 : vector<100x1xf32>
    %cst_2 = arith.constant 1.000000e+00 : f32
    %10 = vector.broadcast %cst_2 : f32 to vector<100x1xf32>
    %11 = arith.cmpf oge, %6, %10 : vector<100x1xf32>
    %cst_3 = arith.constant 8.000000e+00 : f32
    %12 = vector.broadcast %cst_3 : f32 to vector<100x1xf32>
    %13 = arith.cmpf ole, %6, %12 : vector<100x1xf32>
    %14 = arith.andi %11, %13 : vector<100x1xi1>
    %cst_4 = arith.constant 1.000000e+00 : f32
    %15 = vector.broadcast %cst_4 : f32 to vector<100x1xf32>
    %16 = arith.cmpf oge, %9, %15 : vector<100x1xf32>
    %17 = arith.andi %14, %16 : vector<100x1xi1>
    %cst_5 = arith.constant 8.000000e+00 : f32
    %18 = vector.broadcast %cst_5 : f32 to vector<100x1xf32>
    %19 = arith.cmpf ole, %9, %18 : vector<100x1xf32>
    %20 = arith.andi %17, %19 : vector<100x1xi1>
    %21 = arith.extui %20 : vector<100x1xi1> to vector<100x1xi32>
    %22 = arith.sitofp %21 : vector<100x1xi32> to vector<100x1xf32>
    %c0 = arith.constant 0 : index
    %c0_6 = arith.constant 0 : index
    %c0_7 = arith.constant 0 : index
    %23 = vector.load %arg2[%c0, %c0_6, %c0_7] : memref<1x660x4xbf16, #tpu.memory_space<vmem>>, vector<1x100x4xbf16>
    %24 = vector.shape_cast %23 : vector<1x100x4xbf16> to vector<100x4xbf16>
    %c0_8 = arith.constant 0 : index
    %c220 = arith.constant 220 : index
    %c0_9 = arith.constant 0 : index
    %25 = vector.load %arg2[%c0_8, %c220, %c0_9] : memref<1x660x4xbf16, #tpu.memory_space<vmem>>, vector<1x100x4xbf16>
    %26 = vector.shape_cast %25 : vector<1x100x4xbf16> to vector<100x4xbf16>
    %c0_10 = arith.constant 0 : index
    %c110 = arith.constant 110 : index
    %c0_11 = arith.constant 0 : index
    %27 = vector.load %arg2[%c0_10, %c110, %c0_11] : memref<1x660x4xbf16, #tpu.memory_space<vmem>>, vector<1x100x4xbf16>
    %28 = vector.shape_cast %27 : vector<1x100x4xbf16> to vector<100x4xbf16>
    %c0_12 = arith.constant 0 : index
    %c330 = arith.constant 330 : index
    %c0_13 = arith.constant 0 : index
    %29 = vector.load %arg2[%c0_12, %c330, %c0_13] : memref<1x660x4xbf16, #tpu.memory_space<vmem>>, vector<1x100x4xbf16>
    %30 = vector.shape_cast %29 : vector<1x100x4xbf16> to vector<100x4xbf16>
    %c0_14 = arith.constant 0 : index
    %c550 = arith.constant 550 : index
    %c0_15 = arith.constant 0 : index
    %31 = vector.load %arg2[%c0_14, %c550, %c0_15] : memref<1x660x4xbf16, #tpu.memory_space<vmem>>, vector<1x100x4xbf16>
    %32 = vector.shape_cast %31 : vector<1x100x4xbf16> to vector<100x4xbf16>
    %c0_16 = arith.constant 0 : index
    %c440 = arith.constant 440 : index
    %c0_17 = arith.constant 0 : index
    %33 = vector.load %arg2[%c0_16, %c440, %c0_17] : memref<1x660x4xbf16, #tpu.memory_space<vmem>>, vector<1x100x4xbf16>
    %34 = vector.shape_cast %33 : vector<1x100x4xbf16> to vector<100x4xbf16>
    %c0_18 = arith.constant 0 : index
    %c10 = arith.constant 10 : index
    %c0_19 = arith.constant 0 : index
    %35 = vector.load %arg2[%c0_18, %c10, %c0_19] : memref<1x660x4xbf16, #tpu.memory_space<vmem>>, vector<1x100x4xbf16>
    %36 = vector.shape_cast %35 : vector<1x100x4xbf16> to vector<100x4xbf16>
    %c0_20 = arith.constant 0 : index
    %c230 = arith.constant 230 : index
    %c0_21 = arith.constant 0 : index
    %37 = vector.load %arg2[%c0_20, %c230, %c0_21] : memref<1x660x4xbf16, #tpu.memory_space<vmem>>, vector<1x100x4xbf16>
    %38 = vector.shape_cast %37 : vector<1x100x4xbf16> to vector<100x4xbf16>
    %c0_22 = arith.constant 0 : index
    %c120 = arith.constant 120 : index
    %c0_23 = arith.constant 0 : index
    %39 = vector.load %arg2[%c0_22, %c120, %c0_23] : memref<1x660x4xbf16, #tpu.memory_space<vmem>>, vector<1x100x4xbf16>
    %40 = vector.shape_cast %39 : vector<1x100x4xbf16> to vector<100x4xbf16>
    %cst_24 = arith.constant 0.000000e+00 : f32
    %41 = vector.broadcast %cst_24 : f32 to vector<100x16xf32>
    %c0_25 = arith.constant 0 : index
    %c0_26 = arith.constant 0 : index
    %42 = vector.load %arg3[%c0_25, %c0_26] : memref<36x16xbf16, #tpu.memory_space<vmem>>, vector<4x16xbf16>
    %cst_27 = arith.constant dense<0.000000e+00> : vector<100x16xf32>
    %43 = tpu.matmul %24, %42, %cst_27 {dimension_numbers = #tpu.dot_dimension_numbers<[1], [0], [0], [1], [0, 0, 1, 1], [], []>} : vector<100x4xbf16>, vector<4x16xbf16>, vector<100x16xf32> -> vector<100x16xf32>
    %44 = arith.addf %41, %43 : vector<100x16xf32>
    %c4 = arith.constant 4 : index
    %c0_28 = arith.constant 0 : index
    %45 = vector.load %arg3[%c4, %c0_28] : memref<36x16xbf16, #tpu.memory_space<vmem>>, vector<4x16xbf16>
    %cst_29 = arith.constant dense<0.000000e+00> : vector<100x16xf32>
    %46 = tpu.matmul %26, %45, %cst_29 {dimension_numbers = #tpu.dot_dimension_numbers<[1], [0], [0], [1], [0, 0, 1, 1], [], []>} : vector<100x4xbf16>, vector<4x16xbf16>, vector<100x16xf32> -> vector<100x16xf32>
    %47 = arith.addf %44, %46 : vector<100x16xf32>
    %c8 = arith.constant 8 : index
    %c0_30 = arith.constant 0 : index
    %48 = vector.load %arg3[%c8, %c0_30] : memref<36x16xbf16, #tpu.memory_space<vmem>>, vector<4x16xbf16>
    %cst_31 = arith.constant dense<0.000000e+00> : vector<100x16xf32>
    %49 = tpu.matmul %28, %48, %cst_31 {dimension_numbers = #tpu.dot_dimension_numbers<[1], [0], [0], [1], [0, 0, 1, 1], [], []>} : vector<100x4xbf16>, vector<4x16xbf16>, vector<100x16xf32> -> vector<100x16xf32>
    %50 = arith.addf %47, %49 : vector<100x16xf32>
    %c12 = arith.constant 12 : index
    %c0_32 = arith.constant 0 : index
    %51 = vector.load %arg3[%c12, %c0_32] : memref<36x16xbf16, #tpu.memory_space<vmem>>, vector<4x16xbf16>
    %cst_33 = arith.constant dense<0.000000e+00> : vector<100x16xf32>
    %52 = tpu.matmul %30, %51, %cst_33 {dimension_numbers = #tpu.dot_dimension_numbers<[1], [0], [0], [1], [0, 0, 1, 1], [], []>} : vector<100x4xbf16>, vector<4x16xbf16>, vector<100x16xf32> -> vector<100x16xf32>
    %53 = arith.addf %50, %52 : vector<100x16xf32>
    %c16 = arith.constant 16 : index
    %c0_34 = arith.constant 0 : index
    %54 = vector.load %arg3[%c16, %c0_34] : memref<36x16xbf16, #tpu.memory_space<vmem>>, vector<4x16xbf16>
    %cst_35 = arith.constant dense<0.000000e+00> : vector<100x16xf32>
    %55 = tpu.matmul %32, %54, %cst_35 {dimension_numbers = #tpu.dot_dimension_numbers<[1], [0], [0], [1], [0, 0, 1, 1], [], []>} : vector<100x4xbf16>, vector<4x16xbf16>, vector<100x16xf32> -> vector<100x16xf32>
    %56 = arith.addf %53, %55 : vector<100x16xf32>
    %c20 = arith.constant 20 : index
    %c0_36 = arith.constant 0 : index
    %57 = vector.load %arg3[%c20, %c0_36] : memref<36x16xbf16, #tpu.memory_space<vmem>>, vector<4x16xbf16>
    %cst_37 = arith.constant dense<0.000000e+00> : vector<100x16xf32>
    %58 = tpu.matmul %34, %57, %cst_37 {dimension_numbers = #tpu.dot_dimension_numbers<[1], [0], [0], [1], [0, 0, 1, 1], [], []>} : vector<100x4xbf16>, vector<4x16xbf16>, vector<100x16xf32> -> vector<100x16xf32>
    %59 = arith.addf %56, %58 : vector<100x16xf32>
    %c24 = arith.constant 24 : index
    %c0_38 = arith.constant 0 : index
    %60 = vector.load %arg3[%c24, %c0_38] : memref<36x16xbf16, #tpu.memory_space<vmem>>, vector<4x16xbf16>
    %cst_39 = arith.constant dense<0.000000e+00> : vector<100x16xf32>
    %61 = tpu.matmul %36, %60, %cst_39 {dimension_numbers = #tpu.dot_dimension_numbers<[1], [0], [0], [1], [0, 0, 1, 1], [], []>} : vector<100x4xbf16>, vector<4x16xbf16>, vector<100x16xf32> -> vector<100x16xf32>
    %62 = arith.addf %59, %61 : vector<100x16xf32>
    %c28 = arith.constant 28 : index
    %c0_40 = arith.constant 0 : index
    %63 = vector.load %arg3[%c28, %c0_40] : memref<36x16xbf16, #tpu.memory_space<vmem>>, vector<4x16xbf16>
    %cst_41 = arith.constant dense<0.000000e+00> : vector<100x16xf32>
    %64 = tpu.matmul %38, %63, %cst_41 {dimension_numbers = #tpu.dot_dimension_numbers<[1], [0], [0], [1], [0, 0, 1, 1], [], []>} : vector<100x4xbf16>, vector<4x16xbf16>, vector<100x16xf32> -> vector<100x16xf32>
    %65 = arith.addf %62, %64 : vector<100x16xf32>
    %c32 = arith.constant 32 : index
    %c0_42 = arith.constant 0 : index
    %66 = vector.load %arg3[%c32, %c0_42] : memref<36x16xbf16, #tpu.memory_space<vmem>>, vector<4x16xbf16>
    %cst_43 = arith.constant dense<0.000000e+00> : vector<100x16xf32>
    %67 = tpu.matmul %40, %66, %cst_43 {dimension_numbers = #tpu.dot_dimension_numbers<[1], [0], [0], [1], [0, 0, 1, 1], [], []>} : vector<100x4xbf16>, vector<4x16xbf16>, vector<100x16xf32> -> vector<100x16xf32>
    %68 = arith.addf %65, %67 : vector<100x16xf32>
    %69 = vector.extract_strided_slice %68 {offsets = [0, 8], sizes = [100, 8], strides = [1, 1]} : vector<100x16xf32> to vector<100x8xf32>
    %c0_44 = arith.constant 0 : index
    %c0_45 = arith.constant 0 : index
    %70 = vector.load %arg4[%c0_44, %c0_45] : memref<1x8xf32, #tpu.memory_space<vmem>>, vector<1x8xf32>
    %71 = vector.broadcast %70 : vector<1x8xf32> to vector<100x8xf32>
    %72 = arith.addf %69, %71 : vector<100x8xf32>
    %73 = vector.extract_strided_slice %68 {offsets = [0, 0], sizes = [100, 8], strides = [1, 1]} : vector<100x16xf32> to vector<100x8xf32>
    %c0_46 = arith.constant 0 : index
    %c0_47 = arith.constant 0 : index
    %74 = memref.load %arg1[%c0_46, %c0_47] : memref<1x2xf32, #tpu.memory_space<smem>>
    %75 = vector.broadcast %22 : vector<100x1xf32> to vector<100x8xf32>
    %76 = arith.mulf %73, %75 : vector<100x8xf32>
    %cst_48 = arith.constant dense<0.000000e+00> : vector<8xf32>
    %77 = vector.multi_reduction <add>, %76, %cst_48 [0] : vector<100x8xf32> to vector<8xf32>
    %78 = vector.shape_cast %77 : vector<8xf32> to vector<1x8xf32>
    %cst_49 = arith.constant 1.562500e-02 : f32
    %79 = vector.broadcast %cst_49 : f32 to vector<1x8xf32>
    %80 = arith.mulf %78, %79 : vector<1x8xf32>
    %81 = vector.broadcast %80 : vector<1x8xf32> to vector<100x8xf32>
    %82 = arith.subf %73, %81 : vector<100x8xf32>
    %83 = vector.broadcast %22 : vector<100x1xf32> to vector<100x8xf32>
    %84 = arith.mulf %82, %83 : vector<100x8xf32>
    %85 = arith.mulf %84, %84 : vector<100x8xf32>
    %cst_50 = arith.constant dense<0.000000e+00> : vector<8xf32>
    %86 = vector.multi_reduction <add>, %85, %cst_50 [0] : vector<100x8xf32> to vector<8xf32>
    %87 = vector.shape_cast %86 : vector<8xf32> to vector<1x8xf32>
    %cst_51 = arith.constant 1.562500e-02 : f32
    %88 = vector.broadcast %cst_51 : f32 to vector<1x8xf32>
    %89 = arith.mulf %87, %88 : vector<1x8xf32>
    %90 = vector.broadcast %80 : vector<1x8xf32> to vector<100x8xf32>
    %91 = arith.subf %73, %90 : vector<100x8xf32>
    %cst_52 = arith.constant 9.99999974E-6 : f32
    %92 = vector.broadcast %cst_52 : f32 to vector<1x8xf32>
    %93 = arith.addf %89, %92 : vector<1x8xf32>
    %94 = math.rsqrt %93 : vector<1x8xf32>
    %95 = vector.broadcast %94 : vector<1x8xf32> to vector<100x8xf32>
    %96 = arith.mulf %91, %95 : vector<100x8xf32>
    %cst_53 = arith.constant 0.000000e+00 : f32
    %97 = vector.broadcast %cst_53 : f32 to vector<100x8xf32>
    %98 = arith.cmpf oge, %96, %97 : vector<100x8xf32>
    %99 = vector.broadcast %74 : f32 to vector<100x8xf32>
    %100 = arith.mulf %99, %96 : vector<100x8xf32>
    %101 = arith.select %98, %96, %100 : vector<100x8xi1>, vector<100x8xf32>
    %102 = vector.broadcast %22 : vector<100x1xf32> to vector<100x8xf32>
    %103 = arith.mulf %101, %102 : vector<100x8xf32>
    %cst_54 = arith.constant 0.000000e+00 : bf16
    %104 = vector.broadcast %cst_54 : bf16 to vector<11x8xbf16>
    %c0_55 = arith.constant 0 : index
    %c0_56 = arith.constant 0 : index
    %105 = vector.load %arg7[%c0_55, %c0_56] : memref<128x8xbf16, #tpu.memory_space<vmem>>, vector<11x8xbf16>
    tpu.vector_store %arg7[%c0_55, %c0_56], %104 {strides = array<i32>} : memref<128x8xbf16, #tpu.memory_space<vmem>>, vector<11x8xbf16>,
    %cst_57 = arith.constant 0.000000e+00 : bf16
    %106 = vector.broadcast %cst_57 : bf16 to vector<17x8xbf16>
    %c111 = arith.constant 111 : index
    %c0_58 = arith.constant 0 : index
    %107 = vector.load %arg7[%c111, %c0_58] : memref<128x8xbf16, #tpu.memory_space<vmem>>, vector<17x8xbf16>
    tpu.vector_store %arg7[%c111, %c0_58], %106 {strides = array<i32>} : memref<128x8xbf16, #tpu.memory_space<vmem>>, vector<17x8xbf16>,
    %108 = arith.truncf %103 : vector<100x8xf32> to vector<100x8xbf16>
    %c11 = arith.constant 11 : index
    %c0_59 = arith.constant 0 : index
    %109 = vector.load %arg7[%c11, %c0_59] : memref<128x8xbf16, #tpu.memory_space<vmem>>, vector<100x8xbf16>
    tpu.vector_store %arg7[%c11, %c0_59], %108 {strides = array<i32>} : memref<128x8xbf16, #tpu.memory_space<vmem>>, vector<100x8xbf16>,
    %c0_60 = arith.constant 0 : index
    %c0_61 = arith.constant 0 : index
    %110 = vector.load %arg7[%c0_60, %c0_61] : memref<128x8xbf16, #tpu.memory_space<vmem>>, vector<100x8xbf16>
    %c1 = arith.constant 1 : index
    %c0_62 = arith.constant 0 : index
    %111 = vector.load %arg7[%c1, %c0_62] : memref<128x8xbf16, #tpu.memory_space<vmem>>, vector<100x8xbf16>
    %c2 = arith.constant 2 : index
    %c0_63 = arith.constant 0 : index
    %112 = vector.load %arg7[%c2, %c0_63] : memref<128x8xbf16, #tpu.memory_space<vmem>>, vector<100x8xbf16>
    %c10_64 = arith.constant 10 : index
    %c0_65 = arith.constant 0 : index
    %113 = vector.load %arg7[%c10_64, %c0_65] : memref<128x8xbf16, #tpu.memory_space<vmem>>, vector<100x8xbf16>
    %c11_66 = arith.constant 11 : index
    %c0_67 = arith.constant 0 : index
    %114 = vector.load %arg7[%c11_66, %c0_67] : memref<128x8xbf16, #tpu.memory_space<vmem>>, vector<100x8xbf16>
    %c12_68 = arith.constant 12 : index
    %c0_69 = arith.constant 0 : index
    %115 = vector.load %arg7[%c12_68, %c0_69] : memref<128x8xbf16, #tpu.memory_space<vmem>>, vector<100x8xbf16>
    %c20_70 = arith.constant 20 : index
    %c0_71 = arith.constant 0 : index
    %116 = vector.load %arg7[%c20_70, %c0_71] : memref<128x8xbf16, #tpu.memory_space<vmem>>, vector<100x8xbf16>
    %c21 = arith.constant 21 : index
    %c0_72 = arith.constant 0 : index
    %117 = vector.load %arg7[%c21, %c0_72] : memref<128x8xbf16, #tpu.memory_space<vmem>>, vector<100x8xbf16>
    %c22 = arith.constant 22 : index
    %c0_73 = arith.constant 0 : index
    %118 = vector.load %arg7[%c22, %c0_73] : memref<128x8xbf16, #tpu.memory_space<vmem>>, vector<100x8xbf16>
    %cst_74 = arith.constant 0.000000e+00 : f32
    %119 = vector.broadcast %cst_74 : f32 to vector<100x8xf32>
    %c0_75 = arith.constant 0 : index
    %c0_76 = arith.constant 0 : index
    %120 = vector.load %arg5[%c0_75, %c0_76] : memref<72x8xbf16, #tpu.memory_space<vmem>>, vector<8x8xbf16>
    %cst_77 = arith.constant dense<0.000000e+00> : vector<100x8xf32>
    %121 = tpu.matmul %110, %120, %cst_77 {dimension_numbers = #tpu.dot_dimension_numbers<[1], [0], [0], [1], [0, 0, 1, 1], [], []>} : vector<100x8xbf16>, vector<8x8xbf16>, vector<100x8xf32> -> vector<100x8xf32>
    %122 = arith.addf %119, %121 : vector<100x8xf32>
    %c8_78 = arith.constant 8 : index
    %c0_79 = arith.constant 0 : index
    %123 = vector.load %arg5[%c8_78, %c0_79] : memref<72x8xbf16, #tpu.memory_space<vmem>>, vector<8x8xbf16>
    %cst_80 = arith.constant dense<0.000000e+00> : vector<100x8xf32>
    %124 = tpu.matmul %111, %123, %cst_80 {dimension_numbers = #tpu.dot_dimension_numbers<[1], [0], [0], [1], [0, 0, 1, 1], [], []>} : vector<100x8xbf16>, vector<8x8xbf16>, vector<100x8xf32> -> vector<100x8xf32>
    %125 = arith.addf %122, %124 : vector<100x8xf32>
    %c16_81 = arith.constant 16 : index
    %c0_82 = arith.constant 0 : index
    %126 = vector.load %arg5[%c16_81, %c0_82] : memref<72x8xbf16, #tpu.memory_space<vmem>>, vector<8x8xbf16>
    %cst_83 = arith.constant dense<0.000000e+00> : vector<100x8xf32>
    %127 = tpu.matmul %112, %126, %cst_83 {dimension_numbers = #tpu.dot_dimension_numbers<[1], [0], [0], [1], [0, 0, 1, 1], [], []>} : vector<100x8xbf16>, vector<8x8xbf16>, vector<100x8xf32> -> vector<100x8xf32>
    %128 = arith.addf %125, %127 : vector<100x8xf32>
    %c24_84 = arith.constant 24 : index
    %c0_85 = arith.constant 0 : index
    %129 = vector.load %arg5[%c24_84, %c0_85] : memref<72x8xbf16, #tpu.memory_space<vmem>>, vector<8x8xbf16>
    %cst_86 = arith.constant dense<0.000000e+00> : vector<100x8xf32>
    %130 = tpu.matmul %113, %129, %cst_86 {dimension_numbers = #tpu.dot_dimension_numbers<[1], [0], [0], [1], [0, 0, 1, 1], [], []>} : vector<100x8xbf16>, vector<8x8xbf16>, vector<100x8xf32> -> vector<100x8xf32>
    %131 = arith.addf %128, %130 : vector<100x8xf32>
    %c32_87 = arith.constant 32 : index
    %c0_88 = arith.constant 0 : index
    %132 = vector.load %arg5[%c32_87, %c0_88] : memref<72x8xbf16, #tpu.memory_space<vmem>>, vector<8x8xbf16>
    %cst_89 = arith.constant dense<0.000000e+00> : vector<100x8xf32>
    %133 = tpu.matmul %114, %132, %cst_89 {dimension_numbers = #tpu.dot_dimension_numbers<[1], [0], [0], [1], [0, 0, 1, 1], [], []>} : vector<100x8xbf16>, vector<8x8xbf16>, vector<100x8xf32> -> vector<100x8xf32>
    %134 = arith.addf %131, %133 : vector<100x8xf32>
    %c40 = arith.constant 40 : index
    %c0_90 = arith.constant 0 : index
    %135 = vector.load %arg5[%c40, %c0_90] : memref<72x8xbf16, #tpu.memory_space<vmem>>, vector<8x8xbf16>
    %cst_91 = arith.constant dense<0.000000e+00> : vector<100x8xf32>
    %136 = tpu.matmul %115, %135, %cst_91 {dimension_numbers = #tpu.dot_dimension_numbers<[1], [0], [0], [1], [0, 0, 1, 1], [], []>} : vector<100x8xbf16>, vector<8x8xbf16>, vector<100x8xf32> -> vector<100x8xf32>
    %137 = arith.addf %134, %136 : vector<100x8xf32>
    %c48 = arith.constant 48 : index
    %c0_92 = arith.constant 0 : index
    %138 = vector.load %arg5[%c48, %c0_92] : memref<72x8xbf16, #tpu.memory_space<vmem>>, vector<8x8xbf16>
    %cst_93 = arith.constant dense<0.000000e+00> : vector<100x8xf32>
    %139 = tpu.matmul %116, %138, %cst_93 {dimension_numbers = #tpu.dot_dimension_numbers<[1], [0], [0], [1], [0, 0, 1, 1], [], []>} : vector<100x8xbf16>, vector<8x8xbf16>, vector<100x8xf32> -> vector<100x8xf32>
    %140 = arith.addf %137, %139 : vector<100x8xf32>
    %c56 = arith.constant 56 : index
    %c0_94 = arith.constant 0 : index
    %141 = vector.load %arg5[%c56, %c0_94] : memref<72x8xbf16, #tpu.memory_space<vmem>>, vector<8x8xbf16>
    %cst_95 = arith.constant dense<0.000000e+00> : vector<100x8xf32>
    %142 = tpu.matmul %117, %141, %cst_95 {dimension_numbers = #tpu.dot_dimension_numbers<[1], [0], [0], [1], [0, 0, 1, 1], [], []>} : vector<100x8xbf16>, vector<8x8xbf16>, vector<100x8xf32> -> vector<100x8xf32>
    %143 = arith.addf %140, %142 : vector<100x8xf32>
    %c64 = arith.constant 64 : index
    %c0_96 = arith.constant 0 : index
    %144 = vector.load %arg5[%c64, %c0_96] : memref<72x8xbf16, #tpu.memory_space<vmem>>, vector<8x8xbf16>
    %cst_97 = arith.constant dense<0.000000e+00> : vector<100x8xf32>
    %145 = tpu.matmul %118, %144, %cst_97 {dimension_numbers = #tpu.dot_dimension_numbers<[1], [0], [0], [1], [0, 0, 1, 1], [], []>} : vector<100x8xbf16>, vector<8x8xbf16>, vector<100x8xf32> -> vector<100x8xf32>
    %146 = arith.addf %143, %145 : vector<100x8xf32>
    %c0_98 = arith.constant 0 : index
    %c1_99 = arith.constant 1 : index
    %147 = memref.load %arg1[%c0_98, %c1_99] : memref<1x2xf32, #tpu.memory_space<smem>>
    %148 = vector.broadcast %22 : vector<100x1xf32> to vector<100x8xf32>
    %149 = arith.mulf %146, %148 : vector<100x8xf32>
    %cst_100 = arith.constant dense<0.000000e+00> : vector<8xf32>
    %150 = vector.multi_reduction <add>, %149, %cst_100 [0] : vector<100x8xf32> to vector<8xf32>
    %151 = vector.shape_cast %150 : vector<8xf32> to vector<1x8xf32>
    %cst_101 = arith.constant 1.562500e-02 : f32
    %152 = vector.broadcast %cst_101 : f32 to vector<1x8xf32>
    %153 = arith.mulf %151, %152 : vector<1x8xf32>
    %154 = vector.broadcast %153 : vector<1x8xf32> to vector<100x8xf32>
    %155 = arith.subf %146, %154 : vector<100x8xf32>
    %156 = vector.broadcast %22 : vector<100x1xf32> to vector<100x8xf32>
    %157 = arith.mulf %155, %156 : vector<100x8xf32>
    %158 = arith.mulf %157, %157 : vector<100x8xf32>
    %cst_102 = arith.constant dense<0.000000e+00> : vector<8xf32>
    %159 = vector.multi_reduction <add>, %158, %cst_102 [0] : vector<100x8xf32> to vector<8xf32>
    %160 = vector.shape_cast %159 : vector<8xf32> to vector<1x8xf32>
    %cst_103 = arith.constant 1.562500e-02 : f32
    %161 = vector.broadcast %cst_103 : f32 to vector<1x8xf32>
    %162 = arith.mulf %160, %161 : vector<1x8xf32>
    %163 = vector.broadcast %153 : vector<1x8xf32> to vector<100x8xf32>
    %164 = arith.subf %146, %163 : vector<100x8xf32>
    %cst_104 = arith.constant 9.99999974E-6 : f32
    %165 = vector.broadcast %cst_104 : f32 to vector<1x8xf32>
    %166 = arith.addf %162, %165 : vector<1x8xf32>
    %167 = math.rsqrt %166 : vector<1x8xf32>
    %168 = vector.broadcast %167 : vector<1x8xf32> to vector<100x8xf32>
    %169 = arith.mulf %164, %168 : vector<100x8xf32>
    %cst_105 = arith.constant 0.000000e+00 : f32
    %170 = vector.broadcast %cst_105 : f32 to vector<100x8xf32>
    %171 = arith.cmpf oge, %169, %170 : vector<100x8xf32>
    %172 = vector.broadcast %147 : f32 to vector<100x8xf32>
    %173 = arith.mulf %172, %169 : vector<100x8xf32>
    %174 = arith.select %171, %169, %173 : vector<100x8xi1>, vector<100x8xf32>
    %175 = arith.addf %174, %72 : vector<100x8xf32>
    %176 = vector.broadcast %22 : vector<100x1xf32> to vector<100x8xf32>
    %177 = arith.mulf %175, %176 : vector<100x8xf32>
    %178 = arith.truncf %177 : vector<100x8xf32> to vector<100x8xbf16>
    %c0_106 = arith.constant 0 : index
    %c0_107 = arith.constant 0 : index
    %c0_108 = arith.constant 0 : index
    %179 = vector.load %arg6[%c0_106, %c0_107, %c0_108] : memref<1x100x8xbf16, #tpu.memory_space<vmem>>, vector<1x100x8xbf16>
    %180 = vector.shape_cast %179 : vector<1x100x8xbf16> to vector<100x8xbf16>
    %181 = vector.shape_cast %178 : vector<100x8xbf16> to vector<1x100x8xbf16>
    tpu.vector_store %arg6[%c0_106, %c0_107, %c0_108], %181 {strides = array<i32>} : memref<1x100x8xbf16, #tpu.memory_space<vmem>>, vector<1x100x8xbf16>,
    return
  }
  func.func @transform_0(%arg0: i32) -> (i32, i32) {
    %c0_i32 = arith.constant 0 : i32
    %c0_i32_0 = arith.constant 0 : i32
    %c0_i32_1 = arith.constant 0 : i32
    return %c0_i32, %c0_i32_0 : i32, i32
  }
  func.func @transform_1(%arg0: i32) -> (i32, i32, i32) {
    %c0_i32 = arith.constant 0 : i32
    %c0_i32_0 = arith.constant 0 : i32
    %c0_i32_1 = arith.constant 0 : i32
    return %arg0, %c0_i32, %c0_i32_0 : i32, i32, i32
  }
  func.func @transform_2(%arg0: i32) -> (i32, i32) {
    %c0_i32 = arith.constant 0 : i32
    %c0_i32_0 = arith.constant 0 : i32
    %c0_i32_1 = arith.constant 0 : i32
    return %c0_i32, %c0_i32_0 : i32, i32
  }
  func.func @transform_3(%arg0: i32) -> (i32, i32) {
    %c0_i32 = arith.constant 0 : i32
    %c0_i32_0 = arith.constant 0 : i32
    %c0_i32_1 = arith.constant 0 : i32
    return %c0_i32, %c0_i32_0 : i32, i32
  }
  func.func @transform_4(%arg0: i32) -> (i32, i32) {
    %c0_i32 = arith.constant 0 : i32
    %c0_i32_0 = arith.constant 0 : i32
    %c0_i32_1 = arith.constant 0 : i32
    return %c0_i32, %c0_i32_0 : i32, i32
  }
  func.func @transform_5(%arg0: i32) -> (i32, i32, i32) {
    %c0_i32 = arith.constant 0 : i32
    %c0_i32_0 = arith.constant 0 : i32
    %c0_i32_1 = arith.constant 0 : i32
    return %arg0, %c0_i32, %c0_i32_0 : i32, i32, i32
  }
}

module attributes {stable_mosaic.version = 11 : i64} {
  func.func @kernel(%arg0: i32, %arg1: memref<1x2xf32, #tpu.memory_space<smem>>, %arg2: memref<1x252x8xbf16, #tpu.memory_space<vmem>>, %arg3: memref<72x32xbf16, #tpu.memory_space<vmem>>, %arg4: memref<1x16xf32, #tpu.memory_space<vmem>>, %arg5: memref<144x16xbf16, #tpu.memory_space<vmem>>, %arg6: memref<1x36x16xbf16, #tpu.memory_space<vmem>>, %arg7: memref<56x16xbf16, #tpu.memory_space<vmem>>) attributes {dimension_semantics = [#tpu.dimension_semantics<parallel>], iteration_bounds = array<i64: 2>, scalar_prefetch = 0 : i64, scratch_operands = 1 : i64, tpu.core_type = #tpu.core_type<tc>, window_params = [{transform_indices = @transform_0, window_bounds = array<i64: 1, 2>}, {transform_indices = @transform_1, window_bounds = array<i64: 1, 252, 8>}, {pipeline_mode = #tpu.pipeline_mode<synchronous>, transform_indices = @transform_2, window_bounds = array<i64: 72, 32>}, {pipeline_mode = #tpu.pipeline_mode<synchronous>, transform_indices = @transform_3, window_bounds = array<i64: 1, 16>}, {pipeline_mode = #tpu.pipeline_mode<synchronous>, transform_indices = @transform_4, window_bounds = array<i64: 144, 16>}, {transform_indices = @transform_5, window_bounds = array<i64: 1, 36, 16>}]} {
    %0 = tpu.iota {dimensions = array<i32: 0>} : vector<36x1xi32>
    %1 = arith.sitofp %0 : vector<36x1xi32> to vector<36x1xf32>
    %cst = arith.constant 5.000000e-01 : f32
    %2 = vector.broadcast %cst : f32 to vector<36x1xf32>
    %3 = arith.addf %1, %2 : vector<36x1xf32>
    %cst_0 = arith.constant 0.166666672 : f32
    %4 = vector.broadcast %cst_0 : f32 to vector<36x1xf32>
    %5 = arith.mulf %3, %4 : vector<36x1xf32>
    %6 = math.floor %5 : vector<36x1xf32>
    %cst_1 = arith.constant 6.000000e+00 : f32
    %7 = vector.broadcast %cst_1 : f32 to vector<36x1xf32>
    %8 = arith.mulf %6, %7 : vector<36x1xf32>
    %9 = arith.subf %1, %8 : vector<36x1xf32>
    %cst_2 = arith.constant 1.000000e+00 : f32
    %10 = vector.broadcast %cst_2 : f32 to vector<36x1xf32>
    %11 = arith.cmpf oge, %6, %10 : vector<36x1xf32>
    %cst_3 = arith.constant 4.000000e+00 : f32
    %12 = vector.broadcast %cst_3 : f32 to vector<36x1xf32>
    %13 = arith.cmpf ole, %6, %12 : vector<36x1xf32>
    %14 = arith.andi %11, %13 : vector<36x1xi1>
    %cst_4 = arith.constant 1.000000e+00 : f32
    %15 = vector.broadcast %cst_4 : f32 to vector<36x1xf32>
    %16 = arith.cmpf oge, %9, %15 : vector<36x1xf32>
    %17 = arith.andi %14, %16 : vector<36x1xi1>
    %cst_5 = arith.constant 4.000000e+00 : f32
    %18 = vector.broadcast %cst_5 : f32 to vector<36x1xf32>
    %19 = arith.cmpf ole, %9, %18 : vector<36x1xf32>
    %20 = arith.andi %17, %19 : vector<36x1xi1>
    %21 = arith.extui %20 : vector<36x1xi1> to vector<36x1xi32>
    %22 = arith.sitofp %21 : vector<36x1xi32> to vector<36x1xf32>
    %c0 = arith.constant 0 : index
    %c0_6 = arith.constant 0 : index
    %c0_7 = arith.constant 0 : index
    %23 = vector.load %arg2[%c0, %c0_6, %c0_7] : memref<1x252x8xbf16, #tpu.memory_space<vmem>>, vector<1x36x8xbf16>
    %24 = vector.shape_cast %23 : vector<1x36x8xbf16> to vector<36x8xbf16>
    %c0_8 = arith.constant 0 : index
    %c84 = arith.constant 84 : index
    %c0_9 = arith.constant 0 : index
    %25 = vector.load %arg2[%c0_8, %c84, %c0_9] : memref<1x252x8xbf16, #tpu.memory_space<vmem>>, vector<1x36x8xbf16>
    %26 = vector.shape_cast %25 : vector<1x36x8xbf16> to vector<36x8xbf16>
    %c0_10 = arith.constant 0 : index
    %c42 = arith.constant 42 : index
    %c0_11 = arith.constant 0 : index
    %27 = vector.load %arg2[%c0_10, %c42, %c0_11] : memref<1x252x8xbf16, #tpu.memory_space<vmem>>, vector<1x36x8xbf16>
    %28 = vector.shape_cast %27 : vector<1x36x8xbf16> to vector<36x8xbf16>
    %c0_12 = arith.constant 0 : index
    %c126 = arith.constant 126 : index
    %c0_13 = arith.constant 0 : index
    %29 = vector.load %arg2[%c0_12, %c126, %c0_13] : memref<1x252x8xbf16, #tpu.memory_space<vmem>>, vector<1x36x8xbf16>
    %30 = vector.shape_cast %29 : vector<1x36x8xbf16> to vector<36x8xbf16>
    %c0_14 = arith.constant 0 : index
    %c210 = arith.constant 210 : index
    %c0_15 = arith.constant 0 : index
    %31 = vector.load %arg2[%c0_14, %c210, %c0_15] : memref<1x252x8xbf16, #tpu.memory_space<vmem>>, vector<1x36x8xbf16>
    %32 = vector.shape_cast %31 : vector<1x36x8xbf16> to vector<36x8xbf16>
    %c0_16 = arith.constant 0 : index
    %c168 = arith.constant 168 : index
    %c0_17 = arith.constant 0 : index
    %33 = vector.load %arg2[%c0_16, %c168, %c0_17] : memref<1x252x8xbf16, #tpu.memory_space<vmem>>, vector<1x36x8xbf16>
    %34 = vector.shape_cast %33 : vector<1x36x8xbf16> to vector<36x8xbf16>
    %c0_18 = arith.constant 0 : index
    %c6 = arith.constant 6 : index
    %c0_19 = arith.constant 0 : index
    %35 = vector.load %arg2[%c0_18, %c6, %c0_19] : memref<1x252x8xbf16, #tpu.memory_space<vmem>>, vector<1x36x8xbf16>
    %36 = vector.shape_cast %35 : vector<1x36x8xbf16> to vector<36x8xbf16>
    %c0_20 = arith.constant 0 : index
    %c90 = arith.constant 90 : index
    %c0_21 = arith.constant 0 : index
    %37 = vector.load %arg2[%c0_20, %c90, %c0_21] : memref<1x252x8xbf16, #tpu.memory_space<vmem>>, vector<1x36x8xbf16>
    %38 = vector.shape_cast %37 : vector<1x36x8xbf16> to vector<36x8xbf16>
    %c0_22 = arith.constant 0 : index
    %c48 = arith.constant 48 : index
    %c0_23 = arith.constant 0 : index
    %39 = vector.load %arg2[%c0_22, %c48, %c0_23] : memref<1x252x8xbf16, #tpu.memory_space<vmem>>, vector<1x36x8xbf16>
    %40 = vector.shape_cast %39 : vector<1x36x8xbf16> to vector<36x8xbf16>
    %cst_24 = arith.constant 0.000000e+00 : f32
    %41 = vector.broadcast %cst_24 : f32 to vector<36x32xf32>
    %c0_25 = arith.constant 0 : index
    %c0_26 = arith.constant 0 : index
    %42 = vector.load %arg3[%c0_25, %c0_26] : memref<72x32xbf16, #tpu.memory_space<vmem>>, vector<8x32xbf16>
    %cst_27 = arith.constant dense<0.000000e+00> : vector<36x32xf32>
    %43 = tpu.matmul %24, %42, %cst_27 {dimension_numbers = #tpu.dot_dimension_numbers<[1], [0], [0], [1], [0, 0, 1, 1], [], []>} : vector<36x8xbf16>, vector<8x32xbf16>, vector<36x32xf32> -> vector<36x32xf32>
    %44 = arith.addf %41, %43 : vector<36x32xf32>
    %c8 = arith.constant 8 : index
    %c0_28 = arith.constant 0 : index
    %45 = vector.load %arg3[%c8, %c0_28] : memref<72x32xbf16, #tpu.memory_space<vmem>>, vector<8x32xbf16>
    %cst_29 = arith.constant dense<0.000000e+00> : vector<36x32xf32>
    %46 = tpu.matmul %26, %45, %cst_29 {dimension_numbers = #tpu.dot_dimension_numbers<[1], [0], [0], [1], [0, 0, 1, 1], [], []>} : vector<36x8xbf16>, vector<8x32xbf16>, vector<36x32xf32> -> vector<36x32xf32>
    %47 = arith.addf %44, %46 : vector<36x32xf32>
    %c16 = arith.constant 16 : index
    %c0_30 = arith.constant 0 : index
    %48 = vector.load %arg3[%c16, %c0_30] : memref<72x32xbf16, #tpu.memory_space<vmem>>, vector<8x32xbf16>
    %cst_31 = arith.constant dense<0.000000e+00> : vector<36x32xf32>
    %49 = tpu.matmul %28, %48, %cst_31 {dimension_numbers = #tpu.dot_dimension_numbers<[1], [0], [0], [1], [0, 0, 1, 1], [], []>} : vector<36x8xbf16>, vector<8x32xbf16>, vector<36x32xf32> -> vector<36x32xf32>
    %50 = arith.addf %47, %49 : vector<36x32xf32>
    %c24 = arith.constant 24 : index
    %c0_32 = arith.constant 0 : index
    %51 = vector.load %arg3[%c24, %c0_32] : memref<72x32xbf16, #tpu.memory_space<vmem>>, vector<8x32xbf16>
    %cst_33 = arith.constant dense<0.000000e+00> : vector<36x32xf32>
    %52 = tpu.matmul %30, %51, %cst_33 {dimension_numbers = #tpu.dot_dimension_numbers<[1], [0], [0], [1], [0, 0, 1, 1], [], []>} : vector<36x8xbf16>, vector<8x32xbf16>, vector<36x32xf32> -> vector<36x32xf32>
    %53 = arith.addf %50, %52 : vector<36x32xf32>
    %c32 = arith.constant 32 : index
    %c0_34 = arith.constant 0 : index
    %54 = vector.load %arg3[%c32, %c0_34] : memref<72x32xbf16, #tpu.memory_space<vmem>>, vector<8x32xbf16>
    %cst_35 = arith.constant dense<0.000000e+00> : vector<36x32xf32>
    %55 = tpu.matmul %32, %54, %cst_35 {dimension_numbers = #tpu.dot_dimension_numbers<[1], [0], [0], [1], [0, 0, 1, 1], [], []>} : vector<36x8xbf16>, vector<8x32xbf16>, vector<36x32xf32> -> vector<36x32xf32>
    %56 = arith.addf %53, %55 : vector<36x32xf32>
    %c40 = arith.constant 40 : index
    %c0_36 = arith.constant 0 : index
    %57 = vector.load %arg3[%c40, %c0_36] : memref<72x32xbf16, #tpu.memory_space<vmem>>, vector<8x32xbf16>
    %cst_37 = arith.constant dense<0.000000e+00> : vector<36x32xf32>
    %58 = tpu.matmul %34, %57, %cst_37 {dimension_numbers = #tpu.dot_dimension_numbers<[1], [0], [0], [1], [0, 0, 1, 1], [], []>} : vector<36x8xbf16>, vector<8x32xbf16>, vector<36x32xf32> -> vector<36x32xf32>
    %59 = arith.addf %56, %58 : vector<36x32xf32>
    %c48_38 = arith.constant 48 : index
    %c0_39 = arith.constant 0 : index
    %60 = vector.load %arg3[%c48_38, %c0_39] : memref<72x32xbf16, #tpu.memory_space<vmem>>, vector<8x32xbf16>
    %cst_40 = arith.constant dense<0.000000e+00> : vector<36x32xf32>
    %61 = tpu.matmul %36, %60, %cst_40 {dimension_numbers = #tpu.dot_dimension_numbers<[1], [0], [0], [1], [0, 0, 1, 1], [], []>} : vector<36x8xbf16>, vector<8x32xbf16>, vector<36x32xf32> -> vector<36x32xf32>
    %62 = arith.addf %59, %61 : vector<36x32xf32>
    %c56 = arith.constant 56 : index
    %c0_41 = arith.constant 0 : index
    %63 = vector.load %arg3[%c56, %c0_41] : memref<72x32xbf16, #tpu.memory_space<vmem>>, vector<8x32xbf16>
    %cst_42 = arith.constant dense<0.000000e+00> : vector<36x32xf32>
    %64 = tpu.matmul %38, %63, %cst_42 {dimension_numbers = #tpu.dot_dimension_numbers<[1], [0], [0], [1], [0, 0, 1, 1], [], []>} : vector<36x8xbf16>, vector<8x32xbf16>, vector<36x32xf32> -> vector<36x32xf32>
    %65 = arith.addf %62, %64 : vector<36x32xf32>
    %c64 = arith.constant 64 : index
    %c0_43 = arith.constant 0 : index
    %66 = vector.load %arg3[%c64, %c0_43] : memref<72x32xbf16, #tpu.memory_space<vmem>>, vector<8x32xbf16>
    %cst_44 = arith.constant dense<0.000000e+00> : vector<36x32xf32>
    %67 = tpu.matmul %40, %66, %cst_44 {dimension_numbers = #tpu.dot_dimension_numbers<[1], [0], [0], [1], [0, 0, 1, 1], [], []>} : vector<36x8xbf16>, vector<8x32xbf16>, vector<36x32xf32> -> vector<36x32xf32>
    %68 = arith.addf %65, %67 : vector<36x32xf32>
    %69 = vector.extract_strided_slice %68 {offsets = [0, 16], sizes = [36, 16], strides = [1, 1]} : vector<36x32xf32> to vector<36x16xf32>
    %c0_45 = arith.constant 0 : index
    %c0_46 = arith.constant 0 : index
    %70 = vector.load %arg4[%c0_45, %c0_46] : memref<1x16xf32, #tpu.memory_space<vmem>>, vector<1x16xf32>
    %71 = vector.broadcast %70 : vector<1x16xf32> to vector<36x16xf32>
    %72 = arith.addf %69, %71 : vector<36x16xf32>
    %73 = vector.extract_strided_slice %68 {offsets = [0, 0], sizes = [36, 16], strides = [1, 1]} : vector<36x32xf32> to vector<36x16xf32>
    %c0_47 = arith.constant 0 : index
    %c0_48 = arith.constant 0 : index
    %74 = memref.load %arg1[%c0_47, %c0_48] : memref<1x2xf32, #tpu.memory_space<smem>>
    %75 = vector.broadcast %22 : vector<36x1xf32> to vector<36x16xf32>
    %76 = arith.mulf %73, %75 : vector<36x16xf32>
    %cst_49 = arith.constant dense<0.000000e+00> : vector<16xf32>
    %77 = vector.multi_reduction <add>, %76, %cst_49 [0] : vector<36x16xf32> to vector<16xf32>
    %78 = vector.shape_cast %77 : vector<16xf32> to vector<1x16xf32>
    %cst_50 = arith.constant 6.250000e-02 : f32
    %79 = vector.broadcast %cst_50 : f32 to vector<1x16xf32>
    %80 = arith.mulf %78, %79 : vector<1x16xf32>
    %81 = vector.broadcast %80 : vector<1x16xf32> to vector<36x16xf32>
    %82 = arith.subf %73, %81 : vector<36x16xf32>
    %83 = vector.broadcast %22 : vector<36x1xf32> to vector<36x16xf32>
    %84 = arith.mulf %82, %83 : vector<36x16xf32>
    %85 = arith.mulf %84, %84 : vector<36x16xf32>
    %cst_51 = arith.constant dense<0.000000e+00> : vector<16xf32>
    %86 = vector.multi_reduction <add>, %85, %cst_51 [0] : vector<36x16xf32> to vector<16xf32>
    %87 = vector.shape_cast %86 : vector<16xf32> to vector<1x16xf32>
    %cst_52 = arith.constant 6.250000e-02 : f32
    %88 = vector.broadcast %cst_52 : f32 to vector<1x16xf32>
    %89 = arith.mulf %87, %88 : vector<1x16xf32>
    %90 = vector.broadcast %80 : vector<1x16xf32> to vector<36x16xf32>
    %91 = arith.subf %73, %90 : vector<36x16xf32>
    %cst_53 = arith.constant 9.99999974E-6 : f32
    %92 = vector.broadcast %cst_53 : f32 to vector<1x16xf32>
    %93 = arith.addf %89, %92 : vector<1x16xf32>
    %94 = math.rsqrt %93 : vector<1x16xf32>
    %95 = vector.broadcast %94 : vector<1x16xf32> to vector<36x16xf32>
    %96 = arith.mulf %91, %95 : vector<36x16xf32>
    %cst_54 = arith.constant 0.000000e+00 : f32
    %97 = vector.broadcast %cst_54 : f32 to vector<36x16xf32>
    %98 = arith.cmpf oge, %96, %97 : vector<36x16xf32>
    %99 = vector.broadcast %74 : f32 to vector<36x16xf32>
    %100 = arith.mulf %99, %96 : vector<36x16xf32>
    %101 = arith.select %98, %96, %100 : vector<36x16xi1>, vector<36x16xf32>
    %102 = vector.broadcast %22 : vector<36x1xf32> to vector<36x16xf32>
    %103 = arith.mulf %101, %102 : vector<36x16xf32>
    %cst_55 = arith.constant 0.000000e+00 : bf16
    %104 = vector.broadcast %cst_55 : bf16 to vector<7x16xbf16>
    %c0_56 = arith.constant 0 : index
    %c0_57 = arith.constant 0 : index
    %105 = vector.load %arg7[%c0_56, %c0_57] : memref<56x16xbf16, #tpu.memory_space<vmem>>, vector<7x16xbf16>
    tpu.vector_store %arg7[%c0_56, %c0_57], %104 {strides = array<i32>} : memref<56x16xbf16, #tpu.memory_space<vmem>>, vector<7x16xbf16>,
    %cst_58 = arith.constant 0.000000e+00 : bf16
    %106 = vector.broadcast %cst_58 : bf16 to vector<13x16xbf16>
    %c43 = arith.constant 43 : index
    %c0_59 = arith.constant 0 : index
    %107 = vector.load %arg7[%c43, %c0_59] : memref<56x16xbf16, #tpu.memory_space<vmem>>, vector<13x16xbf16>
    tpu.vector_store %arg7[%c43, %c0_59], %106 {strides = array<i32>} : memref<56x16xbf16, #tpu.memory_space<vmem>>, vector<13x16xbf16>,
    %108 = arith.truncf %103 : vector<36x16xf32> to vector<36x16xbf16>
    %c7 = arith.constant 7 : index
    %c0_60 = arith.constant 0 : index
    %109 = vector.load %arg7[%c7, %c0_60] : memref<56x16xbf16, #tpu.memory_space<vmem>>, vector<36x16xbf16>
    tpu.vector_store %arg7[%c7, %c0_60], %108 {strides = array<i32>} : memref<56x16xbf16, #tpu.memory_space<vmem>>, vector<36x16xbf16>,
    %c0_61 = arith.constant 0 : index
    %c0_62 = arith.constant 0 : index
    %110 = vector.load %arg7[%c0_61, %c0_62] : memref<56x16xbf16, #tpu.memory_space<vmem>>, vector<36x16xbf16>
    %c1 = arith.constant 1 : index
    %c0_63 = arith.constant 0 : index
    %111 = vector.load %arg7[%c1, %c0_63] : memref<56x16xbf16, #tpu.memory_space<vmem>>, vector<36x16xbf16>
    %c2 = arith.constant 2 : index
    %c0_64 = arith.constant 0 : index
    %112 = vector.load %arg7[%c2, %c0_64] : memref<56x16xbf16, #tpu.memory_space<vmem>>, vector<36x16xbf16>
    %c6_65 = arith.constant 6 : index
    %c0_66 = arith.constant 0 : index
    %113 = vector.load %arg7[%c6_65, %c0_66] : memref<56x16xbf16, #tpu.memory_space<vmem>>, vector<36x16xbf16>
    %c7_67 = arith.constant 7 : index
    %c0_68 = arith.constant 0 : index
    %114 = vector.load %arg7[%c7_67, %c0_68] : memref<56x16xbf16, #tpu.memory_space<vmem>>, vector<36x16xbf16>
    %c8_69 = arith.constant 8 : index
    %c0_70 = arith.constant 0 : index
    %115 = vector.load %arg7[%c8_69, %c0_70] : memref<56x16xbf16, #tpu.memory_space<vmem>>, vector<36x16xbf16>
    %c12 = arith.constant 12 : index
    %c0_71 = arith.constant 0 : index
    %116 = vector.load %arg7[%c12, %c0_71] : memref<56x16xbf16, #tpu.memory_space<vmem>>, vector<36x16xbf16>
    %c13 = arith.constant 13 : index
    %c0_72 = arith.constant 0 : index
    %117 = vector.load %arg7[%c13, %c0_72] : memref<56x16xbf16, #tpu.memory_space<vmem>>, vector<36x16xbf16>
    %c14 = arith.constant 14 : index
    %c0_73 = arith.constant 0 : index
    %118 = vector.load %arg7[%c14, %c0_73] : memref<56x16xbf16, #tpu.memory_space<vmem>>, vector<36x16xbf16>
    %cst_74 = arith.constant 0.000000e+00 : f32
    %119 = vector.broadcast %cst_74 : f32 to vector<36x16xf32>
    %c0_75 = arith.constant 0 : index
    %c0_76 = arith.constant 0 : index
    %120 = vector.load %arg5[%c0_75, %c0_76] : memref<144x16xbf16, #tpu.memory_space<vmem>>, vector<16x16xbf16>
    %cst_77 = arith.constant dense<0.000000e+00> : vector<36x16xf32>
    %121 = tpu.matmul %110, %120, %cst_77 {dimension_numbers = #tpu.dot_dimension_numbers<[1], [0], [0], [1], [0, 0, 1, 1], [], []>} : vector<36x16xbf16>, vector<16x16xbf16>, vector<36x16xf32> -> vector<36x16xf32>
    %122 = arith.addf %119, %121 : vector<36x16xf32>
    %c16_78 = arith.constant 16 : index
    %c0_79 = arith.constant 0 : index
    %123 = vector.load %arg5[%c16_78, %c0_79] : memref<144x16xbf16, #tpu.memory_space<vmem>>, vector<16x16xbf16>
    %cst_80 = arith.constant dense<0.000000e+00> : vector<36x16xf32>
    %124 = tpu.matmul %111, %123, %cst_80 {dimension_numbers = #tpu.dot_dimension_numbers<[1], [0], [0], [1], [0, 0, 1, 1], [], []>} : vector<36x16xbf16>, vector<16x16xbf16>, vector<36x16xf32> -> vector<36x16xf32>
    %125 = arith.addf %122, %124 : vector<36x16xf32>
    %c32_81 = arith.constant 32 : index
    %c0_82 = arith.constant 0 : index
    %126 = vector.load %arg5[%c32_81, %c0_82] : memref<144x16xbf16, #tpu.memory_space<vmem>>, vector<16x16xbf16>
    %cst_83 = arith.constant dense<0.000000e+00> : vector<36x16xf32>
    %127 = tpu.matmul %112, %126, %cst_83 {dimension_numbers = #tpu.dot_dimension_numbers<[1], [0], [0], [1], [0, 0, 1, 1], [], []>} : vector<36x16xbf16>, vector<16x16xbf16>, vector<36x16xf32> -> vector<36x16xf32>
    %128 = arith.addf %125, %127 : vector<36x16xf32>
    %c48_84 = arith.constant 48 : index
    %c0_85 = arith.constant 0 : index
    %129 = vector.load %arg5[%c48_84, %c0_85] : memref<144x16xbf16, #tpu.memory_space<vmem>>, vector<16x16xbf16>
    %cst_86 = arith.constant dense<0.000000e+00> : vector<36x16xf32>
    %130 = tpu.matmul %113, %129, %cst_86 {dimension_numbers = #tpu.dot_dimension_numbers<[1], [0], [0], [1], [0, 0, 1, 1], [], []>} : vector<36x16xbf16>, vector<16x16xbf16>, vector<36x16xf32> -> vector<36x16xf32>
    %131 = arith.addf %128, %130 : vector<36x16xf32>
    %c64_87 = arith.constant 64 : index
    %c0_88 = arith.constant 0 : index
    %132 = vector.load %arg5[%c64_87, %c0_88] : memref<144x16xbf16, #tpu.memory_space<vmem>>, vector<16x16xbf16>
    %cst_89 = arith.constant dense<0.000000e+00> : vector<36x16xf32>
    %133 = tpu.matmul %114, %132, %cst_89 {dimension_numbers = #tpu.dot_dimension_numbers<[1], [0], [0], [1], [0, 0, 1, 1], [], []>} : vector<36x16xbf16>, vector<16x16xbf16>, vector<36x16xf32> -> vector<36x16xf32>
    %134 = arith.addf %131, %133 : vector<36x16xf32>
    %c80 = arith.constant 80 : index
    %c0_90 = arith.constant 0 : index
    %135 = vector.load %arg5[%c80, %c0_90] : memref<144x16xbf16, #tpu.memory_space<vmem>>, vector<16x16xbf16>
    %cst_91 = arith.constant dense<0.000000e+00> : vector<36x16xf32>
    %136 = tpu.matmul %115, %135, %cst_91 {dimension_numbers = #tpu.dot_dimension_numbers<[1], [0], [0], [1], [0, 0, 1, 1], [], []>} : vector<36x16xbf16>, vector<16x16xbf16>, vector<36x16xf32> -> vector<36x16xf32>
    %137 = arith.addf %134, %136 : vector<36x16xf32>
    %c96 = arith.constant 96 : index
    %c0_92 = arith.constant 0 : index
    %138 = vector.load %arg5[%c96, %c0_92] : memref<144x16xbf16, #tpu.memory_space<vmem>>, vector<16x16xbf16>
    %cst_93 = arith.constant dense<0.000000e+00> : vector<36x16xf32>
    %139 = tpu.matmul %116, %138, %cst_93 {dimension_numbers = #tpu.dot_dimension_numbers<[1], [0], [0], [1], [0, 0, 1, 1], [], []>} : vector<36x16xbf16>, vector<16x16xbf16>, vector<36x16xf32> -> vector<36x16xf32>
    %140 = arith.addf %137, %139 : vector<36x16xf32>
    %c112 = arith.constant 112 : index
    %c0_94 = arith.constant 0 : index
    %141 = vector.load %arg5[%c112, %c0_94] : memref<144x16xbf16, #tpu.memory_space<vmem>>, vector<16x16xbf16>
    %cst_95 = arith.constant dense<0.000000e+00> : vector<36x16xf32>
    %142 = tpu.matmul %117, %141, %cst_95 {dimension_numbers = #tpu.dot_dimension_numbers<[1], [0], [0], [1], [0, 0, 1, 1], [], []>} : vector<36x16xbf16>, vector<16x16xbf16>, vector<36x16xf32> -> vector<36x16xf32>
    %143 = arith.addf %140, %142 : vector<36x16xf32>
    %c128 = arith.constant 128 : index
    %c0_96 = arith.constant 0 : index
    %144 = vector.load %arg5[%c128, %c0_96] : memref<144x16xbf16, #tpu.memory_space<vmem>>, vector<16x16xbf16>
    %cst_97 = arith.constant dense<0.000000e+00> : vector<36x16xf32>
    %145 = tpu.matmul %118, %144, %cst_97 {dimension_numbers = #tpu.dot_dimension_numbers<[1], [0], [0], [1], [0, 0, 1, 1], [], []>} : vector<36x16xbf16>, vector<16x16xbf16>, vector<36x16xf32> -> vector<36x16xf32>
    %146 = arith.addf %143, %145 : vector<36x16xf32>
    %c0_98 = arith.constant 0 : index
    %c1_99 = arith.constant 1 : index
    %147 = memref.load %arg1[%c0_98, %c1_99] : memref<1x2xf32, #tpu.memory_space<smem>>
    %148 = vector.broadcast %22 : vector<36x1xf32> to vector<36x16xf32>
    %149 = arith.mulf %146, %148 : vector<36x16xf32>
    %cst_100 = arith.constant dense<0.000000e+00> : vector<16xf32>
    %150 = vector.multi_reduction <add>, %149, %cst_100 [0] : vector<36x16xf32> to vector<16xf32>
    %151 = vector.shape_cast %150 : vector<16xf32> to vector<1x16xf32>
    %cst_101 = arith.constant 6.250000e-02 : f32
    %152 = vector.broadcast %cst_101 : f32 to vector<1x16xf32>
    %153 = arith.mulf %151, %152 : vector<1x16xf32>
    %154 = vector.broadcast %153 : vector<1x16xf32> to vector<36x16xf32>
    %155 = arith.subf %146, %154 : vector<36x16xf32>
    %156 = vector.broadcast %22 : vector<36x1xf32> to vector<36x16xf32>
    %157 = arith.mulf %155, %156 : vector<36x16xf32>
    %158 = arith.mulf %157, %157 : vector<36x16xf32>
    %cst_102 = arith.constant dense<0.000000e+00> : vector<16xf32>
    %159 = vector.multi_reduction <add>, %158, %cst_102 [0] : vector<36x16xf32> to vector<16xf32>
    %160 = vector.shape_cast %159 : vector<16xf32> to vector<1x16xf32>
    %cst_103 = arith.constant 6.250000e-02 : f32
    %161 = vector.broadcast %cst_103 : f32 to vector<1x16xf32>
    %162 = arith.mulf %160, %161 : vector<1x16xf32>
    %163 = vector.broadcast %153 : vector<1x16xf32> to vector<36x16xf32>
    %164 = arith.subf %146, %163 : vector<36x16xf32>
    %cst_104 = arith.constant 9.99999974E-6 : f32
    %165 = vector.broadcast %cst_104 : f32 to vector<1x16xf32>
    %166 = arith.addf %162, %165 : vector<1x16xf32>
    %167 = math.rsqrt %166 : vector<1x16xf32>
    %168 = vector.broadcast %167 : vector<1x16xf32> to vector<36x16xf32>
    %169 = arith.mulf %164, %168 : vector<36x16xf32>
    %cst_105 = arith.constant 0.000000e+00 : f32
    %170 = vector.broadcast %cst_105 : f32 to vector<36x16xf32>
    %171 = arith.cmpf oge, %169, %170 : vector<36x16xf32>
    %172 = vector.broadcast %147 : f32 to vector<36x16xf32>
    %173 = arith.mulf %172, %169 : vector<36x16xf32>
    %174 = arith.select %171, %169, %173 : vector<36x16xi1>, vector<36x16xf32>
    %175 = arith.addf %174, %72 : vector<36x16xf32>
    %176 = vector.broadcast %22 : vector<36x1xf32> to vector<36x16xf32>
    %177 = arith.mulf %175, %176 : vector<36x16xf32>
    %178 = arith.truncf %177 : vector<36x16xf32> to vector<36x16xbf16>
    %c0_106 = arith.constant 0 : index
    %c0_107 = arith.constant 0 : index
    %c0_108 = arith.constant 0 : index
    %179 = vector.load %arg6[%c0_106, %c0_107, %c0_108] : memref<1x36x16xbf16, #tpu.memory_space<vmem>>, vector<1x36x16xbf16>
    %180 = vector.shape_cast %179 : vector<1x36x16xbf16> to vector<36x16xbf16>
    %181 = vector.shape_cast %178 : vector<36x16xbf16> to vector<1x36x16xbf16>
    tpu.vector_store %arg6[%c0_106, %c0_107, %c0_108], %181 {strides = array<i32>} : memref<1x36x16xbf16, #tpu.memory_space<vmem>>, vector<1x36x16xbf16>,
    return
  }
  func.func @transform_0(%arg0: i32) -> (i32, i32) {
    %c0_i32 = arith.constant 0 : i32
    %c0_i32_0 = arith.constant 0 : i32
    %c0_i32_1 = arith.constant 0 : i32
    return %c0_i32, %c0_i32_0 : i32, i32
  }
  func.func @transform_1(%arg0: i32) -> (i32, i32, i32) {
    %c0_i32 = arith.constant 0 : i32
    %c0_i32_0 = arith.constant 0 : i32
    %c0_i32_1 = arith.constant 0 : i32
    return %arg0, %c0_i32, %c0_i32_0 : i32, i32, i32
  }
  func.func @transform_2(%arg0: i32) -> (i32, i32) {
    %c0_i32 = arith.constant 0 : i32
    %c0_i32_0 = arith.constant 0 : i32
    %c0_i32_1 = arith.constant 0 : i32
    return %c0_i32, %c0_i32_0 : i32, i32
  }
  func.func @transform_3(%arg0: i32) -> (i32, i32) {
    %c0_i32 = arith.constant 0 : i32
    %c0_i32_0 = arith.constant 0 : i32
    %c0_i32_1 = arith.constant 0 : i32
    return %c0_i32, %c0_i32_0 : i32, i32
  }
  func.func @transform_4(%arg0: i32) -> (i32, i32) {
    %c0_i32 = arith.constant 0 : i32
    %c0_i32_0 = arith.constant 0 : i32
    %c0_i32_1 = arith.constant 0 : i32
    return %c0_i32, %c0_i32_0 : i32, i32
  }
  func.func @transform_5(%arg0: i32) -> (i32, i32, i32) {
    %c0_i32 = arith.constant 0 : i32
    %c0_i32_0 = arith.constant 0 : i32
    %c0_i32_1 = arith.constant 0 : i32
    return %arg0, %c0_i32, %c0_i32_0 : i32, i32, i32
  }
}

module attributes {stable_mosaic.version = 11 : i64} {
  func.func @kernel(%arg0: i32, %arg1: memref<1x2xf32, #tpu.memory_space<smem>>, %arg2: memref<1x144x16xbf16, #tpu.memory_space<vmem>>, %arg3: memref<144x64xbf16, #tpu.memory_space<vmem>>, %arg4: memref<1x32xf32, #tpu.memory_space<vmem>>, %arg5: memref<288x32xbf16, #tpu.memory_space<vmem>>, %arg6: memref<1x36x32xbf16, #tpu.memory_space<vmem>>, %arg7: memref<56x32xbf16, #tpu.memory_space<vmem>>) attributes {dimension_semantics = [#tpu.dimension_semantics<parallel>], iteration_bounds = array<i64: 2>, scalar_prefetch = 0 : i64, scratch_operands = 1 : i64, tpu.core_type = #tpu.core_type<tc>, window_params = [{transform_indices = @transform_0, window_bounds = array<i64: 1, 2>}, {transform_indices = @transform_1, window_bounds = array<i64: 1, 144, 16>}, {pipeline_mode = #tpu.pipeline_mode<synchronous>, transform_indices = @transform_2, window_bounds = array<i64: 144, 64>}, {pipeline_mode = #tpu.pipeline_mode<synchronous>, transform_indices = @transform_3, window_bounds = array<i64: 1, 32>}, {pipeline_mode = #tpu.pipeline_mode<synchronous>, transform_indices = @transform_4, window_bounds = array<i64: 288, 32>}, {transform_indices = @transform_5, window_bounds = array<i64: 1, 36, 32>}]} {
    %0 = tpu.iota {dimensions = array<i32: 0>} : vector<36x1xi32>
    %1 = arith.sitofp %0 : vector<36x1xi32> to vector<36x1xf32>
    %cst = arith.constant 5.000000e-01 : f32
    %2 = vector.broadcast %cst : f32 to vector<36x1xf32>
    %3 = arith.addf %1, %2 : vector<36x1xf32>
    %cst_0 = arith.constant 0.166666672 : f32
    %4 = vector.broadcast %cst_0 : f32 to vector<36x1xf32>
    %5 = arith.mulf %3, %4 : vector<36x1xf32>
    %6 = math.floor %5 : vector<36x1xf32>
    %cst_1 = arith.constant 6.000000e+00 : f32
    %7 = vector.broadcast %cst_1 : f32 to vector<36x1xf32>
    %8 = arith.mulf %6, %7 : vector<36x1xf32>
    %9 = arith.subf %1, %8 : vector<36x1xf32>
    %cst_2 = arith.constant 1.000000e+00 : f32
    %10 = vector.broadcast %cst_2 : f32 to vector<36x1xf32>
    %11 = arith.cmpf oge, %6, %10 : vector<36x1xf32>
    %cst_3 = arith.constant 4.000000e+00 : f32
    %12 = vector.broadcast %cst_3 : f32 to vector<36x1xf32>
    %13 = arith.cmpf ole, %6, %12 : vector<36x1xf32>
    %14 = arith.andi %11, %13 : vector<36x1xi1>
    %cst_4 = arith.constant 1.000000e+00 : f32
    %15 = vector.broadcast %cst_4 : f32 to vector<36x1xf32>
    %16 = arith.cmpf oge, %9, %15 : vector<36x1xf32>
    %17 = arith.andi %14, %16 : vector<36x1xi1>
    %cst_5 = arith.constant 4.000000e+00 : f32
    %18 = vector.broadcast %cst_5 : f32 to vector<36x1xf32>
    %19 = arith.cmpf ole, %9, %18 : vector<36x1xf32>
    %20 = arith.andi %17, %19 : vector<36x1xi1>
    %21 = arith.extui %20 : vector<36x1xi1> to vector<36x1xi32>
    %22 = arith.sitofp %21 : vector<36x1xi32> to vector<36x1xf32>
    %c0 = arith.constant 0 : index
    %c0_6 = arith.constant 0 : index
    %c0_7 = arith.constant 0 : index
    %23 = vector.load %arg2[%c0, %c0_6, %c0_7] : memref<1x144x16xbf16, #tpu.memory_space<vmem>>, vector<1x36x16xbf16>
    %24 = vector.shape_cast %23 : vector<1x36x16xbf16> to vector<36x16xbf16>
    %c0_8 = arith.constant 0 : index
    %c48 = arith.constant 48 : index
    %c0_9 = arith.constant 0 : index
    %25 = vector.load %arg2[%c0_8, %c48, %c0_9] : memref<1x144x16xbf16, #tpu.memory_space<vmem>>, vector<1x36x16xbf16>
    %26 = vector.shape_cast %25 : vector<1x36x16xbf16> to vector<36x16xbf16>
    %c0_10 = arith.constant 0 : index
    %c96 = arith.constant 96 : index
    %c0_11 = arith.constant 0 : index
    %27 = vector.load %arg2[%c0_10, %c96, %c0_11] : memref<1x144x16xbf16, #tpu.memory_space<vmem>>, vector<1x36x16xbf16>
    %28 = vector.shape_cast %27 : vector<1x36x16xbf16> to vector<36x16xbf16>
    %c0_12 = arith.constant 0 : index
    %c6 = arith.constant 6 : index
    %c0_13 = arith.constant 0 : index
    %29 = vector.load %arg2[%c0_12, %c6, %c0_13] : memref<1x144x16xbf16, #tpu.memory_space<vmem>>, vector<1x36x16xbf16>
    %30 = vector.shape_cast %29 : vector<1x36x16xbf16> to vector<36x16xbf16>
    %c0_14 = arith.constant 0 : index
    %c54 = arith.constant 54 : index
    %c0_15 = arith.constant 0 : index
    %31 = vector.load %arg2[%c0_14, %c54, %c0_15] : memref<1x144x16xbf16, #tpu.memory_space<vmem>>, vector<1x36x16xbf16>
    %32 = vector.shape_cast %31 : vector<1x36x16xbf16> to vector<36x16xbf16>
    %c0_16 = arith.constant 0 : index
    %c102 = arith.constant 102 : index
    %c0_17 = arith.constant 0 : index
    %33 = vector.load %arg2[%c0_16, %c102, %c0_17] : memref<1x144x16xbf16, #tpu.memory_space<vmem>>, vector<1x36x16xbf16>
    %34 = vector.shape_cast %33 : vector<1x36x16xbf16> to vector<36x16xbf16>
    %c0_18 = arith.constant 0 : index
    %c12 = arith.constant 12 : index
    %c0_19 = arith.constant 0 : index
    %35 = vector.load %arg2[%c0_18, %c12, %c0_19] : memref<1x144x16xbf16, #tpu.memory_space<vmem>>, vector<1x36x16xbf16>
    %36 = vector.shape_cast %35 : vector<1x36x16xbf16> to vector<36x16xbf16>
    %c0_20 = arith.constant 0 : index
    %c60 = arith.constant 60 : index
    %c0_21 = arith.constant 0 : index
    %37 = vector.load %arg2[%c0_20, %c60, %c0_21] : memref<1x144x16xbf16, #tpu.memory_space<vmem>>, vector<1x36x16xbf16>
    %38 = vector.shape_cast %37 : vector<1x36x16xbf16> to vector<36x16xbf16>
    %c0_22 = arith.constant 0 : index
    %c108 = arith.constant 108 : index
    %c0_23 = arith.constant 0 : index
    %39 = vector.load %arg2[%c0_22, %c108, %c0_23] : memref<1x144x16xbf16, #tpu.memory_space<vmem>>, vector<1x36x16xbf16>
    %40 = vector.shape_cast %39 : vector<1x36x16xbf16> to vector<36x16xbf16>
    %cst_24 = arith.constant 0.000000e+00 : f32
    %41 = vector.broadcast %cst_24 : f32 to vector<36x64xf32>
    %c0_25 = arith.constant 0 : index
    %c0_26 = arith.constant 0 : index
    %42 = vector.load %arg3[%c0_25, %c0_26] : memref<144x64xbf16, #tpu.memory_space<vmem>>, vector<16x64xbf16>
    %cst_27 = arith.constant dense<0.000000e+00> : vector<36x64xf32>
    %43 = tpu.matmul %24, %42, %cst_27 {dimension_numbers = #tpu.dot_dimension_numbers<[1], [0], [0], [1], [0, 0, 1, 1], [], []>} : vector<36x16xbf16>, vector<16x64xbf16>, vector<36x64xf32> -> vector<36x64xf32>
    %44 = arith.addf %41, %43 : vector<36x64xf32>
    %c16 = arith.constant 16 : index
    %c0_28 = arith.constant 0 : index
    %45 = vector.load %arg3[%c16, %c0_28] : memref<144x64xbf16, #tpu.memory_space<vmem>>, vector<16x64xbf16>
    %cst_29 = arith.constant dense<0.000000e+00> : vector<36x64xf32>
    %46 = tpu.matmul %26, %45, %cst_29 {dimension_numbers = #tpu.dot_dimension_numbers<[1], [0], [0], [1], [0, 0, 1, 1], [], []>} : vector<36x16xbf16>, vector<16x64xbf16>, vector<36x64xf32> -> vector<36x64xf32>
    %47 = arith.addf %44, %46 : vector<36x64xf32>
    %c32 = arith.constant 32 : index
    %c0_30 = arith.constant 0 : index
    %48 = vector.load %arg3[%c32, %c0_30] : memref<144x64xbf16, #tpu.memory_space<vmem>>, vector<16x64xbf16>
    %cst_31 = arith.constant dense<0.000000e+00> : vector<36x64xf32>
    %49 = tpu.matmul %28, %48, %cst_31 {dimension_numbers = #tpu.dot_dimension_numbers<[1], [0], [0], [1], [0, 0, 1, 1], [], []>} : vector<36x16xbf16>, vector<16x64xbf16>, vector<36x64xf32> -> vector<36x64xf32>
    %50 = arith.addf %47, %49 : vector<36x64xf32>
    %c48_32 = arith.constant 48 : index
    %c0_33 = arith.constant 0 : index
    %51 = vector.load %arg3[%c48_32, %c0_33] : memref<144x64xbf16, #tpu.memory_space<vmem>>, vector<16x64xbf16>
    %cst_34 = arith.constant dense<0.000000e+00> : vector<36x64xf32>
    %52 = tpu.matmul %30, %51, %cst_34 {dimension_numbers = #tpu.dot_dimension_numbers<[1], [0], [0], [1], [0, 0, 1, 1], [], []>} : vector<36x16xbf16>, vector<16x64xbf16>, vector<36x64xf32> -> vector<36x64xf32>
    %53 = arith.addf %50, %52 : vector<36x64xf32>
    %c64 = arith.constant 64 : index
    %c0_35 = arith.constant 0 : index
    %54 = vector.load %arg3[%c64, %c0_35] : memref<144x64xbf16, #tpu.memory_space<vmem>>, vector<16x64xbf16>
    %cst_36 = arith.constant dense<0.000000e+00> : vector<36x64xf32>
    %55 = tpu.matmul %32, %54, %cst_36 {dimension_numbers = #tpu.dot_dimension_numbers<[1], [0], [0], [1], [0, 0, 1, 1], [], []>} : vector<36x16xbf16>, vector<16x64xbf16>, vector<36x64xf32> -> vector<36x64xf32>
    %56 = arith.addf %53, %55 : vector<36x64xf32>
    %c80 = arith.constant 80 : index
    %c0_37 = arith.constant 0 : index
    %57 = vector.load %arg3[%c80, %c0_37] : memref<144x64xbf16, #tpu.memory_space<vmem>>, vector<16x64xbf16>
    %cst_38 = arith.constant dense<0.000000e+00> : vector<36x64xf32>
    %58 = tpu.matmul %34, %57, %cst_38 {dimension_numbers = #tpu.dot_dimension_numbers<[1], [0], [0], [1], [0, 0, 1, 1], [], []>} : vector<36x16xbf16>, vector<16x64xbf16>, vector<36x64xf32> -> vector<36x64xf32>
    %59 = arith.addf %56, %58 : vector<36x64xf32>
    %c96_39 = arith.constant 96 : index
    %c0_40 = arith.constant 0 : index
    %60 = vector.load %arg3[%c96_39, %c0_40] : memref<144x64xbf16, #tpu.memory_space<vmem>>, vector<16x64xbf16>
    %cst_41 = arith.constant dense<0.000000e+00> : vector<36x64xf32>
    %61 = tpu.matmul %36, %60, %cst_41 {dimension_numbers = #tpu.dot_dimension_numbers<[1], [0], [0], [1], [0, 0, 1, 1], [], []>} : vector<36x16xbf16>, vector<16x64xbf16>, vector<36x64xf32> -> vector<36x64xf32>
    %62 = arith.addf %59, %61 : vector<36x64xf32>
    %c112 = arith.constant 112 : index
    %c0_42 = arith.constant 0 : index
    %63 = vector.load %arg3[%c112, %c0_42] : memref<144x64xbf16, #tpu.memory_space<vmem>>, vector<16x64xbf16>
    %cst_43 = arith.constant dense<0.000000e+00> : vector<36x64xf32>
    %64 = tpu.matmul %38, %63, %cst_43 {dimension_numbers = #tpu.dot_dimension_numbers<[1], [0], [0], [1], [0, 0, 1, 1], [], []>} : vector<36x16xbf16>, vector<16x64xbf16>, vector<36x64xf32> -> vector<36x64xf32>
    %65 = arith.addf %62, %64 : vector<36x64xf32>
    %c128 = arith.constant 128 : index
    %c0_44 = arith.constant 0 : index
    %66 = vector.load %arg3[%c128, %c0_44] : memref<144x64xbf16, #tpu.memory_space<vmem>>, vector<16x64xbf16>
    %cst_45 = arith.constant dense<0.000000e+00> : vector<36x64xf32>
    %67 = tpu.matmul %40, %66, %cst_45 {dimension_numbers = #tpu.dot_dimension_numbers<[1], [0], [0], [1], [0, 0, 1, 1], [], []>} : vector<36x16xbf16>, vector<16x64xbf16>, vector<36x64xf32> -> vector<36x64xf32>
    %68 = arith.addf %65, %67 : vector<36x64xf32>
    %69 = vector.extract_strided_slice %68 {offsets = [0, 32], sizes = [36, 32], strides = [1, 1]} : vector<36x64xf32> to vector<36x32xf32>
    %c0_46 = arith.constant 0 : index
    %c0_47 = arith.constant 0 : index
    %70 = vector.load %arg4[%c0_46, %c0_47] : memref<1x32xf32, #tpu.memory_space<vmem>>, vector<1x32xf32>
    %71 = vector.broadcast %70 : vector<1x32xf32> to vector<36x32xf32>
    %72 = arith.addf %69, %71 : vector<36x32xf32>
    %73 = vector.extract_strided_slice %68 {offsets = [0, 0], sizes = [36, 32], strides = [1, 1]} : vector<36x64xf32> to vector<36x32xf32>
    %c0_48 = arith.constant 0 : index
    %c0_49 = arith.constant 0 : index
    %74 = memref.load %arg1[%c0_48, %c0_49] : memref<1x2xf32, #tpu.memory_space<smem>>
    %75 = vector.broadcast %22 : vector<36x1xf32> to vector<36x32xf32>
    %76 = arith.mulf %73, %75 : vector<36x32xf32>
    %cst_50 = arith.constant dense<0.000000e+00> : vector<32xf32>
    %77 = vector.multi_reduction <add>, %76, %cst_50 [0] : vector<36x32xf32> to vector<32xf32>
    %78 = vector.shape_cast %77 : vector<32xf32> to vector<1x32xf32>
    %cst_51 = arith.constant 6.250000e-02 : f32
    %79 = vector.broadcast %cst_51 : f32 to vector<1x32xf32>
    %80 = arith.mulf %78, %79 : vector<1x32xf32>
    %81 = vector.broadcast %80 : vector<1x32xf32> to vector<36x32xf32>
    %82 = arith.subf %73, %81 : vector<36x32xf32>
    %83 = vector.broadcast %22 : vector<36x1xf32> to vector<36x32xf32>
    %84 = arith.mulf %82, %83 : vector<36x32xf32>
    %85 = arith.mulf %84, %84 : vector<36x32xf32>
    %cst_52 = arith.constant dense<0.000000e+00> : vector<32xf32>
    %86 = vector.multi_reduction <add>, %85, %cst_52 [0] : vector<36x32xf32> to vector<32xf32>
    %87 = vector.shape_cast %86 : vector<32xf32> to vector<1x32xf32>
    %cst_53 = arith.constant 6.250000e-02 : f32
    %88 = vector.broadcast %cst_53 : f32 to vector<1x32xf32>
    %89 = arith.mulf %87, %88 : vector<1x32xf32>
    %90 = vector.broadcast %80 : vector<1x32xf32> to vector<36x32xf32>
    %91 = arith.subf %73, %90 : vector<36x32xf32>
    %cst_54 = arith.constant 9.99999974E-6 : f32
    %92 = vector.broadcast %cst_54 : f32 to vector<1x32xf32>
    %93 = arith.addf %89, %92 : vector<1x32xf32>
    %94 = math.rsqrt %93 : vector<1x32xf32>
    %95 = vector.broadcast %94 : vector<1x32xf32> to vector<36x32xf32>
    %96 = arith.mulf %91, %95 : vector<36x32xf32>
    %cst_55 = arith.constant 0.000000e+00 : f32
    %97 = vector.broadcast %cst_55 : f32 to vector<36x32xf32>
    %98 = arith.cmpf oge, %96, %97 : vector<36x32xf32>
    %99 = vector.broadcast %74 : f32 to vector<36x32xf32>
    %100 = arith.mulf %99, %96 : vector<36x32xf32>
    %101 = arith.select %98, %96, %100 : vector<36x32xi1>, vector<36x32xf32>
    %102 = vector.broadcast %22 : vector<36x1xf32> to vector<36x32xf32>
    %103 = arith.mulf %101, %102 : vector<36x32xf32>
    %cst_56 = arith.constant 0.000000e+00 : bf16
    %104 = vector.broadcast %cst_56 : bf16 to vector<7x32xbf16>
    %c0_57 = arith.constant 0 : index
    %c0_58 = arith.constant 0 : index
    %105 = vector.load %arg7[%c0_57, %c0_58] : memref<56x32xbf16, #tpu.memory_space<vmem>>, vector<7x32xbf16>
    tpu.vector_store %arg7[%c0_57, %c0_58], %104 {strides = array<i32>} : memref<56x32xbf16, #tpu.memory_space<vmem>>, vector<7x32xbf16>,
    %cst_59 = arith.constant 0.000000e+00 : bf16
    %106 = vector.broadcast %cst_59 : bf16 to vector<13x32xbf16>
    %c43 = arith.constant 43 : index
    %c0_60 = arith.constant 0 : index
    %107 = vector.load %arg7[%c43, %c0_60] : memref<56x32xbf16, #tpu.memory_space<vmem>>, vector<13x32xbf16>
    tpu.vector_store %arg7[%c43, %c0_60], %106 {strides = array<i32>} : memref<56x32xbf16, #tpu.memory_space<vmem>>, vector<13x32xbf16>,
    %108 = arith.truncf %103 : vector<36x32xf32> to vector<36x32xbf16>
    %c7 = arith.constant 7 : index
    %c0_61 = arith.constant 0 : index
    %109 = vector.load %arg7[%c7, %c0_61] : memref<56x32xbf16, #tpu.memory_space<vmem>>, vector<36x32xbf16>
    tpu.vector_store %arg7[%c7, %c0_61], %108 {strides = array<i32>} : memref<56x32xbf16, #tpu.memory_space<vmem>>, vector<36x32xbf16>,
    %c0_62 = arith.constant 0 : index
    %c0_63 = arith.constant 0 : index
    %110 = vector.load %arg7[%c0_62, %c0_63] : memref<56x32xbf16, #tpu.memory_space<vmem>>, vector<36x32xbf16>
    %c1 = arith.constant 1 : index
    %c0_64 = arith.constant 0 : index
    %111 = vector.load %arg7[%c1, %c0_64] : memref<56x32xbf16, #tpu.memory_space<vmem>>, vector<36x32xbf16>
    %c2 = arith.constant 2 : index
    %c0_65 = arith.constant 0 : index
    %112 = vector.load %arg7[%c2, %c0_65] : memref<56x32xbf16, #tpu.memory_space<vmem>>, vector<36x32xbf16>
    %c6_66 = arith.constant 6 : index
    %c0_67 = arith.constant 0 : index
    %113 = vector.load %arg7[%c6_66, %c0_67] : memref<56x32xbf16, #tpu.memory_space<vmem>>, vector<36x32xbf16>
    %c7_68 = arith.constant 7 : index
    %c0_69 = arith.constant 0 : index
    %114 = vector.load %arg7[%c7_68, %c0_69] : memref<56x32xbf16, #tpu.memory_space<vmem>>, vector<36x32xbf16>
    %c8 = arith.constant 8 : index
    %c0_70 = arith.constant 0 : index
    %115 = vector.load %arg7[%c8, %c0_70] : memref<56x32xbf16, #tpu.memory_space<vmem>>, vector<36x32xbf16>
    %c12_71 = arith.constant 12 : index
    %c0_72 = arith.constant 0 : index
    %116 = vector.load %arg7[%c12_71, %c0_72] : memref<56x32xbf16, #tpu.memory_space<vmem>>, vector<36x32xbf16>
    %c13 = arith.constant 13 : index
    %c0_73 = arith.constant 0 : index
    %117 = vector.load %arg7[%c13, %c0_73] : memref<56x32xbf16, #tpu.memory_space<vmem>>, vector<36x32xbf16>
    %c14 = arith.constant 14 : index
    %c0_74 = arith.constant 0 : index
    %118 = vector.load %arg7[%c14, %c0_74] : memref<56x32xbf16, #tpu.memory_space<vmem>>, vector<36x32xbf16>
    %cst_75 = arith.constant 0.000000e+00 : f32
    %119 = vector.broadcast %cst_75 : f32 to vector<36x32xf32>
    %c0_76 = arith.constant 0 : index
    %c0_77 = arith.constant 0 : index
    %120 = vector.load %arg5[%c0_76, %c0_77] : memref<288x32xbf16, #tpu.memory_space<vmem>>, vector<32x32xbf16>
    %cst_78 = arith.constant dense<0.000000e+00> : vector<36x32xf32>
    %121 = tpu.matmul %110, %120, %cst_78 {dimension_numbers = #tpu.dot_dimension_numbers<[1], [0], [0], [1], [0, 0, 1, 1], [], []>} : vector<36x32xbf16>, vector<32x32xbf16>, vector<36x32xf32> -> vector<36x32xf32>
    %122 = arith.addf %119, %121 : vector<36x32xf32>
    %c32_79 = arith.constant 32 : index
    %c0_80 = arith.constant 0 : index
    %123 = vector.load %arg5[%c32_79, %c0_80] : memref<288x32xbf16, #tpu.memory_space<vmem>>, vector<32x32xbf16>
    %cst_81 = arith.constant dense<0.000000e+00> : vector<36x32xf32>
    %124 = tpu.matmul %111, %123, %cst_81 {dimension_numbers = #tpu.dot_dimension_numbers<[1], [0], [0], [1], [0, 0, 1, 1], [], []>} : vector<36x32xbf16>, vector<32x32xbf16>, vector<36x32xf32> -> vector<36x32xf32>
    %125 = arith.addf %122, %124 : vector<36x32xf32>
    %c64_82 = arith.constant 64 : index
    %c0_83 = arith.constant 0 : index
    %126 = vector.load %arg5[%c64_82, %c0_83] : memref<288x32xbf16, #tpu.memory_space<vmem>>, vector<32x32xbf16>
    %cst_84 = arith.constant dense<0.000000e+00> : vector<36x32xf32>
    %127 = tpu.matmul %112, %126, %cst_84 {dimension_numbers = #tpu.dot_dimension_numbers<[1], [0], [0], [1], [0, 0, 1, 1], [], []>} : vector<36x32xbf16>, vector<32x32xbf16>, vector<36x32xf32> -> vector<36x32xf32>
    %128 = arith.addf %125, %127 : vector<36x32xf32>
    %c96_85 = arith.constant 96 : index
    %c0_86 = arith.constant 0 : index
    %129 = vector.load %arg5[%c96_85, %c0_86] : memref<288x32xbf16, #tpu.memory_space<vmem>>, vector<32x32xbf16>
    %cst_87 = arith.constant dense<0.000000e+00> : vector<36x32xf32>
    %130 = tpu.matmul %113, %129, %cst_87 {dimension_numbers = #tpu.dot_dimension_numbers<[1], [0], [0], [1], [0, 0, 1, 1], [], []>} : vector<36x32xbf16>, vector<32x32xbf16>, vector<36x32xf32> -> vector<36x32xf32>
    %131 = arith.addf %128, %130 : vector<36x32xf32>
    %c128_88 = arith.constant 128 : index
    %c0_89 = arith.constant 0 : index
    %132 = vector.load %arg5[%c128_88, %c0_89] : memref<288x32xbf16, #tpu.memory_space<vmem>>, vector<32x32xbf16>
    %cst_90 = arith.constant dense<0.000000e+00> : vector<36x32xf32>
    %133 = tpu.matmul %114, %132, %cst_90 {dimension_numbers = #tpu.dot_dimension_numbers<[1], [0], [0], [1], [0, 0, 1, 1], [], []>} : vector<36x32xbf16>, vector<32x32xbf16>, vector<36x32xf32> -> vector<36x32xf32>
    %134 = arith.addf %131, %133 : vector<36x32xf32>
    %c160 = arith.constant 160 : index
    %c0_91 = arith.constant 0 : index
    %135 = vector.load %arg5[%c160, %c0_91] : memref<288x32xbf16, #tpu.memory_space<vmem>>, vector<32x32xbf16>
    %cst_92 = arith.constant dense<0.000000e+00> : vector<36x32xf32>
    %136 = tpu.matmul %115, %135, %cst_92 {dimension_numbers = #tpu.dot_dimension_numbers<[1], [0], [0], [1], [0, 0, 1, 1], [], []>} : vector<36x32xbf16>, vector<32x32xbf16>, vector<36x32xf32> -> vector<36x32xf32>
    %137 = arith.addf %134, %136 : vector<36x32xf32>
    %c192 = arith.constant 192 : index
    %c0_93 = arith.constant 0 : index
    %138 = vector.load %arg5[%c192, %c0_93] : memref<288x32xbf16, #tpu.memory_space<vmem>>, vector<32x32xbf16>
    %cst_94 = arith.constant dense<0.000000e+00> : vector<36x32xf32>
    %139 = tpu.matmul %116, %138, %cst_94 {dimension_numbers = #tpu.dot_dimension_numbers<[1], [0], [0], [1], [0, 0, 1, 1], [], []>} : vector<36x32xbf16>, vector<32x32xbf16>, vector<36x32xf32> -> vector<36x32xf32>
    %140 = arith.addf %137, %139 : vector<36x32xf32>
    %c224 = arith.constant 224 : index
    %c0_95 = arith.constant 0 : index
    %141 = vector.load %arg5[%c224, %c0_95] : memref<288x32xbf16, #tpu.memory_space<vmem>>, vector<32x32xbf16>
    %cst_96 = arith.constant dense<0.000000e+00> : vector<36x32xf32>
    %142 = tpu.matmul %117, %141, %cst_96 {dimension_numbers = #tpu.dot_dimension_numbers<[1], [0], [0], [1], [0, 0, 1, 1], [], []>} : vector<36x32xbf16>, vector<32x32xbf16>, vector<36x32xf32> -> vector<36x32xf32>
    %143 = arith.addf %140, %142 : vector<36x32xf32>
    %c256 = arith.constant 256 : index
    %c0_97 = arith.constant 0 : index
    %144 = vector.load %arg5[%c256, %c0_97] : memref<288x32xbf16, #tpu.memory_space<vmem>>, vector<32x32xbf16>
    %cst_98 = arith.constant dense<0.000000e+00> : vector<36x32xf32>
    %145 = tpu.matmul %118, %144, %cst_98 {dimension_numbers = #tpu.dot_dimension_numbers<[1], [0], [0], [1], [0, 0, 1, 1], [], []>} : vector<36x32xbf16>, vector<32x32xbf16>, vector<36x32xf32> -> vector<36x32xf32>
    %146 = arith.addf %143, %145 : vector<36x32xf32>
    %c0_99 = arith.constant 0 : index
    %c1_100 = arith.constant 1 : index
    %147 = memref.load %arg1[%c0_99, %c1_100] : memref<1x2xf32, #tpu.memory_space<smem>>
    %148 = vector.broadcast %22 : vector<36x1xf32> to vector<36x32xf32>
    %149 = arith.mulf %146, %148 : vector<36x32xf32>
    %cst_101 = arith.constant dense<0.000000e+00> : vector<32xf32>
    %150 = vector.multi_reduction <add>, %149, %cst_101 [0] : vector<36x32xf32> to vector<32xf32>
    %151 = vector.shape_cast %150 : vector<32xf32> to vector<1x32xf32>
    %cst_102 = arith.constant 6.250000e-02 : f32
    %152 = vector.broadcast %cst_102 : f32 to vector<1x32xf32>
    %153 = arith.mulf %151, %152 : vector<1x32xf32>
    %154 = vector.broadcast %153 : vector<1x32xf32> to vector<36x32xf32>
    %155 = arith.subf %146, %154 : vector<36x32xf32>
    %156 = vector.broadcast %22 : vector<36x1xf32> to vector<36x32xf32>
    %157 = arith.mulf %155, %156 : vector<36x32xf32>
    %158 = arith.mulf %157, %157 : vector<36x32xf32>
    %cst_103 = arith.constant dense<0.000000e+00> : vector<32xf32>
    %159 = vector.multi_reduction <add>, %158, %cst_103 [0] : vector<36x32xf32> to vector<32xf32>
    %160 = vector.shape_cast %159 : vector<32xf32> to vector<1x32xf32>
    %cst_104 = arith.constant 6.250000e-02 : f32
    %161 = vector.broadcast %cst_104 : f32 to vector<1x32xf32>
    %162 = arith.mulf %160, %161 : vector<1x32xf32>
    %163 = vector.broadcast %153 : vector<1x32xf32> to vector<36x32xf32>
    %164 = arith.subf %146, %163 : vector<36x32xf32>
    %cst_105 = arith.constant 9.99999974E-6 : f32
    %165 = vector.broadcast %cst_105 : f32 to vector<1x32xf32>
    %166 = arith.addf %162, %165 : vector<1x32xf32>
    %167 = math.rsqrt %166 : vector<1x32xf32>
    %168 = vector.broadcast %167 : vector<1x32xf32> to vector<36x32xf32>
    %169 = arith.mulf %164, %168 : vector<36x32xf32>
    %cst_106 = arith.constant 0.000000e+00 : f32
    %170 = vector.broadcast %cst_106 : f32 to vector<36x32xf32>
    %171 = arith.cmpf oge, %169, %170 : vector<36x32xf32>
    %172 = vector.broadcast %147 : f32 to vector<36x32xf32>
    %173 = arith.mulf %172, %169 : vector<36x32xf32>
    %174 = arith.select %171, %169, %173 : vector<36x32xi1>, vector<36x32xf32>
    %175 = arith.addf %174, %72 : vector<36x32xf32>
    %176 = vector.broadcast %22 : vector<36x1xf32> to vector<36x32xf32>
    %177 = arith.mulf %175, %176 : vector<36x32xf32>
    %178 = arith.truncf %177 : vector<36x32xf32> to vector<36x32xbf16>
    %c0_107 = arith.constant 0 : index
    %c0_108 = arith.constant 0 : index
    %c0_109 = arith.constant 0 : index
    %179 = vector.load %arg6[%c0_107, %c0_108, %c0_109] : memref<1x36x32xbf16, #tpu.memory_space<vmem>>, vector<1x36x32xbf16>
    %180 = vector.shape_cast %179 : vector<1x36x32xbf16> to vector<36x32xbf16>
    %181 = vector.shape_cast %178 : vector<36x32xbf16> to vector<1x36x32xbf16>
    tpu.vector_store %arg6[%c0_107, %c0_108, %c0_109], %181 {strides = array<i32>} : memref<1x36x32xbf16, #tpu.memory_space<vmem>>, vector<1x36x32xbf16>,
    return
  }
  func.func @transform_0(%arg0: i32) -> (i32, i32) {
    %c0_i32 = arith.constant 0 : i32
    %c0_i32_0 = arith.constant 0 : i32
    %c0_i32_1 = arith.constant 0 : i32
    return %c0_i32, %c0_i32_0 : i32, i32
  }
  func.func @transform_1(%arg0: i32) -> (i32, i32, i32) {
    %c0_i32 = arith.constant 0 : i32
    %c0_i32_0 = arith.constant 0 : i32
    %c0_i32_1 = arith.constant 0 : i32
    return %arg0, %c0_i32, %c0_i32_0 : i32, i32, i32
  }
  func.func @transform_2(%arg0: i32) -> (i32, i32) {
    %c0_i32 = arith.constant 0 : i32
    %c0_i32_0 = arith.constant 0 : i32
    %c0_i32_1 = arith.constant 0 : i32
    return %c0_i32, %c0_i32_0 : i32, i32
  }
  func.func @transform_3(%arg0: i32) -> (i32, i32) {
    %c0_i32 = arith.constant 0 : i32
    %c0_i32_0 = arith.constant 0 : i32
    %c0_i32_1 = arith.constant 0 : i32
    return %c0_i32, %c0_i32_0 : i32, i32
  }
  func.func @transform_4(%arg0: i32) -> (i32, i32) {
    %c0_i32 = arith.constant 0 : i32
    %c0_i32_0 = arith.constant 0 : i32
    %c0_i32_1 = arith.constant 0 : i32
    return %c0_i32, %c0_i32_0 : i32, i32
  }
  func.func @transform_5(%arg0: i32) -> (i32, i32, i32) {
    %c0_i32 = arith.constant 0 : i32
    %c0_i32_0 = arith.constant 0 : i32
    %c0_i32_1 = arith.constant 0 : i32
    return %arg0, %c0_i32, %c0_i32_0 : i32, i32, i32
  }
}

</mosaic_0001>

<bundles_post_ra>
// kernel: tpu_custom_call.1
= control target key start
LH: loop header
LB: loop body
LE: loop exit
PB: predicated region body
PF: predicated region fallthrough
CT: control target
= control target key end

     0   :  { %s1134_s15 = smov 8   ;;  %s1135_s16 = smov 4   ;;  %vm700_vm0 = vcmask 1041408   ;;  %vm538_vm1 = vcmask 31744   ;;  %vm560_vm2 = vcmask 64512   ;;  %vm575_vm3 = vcmask 97280   ;;  %s1533_s0 = inlined_call_operand.vmem [shape: bf16[936,4], index: 0, kind: input, shape index: {}]   ;;  %s1534_s1 = inlined_call_operand.vmem [shape: bf16[36,16], index: 1, kind: input, shape index: {}]   ;;  %s1535_s2 = inlined_call_operand.vmem [shape: f32[104,8], index: 2, kind: output, shape index: {}]  }
   0x1   :  { %v1072_v0 = vld [vmem:[%s1533_s0 + $0x68] sm:$0xff]  ;;  %v1071_v1 = vld [vmem:[%s1533_s0 + $0x5c] sm:$0xff]  ;;  %v1066_v2 = vld [vmem:[%s1533_s0 + $0x34] sm:$0xff]  ;;  %s1136_s23 = smov 12   ;;  %s1137_s30 = smov 16   ;;  %vm590_vm4 = vcmask 130048  }
   0x2   :  { %242 = vrot.lane.b32.xlu1 %v1072_v0, %s1134_s15  ;;  %205 = vrot.lane.b32.xlu2 %v1071_v1, %s1135_s16  ;;  %v1074_v3 = vld [vmem:[%s1533_s0 + $0x78] sm:$0xff]  ;;  %v1068_v5 = vld [vmem:[%s1533_s0 + $0x44] sm:$0xff]  ;;  %s1138_s9 = smov 20   ;;  %s1139_s18 = smov 24   ;;  %vm605_vm5 = vcmask 162816   ;;  %vm620_vm6 = vcmask 195584  }
   0x3   :  { %195 = vrot.lane.b32.xlu0 %v1066_v2, %s1135_s16  ;;  %v1078_v4 = vld [vmem:[%s1533_s0 + $0x9c] sm:$0xff]  ;;  %v1077_v6 = vld [vmem:[%s1533_s0 + $0x90] sm:$0xff]  ;;  %v1083_v9 = vld [vmem:[%s1533_s0 + $0xc4] sm:$0xff]  ;;  %s1140_s26 = smov 28   ;;  %s1141_s6 = smov 32   ;;  %vm635_vm7 = vcmask 228352  }
   0x4   :  { %v1084_v7 = vld [vmem:[%s1533_s0 + $0xd0] sm:$0xff]  ;;  %v1090_v10 = vld [vmem:[%s1533_s0 + $0x104] sm:$0xff]  ;;  %v1089_v12 = vld [vmem:[%s1533_s0 + $0xf8] sm:$0xff]  ;;  %vm650_vm8 = vcmask 261120   ;;  %vm685_vm9 = vcmask 293888  }
   0x5   :  { %v1080_v8 = vld [vmem:[%s1533_s0 + $0xac] sm:$0xff]  ;;  %v1086_v11 = vld [vmem:[%s1533_s0 + $0xe0] sm:$0xff]  ;;  %v1096_v13 = vld [vmem:[%s1533_s0 + $0x138] sm:$0xff] }
   0x6   :  { %v1092_v14 = vld [vmem:[%s1533_s0 + $0x114] sm:$0xff]  ;;  %v1095_v15 = vld [vmem:[%s1533_s0 + $0x12c] sm:$0xff]  ;;  %v1101_v18 = vld [vmem:[%s1533_s0 + $0x160] sm:$0xff] }
   0x7   :  { %v1102_v16 = vld [vmem:[%s1533_s0 + $0x16c] sm:$0xff]  ;;  %v1108_v19 = vld [vmem:[%s1533_s0 + $0x1a0] sm:$0xff]  ;;  %v1107_v21 = vld [vmem:[%s1533_s0 + $0x194] sm:$0xff] }
   0x8   :  { %v1098_v17 = vld [vmem:[%s1533_s0 + $0x148] sm:$0xff]  ;;  %v1104_v20 = vld [vmem:[%s1533_s0 + $0x17c] sm:$0xff]  ;;  %v1110_v23 = vld [vmem:[%s1533_s0 + $0x1b0] sm:$0xff] }
   0x9   :  { %v1113_v22 = vld [vmem:[%s1533_s0 + $0x1c8] sm:$0xff]  ;;  %v1082_v25 = vld [vmem:[%s1533_s0 + $0xbc] sm:$0xff]  ;;  %v1070_v26 = vld [vmem:[%s1533_s0 + $0x54] sm:$0xff] }
   0xa   :  { %246 = vrot.lane.b32.xlu1 %v1074_v3, %s1134_s15  ;;  %289 = vrot.lane.b32.xlu2 %v1078_v4, %s1136_s23  ;;  %v1076_v24 = vld [vmem:[%s1533_s0 + $0x88] sm:$0xff]  ;;  %v1100_v28 = vld [vmem:[%s1533_s0 + $0x158] sm:$0xff] }
   0xb   :  { %199 = vrot.lane.b32.xlu0 %v1068_v5, %s1135_s16  ;;  %v1094_v27 = vld [vmem:[%s1533_s0 + $0x124] sm:$0xff]  ;;  %v1088_v29 = vld [vmem:[%s1533_s0 + $0xf0] sm:$0xff]  ;;  %v1067_v32 = vld [vmem:[%s1533_s0 + $0x3c] sm:$0xff] }
   0xc   :  { %v1106_v30 = vld [vmem:[%s1533_s0 + $0x18c] sm:$0xff]  ;;  %v1112_v33 = vld [vmem:[%s1533_s0 + $0x1c0] sm:$0xff]  ;;  %v1081_v39 = vld [vmem:[%s1533_s0 + $0xb4] sm:$0xff] }
   0xd   :  { %v1069_v31 = vld [vmem:[%s1533_s0 + $0x4c] sm:$0xff]  ;;  %v1075_v34 = vld [vmem:[%s1533_s0 + $0x80] sm:$0xff]  ;;  %v50_v44 = vld [vmem:[%s1533_s0 + $0x98] sm:$0xf] }
   0xe   :  { %v1073_v35 = vld [vmem:[%s1533_s0 + $0x70] sm:$0xff]  ;;  %v37_v36 = vld [vmem:[%s1533_s0 + $0x64] sm:$0xf]  ;;  %v234_v46 = vunpack.c.l.b16 %v50_v44  ;;  %v1087_v49 = vld [vmem:[%s1533_s0 + $0xe8] sm:$0xff] }
   0xf   :  { %v187_v37 = vunpack.c.l.b16 %v37_v36  ;;  %v1079_v40 = vld [vmem:[%s1533_s0 + $0xa4] sm:$0xff]  ;;  %v669_v41 = vld [vmem:[%s1534_s1 + $0x10] sm:$0x3]  ;;  %v1085_v50 = vld [vmem:[%s1533_s0 + $0xd8] sm:$0xff] }
  0x10   :  { %v679_v43 = vunpack.c.l.b16 %v669_v41  ;;  %v1115_v51 = vld [vmem:[%s1534_s1 + $0x8] sm:$0xff]  ;;  %v241_v52 = vpack.c.b16 %v234_v46, %v234_v46  ;;  %v1114_v54 = vld [vmem:[%s1534_s1] sm:$0xff]  ;;  %v1099_v1 = vld [vmem:[%s1533_s0 + $0x150] sm:$0xff] }
  0x11   :  { %v194_v42 = vpack.c.b16 %v187_v37, %v187_v37  ;;  %v63_v53 = vld [vmem:[%s1533_s0 + $0xcc] sm:$0xf]  ;;  %v1093_v57 = vld [vmem:[%s1533_s0 + $0x11c] sm:$0xff]  ;;  %v89_v4 = vld [vmem:[%s1533_s0 + $0x134] sm:$0xf] }
  0x12   :  { %252 = vrot.lane.b32.xlu1 %v1077_v6, %s1134_s15  ;;  %336 = vrot.lane.b32.xlu2 %v1084_v7, %s1137_s30  ;;  %v682_v45 = vpack.c.b16 %v679_v43, %v679_v43  ;;  %v281_v55 = vunpack.c.l.b16 %v63_v53  ;;  %v1091_v58 = vld [vmem:[%s1533_s0 + $0x10c] sm:$0xff]  ;;  %v76_v60 = vld [vmem:[%s1533_s0 + $0x100] sm:$0xf]  ;;  %v375_v6 = vunpack.c.l.b16 %v89_v4 }
  0x13   :  { %293 = vrot.lane.b32.xlu0 %v1080_v8, %s1136_s23  ;;  %v328_v61 = vunpack.c.l.b16 %v76_v60  ;;  %v1097_v2 = vld [vmem:[%s1533_s0 + $0x140] sm:$0xff]  ;;  %v1065_v46 = vld [vmem:[%s1533_s0 + $0x28] sm:$0xff] }
  0x14   :  { %v702_v47 = vsel %vm700_vm0, %v682_v45, 0  ;;  %v288_v59 = vpack.c.b16 %v281_v55, %v281_v55  ;;  %v1060_v5 = vld [vmem:[%s1533_s0] sm:$0xff]  ;;  %v1062_v45 = vld [vmem:[%s1533_s0 + $0x10] sm:$0xff] }
  0x15   :  { %709 = vmatpush.bf16.msra.mxu0 %v702_v47  ;;  %1116 = vmatpush.bf16.msra.mxu1 %v702_v47  ;;  %v335_v3 = vpack.c.b16 %v328_v61, %v328_v61  ;;  %v1064_v4 = vld [vmem:[%s1533_s0 + $0x20] sm:$0xff] }
  0x16   :  { %1118 = vmatpush.bf16.msra.mxu3 %v702_v47  ;;  %1117 = vmatpush.bf16.msra.mxu2 %v702_v47 }
  0x19   :  { %710 = vmatpush.bf16.msra.mxu0 %v1115_v51  ;;  %1119 = vmatpush.bf16.msra.mxu1 %v1115_v51 }
  0x1a   :  { %299 = vrot.lane.b32.xlu1 %v1083_v9, %s1136_s23  ;;  %383 = vrot.lane.b32.xlu2 %v1090_v10, %s1138_s9 }
  0x1b   :  { %340 = vrot.lane.b32.xlu0 %v1086_v11, %s1137_s30  ;;  %1121 = vmatpush.bf16.msra.mxu3 %v1115_v51  ;;  %v1105_v11 = vld [vmem:[%s1533_s0 + $0x184] sm:$0xff] }
  0x1c   :  { %1120 = vmatpush.bf16.msra.mxu2 %v1115_v51 }
  0x1d   :  { %711 = vmatpush.bf16.msra.mxu0 %v1114_v54  ;;  %1122 = vmatpush.bf16.msra.mxu1 %v1114_v54 }
  0x1f   :  { %1124 = vmatpush.bf16.msra.mxu3 %v1114_v54 }
  0x20   :  { %1123 = vmatpush.bf16.msra.mxu2 %v1114_v54 }
  0x22   :  { %346 = vrot.lane.b32.xlu1 %v1089_v12, %s1137_s30  ;;  %430 = vrot.lane.b32.xlu2 %v1096_v13, %s1139_s18  ;;  %v1103_v12 = vld [vmem:[%s1533_s0 + $0x174] sm:$0xff]  ;;  %v382_v13 = vpack.c.b16 %v375_v6, %v375_v6 }
  0x23   :  { %387 = vrot.lane.b32.xlu0 %v1092_v14, %s1138_s9  ;;  %v102_v14 = vld [vmem:[%s1533_s0 + $0x168] sm:$0xf] }
  0x2a   :  { %393 = vrot.lane.b32.xlu1 %v1095_v15, %s1138_s9  ;;  %477 = vrot.lane.b32.xlu2 %v1102_v16, %s1140_s26  ;;  %v422_v16 = vunpack.c.l.b16 %v102_v14 }
  0x2b   :  { %434 = vrot.lane.b32.xlu0 %v1098_v17, %s1139_s18 }
  0x32   :  { %440 = vrot.lane.b32.xlu1 %v1101_v18, %s1139_s18  ;;  %524 = vrot.lane.b32.xlu2 %v1108_v19, %s1141_s6 }
  0x33   :  { %481 = vrot.lane.b32.xlu0 %v1104_v20, %s1140_s26 }
  0x3a   :  { %487 = vrot.lane.b32.xlu1 %v1107_v21, %s1140_s26  ;;  %534 = vrot.lane.b32.xlu2 %v1113_v22, %s1141_s6  ;;  %v1111_v21 = vld [vmem:[%s1533_s0 + $0x1b8] sm:$0xff]  ;;  %v1109_v22 = vld [vmem:[%s1533_s0 + $0x1a8] sm:$0xff] }
  0x3b   :  { %528 = vrot.lane.b32.xlu0 %v1110_v23, %s1141_s6 }
  0x42   :  { %250 = vrot.lane.b32.xlu1 %v1076_v24, %s1134_s15  ;;  %297 = vrot.lane.b32.xlu2 %v1082_v25, %s1136_s23  ;;  %v429_v24 = vpack.c.b16 %v422_v16, %v422_v16  ;;  %v128_v25 = vld [vmem:[%s1533_s0 + $0x1d0] sm:$0xf] }
  0x43   :  { %203 = vrot.lane.b32.xlu0 %v1070_v26, %s1135_s16  ;;  %v115_v26 = vld [vmem:[%s1533_s0 + $0x19c] sm:$0xf] }
  0x4a   :  { %391 = vrot.lane.b32.xlu1 %v1094_v27, %s1138_s9  ;;  %438 = vrot.lane.b32.xlu2 %v1100_v28, %s1139_s18  ;;  %v516_v28 = vunpack.c.l.b16 %v128_v25  ;;  %v1063_v25 = vld [vmem:[%s1533_s0 + $0x18] sm:$0xff] }
  0x4b   :  { %344 = vrot.lane.b32.xlu0 %v1088_v29, %s1137_s30 }
  0x4c   :  { %v523_v36 = vpack.c.b16 %v516_v28, %v516_v28 }
  0x52   :  { %485 = vrot.lane.b32.xlu2 %v1106_v30, %s1140_s26  ;;  %201 = vrot.lane.b32.xlu1 %v1069_v31, %s1135_s16  ;;  %v469_v30 = vunpack.c.l.b16 %v115_v26 }
  0x53   :  { %197 = vrot.lane.b32.xlu0 %v1067_v32, %s1135_s16 }
  0x54   :  { %v476_v37 = vpack.c.b16 %v469_v30, %v469_v30 }
  0x5a   :  { %532 = vrot.lane.b32.xlu2 %v1112_v33, %s1141_s6  ;;  %248 = vrot.lane.b32.xlu1 %v1075_v34, %s1134_s15 }
  0x5b   :  { %244 = vrot.lane.b32.xlu0 %v1073_v35, %s1134_s15 }
  0x5c   :  { %v1305_v38 = vpop.permute.xlu2 %205 }
  0x5d   :  { %v556_v51 = vsel %vm538_vm1, %v1065_v46, %v1305_v38  ;;  %v1061_v46 = vld [vmem:[%s1533_s0 + $0x8] sm:$0xff] }
  0x62   :  { %295 = vrot.lane.b32.xlu2 %v1081_v39, %s1136_s23  ;;  %291 = vrot.lane.b32.xlu1 %v1079_v40, %s1136_s23 }
  0x63   :  { %207 = vrot.lane.b32.xlu0 %v194_v42, %s1135_s16 }
  0x64   :  { %v290_v48 = vpop.permute.xlu2 %289 }
  0x6a   :  { %342 = vrot.lane.b32.xlu2 %v1087_v49, %s1137_s30  ;;  %338 = vrot.lane.b32.xlu1 %v1085_v50, %s1137_s30 }
  0x6b   :  { %254 = vrot.lane.b32.xlu0 %v241_v52, %s1134_s15 }
  0x6c   :  { %v337_v56 = vpop.permute.xlu2 %336 }
  0x72   :  { %389 = vrot.lane.b32.xlu2 %v1093_v57, %s1138_s9  ;;  %385 = vrot.lane.b32.xlu1 %v1091_v58, %s1138_s9 }
  0x73   :  { %301 = vrot.lane.b32.xlu0 %v288_v59, %s1136_s23 }
  0x74   :  { %v243_v62 = vpop.permute.xlu1 %242  ;;  %v384_v63 = vpop.permute.xlu2 %383 }
  0x75   :  { %v196_v0 = vpop.permute.xlu0 %195 }
  0x76   :  { %v541_v10 = vsel %vm538_vm1, %v1060_v5, %v196_v0 }
  0x77   :  { %v562_v15 = vsel %vm560_vm2, %v541_v10, %v243_v62 }
  0x78   :  { %v577_v17 = vsel %vm575_vm3, %v562_v15, %v290_v48 }
  0x79   :  { %v592_v23 = vsel %vm590_vm4, %v577_v17, %v337_v56 }
  0x7a   :  { %436 = vrot.lane.b32.xlu2 %v1099_v1, %s1139_s18  ;;  %432 = vrot.lane.b32.xlu1 %v1097_v2, %s1139_s18  ;;  %v607_v27 = vsel %vm605_vm5, %v592_v23, %v384_v63 }
  0x7b   :  { %348 = vrot.lane.b32.xlu0 %v335_v3, %s1137_s30 }
  0x7c   :  { %v1367_v7 = vpop.permute.xlu1 %246  ;;  %v431_v8 = vpop.permute.xlu2 %430 }
  0x7d   :  { %v200_v9 = vpop.permute.xlu0 %199  ;;  %v622_v29 = vsel %vm620_vm6, %v607_v27, %v431_v8 }
  0x7e   :  { %v547_v49 = vsel %vm538_vm1, %v1062_v45, %v200_v9 }
  0x7f   :  { %v566_v53 = vsel %vm560_vm2, %v547_v49, %v1367_v7 }
  0x82   :  { %483 = vrot.lane.b32.xlu2 %v1105_v11, %s1140_s26  ;;  %479 = vrot.lane.b32.xlu1 %v1103_v12, %s1140_s26 }
  0x83   :  { %395 = vrot.lane.b32.xlu0 %v382_v13, %s1138_s9 }
  0x84   :  { %v253_v18 = vpop.permute.xlu1 %252  ;;  %v478_v19 = vpop.permute.xlu2 %477 }
  0x85   :  { %v294_v20 = vpop.permute.xlu0 %293  ;;  %v637_v31 = vsel %vm635_vm7, %v622_v29, %v478_v19  ;;  %v572_v52 = vsel %vm560_vm2, %v556_v51, %v253_v18 }
  0x86   :  { %v581_v54 = vsel %vm575_vm3, %v566_v53, %v294_v20 }
  0x8a   :  { %530 = vrot.lane.b32.xlu2 %v1111_v21, %s1141_s6  ;;  %526 = vrot.lane.b32.xlu1 %v1109_v22, %s1141_s6 }
  0x8b   :  { %442 = vrot.lane.b32.xlu0 %v429_v24, %s1139_s18 }
  0x8c   :  { %v300_v32 = vpop.permute.xlu1 %299  ;;  %v525_v33 = vpop.permute.xlu2 %524 }
  0x8d   :  { %v341_v34 = vpop.permute.xlu0 %340  ;;  %v652_v35 = vsel %vm650_vm8, %v637_v31, %v525_v33  ;;  %v587_v55 = vsel %vm575_vm3, %v572_v52, %v300_v32 }
  0x8e   :  { %1053 = vmatmul.msk.bf16.vlgmr.msra.gmra.mxu0 %vm685_vm9, %v652_v35  ;;  %v596_v56 = vsel %vm590_vm4, %v581_v54, %v341_v34 }
  0x92   :  { %536 = vrot.lane.b32.xlu1 %v523_v36, %s1141_s6 }
  0x93   :  { %489 = vrot.lane.b32.xlu0 %v476_v37, %s1140_s26 }
  0x94   :  { %v347_v39 = vpop.permute.xlu1 %346  ;;  %v535_v40 = vpop.permute.xlu2 %534 }
  0x95   :  { %v388_v41 = vpop.permute.xlu0 %387  ;;  %v602_v57 = vsel %vm590_vm4, %v587_v55, %v347_v39 }
  0x96   :  { %v611_v58 = vsel %vm605_vm5, %v596_v56, %v388_v41 }
  0x9c   :  { %v394_v42 = vpop.permute.xlu1 %393  ;;  %v298_v43 = vpop.permute.xlu2 %297 }
  0x9d   :  { %v435_v44 = vpop.permute.xlu0 %434  ;;  %v617_v59 = vsel %vm605_vm5, %v602_v57, %v394_v42 }
  0x9e   :  { %v626_v60 = vsel %vm620_vm6, %v611_v58, %v435_v44 }
  0xa4   :  { %v441_v47 = vpop.permute.xlu1 %440  ;;  %v439_v48 = vpop.permute.xlu2 %438 }
  0xa5   :  { %v482_v50 = vpop.permute.xlu0 %481  ;;  %v632_v38 = vsel %vm620_vm6, %v617_v59, %v441_v47  ;;  %v24_v47 = vld [vmem:[%s1533_s0 + $0x30] sm:$0xf]  ;;  %s1142_s0 = smov 120  }
  0xa6   :  { %v641_v63 = vsel %vm635_vm7, %v626_v60, %v482_v50  ;;  %v154_v49 = vunpack.c.l.b16 %v24_v47 }
  0xa8   :  { %v161_v54 = vpack.c.b16 %v154_v49, %v154_v49 }
  0xac   :  { %v488_v61 = vpop.permute.xlu1 %487  ;;  %v486_v62 = vpop.permute.xlu2 %485 }
  0xad   :  { %v647_v0 = vsel %vm635_vm7, %v632_v38, %v488_v61  ;;  %v529_v1 = vpop.permute.xlu0 %528 }
  0xae   :  { %v656_v2 = vsel %vm650_vm8, %v641_v63, %v529_v1  ;;  %v662_v3 = vsel %vm650_vm8, %v647_v0, %v535_v40 }
  0xaf   :  { %1055 = vmatmul.msk.bf16.vlgmr.msra.gmra.mxu1 %vm685_vm9, %v656_v2  ;;  %1058 = vmatmul.msk.bf16.vlgmr.msra.gmra.mxu3 %vm685_vm9, %v662_v3 }
  0xb4   :  { %v251_v5 = vpop.permute.xlu1 %250  ;;  %v533_v6 = vpop.permute.xlu2 %532 }
  0xb5   :  { %v204_v7 = vpop.permute.xlu0 %203 }
  0xb6   :  { %v553_v8 = vsel %vm538_vm1, %v1064_v4, %v204_v7 }
  0xb7   :  { %v570_v9 = vsel %vm560_vm2, %v553_v8, %v251_v5 }
  0xb8   :  { %v585_v13 = vsel %vm575_vm3, %v570_v9, %v298_v43 }
  0xbc   :  { %v392_v10 = vpop.permute.xlu1 %391  ;;  %v296_v11 = vpop.permute.xlu2 %295 }
  0xbd   :  { %v345_v12 = vpop.permute.xlu0 %344 }
  0xbe   :  { %v600_v14 = vsel %vm590_vm4, %v585_v13, %v345_v12 }
  0xbf   :  { %v615_v15 = vsel %vm605_vm5, %v600_v14, %v392_v10 }
  0xc0   :  { %v630_v16 = vsel %vm620_vm6, %v615_v15, %v439_v48 }
  0xc1   :  { %v645_v17 = vsel %vm635_vm7, %v630_v16, %v486_v62 }
  0xc2   :  { %v660_v18 = vsel %vm650_vm8, %v645_v17, %v533_v6 }
  0xc3   :  { %1057 = vmatmul.msk.bf16.vlgmr.msra.gmra.mxu2 %vm685_vm9, %v660_v18 }
  0xc4   :  { %v343_v19 = vpop.permute.xlu2 %342  ;;  %v202_v20 = vpop.permute.xlu1 %201 }
  0xc5   :  { %v198_v21 = vpop.permute.xlu0 %197  ;;  %v550_v29 = vsel %vm538_vm1, %v1063_v25, %v202_v20 }
  0xc6   :  { %v544_v48 = vsel %vm538_vm1, %v1061_v46, %v198_v21 }
  0xcc   :  { %v390_v22 = vpop.permute.xlu2 %389  ;;  %v249_v23 = vpop.permute.xlu1 %248 }
  0xcd   :  { %v245_v24 = vpop.permute.xlu0 %244  ;;  %v568_v30 = vsel %vm560_vm2, %v550_v29, %v249_v23 }
  0xce   :  { %v583_v31 = vsel %vm575_vm3, %v568_v30, %v296_v11  ;;  %v564_v51 = vsel %vm560_vm2, %v544_v48, %v245_v24 }
  0xcf   :  { %v598_v35 = vsel %vm590_vm4, %v583_v31, %v343_v19 }
  0xd0   :  { %v613_v36 = vsel %vm605_vm5, %v598_v35, %v390_v22 }
  0xd4   :  { %v437_v26 = vpop.permute.xlu2 %436  ;;  %v292_v27 = vpop.permute.xlu1 %291 }
  0xd5   :  { %v208_v28 = vpop.permute.xlu0 %207  ;;  %v628_v37 = vsel %vm620_vm6, %v613_v36, %v437_v26  ;;  %v579_v53 = vsel %vm575_vm3, %v564_v51, %v292_v27 }
  0xd6   :  { %v559_v58 = vsel %vm538_vm1, %v161_v54, %v208_v28 }
  0xdc   :  { %v484_v32 = vpop.permute.xlu2 %483  ;;  %v339_v33 = vpop.permute.xlu1 %338 }
  0xdd   :  { %v255_v34 = vpop.permute.xlu0 %254  ;;  %v643_v39 = vsel %vm635_vm7, %v628_v37, %v484_v32  ;;  %v594_v55 = vsel %vm590_vm4, %v579_v53, %v339_v33 }
  0xde   :  { %v574_v62 = vsel %vm560_vm2, %v559_v58, %v255_v34 }
  0xe4   :  { %v531_v40 = vpop.permute.xlu2 %530  ;;  %v386_v41 = vpop.permute.xlu1 %385 }
  0xe5   :  { %v302_v42 = vpop.permute.xlu0 %301  ;;  %v658_v43 = vsel %vm650_vm8, %v643_v39, %v531_v40  ;;  %v609_v56 = vsel %vm605_vm5, %v594_v55, %v386_v41 }
  0xe6   :  { %1056 = vmatmul.msk.bf16.gmra.mxu1 %vm685_vm9, %v658_v43  ;;  %v589_v63 = vsel %vm575_vm3, %v574_v62, %v302_v42 }
  0xec   :  { %v433_v44 = vpop.permute.xlu1 %432 }
  0xed   :  { %v349_v45 = vpop.permute.xlu0 %348  ;;  %v624_v57 = vsel %vm620_vm6, %v609_v56, %v433_v44 }
  0xee   :  { %v604_v0 = vsel %vm590_vm4, %v589_v63, %v349_v45 }
  0xf4   :  { %v480_v50 = vpop.permute.xlu1 %479 }
  0xf5   :  { %v396_v52 = vpop.permute.xlu0 %395  ;;  %v639_v59 = vsel %vm635_vm7, %v624_v57, %v480_v50 }
  0xf6   :  { %v619_v1 = vsel %vm605_vm5, %v604_v0, %v396_v52 }
  0xfc   :  { %v527_v60 = vpop.permute.xlu1 %526 }
  0xfd   :  { %v443_v38 = vpop.permute.xlu0 %442  ;;  %v654_v61 = vsel %vm650_vm8, %v639_v59, %v527_v60 }
  0xfe   :  { %1054 = vmatmul.msk.bf16.gmra.mxu0 %vm685_vm9, %v654_v61  ;;  %v634_v3 = vsel %vm620_vm6, %v619_v1, %v443_v38 }
 0x104   :  { %v537_v2 = vpop.permute.xlu1 %536 }
 0x105   :  { %v490_v4 = vpop.permute.xlu0 %489 }
 0x106   :  { %v649_v5 = vsel %vm635_vm7, %v634_v3, %v490_v4 }
 0x107   :  { %v664_v6 = vsel %vm650_vm8, %v649_v5, %v537_v2 }
 0x108   :  { %1059 = vmatmul.msk.bf16.gmra.mxu3 %vm685_vm9, %v664_v6 }
 0x10b   :  { %v713_v7 = vpop.f32.mrf.mxu0 }
 0x10c   :  { %760 = vrot.lane.b32.xlu2 %v713_v7, %s1142_s0 }
 0x113   :  { %v715_v9 = vpop.f32.mrf.mxu0 }
 0x12c   :  { %v723_v8 = vpop.f32.mrf.mxu1 }
 0x12d   :  { %768 = vrot.lane.b32.xlu0 %v723_v8, %s1142_s0 }
 0x132   :  { %v738_v17 = vpop.f32.mrf.mxu3 }
 0x134   :  { %v725_v11 = vpop.f32.mrf.mxu1 }
 0x135   :  { %762 = vrot.lane.b32.xlu0 %v715_v9, %s1142_s0 }
 0x13a   :  { %v740_v19 = vpop.f32.mrf.mxu3 }
 0x146   :  { %v733_v10 = vpop.f32.mrf.mxu2 }
 0x147   :  { %776 = vrot.lane.b32.xlu1 %v733_v10, %s1142_s0 }
 0x14e   :  { %v735_v12 = vpop.f32.mrf.mxu2 }
 0x14f   :  { %770 = vrot.lane.b32.xlu1 %v725_v11, %s1142_s0  ;;  %778 = vrot.lane.b32.xlu2 %v735_v12, %s1142_s0 }
 0x163   :  { %v728_v13 = vpop.f32.mrf.mxu1 }
 0x164   :  { %772 = vrot.lane.b32.xlu2 %v728_v13, %s1142_s0 }
 0x166   :  { %v761_v14 = vpop.permute.xlu2 %760 }
 0x167   :  { %v799_v15 = vadd.f32 %v761_v14, %v713_v7 }
 0x169   :  { %812 = vst.msk [vmem:[%s1535_s2] sm:$0xff] %vm560_vm2, %v799_v15 }
 0x16b   :  { %v730_v16 = vpop.f32.mrf.mxu1 }
 0x16c   :  { %774 = vrot.lane.b32.xlu0 %v730_v16, %s1142_s0 }
 0x174   :  { %780 = vrot.lane.b32.xlu0 %v738_v17, %s1142_s0 }
 0x17b   :  { %v718_v18 = vpop.f32.mrf.mxu0 }
 0x17c   :  { %764 = vrot.lane.b32.xlu1 %v718_v18, %s1142_s0 }
 0x183   :  { %v720_v20 = vpop.f32.mrf.mxu0 }
 0x184   :  { %782 = vrot.lane.b32.xlu1 %v740_v19, %s1142_s0  ;;  %766 = vrot.lane.b32.xlu2 %v720_v20, %s1142_s0 }
 0x18b   :  { %v743_v21 = vpop.f32.mrf.mxu3 }
 0x18c   :  { %784 = vrot.lane.b32.xlu2 %v743_v21, %s1142_s0 }
 0x193   :  { %v745_v22 = vpop.f32.mrf.mxu3 }
 0x19f   :  { %v769_v23 = vpop.permute.xlu0 %768 }
 0x1a0   :  { %v803_v24 = vadd.f32 %v769_v23, %v723_v8 }
 0x1a2   :  { %816 = vst.msk [vmem:[%s1535_s2 + $0x20] sm:$0xff] %vm560_vm2, %v803_v24 }
 0x1a7   :  { %v763_v25 = vpop.permute.xlu0 %762 }
 0x1a8   :  { %v800_v26 = vadd.f32 %v763_v25, %v715_v9 }
 0x1a9   :  { %v779_v27 = vpop.permute.xlu2 %778 }
 0x1aa   :  { %813 = vst.msk [vmem:[%s1535_s2 + $0x8] sm:$0xff] %vm560_vm2, %v800_v26  ;;  %v808_v28 = vadd.f32 %v779_v27, %v735_v12 }
 0x1ac   :  { %821 = vst.msk [vmem:[%s1535_s2 + $0x48] sm:$0xff] %vm560_vm2, %v808_v28 }
 0x1b9   :  { %v777_v29 = vpop.permute.xlu1 %776 }
 0x1ba   :  { %v807_v30 = vadd.f32 %v777_v29, %v733_v10 }
 0x1bc   :  { %820 = vst.msk [vmem:[%s1535_s2 + $0x40] sm:$0xff] %vm560_vm2, %v807_v30 }
 0x1be   :  { %v773_v31 = vpop.permute.xlu2 %772 }
 0x1bf   :  { %v805_v32 = vadd.f32 %v773_v31, %v728_v13 }
 0x1c1   :  { %818 = vst.msk [vmem:[%s1535_s2 + $0x30] sm:$0xff] %vm560_vm2, %v805_v32  ;;  %v771_v33 = vpop.permute.xlu1 %770 }
 0x1c2   :  { %v804_v34 = vadd.f32 %v771_v33, %v725_v11 }
 0x1c4   :  { %817 = vst.msk [vmem:[%s1535_s2 + $0x28] sm:$0xff] %vm560_vm2, %v804_v34 }
 0x1de   :  { %v775_v35 = vpop.permute.xlu0 %774  ;;  %v767_v36 = vpop.permute.xlu2 %766 }
 0x1df   :  { %v806_v37 = vadd.f32 %v775_v35, %v730_v16  ;;  %v802_v39 = vadd.f32 %v767_v36, %v720_v20 }
 0x1e1   :  { %819 = vst.msk [vmem:[%s1535_s2 + $0x38] sm:$0xff] %vm560_vm2, %v806_v37 }
 0x1e2   :  { %815 = vst.msk [vmem:[%s1535_s2 + $0x18] sm:$0xff] %vm560_vm2, %v802_v39 }
 0x1e6   :  { %v781_v40 = vpop.permute.xlu0 %780  ;;  %v785_v41 = vpop.permute.xlu2 %784 }
 0x1e7   :  { %v809_v42 = vadd.f32 %v781_v40, %v738_v17  ;;  %v811_v43 = vadd.f32 %v785_v41, %v743_v21 }
 0x1e9   :  { %822 = vst.msk [vmem:[%s1535_s2 + $0x50] sm:$0xff] %vm560_vm2, %v809_v42 }
 0x1ea   :  { %824 = vst.msk [vmem:[%s1535_s2 + $0x60] sm:$0xff] %vm560_vm2, %v811_v43 }
 0x1ee   :  { %v765_v44 = vpop.permute.xlu1 %764 }
 0x1ef   :  { %v801_v45 = vadd.f32 %v765_v44, %v718_v18 }
 0x1f1   :  { %814 = vst.msk [vmem:[%s1535_s2 + $0x10] sm:$0xff] %vm560_vm2, %v801_v45 }
 0x1f6   :  { %v783_v46 = vpop.permute.xlu1 %782 }
 0x1f7   :  { %v810_v47 = vadd.f32 %v783_v46, %v740_v19 }
 0x1f9   :  { %823 = vst.msk [vmem:[%s1535_s2 + $0x58] sm:$0xff] %vm560_vm2, %v810_v47 }

// kernel: _lambda_.3
= control target key start
LH: loop header
LB: loop body
LE: loop exit
PB: predicated region body
PF: predicated region fallthrough
CT: control target
= control target key end

     0   :  { %10 = vsyncpa [#allocation4], 0  ;;  %s3928_s18 = smov 0   ;;  %s5577_s0 = inlined_call_operand.vmem [shape: f32[1,2], index: 0, kind: input, shape index: {}]   ;;  %s5578_s1 = inlined_call_operand.vmem [shape: bf16[2,660,4], index: 1, kind: input, shape index: {}]   ;;  %s5579_s2 = inlined_call_operand.vmem [shape: bf16[36,16], index: 2, kind: input, shape index: {}]   ;;  %s5580_s3 = inlined_call_operand.vmem [shape: f32[1,8], index: 3, kind: input, shape index: {}]   ;;  %s5581_s4 = inlined_call_operand.vmem [shape: bf16[72,8], index: 4, kind: input, shape index: {}]   ;;  %s5582_s5 = inlined_call_operand.vmem [shape: bf16[2,100,8], index: 5, kind: output, shape index: {}]  }
   0x1 LB: > { %s3355_s19 = sadd.s32 4294967295, %s3891_s18   ;;  %p3357_p0 = scmp.ge.s32.totalorder %s3891_s18, 1  ;;  %s3891_s18 = sphi %s3928_s18, %s16_s18  }
   0x2   : > { %p157_p1 = scmp.lt.s32.totalorder %s3891_s18, 3  ;;  %s169_s22 = sshll.u32 %s5577_s0, 4  ;;  %s170_s22 = int_to_ptr.vmem [resolvable:$true] %s169_s22 }
   0x3   : > { %p3841_p3 = scmp.eq.s32.totalorder %s3355_s19, 0  ;;  %s3893_s23 = smov [#allocation3]  }
   0x4   : > { %p158_p2 = pnand %p3357_p0, %p157_p1 }
   0x6   : > { %p3837_p4 = pneg %p158_p2  ;;  %199 = sbr.rel (%p158_p2) target bundleno = 1148 (0x47c), region = 40 }
   0x8   : > { %p3838_p5 = pnand %p3841_p3, %p3837_p4 }
   0xa   : > { %3840 = dma.vmem_to_smem (!%p3838_p5), %s170_s22, 16, %s3893_s23, [#allocation4]  }
   0xb   : > { %3881 = dma.done.wait (%p3841_p3), [#allocation4], 16  }
   0xc   : > { %3883 = vsyncadd (%p3841_p3), [#allocation4], 4294967280 }
   0xd   : > { %206 = sfence }
   0xe   : > { %v538_v0 = vld [vmem:[%s5579_s2] sm:$0xc]  ;;  %vm612_vm0 = vcmask 1041408   ;;  %v537_v1 = vld [vmem:[%s5579_s2] sm:$0x3]  ;;  %p229_p6 = scmp.lt.s32.totalorder %s3355_s19, 1 }
   0xf   : > { %v587_v2 = vunpack.c.l.b16 %v538_v0  ;;  %v714_v3 = vsel %vm612_vm0, %v537_v1, 0  ;;  %v889_v4 = vld [vmem:[%s5579_s2 + $0x4] sm:$0xc]  ;;  %v1021_v6 = vld [vmem:[%s5579_s2 + $0x8] sm:$0x3]  ;;  %vm572_vm1 = vcmask 1045504  }
  0x10   : > { %3820 = vmatpush.bf16.msra.mxu3 %v714_v3  ;;  %723 = vmatpush.bf16.msra.mxu1 %v714_v3  ;;  %s5679_s19 = smov (!%p229_p6, %s3355_s19), 1  ;;  %v938_v7 = vunpack.c.l.b16 %v889_v4  ;;  %v759_v8 = vld [vmem:[%s5579_s2 + $0x4] sm:$0x3]  ;;  %vm590_vm2 = vcmask 31744   ;;  %v1092_v11 = vsel %vm612_vm0, %v1021_v6, 0  ;;  %vm5588_vm3 = vcmask 1046528  }
  0x11   : > { %v588_v5 = vpack.c.b16 %v587_v2, %v587_v2  ;;  %s3831_s7 = smul.u32 332, %s5679_s19  ;;  %v831_v16 = vsel %vm612_vm0, %v759_v8, 0  ;;  %v1268_v46 = vld [vmem:[%s5579_s2 + $0xc] sm:$0x3]  ;;  %v1375_v47 = vld [vmem:[%s5579_s2 + $0xc] sm:$0xc] }
  0x12   : > { %v939_v10 = vpack.c.b16 %v938_v7, %v938_v7  ;;  %v1317_v48 = vsel %vm612_vm0, %v1268_v46, 0  ;;  %v1403_v49 = vunpack.c.l.b16 %v1375_v47  ;;  %v1150_v56 = vld [vmem:[%s5579_s2 + $0x8] sm:$0xc]  ;;  %v1486_v7 = vld [vmem:[%s5579_s2 + $0x10] sm:$0x3]  ;;  %vm5587_vm4 = vcmask 1044480  }
  0x13   : > { %v589_v9 = vrot.slane %v588_v5, 2  ;;  %s3961_s12 = scalar_lea.vmem %s5578_s1, %s3831_s7  ;;  %v1185_v57 = vunpack.c.l.b16 %v1150_v56  ;;  %s3894_s25 = smov 8  }
  0x14   : > { %v3966_v13 = vld [vmem:[%s3961_s12 + $0x8c] sm:$0xff]   ;;  %v3828_v14 = vld [vmem:[%s3961_s12 + $0x94] sm:$0xff]   ;;  %v3717_v15 = vld [vmem:[%s3961_s12 + $0x20] sm:$0xff]   ;;  %v940_v17 = vrot.slane %v939_v10, 2  ;;  %v1404_v50 = vpack.c.b16 %v1403_v49, %v1403_v49  ;;  %v1515_v10 = vsel %vm612_vm0, %v1486_v7, 0  ;;  %s3895_s26 = smov 120  }
  0x15   : > { %v614_v12 = vsel %vm612_vm0, %v589_v9, 0  ;;  %v3379_v18 = vld [vmem:[%s3961_s12 + $0x6c] sm:$0xc]  ;;  %v3619_v19 = vld [vmem:[%s3961_s12 + $0x6c] sm:$0xf0]  ;;  %v580_v21 = vrot.slane %v3966_v13, 2  ;;  %3396 = vmatmul.msk.bf16.vlgmr.msra.gmra.mxu3 %vm590_vm2, %v3717_v15  ;;  %v1186_v61 = vpack.c.b16 %v1185_v57, %v1185_v57 }
  0x16   : > { %3819 = vmatpush.bf16.msra.mxu2 %v614_v12  ;;  %623 = vmatpush.bf16.msra.mxu0 %v614_v12  ;;  %v3974_v20 = vld [vmem:[%s3961_s12 + $0x74] sm:$0xf]  ;;  %v582_v22 = vrot.slane %v3828_v14, 2  ;;  %v3979_v23 = vld [vmem:[%s3961_s12 + $0x78] sm:$0xff]   ;;  %v3380_v25 = vor.u32 %v3619_v19, %v3379_v18  ;;  %v3618_v26 = vld [vmem:[%s3961_s12] sm:$0xff]  ;;  %v963_v28 = vsel %vm612_vm0, %v940_v17, 0 }
  0x17   : > { %v554_v24 = vunpack.c.l.b16 %v3974_v20  ;;  %v3668_v27 = vunpack.c.l.b16 %v3979_v23  ;;  %v3986_v29 = vld [vmem:[%s3961_s12 + $0x98] sm:$0xff]   ;;  %3392 = vmatmul.msk.bf16.vlgmr.msra.gmra.mxu1 %vm590_vm2, %v3618_v26  ;;  %972 = vmatpush.bf16.msrb.mxu3 %v963_v28  ;;  %v3718_v38 = vld [vmem:[%s3961_s12 + $0x28] sm:$0xff]   ;;  %v461_v44 = vld [vmem:[%s3961_s12 + $0x30] sm:$0x3]  ;;  %v1405_v53 = vrot.slane %v1404_v50, 2  ;;  %v1187_v62 = vrot.slane %v1186_v61, 2 }
  0x18   : > { %v583_v30 = vsel %vm572_vm1, %v580_v21, %v582_v22  ;;  %v573_v32 = vrot.slane %v3380_v25, 2  ;;  %v3685_v33 = vunpack.c.h.b16 %v3986_v29  ;;  %v3823_v39 = vld [vmem:[%s3961_s12 + $0x7c] sm:$0xff]   ;;  %v3714_v40 = vld [vmem:[%s3961_s12 + $0x8] sm:$0xff]   ;;  %v684_v45 = vunpack.c.l.b16 %v461_v44  ;;  %v3715_v54 = vld [vmem:[%s3961_s12 + $0x10] sm:$0xff]   ;;  %s1592_s27 = sld [smem:[#allocation3]]  ;;  %s3832_s24 = smul.u32 52, %s5679_s19 }
  0x19   : > { %3385 = vmatmul.msk.bf16.vlgmr.msra.gmra.mxu2 %vm590_vm2, %v583_v30  ;;  %v566_v31 = vpack.c.b16 %v3668_v27, %v554_v24  ;;  %v576_v42 = vrot.slane %v3823_v39, 2  ;;  %v3825_v52 = vld [vmem:[%s3961_s12 + $0x84] sm:$0xff]   ;;  %v1428_v55 = vsel %vm612_vm0, %v1405_v53, 0  ;;  %v3401_v0 = vld [vmem:[%s3961_s12 + $0x34] sm:$0x8]  ;;  %v3627_v2 = vld [vmem:[%s3961_s12 + $0xac] sm:$0xff] }
  0x1a   : > { %1101 = vmatpush.bf16.msrb.mxu0 %v1092_v11  ;;  %840 = vmatpush.bf16.msrb.mxu2 %v831_v16  ;;  %v571_v36 = vpack.c.b16 %v3685_v33, %v3685_v33  ;;  %v691_v51 = vpack.c.b16 %v684_v45, %v684_v45  ;;  %v578_v58 = vrot.slane %v3825_v52, 2  ;;  %v3432_v59 = vld [vmem:[%s3961_s12 + $0xa4] sm:$0xe]  ;;  %v3626_v60 = vld [vmem:[%s3961_s12 + $0xa4] sm:$0xf0]  ;;  %v1210_v4 = vsel %vm612_vm0, %v1187_v62, 0 }
  0x1b   : > { %v574_v34 = vrot.slane %v566_v31, 2  ;;  %1437 = vmatpush.bf16.msra.mxu3 %v1428_v55  ;;  %v3620_v1 = vld [vmem:[%s3961_s12 + $0x34] sm:$0xf0]  ;;  %v3433_v3 = vor.u32 %v3626_v60, %v3432_v59  ;;  %1219 = vmatpush.bf16.msrb.mxu1 %v1210_v4  ;;  %v4033_v5 = vld [vmem:[%s3961_s12 + $0x3c] sm:$0xff]  ;;  %v925_v9 = vrot.slane %v3627_v2, 1  ;;  %v4052_v19 = vld [vmem:[%s3961_s12 + $0x44] sm:$0xff] }
  0x1c   : > { %v584_v37 = vrot.slane %v571_v36, 2  ;;  %v579_v63 = vsel %vm572_vm1, %v576_v42, %v578_v58  ;;  %v3402_v6 = vor.u32 %v3620_v1, %v3401_v0  ;;  %v797_v12 = vrot.slane %v4033_v5, 3  ;;  %v3716_v15 = vld [vmem:[%s3961_s12 + $0x18] sm:$0xff]   ;;  %v3463_v25 = vld [vmem:[%s3961_s12 + $0x110] sm:$0x8]  ;;  %v3630_v45 = vld [vmem:[%s3961_s12 + $0xc4] sm:$0xff] }
  0x1d   : > { %v575_v35 = vsel %vm572_vm1, %v573_v32, %v574_v34  ;;  %v577_v43 = vsel %vm572_vm1, %v574_v34, %v576_v42  ;;  %v924_v8 = vrot.slane %v3433_v3, 1  ;;  %v581_v17 = vsel %vm572_vm1, %v578_v58, %v580_v21  ;;  %v3628_v18 = vld [vmem:[%s3961_s12 + $0xb4] sm:$0xff]  ;;  %v3639_v13 = vld [vmem:[%s3961_s12 + $0xdc] sm:$0xff]  ;;  %v4068_v36 = vld [vmem:[%s3961_s12 + $0x4c] sm:$0xff]  ;;  %s3615_s23 = sld [smem:[#allocation3 + $0x1]] }
  0x1e   : > { %3381 = vmatmul.msk.bf16.vlgmr.msra.gmra.mxu0 %vm590_vm2, %v575_v35  ;;  %v585_v41 = vsel %vm572_vm1, %v582_v22, %v584_v37  ;;  %1326 = vmatpush.bf16.msra.mxu2 %v1317_v48  ;;  %v796_v11 = vrot.slane %v3402_v6, 3  ;;  %v927_v22 = vrot.slane %v3628_v18, 1  ;;  %v3632_v26 = vld [vmem:[%s3961_s12 + $0x110] sm:$0xf0]  ;;  %v799_v27 = vrot.slane %v4052_v19, 3  ;;  %v3633_v30 = vld [vmem:[%s3961_s12 + $0x118] sm:$0xff] }
  0x1f   : > { %1524 = vmatpush.bf16.msra.mxu0 %v1515_v10  ;;  %v926_v14 = vsel %vm5588_vm3, %v924_v8, %v925_v9  ;;  %v3464_v31 = vor.u32 %v3632_v26, %v3463_v25  ;;  %v1058_v33 = vrot.slane %v3633_v30, 3  ;;  %v3629_v35 = vld [vmem:[%s3961_s12 + $0xbc] sm:$0xff]  ;;  %v4082_v46 = vld [vmem:[%s3961_s12 + $0x54] sm:$0xff]  ;;  %v931_v47 = vrot.slane %v3630_v45, 1  ;;  %v3635_v50 = vld [vmem:[%s3961_s12 + $0x128] sm:$0xff] }
  0x20   : > { %v798_v16 = vsel %vm5587_vm4, %v796_v11, %v797_v12  ;;  %v928_v28 = vsel %vm5588_vm3, %v925_v9, %v927_v22  ;;  %v800_v21 = vsel %vm5587_vm4, %v797_v12, %v799_v27  ;;  %v803_v48 = vrot.slane %v4082_v46, 3  ;;  %v3631_v55 = vld [vmem:[%s3961_s12 + $0xcc] sm:$0xff]  ;;  %v4096_v56 = vld [vmem:[%s3961_s12 + $0x5c] sm:$0xff]  ;;  %v3642_v61 = vld [vmem:[%s3961_s12 + $0xf4] sm:$0xff] }
  0x21   : > { %v1057_v32 = vrot.slane %v3464_v31, 3  ;;  %v1062_v53 = vrot.slane %v3635_v50, 3  ;;  %v933_v57 = vrot.slane %v3631_v55, 1  ;;  %v805_v58 = vrot.slane %v4096_v56, 3  ;;  %v3636_v60 = vld [vmem:[%s3961_s12 + $0x130] sm:$0xff]  ;;  %v4106_v1 = vld [vmem:[%s3961_s12 + $0x64] sm:$0xff]  }
  0x22   : > { %v501_v62 = vld [vmem:[%s3961_s12 + $0xd4] sm:$0x7]  ;;  %v1064_v0 = vrot.slane %v3636_v60, 3  ;;  %v3886_v2 = vld [vmem:[%s3961_s12 + $0x64] sm:$0xf]   ;;  %v3637_v12 = vld [vmem:[%s3961_s12 + $0x138] sm:$0xff] }
  0x23   : > { %v1059_v34 = vsel %vm5587_vm4, %v1057_v32, %v1058_v33  ;;  %v934_v59 = vsel %vm5588_vm3, %v931_v47, %v933_v57  ;;  %v3888_v3 = vld [vmem:[%s3961_s12 + $0x64] sm:$0x10]  ;;  %v915_v4 = vunpack.c.l.b16 %v501_v62  ;;  %v3487_v31 = vld [vmem:[%s3961_s12 + $0x140] sm:$0xf] }
  0x24   : > { %v1065_v6 = vsel %vm5587_vm4, %v1062_v53, %v1064_v0  ;;  %v3887_v8 = vor.u32 %v3888_v3, %v3886_v2  ;;  %v3778_v45 = vld [vmem:[%s3961_s12 + $0x4] sm:$0xf0]  }
  0x25   : > { %3397 = vmatmul.msk.bf16.gmra.mxu3 %vm590_vm2, %v3718_v38  ;;  %v801_v38 = vrot.slane %v4068_v36, 3  ;;  %v922_v7 = vpack.c.b16 %v915_v4, %v915_v4 }
  0x26   : > { %v807_v10 = vrot.slane %v3887_v8, 3 }
  0x27   : > { %3393 = vmatmul.msk.bf16.gmra.mxu1 %vm590_vm2, %v3714_v40  ;;  %v3634_v40 = vld [vmem:[%s3961_s12 + $0x120] sm:$0xff]  ;;  %v802_v42 = vsel %vm5587_vm4, %v799_v27, %v801_v38  ;;  %v804_v52 = vsel %vm5587_vm4, %v801_v38, %v803_v48  ;;  %v935_v9 = vrot.slane %v922_v7, 1 }
  0x29   : > { %3386 = vmatmul.msk.bf16.gmra.mxu2 %vm590_vm2, %v585_v41  ;;  %v3640_v41 = vld [vmem:[%s3961_s12 + $0xe4] sm:$0xff]  ;;  %v936_v11 = vsel %vm5588_vm3, %v933_v57, %v935_v9 }
  0x2e   : > { %3382 = vmatmul.msk.bf16.gmra.mxu0 %vm590_vm2, %v577_v43  ;;  %v1060_v43 = vrot.slane %v3634_v40, 3 }
  0x30   : > { %v1061_v44 = vsel %vm5587_vm4, %v1058_v33, %v1060_v43 }
  0x35   : > { %3398 = vmatmul.msk.bf16.gmra.mxu3 %vm590_vm2, %v691_v51  ;;  %v3641_v51 = vld [vmem:[%s3961_s12 + $0xec] sm:$0xff] }
  0x37   : > { %3394 = vmatmul.msk.bf16.gmra.mxu1 %vm590_vm2, %v3715_v54  ;;  %v1063_v54 = vsel %vm5587_vm4, %v1060_v43, %v1062_v53  ;;  %v528_v53 = vld [vmem:[%s3961_s12 + $0x10c] sm:$0x3] }
  0x39   : > { %3387 = vmatmul.msk.bf16.gmra.mxu2 %vm590_vm2, %v584_v37  ;;  %v929_v37 = vrot.slane %v3629_v35, 1  ;;  %v3644_v35 = vld [vmem:[%s3961_s12 + $0x104] sm:$0xff] }
  0x3b   : > { %v930_v39 = vsel %vm5588_vm3, %v927_v22, %v929_v37  ;;  %v932_v49 = vsel %vm5588_vm3, %v929_v37, %v931_v47  ;;  %v532_v37 = vld [vmem:[%s3961_s12 + $0x70] sm:$0x8]  ;;  %v3726_v47 = vld [vmem:[%s3961_s12 + $0x4] sm:$0xe] }
  0x3c   : > { %v3727_v55 = vor.u32 %v3778_v45, %v3726_v47 }
  0x3e   : > { %3383 = vmatmul.msk.bf16.gmra.mxu0 %vm590_vm2, %v579_v63  ;;  %v806_v63 = vsel %vm5587_vm4, %v803_v48, %v805_v58 }
  0x45   : > { %3454 = vmatmul.msk.bf16.vlgmr.msrb.gmra.mxu3 %vm590_vm2, %v926_v14  ;;  %v3643_v14 = vld [vmem:[%s3961_s12 + $0xfc] sm:$0xff] }
  0x47   : > { %3395 = vmatmul.msk.bf16.gmra.mxu1 %vm590_vm2, %v3716_v15 }
  0x49   : > { %3423 = vmatmul.msk.bf16.vlgmr.msrb.gmra.mxu2 %vm590_vm2, %v798_v16  ;;  %v808_v16 = vsel %vm5587_vm4, %v805_v58, %v807_v10  ;;  %v1390_v58 = vrot.slane %v3979_v23, 3  ;;  %v3856_v23 = vld [vmem:[%s5580_s3] ss:$0 sm:$0xff] }
  0x4a   : > { %1576 = vrot.lane.b32.xlu0 %v3856_v23, %s3894_s25 }
  0x4e   : > { %3384 = vmatmul.msk.bf16.gmra.mxu0 %vm590_vm2, %v581_v17  ;;  %v1066_v17 = vrot.slane %v3637_v12, 3 }
  0x50   : > { %v1067_v25 = vsel %vm5587_vm4, %v1064_v0, %v1066_v17 }
  0x55   : > { %3455 = vmatmul.msk.bf16.gmra.mxu3 %vm590_vm2, %v928_v28 }
  0x57   : > { %3520 = vmatmul.msk.bf16.vlgmr.msrb.gmra.mxu1 %vm590_vm2, %v3639_v13  ;;  %v3638_v13 = vld [vmem:[%s3961_s12 + $0x140] sm:$0x10] }
  0x58   : > { %v3488_v33 = vor.u32 %v3638_v13, %v3487_v31 }
  0x59   : > { %3424 = vmatmul.msk.bf16.gmra.mxu2 %vm590_vm2, %v800_v21 }
  0x5a   : > { %v1068_v40 = vrot.slane %v3488_v33, 3 }
  0x5e   : > { %3489 = vmatmul.msk.bf16.vlgmr.msrb.gmra.mxu0 %vm590_vm2, %v1059_v34 }
  0x65   : > { %3456 = vmatmul.msk.bf16.gmra.mxu3 %vm590_vm2, %v930_v39 }
  0x67   : > { %3521 = vmatmul.msk.bf16.gmra.mxu1 %vm590_vm2, %v3640_v41  ;;  %v1379_v41 = vunpack.c.l.b16 %v532_v37 }
  0x69   : > { %3425 = vmatmul.msk.bf16.gmra.mxu2 %vm590_vm2, %v802_v42  ;;  %v1382_v48 = vpack.c.b16 %v554_v24, %v1379_v41 }
  0x6b   : > { %v1389_v57 = vrot.slane %v1382_v48, 3 }
  0x6d   : > { %v1391_v62 = vsel %vm5587_vm4, %v1389_v57, %v1390_v58 }
  0x6e   : > { %3490 = vmatmul.msk.bf16.gmra.mxu0 %vm590_vm2, %v1061_v44  ;;  %v1069_v44 = vsel %vm5587_vm4, %v1066_v17, %v1068_v40 }
  0x75   : > { %3457 = vmatmul.msk.bf16.gmra.mxu3 %vm590_vm2, %v932_v49 }
  0x77   : > { %3522 = vmatmul.msk.bf16.gmra.mxu1 %vm590_vm2, %v3641_v51 }
  0x79   : > { %3426 = vmatmul.msk.bf16.gmra.mxu2 %vm590_vm2, %v804_v52 }
  0x7e   : > { %3491 = vmatmul.msk.bf16.gmra.mxu0 %vm590_vm2, %v1063_v54  ;;  %v3780_v54 = vld [vmem:[%s3961_s12 + $0xc] sm:$0xff]  }
  0x7f   : > { %v1283_v20 = vrot.slane %v3780_v54, 1 }
  0x85   : > { %3458 = vmatmul.msk.bf16.gmra.mxu3 %vm590_vm2, %v934_v59  ;;  %v1176_v59 = vunpack.c.l.b16 %v528_v53 }
  0x87   : > { %3523 = vmatmul.msk.bf16.gmra.mxu1 %vm590_vm2, %v3642_v61  ;;  %v1282_v61 = vrot.slane %v3727_v55, 1  ;;  %v1183_v0 = vpack.c.b16 %v1176_v59, %v1176_v59 }
  0x89   : > { %3427 = vmatmul.msk.bf16.gmra.mxu2 %vm590_vm2, %v806_v63  ;;  %v1284_v4 = vsel %vm5588_vm3, %v1282_v61, %v1283_v20 }
  0x8e   : > { %3492 = vmatmul.msk.bf16.gmra.mxu0 %vm590_vm2, %v1065_v6 }
  0x94   : > { %v725_v15 = vpop.f32.mrf.mxu1 }
  0x95   : > { %3459 = vmatmul.msk.bf16.gmra.mxu3 %vm590_vm2, %v936_v11 }
  0x97   : > { %3524 = vmatmul.msk.bf16.gmra.mxu1 %vm590_vm2, %v3643_v14  ;;  %v3782_v14 = vld [vmem:[%s3961_s12 + $0x14] sm:$0xff]  }
  0x98   : > { %v745_v18 = vpop.f32.mrf.mxu3  ;;  %v1285_v17 = vrot.slane %v3782_v14, 1 }
  0x99   : > { %3428 = vmatmul.msk.bf16.gmra.mxu2 %vm590_vm2, %v808_v16 }
  0x9a   : > { %v1286_v31 = vsel %vm5588_vm3, %v1283_v20, %v1285_v17  ;;  %v3786_v20 = vld [vmem:[%s3961_s12 + $0x24] sm:$0xff]  }
  0x9b   : > { %v625_v22 = vpop.f32.mrf.mxu0 }
  0x9c   : > { %v4122_v26 = vadd.f32 %v725_v15, %v625_v22  ;;  %v645_v27 = vpop.f32.mrf.mxu2  ;;  %v4126_v30 = vpop.f32.mrf.mxu1 }
  0x9d   : > { %v4124_v28 = vadd.f32 %v745_v18, %v645_v27 }
  0x9e   : > { %3493 = vmatmul.msk.bf16.gmra.mxu0 %vm590_vm2, %v1067_v25 }
  0xa0   : > { %v747_v21 = vpop.f32.mrf.mxu3 }
  0xa3   : > { %v4131_v32 = vpop.f32.mrf.mxu0 }
  0xa4   : > { %v647_v34 = vpop.f32.mrf.mxu2  ;;  %v730_v39 = vpop.f32.mrf.mxu1  ;;  %v728_v45 = vadd.f32 %v4126_v30, %v4131_v32  ;;  %v3722_v30 = vld [vmem:[%s3961_s12 + $0x90] sm:$0xff]  }
  0xa5   : > { %v4135_v38 = vadd.f32 %v747_v21, %v647_v34  ;;  %3460 = vmatmul.msk.bf16.gmra.mxu3 %vm590_vm2, %v935_v9 }
  0xa7   : > { %3525 = vmatmul.msk.bf16.gmra.mxu1 %vm590_vm2, %v3644_v35  ;;  %v3721_v35 = vld [vmem:[%s3961_s12 + $0x88] sm:$0xff]  }
  0xa8   : > { %v750_v42 = vpop.f32.mrf.mxu3 }
  0xa9   : > { %3429 = vmatmul.msk.bf16.gmra.mxu2 %vm590_vm2, %v807_v10  ;;  %v3720_v10 = vld [vmem:[%s3961_s12 + $0x80] sm:$0xff]  }
  0xaa   : > { %v1392_v15 = vrot.slane %v3720_v10, 3 }
  0xab   : > { %v630_v43 = vpop.f32.mrf.mxu0 }
  0xac   : > { %v4145_v49 = vadd.f32 %v730_v39, %v630_v43  ;;  %v650_v50 = vpop.f32.mrf.mxu2  ;;  %v4149_v52 = vpop.f32.mrf.mxu1  ;;  %v1393_v22 = vsel %vm5587_vm4, %v1390_v58, %v1392_v15 }
  0xad   : > { %v4147_v51 = vadd.f32 %v750_v42, %v650_v50  ;;  %v1394_v42 = vrot.slane %v3721_v35, 3 }
  0xae   : > { %3494 = vmatmul.msk.bf16.gmra.mxu0 %vm590_vm2, %v1069_v44 }
  0xaf   : > { %v1395_v48 = vsel %vm5587_vm4, %v1392_v15, %v1394_v42 }
  0xb0   : > { %v752_v60 = vpop.f32.mrf.mxu3 }
  0xb3   : > { %v4155_v24 = vpop.f32.mrf.mxu0 }
  0xb4   : > { %v652_v63 = vpop.f32.mrf.mxu2  ;;  %v735_v3 = vpop.f32.mrf.mxu1 }
  0xb5   : > { %v4158_v2 = vadd.f32 %v752_v60, %v652_v63  ;;  %3538 = vmatmul.msk.bf16.vlgmr.msra.gmra.mxu3 %vm590_vm2, %v1391_v62  ;;  %v1396_v63 = vrot.slane %v3722_v30, 3 }
  0xb7   : > { %3526 = vmatmul.msk.bf16.gmra.mxu1 %vm590_vm2, %v1183_v0 }
  0xb8   : > { %v755_v6 = vpop.f32.mrf.mxu3 }
  0xb9   : > { %3527 = vmatmul.msk.bf16.vlgmr.msra.gmra.mxu2 %vm590_vm2, %v1284_v4  ;;  %v733_v4 = vadd.f32 %v4149_v52, %v4155_v24 }
  0xbb   : > { %v635_v7 = vpop.f32.mrf.mxu0 }
  0xbc   : > { %v4167_v8 = vadd.f32 %v735_v3, %v635_v7  ;;  %v655_v9 = vpop.f32.mrf.mxu2  ;;  %v4172_v12 = vpop.f32.mrf.mxu1  ;;  %v1289_v3 = vrot.slane %v3786_v20, 1 }
  0xbd   : > { %v4170_v11 = vadd.f32 %v755_v6, %v655_v9  ;;  %v1397_v6 = vsel %vm5587_vm4, %v1394_v42, %v1396_v63 }
  0xbe   : > { %3495 = vmatmul.msk.bf16.gmra.mxu0 %vm590_vm2, %v1068_v40  ;;  %v3784_v40 = vld [vmem:[%s3961_s12 + $0x1c] sm:$0xff]  }
  0xbf   : > { %v1287_v44 = vrot.slane %v3784_v40, 1 }
  0xc0   : > { %v757_v16 = vpop.f32.mrf.mxu3 }
  0xc1   : > { %v1288_v54 = vsel %vm5588_vm3, %v1285_v17, %v1287_v44  ;;  %v1290_v14 = vsel %vm5588_vm3, %v1287_v44, %v1289_v3  ;;  %v3645_v44 = vld [vmem:[%s3961_s12 + $0xa0] sm:$0x10] }
  0xc3   : > { %v4176_v18 = vpop.f32.mrf.mxu0 }
  0xc4   : > { %v657_v25 = vpop.f32.mrf.mxu2  ;;  %v740_v27 = vpop.f32.mrf.mxu1 }
  0xc5   : > { %3539 = vmatmul.msk.bf16.gmra.mxu3 %vm590_vm2, %v1393_v22 }
  0xc8   : > { %v974_v13 = vpop.f32.mrf.mxu3 }
  0xc9   : > { %3528 = vmatmul.msk.bf16.gmra.mxu2 %vm590_vm2, %v1286_v31 }
  0xcb   : > { %v640_v21 = vpop.f32.mrf.mxu0 }
  0xcc   : > { %v4182_v33 = vadd.f32 %v740_v27, %v640_v21  ;;  %v842_v34 = vpop.f32.mrf.mxu2  ;;  %v4186_v39 = vpop.f32.mrf.mxu1  ;;  %v3787_v27 = vld [vmem:[%s3961_s12 + $0x2c] sm:$0xff] }
  0xcd   : > { %v876_v37 = vadd.f32 %v842_v34, %v4122_v26  ;;  %v1291_v34 = vrot.slane %v3787_v27, 1 }
  0xce   : > { %3545 = vmatmul.msk.bf16.vlgmr.msra.gmra.mxu0 %vm590_vm2, %v4033_v5 }
  0xcf   : > { %v1008_v41 = vadd.f32 %v974_v13, %v876_v37  ;;  %v1398_v13 = vrot.slane %v3986_v29, 3  ;;  %v1292_v42 = vsel %vm5588_vm3, %v1289_v3, %v1291_v34 }
  0xd0   : > { %v976_v43 = vpop.f32.mrf.mxu3 }
  0xd3   : > { %v4193_v47 = vpop.f32.mrf.mxu0 }
  0xd4   : > { %v844_v50 = vpop.f32.mrf.mxu2  ;;  %v1221_v53 = vpop.f32.mrf.mxu1 }
  0xd5   : > { %v877_v26 = vadd.f32 %v844_v50, %v728_v45  ;;  %3540 = vmatmul.msk.bf16.gmra.mxu3 %vm590_vm2, %v1395_v48 }
  0xd7   : > { %v1009_v5 = vadd.f32 %v976_v43, %v877_v26  ;;  %v3536_v43 = vld [vmem:[%s3961_s12 + $0xa0] sm:$0xf] }
  0xd8   : > { %v979_v55 = vpop.f32.mrf.mxu3  ;;  %v3537_v50 = vor.u32 %v3645_v44, %v3536_v43 }
  0xd9   : > { %3529 = vmatmul.msk.bf16.gmra.mxu2 %vm590_vm2, %v1288_v54 }
  0xdb   : > { %v1103_v57 = vpop.f32.mrf.mxu0 }
  0xdc   : > { %v1137_v58 = vadd.f32 %v1103_v57, %v1008_v41  ;;  %v847_v59 = vpop.f32.mrf.mxu2  ;;  %v4201_v60 = vpop.f32.mrf.mxu1 }
  0xdd   : > { %v878_v32 = vadd.f32 %v847_v59, %v4145_v49  ;;  %v1400_v59 = vrot.slane %v3537_v50, 3 }
  0xde   : > { %v4203_v61 = vadd.f32 %v1221_v53, %v1137_v58  ;;  %3546 = vmatmul.msk.bf16.gmra.mxu0 %vm590_vm2, %v4052_v19 }
  0xdf   : > { %v1010_v62 = vadd.f32 %v979_v55, %v878_v32 }
  0xe0   : > { %v981_v0 = vpop.f32.mrf.mxu3 }
  0xe3   : > { %v1105_v23 = vpop.f32.mrf.mxu0 }
  0xe4   : > { %v4211_v7 = vadd.f32 %v1105_v23, %v1009_v5  ;;  %v849_v49 = vpop.f32.mrf.mxu2  ;;  %v1226_v10 = vpop.f32.mrf.mxu1 }
  0xe5   : > { %v879_v9 = vadd.f32 %v849_v49, %v733_v4  ;;  %3541 = vmatmul.msk.bf16.gmra.mxu3 %vm590_vm2, %v1397_v6 }
  0xe7   : > { %v1011_v19 = vadd.f32 %v981_v0, %v879_v9 }
  0xe8   : > { %v984_v15 = vpop.f32.mrf.mxu3 }
  0xe9   : > { %3530 = vmatmul.msk.bf16.gmra.mxu2 %vm590_vm2, %v1290_v14 }
  0xeb   : > { %v1108_v16 = vpop.f32.mrf.mxu0 }
  0xec   : > { %v1139_v17 = vadd.f32 %v1108_v16, %v1010_v62  ;;  %v852_v52 = vpop.f32.mrf.mxu2  ;;  %v4217_v22 = vpop.f32.mrf.mxu1  ;;  %v1401_v62 = vsel %vm5587_vm4, %v1398_v13, %v1400_v59 }
  0xed   : > { %v880_v24 = vadd.f32 %v852_v52, %v4167_v8  ;;  %v1399_v8 = vsel %vm5587_vm4, %v1396_v63, %v1398_v13 }
  0xee   : > { %v4219_v25 = vadd.f32 %v1226_v10, %v1139_v17  ;;  %3547 = vmatmul.msk.bf16.gmra.mxu0 %vm590_vm2, %v4068_v36  ;;  %v531_v36 = vld [vmem:[%s3961_s12 + $0x34] sm:$0x7] }
  0xef   : > { %v1012_v31 = vadd.f32 %v984_v15, %v880_v24  ;;  %v1274_v45 = vunpack.c.l.b16 %v531_v36 }
  0xf0   : > { %v4225_v21 = vpop.f32.mrf.mxu3 }
  0xf1   : > { %v1281_v57 = vpack.c.b16 %v1274_v45, %v1274_v45 }
  0xf3   : > { %v1110_v35 = vpop.f32.mrf.mxu0  ;;  %v1293_v32 = vrot.slane %v1281_v57, 1 }
  0xf4   : > { %v4228_v37 = vadd.f32 %v1110_v35, %v1011_v19  ;;  %v4230_v40 = vpop.f32.mrf.mxu2  ;;  %v1231_v41 = vpop.f32.mrf.mxu1 }
  0xf5   : > { %3542 = vmatmul.msk.bf16.gmra.mxu3 %vm590_vm2, %v1399_v8  ;;  %v1294_v0 = vsel %vm5588_vm3, %v1291_v34, %v1293_v32  ;;  %v536_v8 = vld [vmem:[%s3961_s12 + $0x6c] sm:$0x3] }
  0xf6   : > { %v1490_v36 = vunpack.c.l.b16 %v536_v8 }
  0xf8   : > { %v989_v29 = vpop.f32.mrf.mxu3  ;;  %v1492_v44 = vpack.c.b16 %v1490_v36, %v1490_v36 }
  0xf9   : > { %3531 = vmatmul.msk.bf16.gmra.mxu2 %vm590_vm2, %v1292_v42 }
  0xfb   : > { %v1113_v48 = vpop.f32.mrf.mxu0 }
  0xfc   : > { %v1141_v26 = vadd.f32 %v1113_v48, %v1012_v31  ;;  %v857_v53 = vpop.f32.mrf.mxu2  ;;  %v4239_v5 = vpop.f32.mrf.mxu1 }
  0xfd   : > { %v882_v54 = vadd.f32 %v857_v53, %v4182_v33 }
  0xfe   : > { %v4241_v55 = vadd.f32 %v1231_v41, %v1141_v26  ;;  %3548 = vmatmul.msk.bf16.gmra.mxu0 %vm590_vm2, %v4082_v46 }
  0xff   : > { %v1014_v58 = vadd.f32 %v989_v29, %v882_v54 }
 0x100   : > { %v4245_v30 = vpop.f32.mrf.mxu3 }
 0x103   : > { %v4247_v20 = vpop.f32.mrf.mxu0 }
 0x104   : > { %v4250_v63 = vpop.f32.mrf.mxu2  ;;  %v1236_v33 = vpop.f32.mrf.mxu1 }
 0x105   : > { %3543 = vmatmul.msk.bf16.gmra.mxu3 %vm590_vm2, %v1401_v62 }
 0x108   : > { %v994_v46 = vpop.f32.mrf.mxu3 }
 0x109   : > { %3532 = vmatmul.msk.bf16.gmra.mxu2 %vm590_vm2, %v1294_v0 }
 0x10b   : > { %v1118_v3 = vpop.f32.mrf.mxu0 }
 0x10c   : > { %v1143_v4 = vadd.f32 %v1118_v3, %v1014_v58  ;;  %v862_v23 = vpop.f32.mrf.mxu2  ;;  %v4256_v49 = vpop.f32.mrf.mxu1 }
 0x10d   : > { %v884_v6 = vadd.f32 %v862_v23, %v4124_v28 }
 0x10e   : > { %v4258_v9 = vadd.f32 %v1236_v33, %v1143_v4  ;;  %3549 = vmatmul.msk.bf16.gmra.mxu0 %vm590_vm2, %v4096_v56 }
 0x10f   : > { %v1016_v10 = vadd.f32 %v994_v46, %v884_v6  ;;  %v240_v6 = vlaneseq }
 0x110   : > { %v4262_v14 = vpop.f32.mrf.mxu3 }
 0x113   : > { %v4264_v19 = vpop.f32.mrf.mxu0 }
 0x114   : > { %v4266_v15 = vpop.f32.mrf.mxu2  ;;  %v1241_v16 = vpop.f32.mrf.mxu1 }
 0x115   : > { %3544 = vmatmul.msk.bf16.gmra.mxu3 %vm590_vm2, %v1400_v59 }
 0x118   : > { %v999_v28 = vpop.f32.mrf.mxu3 }
 0x119   : > { %3533 = vmatmul.msk.bf16.gmra.mxu2 %vm590_vm2, %v1293_v32 }
 0x11b   : > { %v1123_v17 = vpop.f32.mrf.mxu0 }
 0x11c   : > { %v1145_v52 = vadd.f32 %v1123_v17, %v1016_v10  ;;  %v867_v24 = vpop.f32.mrf.mxu2  ;;  %v4271_v56 = vpop.f32.mrf.mxu1 }
 0x11d   : > { %v886_v27 = vadd.f32 %v867_v24, %v4147_v51  ;;  %v1256_v24 = vadd.f32 %v4201_v60, %v4211_v7 }
 0x11e   : > { %v4273_v31 = vadd.f32 %v1241_v16, %v1145_v52  ;;  %3550 = vmatmul.msk.bf16.gmra.mxu0 %vm590_vm2, %v4106_v1  ;;  %v4297_v52 = vpop.permute.xlu0 %1576 }
 0x11f   : > { %v1018_v13 = vadd.f32 %v999_v28, %v886_v27  ;;  %v4295_v28 = vshrl.u32 %v240_v6, 7 }
 0x120   : > { %v4277_v34 = vpop.f32.mrf.mxu3 }
 0x121   : > { %v4304_v8 = vadd.s32 8, %v4295_v28  ;;  %v254_v36 = vcvt.s32.f32 %v4295_v28 }
 0x123   : > { %v4279_v35 = vpop.f32.mrf.mxu0  ;;  %v255_v60 = vcvt.s32.f32 %v4304_v8 }
 0x124   : > { %v4282_v41 = vpop.f32.mrf.mxu2  ;;  %v1246_v42 = vpop.f32.mrf.mxu1 }
 0x128   : > { %v1004_v43 = vpop.f32.mrf.mxu3 }
 0x12b   : > { %v1128_v51 = vpop.f32.mrf.mxu0 }
 0x12c   : > { %v1147_v29 = vadd.f32 %v1128_v51, %v1018_v13  ;;  %v872_v45 = vpop.f32.mrf.mxu2  ;;  %v4285_v50 = vpop.f32.mrf.mxu1  ;;  %v267_v51 = vadd.f32 0.5, %v254_v36 }
 0x12d   : > { %v888_v48 = vadd.f32 %v872_v45, %v4170_v11 }
 0x12e   : > { %v4287_v1 = vadd.f32 %v1246_v42, %v1147_v29  ;;  %3551 = vmatmul.msk.bf16.gmra.mxu0 %vm590_vm2, %v1492_v44 }
 0x12f   : > { %v1020_v26 = vadd.f32 %v1004_v43, %v888_v48  ;;  %v4310_v43 = vadd.s32 16, %v4295_v28  ;;  %v4316_v48 = vadd.s32 24, %v4295_v28 }
 0x130   : > { %v1006_v53 = vpop.f32.mrf.mxu3 }
 0x131   : > { %v5586_v45 = vcvt.s32.f32 %v4310_v43 }
 0x133   : > { %v4290_v54 = vpop.f32.mrf.mxu0 }
 0x134   : > { %v874_v57 = vpop.f32.mrf.mxu2  ;;  %v1251_v58 = vpop.f32.mrf.mxu1 }
 0x138   : > { %v1439_v59 = vpop.f32.mrf.mxu3 }
 0x13b   : > { %v1133_v32 = vpop.f32.mrf.mxu0 }
 0x13c   : > { %v1149_v62 = vadd.f32 %v1133_v32, %v1020_v26  ;;  %v1328_v33 = vpop.f32.mrf.mxu2  ;;  %v1253_v0 = vpop.f32.mrf.mxu1  ;;  %v268_v26 = vadd.f32 0.5, %v255_v60 }
 0x13d   : > { %v1362_v23 = vadd.f32 %v1328_v33, %v4203_v61  ;;  %v269_v33 = vadd.f32 0.5, %v5586_v45  ;;  %v5584_v0 = vcvt.s32.f32 %v4316_v48 }
 0x13e   : > { %v4292_v46 = vadd.f32 %v1251_v58, %v1149_v62  ;;  %v4321_v58 = vadd.s32 32, %v4295_v28  ;;  %v280_v62 = vmul.f32 0.1, %v267_v51 }
 0x13f   : > { %v1473_v16 = vadd.f32 %v1439_v59, %v1362_v23  ;;  %v270_v8 = vadd.f32 0.5, %v5584_v0 }
 0x140   : > { %5598 = vst [vmem:[#allocation6_spill] sm:$0xff] %v4292_v46  ;;  %v1441_v11 = vpop.f32.mrf.mxu3  ;;  %v5583_v23 = vcvt.s32.f32 %v4321_v58 }
 0x143   : > { %v1135_v3 = vpop.f32.mrf.mxu0 }
 0x144   : > { %v1330_v4 = vpop.f32.mrf.mxu2  ;;  %v4331_v3 = vadd.s32 40, %v4295_v28 }
 0x145   : > { %v1363_v42 = vadd.f32 %v1330_v4, %v1256_v24  ;;  %v282_v24 = vmul.f32 0.1, %v269_v33 }
 0x146   : > { %v5585_v51 = vcvt.s32.f32 %v4331_v3 }
 0x147   : > { %v1474_v44 = vadd.f32 %v1441_v11, %v1363_v42  ;;  %v281_v11 = vmul.f32 0.1, %v268_v26 }
 0x148   : > { %v1444_v10 = vpop.f32.mrf.mxu3  ;;  %v272_v33 = vadd.f32 0.5, %v5585_v51 }
 0x149   : > { %v294_v42 = vfloor.f32 %v281_v11 }
 0x14a   : > { %v285_v45 = vmul.f32 0.1, %v272_v33 }
 0x14b   : > { %v1526_v17 = vpop.f32.mrf.mxu0  ;;  %vm333_vm7 = vcmp.ge.f32.partialorder %v294_v42, 1.0  ;;  %vm346_vm8 = vcmp.le.f32.partialorder %v294_v42, 8.0 }
 0x14c   : > { %v4301_v27 = vadd.f32 %v1526_v17, %v1473_v16  ;;  %v1333_v13 = vpop.f32.mrf.mxu2  ;;  %v1258_v16 = vadd.f32 %v4217_v22, %v4228_v37  ;;  %v293_v17 = vfloor.f32 %v280_v62  ;;  %v307_v62 = vmul.f32 10.0, %v294_v42  ;;  %vm4387_vm11 = vmand %vm333_vm7, %vm346_vm8 }
 0x14d   : > { %v1364_v59 = vadd.f32 %v1333_v13, %v4219_v25  ;;  %v738_v25 = vadd.f32 %v4172_v12, %v4176_v18  ;;  %v271_v12 = vadd.f32 0.5, %v5583_v23 }
 0x14e   : > { %v1579_v61 = vadd.f32 %v4297_v52, %v4301_v27  ;;  %v306_v26 = vmul.f32 10.0, %v293_v17  ;;  %vm332_vm5 = vcmp.ge.f32.partialorder %v293_v17, 1.0  ;;  %vm345_vm6 = vcmp.le.f32.partialorder %v293_v17, 8.0 }
 0x14f   : > { %v1475_v6 = vadd.f32 %v1444_v10, %v1364_v59  ;;  %v881_v18 = vadd.f32 %v4230_v40, %v738_v25  ;;  %v4354_v10 = vadd.s32 56, %v4295_v28  ;;  %v295_v59 = vfloor.f32 %v282_v24  ;;  %vm4379_vm9 = vmand %vm332_vm5, %vm345_vm6 }
 0x150   : > { %3196 = vrot.lane.b32.xlu0 %v1579_v61, %s3895_s26  ;;  %v1446_v7 = vpop.f32.mrf.mxu3  ;;  %v284_v40 = vmul.f32 0.1, %v271_v12  ;;  %v4392_v17 = vfloor.f32 %v285_v45 }
 0x151   : > { %v308_v24 = vmul.f32 10.0, %v295_v59  ;;  %vm334_vm13 = vcmp.ge.f32.partialorder %v295_v59, 1.0  ;;  %vm347_vm14 = vcmp.le.f32.partialorder %v295_v59, 8.0  ;;  %v5613_v59 = vcvt.s32.f32 %v4321_v58 }
 0x152   : > { %vm4414_vm8 = vmand %vm334_vm13, %vm347_vm14 }
 0x153   : > { %v1528_v29 = vpop.f32.mrf.mxu0 }
 0x154   : > { %v4318_v53 = vadd.f32 %v1528_v29, %v1474_v44  ;;  %v1335_v57 = vpop.f32.mrf.mxu2  ;;  %v4346_v29 = vadd.s32 48, %v4295_v28 }
 0x155   : > { %v1365_v22 = vadd.f32 %v1335_v57, %v1258_v16  ;;  %v1013_v57 = vadd.f32 %v4225_v21, %v881_v18  ;;  %v261_v16 = vcvt.s32.f32 %v4354_v10  ;;  %v297_v21 = vfloor.f32 %v284_v40 }
 0x156   : > { %v1580_v32 = vadd.f32 %v4297_v52, %v4318_v53  ;;  %v260_v11 = vcvt.s32.f32 %v4346_v29 }
 0x157   : > { %v1476_v25 = vadd.f32 %v1446_v7, %v1365_v22  ;;  %v1142_v12 = vadd.f32 %v4247_v20, %v1013_v57  ;;  %v5601_v20 = vcvt.s32.f32 %v4310_v43  ;;  %v310_v43 = vmul.f32 10.0, %v297_v21 }
 0x158   : > { %3198 = vrot.lane.b32.xlu1 %v1580_v32, %s3895_s26  ;;  %v4333_v4 = vpop.f32.mrf.mxu3  ;;  %v283_v32 = vmul.f32 0.1, %v270_v8  ;;  %v273_v46 = vadd.f32 0.5, %v260_v11 }
 0x159   : > { %v321_v42 = vsub.f32 %v5601_v20, %v308_v24 }
 0x15a   : > { %v296_v8 = vfloor.f32 %v283_v32  ;;  %v1260_v32 = vadd.f32 %v4239_v5, %v1142_v12  ;;  %v311_v12 = vmul.f32 10.0, %v4392_v17 }
 0x15b   : > { %v1531_v13 = vpop.f32.mrf.mxu0  ;;  %vm373_vm6 = vcmp.ge.f32.partialorder %v321_v42, 1.0 }
 0x15c   : > { %v4342_v61 = vadd.f32 %v1531_v13, %v1475_v6  ;;  %v1338_v44 = vpop.f32.mrf.mxu2  ;;  %v319_v13 = vsub.f32 %v254_v36, %v306_v26  ;;  %v286_v26 = vmul.f32 0.1, %v273_v46  ;;  %v5608_v46 = vcvt.s32.f32 %v4316_v48  ;;  %vm386_vm14 = vmand %vm4414_vm8, %vm373_vm6 }
 0x15d   : > { %v1366_v7 = vadd.f32 %v1338_v44, %v4241_v55  ;;  %v309_v55 = vmul.f32 10.0, %v296_v8  ;;  %v743_v44 = vadd.f32 %v4186_v39, %v4193_v47  ;;  %vm335_vm7 = vcmp.ge.f32.partialorder %v296_v8, 1.0 }
 0x15e   : > { %v1581_v37 = vadd.f32 %v4297_v52, %v4342_v61  ;;  %vm371_vm10 = vcmp.ge.f32.partialorder %v319_v13, 1.0  ;;  %vm397_vm0 = vcmp.le.f32.partialorder %v319_v13, 8.0  ;;  %vm337_vm8 = vcmp.ge.f32.partialorder %v4392_v17, 1.0 }
 0x15f   : > { %vm4399_vm15 = vmand %vm4379_vm9, %vm371_vm10  ;;  %v1477_v47 = vadd.f32 %v4333_v4, %v1366_v7  ;;  %v322_v40 = vsub.f32 %v5608_v46, %v309_v55  ;;  %vm348_vm9 = vcmp.le.f32.partialorder %v296_v8, 8.0  ;;  %v299_v7 = vfloor.f32 %v286_v26 }
 0x160   : > { %3200 = vrot.lane.b32.xlu1 %v1581_v37, %s3895_s26  ;;  %v4360_v6 = vpop.f32.mrf.mxu3  ;;  %v320_v37 = vsub.f32 %v255_v60, %v307_v62  ;;  %v274_v60 = vadd.f32 0.5, %v261_v16  ;;  %vm4424_vm10 = vmand %vm4399_vm15, %vm397_vm0  ;;  %v883_v22 = vadd.f32 %v4250_v63, %v743_v44  ;;  %vm399_vm15 = vcmp.le.f32.partialorder %v321_v42, 8.0 }
 0x161   : > { %vm4450_vm0 = vmand %vm335_vm7, %vm348_vm9  ;;  %vm350_vm9 = vcmp.le.f32.partialorder %v4392_v17, 8.0 }
 0x162   : > { %vm372_vm12 = vcmp.ge.f32.partialorder %v320_v37, 1.0  ;;  %v287_v33 = vmul.f32 0.1, %v274_v60  ;;  %vm398_vm5 = vcmp.le.f32.partialorder %v320_v37, 8.0  ;;  %v4431_v60 = vadd.s32 72, %v4295_v28  ;;  %vm4467_vm7 = vmand %vm386_vm14, %vm399_vm15 }
 0x163   : > { %v1533_v23 = vpop.f32.mrf.mxu0  ;;  %vm4407_vm2 = vmand %vm4387_vm11, %vm372_vm12  ;;  %vm336_vm11 = vcmp.ge.f32.partialorder %v297_v21, 1.0  ;;  %vm349_vm12 = vcmp.le.f32.partialorder %v297_v21, 8.0  ;;  %v1015_v39 = vadd.f32 %v4245_v30, %v883_v22 }
 0x164   : > { %v4364_v0 = vadd.f32 %v1533_v23, %v1476_v25  ;;  %v1340_v51 = vpop.f32.mrf.mxu2  ;;  %v4375_v23 = vadd.s32 64, %v4295_v28  ;;  %vm4436_vm13 = vmand %vm4407_vm2, %vm398_vm5  ;;  %v300_v55 = vfloor.f32 %v287_v33  ;;  %vm374_vm2 = vcmp.ge.f32.partialorder %v322_v40, 1.0 }
 0x165   : > { %v1367_v13 = vadd.f32 %v1340_v51, %v1260_v32  ;;  %v5618_v51 = vcvt.s32.f32 %v4331_v3  ;;  %v312_v32 = vmul.f32 10.0, %v299_v7  ;;  %vm4459_vm5 = vmand %vm336_vm11, %vm349_vm12  ;;  %v263_v42 = vcvt.s32.f32 %v4431_v60 }
 0x166   : > { %v1582_v36 = vadd.f32 %v4297_v52, %v4364_v0  ;;  %v262_v45 = vcvt.s32.f32 %v4375_v23  ;;  %v313_v21 = vmul.f32 10.0, %v300_v55  ;;  %vm387_vm11 = vmand %vm4450_vm0, %vm374_vm2  ;;  %vm400_vm12 = vcmp.le.f32.partialorder %v322_v40, 8.0 }
 0x167   : > { %v324_v26 = vsub.f32 %v5618_v51, %v311_v12  ;;  %v1478_v3 = vadd.f32 %v4360_v6, %v1367_v13  ;;  %vm338_vm0 = vcmp.ge.f32.partialorder %v299_v7, 1.0  ;;  %vm351_vm2 = vcmp.le.f32.partialorder %v299_v7, 8.0 }
 0x168   : > { %3202 = vrot.lane.b32.xlu2 %v1582_v36, %s3895_s26  ;;  %v4395_v62 = vpop.f32.mrf.mxu3  ;;  %v323_v36 = vsub.f32 %v5613_v59, %v310_v43  ;;  %v275_v58 = vadd.f32 0.5, %v262_v45  ;;  %v276_v25 = vadd.f32 0.5, %v263_v42  ;;  %v4504_v12 = vadd.s32 80, %v4295_v28 }
 0x169   : > { %vm376_vm4 = vcmp.ge.f32.partialorder %v324_v26, 1.0  ;;  %v326_v17 = vsub.f32 %v261_v16, %v313_v21  ;;  %v1144_v13 = vadd.f32 %v4264_v19, %v1015_v39  ;;  %v4593_v6 = vadd.s32 88, %v4295_v28 }
 0x16a   : > { %vm375_vm6 = vcmp.ge.f32.partialorder %v323_v36, 1.0  ;;  %v288_v43 = vmul.f32 0.1, %v275_v58  ;;  %vm401_vm15 = vcmp.le.f32.partialorder %v323_v36, 8.0  ;;  %v289_v36 = vmul.f32 0.1, %v276_v25 }
 0x16b   : > { %v1536_v57 = vpop.f32.mrf.mxu0  ;;  %vm4485_vm14 = vmand %vm4459_vm5, %vm375_vm6  ;;  %v1262_v7 = vadd.f32 %v4256_v49, %v1144_v13  ;;  %v265_v19 = vcvt.s32.f32 %v4593_v6 }
 0x16c   : > { %v4418_v4 = vadd.f32 %v1536_v57, %v1477_v47  ;;  %v1343_v24 = vpop.f32.mrf.mxu2  ;;  %v3896_v47 = vmov 0.0   ;;  %v325_v57 = vsub.f32 %v260_v11, %v312_v32  ;;  %vm4506_vm5 = vmand %vm387_vm11, %vm400_vm12  ;;  %v301_v18 = vfloor.f32 %v288_v43 }
 0x16d   : > { %v4477_v33 = vsel %vm4436_vm13, 1.0, %v3896_v47  ;;  %vm4497_vm13 = vmand %vm337_vm8, %vm350_vm9  ;;  %v1368_v29 = vadd.f32 %v1343_v24, %v4258_v9  ;;  %vm339_vm8 = vcmp.ge.f32.partialorder %v300_v55, 1.0  ;;  %vm352_vm9 = vcmp.le.f32.partialorder %v300_v55, 8.0 }
 0x16e   : > { %v1583_v20 = vadd.f32 %v4297_v52, %v4418_v4  ;;  %vm4519_vm6 = vmand %vm4485_vm14, %vm401_vm15  ;;  %v4526_v9 = vsel %vm4424_vm10, 1.0, %v3896_v47  ;;  %v1594_v10 = vmul.f32 %v4477_v33, %v4318_v53  ;;  %vm402_vm12 = vcmp.le.f32.partialorder %v324_v26, 8.0 }
 0x16f   : > { %vm4533_vm11 = vmand %vm4497_vm13, %vm376_vm4  ;;  %v4541_v16 = vsel %vm4467_vm7, 1.0, %v3896_v47  ;;  %vm377_vm14 = vcmp.ge.f32.partialorder %v325_v57, 1.0  ;;  %v264_v55 = vcvt.s32.f32 %v4504_v12  ;;  %v1479_v58 = vadd.f32 %v4395_v62, %v1368_v29 }
 0x170   : > { %3204 = vrot.lane.b32.xlu2 %v1583_v20, %s3895_s26  ;;  %v4464_v8 = vpop.f32.mrf.mxu3  ;;  %vm4545_vm10 = vmand %vm338_vm0, %vm351_vm2  ;;  %vm378_vm7 = vcmp.ge.f32.partialorder %v326_v17, 1.0  ;;  %v314_v37 = vmul.f32 10.0, %v301_v18  ;;  %v1593_v51 = vmul.f32 %v4526_v9, %v4301_v27  ;;  %vm1606_vm15 = vcmask 64512  }
 0x171   : > { %vm4553_vm4 = vmand %vm339_vm8, %vm352_vm9  ;;  %v4563_v32 = vsel %vm4506_vm5, 1.0, %v3896_v47  ;;  %v1608_v44 = vsel %vm1606_vm15, %v1594_v10, 0.0  ;;  %v1595_v49 = vmul.f32 %v4541_v16, %v4342_v61  ;;  %vm403_vm2 = vcmp.le.f32.partialorder %v325_v57, 8.0 }
 0x172   : > { %vm4568_vm13 = vmand %vm4533_vm11, %vm402_vm12  ;;  %vm404_vm8 = vcmp.le.f32.partialorder %v326_v17, 8.0  ;;  %v302_v39 = vfloor.f32 %v289_v36  ;;  %v4598_v57 = vsel %vm4519_vm6, 1.0, %v3896_v47  ;;  %v327_v59 = vsub.f32 %v262_v45, %v314_v37 }
 0x173   : > { %v1538_v5 = vpop.f32.mrf.mxu0  ;;  %vm4578_vm0 = vmand %vm4545_vm10, %vm377_vm14  ;;  %v885_v29 = vadd.f32 %v4266_v15, %v4135_v38  ;;  %vm340_vm6 = vcmp.ge.f32.partialorder %v301_v18, 1.0  ;;  %vm353_vm11 = vcmp.le.f32.partialorder %v301_v18, 8.0  ;;  %v1610_v20 = vsel %vm1606_vm15, %v1595_v49, 0.0 }
 0x174   : > { %v4489_v30 = vadd.f32 %v1538_v5, %v1478_v3  ;;  %v1345_v46 = vpop.f32.mrf.mxu2  ;;  %vm4586_vm5 = vmand %vm4553_vm4, %vm378_vm7  ;;  %v277_v5 = vadd.f32 0.5, %v264_v55  ;;  %v1596_v23 = vmul.f32 %v4563_v32, %v4364_v0  ;;  %v4619_v38 = vsel %vm4568_vm13, 1.0, %v3896_v47 }
 0x175   : > { %v1369_v40 = vadd.f32 %v1345_v46, %v1262_v7  ;;  %vm4609_vm9 = vmand %vm4578_vm0, %vm403_vm2  ;;  %v1597_v15 = vmul.f32 %v4598_v57, %v4418_v4  ;;  %v315_v18 = vmul.f32 10.0, %v302_v39  ;;  %vm379_vm14 = vcmp.ge.f32.partialorder %v327_v59, 1.0 }
 0x176   : > { %v1584_v11 = vadd.f32 %v4297_v52, %v4489_v30  ;;  %vm417_vm12 = vmand %vm4586_vm5, %vm404_vm8  ;;  %v290_v10 = vmul.f32 0.1, %v277_v5  ;;  %v1017_v36 = vadd.f32 %v4262_v14, %v885_v29  ;;  %v4635_v17 = vsel %vm4609_vm9, 1.0, %v3896_v47 }
 0x177   : > { %v1480_v24 = vadd.f32 %v4464_v8, %v1369_v40  ;;  %vm366_vm10 = vmand %vm340_vm6, %vm353_vm11  ;;  %v4638_v22 = vsel %vm417_vm12, 1.0, %v3896_v47  ;;  %v1612_v7 = vsel %vm1606_vm15, %v1596_v23, 0.0  ;;  %vm405_vm4 = vcmp.le.f32.partialorder %v327_v59, 8.0 }
 0x178   : > { %3206 = vrot.lane.b32.xlu0 %v1584_v11, %s3895_s26  ;;  %v4549_v48 = vpop.f32.mrf.mxu3  ;;  %v1607_v11 = vsel %vm1606_vm15, %v1593_v51, 0.0  ;;  %v1598_v51 = vmul.f32 %v4619_v38, %v4489_v30  ;;  %v1614_v14 = vsel %vm1606_vm15, %v1597_v15, 0.0  ;;  %vm4646_vm7 = vmand %vm366_vm10, %vm379_vm14  ;;  %v303_v49 = vfloor.f32 %v290_v10 }
 0x179   : > { %v1609_v46 = vadd.f32 %v1608_v44, %v1607_v11  ;;  %v328_v44 = vsub.f32 %v263_v42, %v315_v18  ;;  %v278_v3 = vadd.f32 0.5, %v265_v19  ;;  %vm341_vm13 = vcmp.ge.f32.partialorder %v302_v39, 1.0  ;;  %vm418_vm2 = vmand %vm4646_vm7, %vm405_vm4 }
 0x17a   : > { %vm354_vm0 = vcmp.le.f32.partialorder %v302_v39, 8.0  ;;  %v1146_v60 = vadd.f32 %v4279_v35, %v1017_v36  ;;  %v1616_v42 = vsel %vm1606_vm15, %v1598_v51, 0.0  ;;  %v4674_v23 = vsel %vm418_vm2, 1.0, %v3896_v47 }
 0x17b   : > { %v1541_v63 = vpop.f32.mrf.mxu0  ;;  %v291_v13 = vmul.f32 0.1, %v278_v3  ;;  %vm367_vm5 = vmand %vm341_vm13, %vm354_vm0  ;;  %vm380_vm8 = vcmp.ge.f32.partialorder %v328_v44, 1.0  ;;  %vm406_vm6 = vcmp.le.f32.partialorder %v328_v44, 8.0  ;;  %vm342_vm11 = vcmp.ge.f32.partialorder %v303_v49, 1.0 }
 0x17c   : > { %v4582_v26 = vadd.f32 %v1541_v63, %v1479_v58  ;;  %v1348_v21 = vpop.f32.mrf.mxu2  ;;  %v1611_v58 = vadd.f32 %v1610_v20, %v1609_v46  ;;  %v1264_v15 = vadd.f32 %v4271_v56, %v1146_v60  ;;  %vm393_vm9 = vmand %vm367_vm5, %vm380_vm8  ;;  %vm355_vm12 = vcmp.le.f32.partialorder %v303_v49, 8.0 }
 0x17d   : > { %v1370_v5 = vadd.f32 %v1348_v21, %v4273_v31  ;;  %vm419_vm10 = vmand %vm393_vm9, %vm406_vm6  ;;  %v887_v12 = vadd.f32 %v4282_v41, %v4158_v2 }
 0x17e   : > { %v1585_v25 = vadd.f32 %v4297_v52, %v4582_v26  ;;  %v1599_v43 = vmul.f32 %v4635_v17, %v4582_v26  ;;  %v1613_v29 = vadd.f32 %v1612_v7, %v1611_v58  ;;  %v304_v58 = vfloor.f32 %v291_v13  ;;  %vm368_vm14 = vmand %vm342_vm11, %vm355_vm12 }
 0x17f   : > { %v1481_v39 = vadd.f32 %v4549_v48, %v1370_v5  ;;  %v4694_v5 = vsel %vm419_vm10, 1.0, %v3896_v47  ;;  %v1019_v60 = vadd.f32 %v4277_v34, %v887_v12 }
 0x180   : > { %3208 = vrot.lane.b32.xlu1 %v1585_v25, %s3895_s26  ;;  %v4627_v45 = vpop.f32.mrf.mxu3  ;;  %v4660_v25 = vadd.s32 96, %v4295_v28  ;;  %v1615_v31 = vadd.f32 %v1614_v14, %v1613_v29  ;;  %v316_v28 = vmul.f32 10.0, %v303_v49  ;;  %v1618_v46 = vsel %vm1606_vm15, %v1599_v43, 0.0 }
 0x181   : > { %v317_v44 = vmul.f32 10.0, %v304_v58  ;;  %vm343_vm0 = vcmp.ge.f32.partialorder %v304_v58, 1.0  ;;  %vm356_vm2 = vcmp.le.f32.partialorder %v304_v58, 8.0 }
 0x182   : > { %v266_v35 = vcvt.s32.f32 %v4660_v25  ;;  %v1617_v20 = vadd.f32 %v1616_v42, %v1615_v31  ;;  %v329_v48 = vsub.f32 %v264_v55, %v316_v28  ;;  %v1148_v31 = vadd.f32 %v4290_v54, %v1019_v60  ;;  %vm369_vm8 = vmand %vm343_vm0, %vm356_vm2  ;;  %v5647_v25 = vld [vmem:[#allocation6_spill] sm:$0xff] }
 0x183   : > { %v1543_v37 = vpop.f32.mrf.mxu0  ;;  %v330_v2 = vsub.f32 %v265_v19, %v317_v44 }
 0x184   : > { %v4643_v8 = vadd.f32 %v1543_v37, %v1480_v24  ;;  %v1350_v62 = vpop.f32.mrf.mxu2  ;;  %v1619_v36 = vadd.f32 %v1618_v46, %v1617_v20  ;;  %v279_v56 = vadd.f32 0.5, %v266_v35  ;;  %vm381_vm4 = vcmp.ge.f32.partialorder %v329_v48, 1.0 }
 0x185   : > { %v1371_v37 = vadd.f32 %v1350_v62, %v1264_v15  ;;  %vm394_vm7 = vmand %vm368_vm14, %vm381_vm4  ;;  %vm407_vm13 = vcmp.le.f32.partialorder %v329_v48, 8.0  ;;  %vm382_vm9 = vcmp.ge.f32.partialorder %v330_v2, 1.0  ;;  %vm408_vm11 = vcmp.le.f32.partialorder %v330_v2, 8.0 }
 0x186   : > { %v1586_v40 = vadd.f32 %v4297_v52, %v4643_v8  ;;  %v1600_v11 = vmul.f32 %v4638_v22, %v4643_v8  ;;  %v292_v43 = vmul.f32 0.1, %v279_v56  ;;  %vm420_vm5 = vmand %vm394_vm7, %vm407_vm13 }
 0x187   : > { %v1482_v3 = vadd.f32 %v4627_v45, %v1371_v37  ;;  %v4710_v13 = vsel %vm420_vm5, 1.0, %v3896_v47  ;;  %vm395_vm6 = vmand %vm369_vm8, %vm382_vm9  ;;  %vm1630_vm5 = vcmask 60416   ;;  %vm1795_vm8 = vcmask 60419  }
 0x188   : > { %3210 = vrot.lane.b32.xlu2 %v1586_v40, %s3895_s26  ;;  %v1464_v21 = vpop.f32.mrf.mxu3  ;;  %v1620_v18 = vsel %vm1606_vm15, %v1600_v11, 0.0  ;;  %v305_v11 = vfloor.f32 %v292_v43  ;;  %vm421_vm14 = vmand %vm395_vm6, %vm408_vm11  ;;  %vm1796_vm9 = vsmask.f32 7950 }
 0x189   : > { %v1621_v14 = vadd.f32 %v1620_v18, %v1619_v36  ;;  %v4720_v58 = vsel %vm421_vm14, 1.0, %v3896_v47  ;;  %vm1797_vm6 = vmand %vm1795_vm8, %vm1796_vm9 }
 0x18a   : > { %vm344_vm12 = vcmp.ge.f32.partialorder %v305_v11, 1.0  ;;  %vm357_vm10 = vcmp.le.f32.partialorder %v305_v11, 8.0 }
 0x18b   : > { %v1546_v59 = vpop.f32.mrf.mxu0  ;;  %vm370_vm4 = vmand %vm344_vm12, %vm357_vm10 }
 0x18c   : > { %v4678_v10 = vadd.f32 %v1546_v59, %v1481_v39  ;;  %v1353_v24 = vpop.f32.mrf.mxu2  ;;  %v1266_v39 = vadd.f32 %v4285_v50, %v1148_v31 }
 0x18d   : > { %v1372_v41 = vadd.f32 %v1353_v24, %v4287_v1  ;;  %v318_v1 = vmul.f32 10.0, %v305_v11 }
 0x18e   : > { %v1601_v7 = vmul.f32 %v4674_v23, %v4678_v10  ;;  %v1587_v51 = vadd.f32 %v4297_v52, %v4678_v10 }
 0x18f   : > { %v1483_v28 = vadd.f32 %v1464_v21, %v1372_v41  ;;  %v331_v21 = vsub.f32 %v266_v35, %v318_v1 }
 0x190   : > { %v1622_v63 = vsel %vm1606_vm15, %v1601_v7, 0.0  ;;  %3212 = vrot.lane.b32.xlu0 %v1587_v51, %s3895_s26  ;;  %v1466_v62 = vpop.f32.mrf.mxu3 }
 0x191   : > { %v1623_v55 = vadd.f32 %v1622_v63, %v1621_v14  ;;  %vm383_vm7 = vcmp.ge.f32.partialorder %v331_v21, 1.0  ;;  %vm409_vm0 = vcmp.le.f32.partialorder %v331_v21, 8.0 }
 0x192   : > { %vm396_vm13 = vmand %vm370_vm4, %vm383_vm7 }
 0x193   : > { %v1548_v49 = vpop.f32.mrf.mxu0  ;;  %vm422_vm2 = vmand %vm396_vm13, %vm409_vm0 }
 0x194   : > { %v4696_v40 = vadd.f32 %v1548_v49, %v1482_v3  ;;  %v1355_v29 = vpop.f32.mrf.mxu2 }
 0x195   : > { %v1373_v54 = vadd.f32 %v1355_v29, %v1266_v39 }
 0x196   : > { %v1602_v45 = vmul.f32 %v4694_v5, %v4696_v40  ;;  %v1588_v42 = vadd.f32 %v4297_v52, %v4696_v40 }
 0x197   : > { %v1484_v48 = vadd.f32 %v1466_v62, %v1373_v54  ;;  %v4728_v62 = vsel %vm422_vm2, 1.0, %v3896_v47 }
 0x198   : > { %v1624_v34 = vsel %vm1606_vm15, %v1602_v45, 0.0  ;;  %3214 = vrot.lane.b32.xlu1 %v1588_v42, %s3895_s26  ;;  %v1469_v19 = vpop.f32.mrf.mxu3 }
 0x199   : > { %v1625_v6 = vadd.f32 %v1624_v34, %v1623_v55 }
 0x19b   : > { %v1551_v46 = vpop.f32.mrf.mxu0 }
 0x19c   : > { %v1570_v20 = vadd.f32 %v1551_v46, %v1483_v28  ;;  %v1358_v59 = vpop.f32.mrf.mxu2 }
 0x19d   : > { %v1374_v35 = vadd.f32 %v1358_v59, %v5647_v25 }
 0x19e   : > { %v1603_v15 = vmul.f32 %v4710_v13, %v1570_v20  ;;  %v1589_v18 = vadd.f32 %v4297_v52, %v1570_v20 }
 0x19f   : > { %v1485_v55 = vadd.f32 %v1469_v19, %v1374_v35 }
 0x1a0   : > { %v1626_v24 = vsel %vm1606_vm15, %v1603_v15, 0.0  ;;  %3216 = vrot.lane.b32.xlu2 %v1589_v18, %s3895_s26  ;;  %v1471_v36 = vpop.f32.mrf.mxu3 }
 0x1a1   : > { %v1627_v50 = vadd.f32 %v1626_v24, %v1625_v6 }
 0x1a3   : > { %v1553_v37 = vpop.f32.mrf.mxu0 }
 0x1a4   : > { %v1571_v7 = vadd.f32 %v1553_v37, %v1484_v48  ;;  %v1360_v51 = vpop.f32.mrf.mxu2 }
 0x1a6   : > { %v1604_v56 = vmul.f32 %v4720_v58, %v1571_v7  ;;  %v1590_v14 = vadd.f32 %v4297_v52, %v1571_v7 }
 0x1a8   : > { %v1628_v63 = vsel %vm1606_vm15, %v1604_v56, 0.0  ;;  %3218 = vrot.lane.b32.xlu0 %v1590_v14, %s3895_s26 }
 0x1a9   : > { %v1629_v12 = vadd.f32 %v1628_v63, %v1627_v50 }
 0x1ab   : > { %v1556_v44 = vpop.f32.mrf.mxu0 }
 0x1ac   : > { %v1572_v3 = vadd.f32 %v1556_v44, %v1485_v55 }
 0x1ae   : > { %v1605_v43 = vmul.f32 %v4728_v62, %v1572_v3  ;;  %v1591_v49 = vadd.f32 %v4297_v52, %v1572_v3 }
 0x1b0   : > { %v1631_v29 = vsel %vm1630_vm5, %v1605_v43, 0.0  ;;  %3220 = vrot.lane.b32.xlu1 %v1591_v49, %s3895_s26  ;;  %s5538_s26 = scalar_lea.vmem %s5582_s5, %s3832_s24 }
 0x1b1   : > { %v1632_v60 = vadd.f32 %v1631_v29, %v1629_v12 }
 0x1b3   : > { %v1633_v2 = vrot.slane %v1632_v60, 4  ;;  %v1558_v41 = vpop.f32.mrf.mxu0 }
 0x1b5   : > { %v1634_v45 = vadd.f32 %v1633_v2, %v1632_v60 }
 0x1b7   : > { %v1635_v42 = vrot.slane %v1634_v45, 2 }
 0x1b9   : > { %v1636_v11 = vadd.f32 %v1635_v42, %v1634_v45 }
 0x1bb   : > { %v1637_v31 = vrot.slane %v1636_v11, 1 }
 0x1bd   : > { %v1638_v47 = vadd.f32 %v1637_v31, %v1636_v11 }
 0x1bf   : > { %v1639_v34 = vmul.f32 0.015625, %v1638_v47 }
 0x1c1   : > { %v4735_v6 = vsub.f32 %v4301_v27, %v1639_v34  ;;  %v4738_v19 = vsub.f32 %v4318_v53, %v1639_v34  ;;  %v4741_v52 = vsub.f32 %v4342_v61, %v1639_v34  ;;  %v4744_v28 = vsub.f32 %v4364_v0, %v1639_v34 }
 0x1c2   : > { %v4747_v1 = vsub.f32 %v4643_v8, %v1639_v34  ;;  %v4750_v46 = vsub.f32 %v4678_v10, %v1639_v34  ;;  %v4753_v39 = vsub.f32 %v4696_v40, %v1639_v34  ;;  %v4755_v27 = vsub.f32 %v1570_v20, %v1639_v34 }
 0x1c3   : > { %v4757_v59 = vsub.f32 %v1571_v7, %v1639_v34  ;;  %v4759_v53 = vsub.f32 %v1572_v3, %v1639_v34  ;;  %v1653_v61 = vmul.f32 %v4526_v9, %v4735_v6  ;;  %v1654_v0 = vmul.f32 %v4477_v33, %v4738_v19 }
 0x1c4   : > { %v4766_v8 = vsub.f32 %v4418_v4, %v1639_v34  ;;  %v1655_v10 = vmul.f32 %v4541_v16, %v4741_v52  ;;  %v4771_v40 = vsub.f32 %v4489_v30, %v1639_v34  ;;  %v1656_v20 = vmul.f32 %v4563_v32, %v4744_v28 }
 0x1c5   : > { %v1666_v54 = vmul.f32 %v1653_v61, %v1653_v61  ;;  %v1667_v15 = vmul.f32 %v1654_v0, %v1654_v0  ;;  %v4776_v18 = vsub.f32 %v4582_v26, %v1639_v34  ;;  %v1660_v25 = vmul.f32 %v4638_v22, %v4747_v1 }
 0x1c6   : > { %v1657_v21 = vmul.f32 %v4598_v57, %v4766_v8  ;;  %v1668_v24 = vmul.f32 %v1655_v10, %v1655_v10  ;;  %v1658_v50 = vmul.f32 %v4619_v38, %v4771_v40  ;;  %v1669_v36 = vmul.f32 %v1656_v20, %v1656_v20 }
 0x1c7   : > { %v1679_v4 = vsel %vm1606_vm15, %v1666_v54, 0.0  ;;  %v1680_v30 = vsel %vm1606_vm15, %v1667_v15, 0.0  ;;  %v1659_v37 = vmul.f32 %v4635_v17, %v4776_v18  ;;  %v1661_v63 = vmul.f32 %v4674_v23, %v4750_v46 }
 0x1c8   : > { %v1681_v48 = vadd.f32 %v1680_v30, %v1679_v4  ;;  %v1670_v7 = vmul.f32 %v1657_v21, %v1657_v21  ;;  %v1682_v26 = vsel %vm1606_vm15, %v1668_v24, 0.0  ;;  %v1671_v35 = vmul.f32 %v1658_v50, %v1658_v50 }
 0x1c9   : > { %v1684_v56 = vsel %vm1606_vm15, %v1669_v36, 0.0  ;;  %v1672_v12 = vmul.f32 %v1659_v37, %v1659_v37  ;;  %v1662_v3 = vmul.f32 %v4694_v5, %v4753_v39  ;;  %v1673_v43 = vmul.f32 %v1660_v25, %v1660_v25 }
 0x1ca   : > { %v1683_v51 = vadd.f32 %v1682_v26, %v1681_v48  ;;  %v1686_v55 = vsel %vm1606_vm15, %v1670_v7, 0.0  ;;  %v1688_v49 = vsel %vm1606_vm15, %v1671_v35, 0.0  ;;  %v1663_v60 = vmul.f32 %v4710_v13, %v4755_v27 }
 0x1cb   : > { %v1674_v2 = vmul.f32 %v1661_v63, %v1661_v63  ;;  %v1690_v41 = vsel %vm1606_vm15, %v1672_v12, 0.0  ;;  %v1664_v42 = vmul.f32 %v4720_v58, %v4757_v59  ;;  %v1675_v11 = vmul.f32 %v1662_v3, %v1662_v3  ;;  %v1798_v63 = vld [vmem:[#allocation2 + $0x34] sm:$0x8] }
 0x1cc   : > { %v1685_v14 = vadd.f32 %v1684_v56, %v1683_v51  ;;  %v1692_v31 = vsel %vm1606_vm15, %v1673_v43, 0.0  ;;  %v1665_v34 = vmul.f32 %v4728_v62, %v4759_v53  ;;  %v1676_v61 = vmul.f32 %v1663_v60, %v1663_v60 }
 0x1cd   : > { %v1694_v0 = vsel %vm1606_vm15, %v1674_v2, 0.0  ;;  %v1677_v20 = vmul.f32 %v1664_v42, %v1664_v42  ;;  %v1696_v54 = vsel %vm1606_vm15, %v1675_v11, 0.0  ;;  %v1799_v12 = vsel %vm1797_vm6, 0, %v1798_v63 }
 0x1ce   : > { %v1687_v44 = vadd.f32 %v1686_v55, %v1685_v14  ;;  %v1678_v21 = vmul.f32 %v1665_v34, %v1665_v34  ;;  %v1698_v24 = vsel %vm1606_vm15, %v1676_v61, 0.0  ;;  %1800 = vst [vmem:[#allocation2 + $0x34] sm:$0x8] %v1799_v12  ;;  %v1748_v2 = vstv %s1592_s27 }
 0x1cf   : > { %v1700_v50 = vsel %vm1606_vm15, %v1677_v20, 0.0 }
 0x1d0   : > { %v1689_v29 = vadd.f32 %v1688_v49, %v1687_v44  ;;  %v1702_v30 = vsel %vm1630_vm5, %v1678_v21, 0.0 }
 0x1d2   : > { %v1691_v45 = vadd.f32 %v1690_v41, %v1689_v29 }
 0x1d4   : > { %v1693_v47 = vadd.f32 %v1692_v31, %v1691_v45 }
 0x1d6   : > { %v1695_v10 = vadd.f32 %v1694_v0, %v1693_v47 }
 0x1d8   : > { %v1697_v15 = vadd.f32 %v1696_v54, %v1695_v10 }
 0x1da   : > { %v1699_v4 = vadd.f32 %v1698_v24, %v1697_v15 }
 0x1dc   : > { %v1701_v36 = vadd.f32 %v1700_v50, %v1699_v4 }
 0x1de   : > { %v1703_v48 = vadd.f32 %v1702_v30, %v1701_v36 }
 0x1e0   : > { %v1704_v37 = vrot.slane %v1703_v48, 4 }
 0x1e2   : > { %v1705_v7 = vadd.f32 %v1704_v37, %v1703_v48 }
 0x1e4   : > { %v1706_v26 = vrot.slane %v1705_v7, 2 }
 0x1e6   : > { %v1707_v51 = vadd.f32 %v1706_v26, %v1705_v7 }
 0x1e8   : > { %v1708_v25 = vrot.slane %v1707_v51, 1 }
 0x1ea   : > { %v1709_v35 = vadd.f32 %v1708_v25, %v1707_v51 }
 0x1ec   : > { %v1710_v56 = vmul.f32 0.015625, %v1709_v35 }
 0x1ee   : > { %v1711_v14 = vadd.f32 1e-05, %v1710_v56 }
 0x1f0   : > { %3857 = vrsqrt.f32 %v1711_v14  ;;  %vm1718_vm12 = vweird.f32 %v1711_v14 }
 0x1f6   : > { %v3858_v55 = vpop.eup %3857 }
 0x1f7   : > { %v1713_v44 = vmul.f32 %v3858_v55, %v1711_v14  ;;  %vm1719_vm11 = vweird.f32 %v3858_v55 }
 0x1f8   : > { %vm1720_vm10 = vmor %vm1718_vm12, %vm1719_vm11 }
 0x1f9   : > { %v1714_v3 = vmul.f32 %v3858_v55, %v1713_v44 }
 0x1fb   : > { %v1715_v43 = vmul.f32 0.5, %v1714_v3 }
 0x1fd   : > { %v1716_v49 = vsub.f32 1.5, %v1715_v43 }
 0x1ff   : > { %v1717_v29 = vmul.f32 %v3858_v55, %v1716_v49 }
 0x201   : > { %v1721_v60 = vsel %vm1720_vm10, %v3858_v55, %v1717_v29 }
 0x202   : > { %v1722_v41 = vmul.f32 %v1721_v60, %v4735_v6  ;;  %v1723_v45 = vmul.f32 %v1721_v60, %v4738_v19  ;;  %v1724_v42 = vmul.f32 %v1721_v60, %v4741_v52  ;;  %v1725_v11 = vmul.f32 %v1721_v60, %v4744_v28 }
 0x203   : > { %v1726_v31 = vmul.f32 %v1721_v60, %v4766_v8  ;;  %v1727_v47 = vmul.f32 %v1721_v60, %v4771_v40  ;;  %v1728_v34 = vmul.f32 %v1721_v60, %v4776_v18  ;;  %v1729_v61 = vmul.f32 %v1721_v60, %v4747_v1 }
 0x204   : > { %v1730_v0 = vmul.f32 %v1721_v60, %v4750_v46  ;;  %v1731_v10 = vmul.f32 %v1721_v60, %v4753_v39  ;;  %v1732_v6 = vmul.f32 %v1721_v60, %v4755_v27  ;;  %v1733_v19 = vmul.f32 %v1721_v60, %v4757_v59 }
 0x205   : > { %v1734_v52 = vmul.f32 %v1721_v60, %v4759_v53  ;;  %vm1735_vm14 = vcmp.ge.f32.partialorder %v1722_v41, 0.0  ;;  %vm1736_vm4 = vcmp.ge.f32.partialorder %v1723_v45, 0.0  ;;  %vm1737_vm7 = vcmp.ge.f32.partialorder %v1724_v42, 0.0 }
 0x206   : > { %vm1738_vm13 = vcmp.ge.f32.partialorder %v1725_v11, 0.0  ;;  %vm1739_vm0 = vcmp.ge.f32.partialorder %v1726_v31, 0.0  ;;  %vm1740_vm2 = vcmp.ge.f32.partialorder %v1727_v47, 0.0  ;;  %vm1741_vm8 = vcmp.ge.f32.partialorder %v1728_v34, 0.0 }
 0x207   : > { %vm1742_vm9 = vcmp.ge.f32.partialorder %v1729_v61, 0.0  ;;  %vm1743_vm6 = vcmp.ge.f32.partialorder %v1730_v0, 0.0  ;;  %vm1744_vm11 = vcmp.ge.f32.partialorder %v1731_v10, 0.0  ;;  %vm1745_vm12 = vcmp.ge.f32.partialorder %v1732_v6, 0.0 }
 0x208   : > { %vm1746_vm10 = vcmp.ge.f32.partialorder %v1733_v19, 0.0  ;;  %vm1747_vm3 = vcmp.ge.f32.partialorder %v1734_v52, 0.0  ;;  %v1749_v28 = vmul.f32 %v1748_v2, %v1722_v41  ;;  %v1750_v1 = vmul.f32 %v1748_v2, %v1723_v45 }
 0x209   : > { %v1751_v46 = vmul.f32 %v1748_v2, %v1724_v42  ;;  %v1752_v39 = vmul.f32 %v1748_v2, %v1725_v11  ;;  %v1753_v27 = vmul.f32 %v1748_v2, %v1726_v31  ;;  %v1754_v59 = vmul.f32 %v1748_v2, %v1727_v47 }
 0x20a   : > { %v1755_v53 = vmul.f32 %v1748_v2, %v1728_v34  ;;  %v1756_v8 = vmul.f32 %v1748_v2, %v1729_v61  ;;  %v1757_v40 = vmul.f32 %v1748_v2, %v1730_v0  ;;  %v1758_v18 = vmul.f32 %v1748_v2, %v1731_v10 }
 0x20b   : > { %v1759_v20 = vmul.f32 %v1748_v2, %v1732_v6  ;;  %v1760_v54 = vmul.f32 %v1748_v2, %v1733_v19  ;;  %v1761_v15 = vmul.f32 %v1748_v2, %v1734_v52  ;;  %v1762_v21 = vsel %vm1735_vm14, %v1722_v41, %v1749_v28 }
 0x20c   : > { %v1763_v24 = vsel %vm1736_vm4, %v1723_v45, %v1750_v1  ;;  %v1764_v4 = vsel %vm1737_vm7, %v1724_v42, %v1751_v46  ;;  %v1765_v50 = vsel %vm1738_vm13, %v1725_v11, %v1752_v39  ;;  %v1766_v36 = vsel %vm1739_vm0, %v1726_v31, %v1753_v27 }
 0x20d   : > { %v1767_v30 = vsel %vm1740_vm2, %v1727_v47, %v1754_v59  ;;  %v1768_v48 = vsel %vm1741_vm8, %v1728_v34, %v1755_v53  ;;  %v1769_v37 = vsel %vm1742_vm9, %v1729_v61, %v1756_v8  ;;  %v1770_v7 = vsel %vm1743_vm6, %v1730_v0, %v1757_v40 }
 0x20e   : > { %v1771_v26 = vsel %vm1744_vm11, %v1731_v10, %v1758_v18  ;;  %v1772_v51 = vsel %vm1745_vm12, %v1732_v6, %v1759_v20  ;;  %v1773_v25 = vsel %vm1746_vm10, %v1733_v19, %v1760_v54  ;;  %v1774_v35 = vsel %vm1747_vm3, %v1734_v52, %v1761_v15 }
 0x20f   : > { %v1775_v56 = vmul.f32 %v4526_v9, %v1762_v21  ;;  %v1776_v14 = vmul.f32 %v4477_v33, %v1763_v24  ;;  %v1777_v63 = vmul.f32 %v4541_v16, %v1764_v4  ;;  %v1778_v12 = vmul.f32 %v4563_v32, %v1765_v50 }
 0x210   : > { %v1779_v55 = vmul.f32 %v4598_v57, %v1766_v36  ;;  %v1780_v44 = vmul.f32 %v4619_v38, %v1767_v30  ;;  %v1781_v3 = vmul.f32 %v4635_v17, %v1768_v48  ;;  %v1782_v43 = vmul.f32 %v4638_v22, %v1769_v37 }
 0x211   : > { %vm1816_vm14 = vsmask.f32 5392  ;;  %v1783_v49 = vmul.f32 %v4674_v23, %v1770_v7  ;;  %v1784_v29 = vmul.f32 %v4694_v5, %v1771_v26  ;;  %v1785_v60 = vmul.f32 %v4710_v13, %v1772_v51 }
 0x212   : > { %v1786_v2 = vmul.f32 %v4720_v58, %v1773_v25  ;;  %v1787_v41 = vmul.f32 %v4728_v62, %v1774_v35  ;;  %vm1790_vm3 = vsmask.f32 1280  ;;  %v1803_v45 = vpack.c.bf16 %v1775_v56, %v1775_v56 }
 0x213   : > { %v1804_v42 = vpack.c.bf16 %v1776_v14, %v1776_v14  ;;  %v1805_v11 = vpack.c.bf16 %v1777_v63, %v1777_v63  ;;  %v1806_v31 = vpack.c.bf16 %v1778_v12, %v1778_v12  ;;  %v1807_v47 = vpack.c.bf16 %v1779_v55, %v1779_v55  ;;  %vm4864_vm4 = vmor %vm1790_vm3, %vm1816_vm14 }
 0x214   : > { %v1808_v34 = vpack.c.bf16 %v1780_v44, %v1780_v44  ;;  %v1809_v61 = vpack.c.bf16 %v1781_v3, %v1781_v3  ;;  %v1810_v0 = vpack.c.bf16 %v1782_v43, %v1782_v43  ;;  %v1811_v10 = vpack.c.bf16 %v1783_v49, %v1783_v49 }
 0x215   : > { %v4848_v6 = vpack.c.bf16 %v1784_v29, %v1784_v29  ;;  %v4850_v19 = vpack.c.bf16 %v1785_v60, %v1785_v60  ;;  %v4852_v52 = vpack.c.bf16 %v1786_v2, %v1786_v2  ;;  %v4854_v28 = vpack.c.bf16 %v1787_v41, %v1787_v41 }
 0x216   : > { %v1819_v1 = vshrl.u32 %v1803_v45, 16  ;;  %v1822_v46 = vshll.u32 %v1803_v45, 16  ;;  %v1828_v39 = vshrl.u32 %v1804_v42, 16  ;;  %v1831_v27 = vshll.u32 %v1804_v42, 16 }
 0x217   : > { %v1838_v59 = vshrl.u32 %v1805_v11, 16  ;;  %v1841_v53 = vshll.u32 %v1805_v11, 16  ;;  %v1848_v18 = vshrl.u32 %v1806_v31, 16  ;;  %v1851_v20 = vshll.u32 %v1806_v31, 16 }
 0x218   : > { %v4856_v8 = vrot.slane %v1819_v1, 6  ;;  %v4858_v40 = vrot.slane %v1822_v46, 7  ;;  %v1830_v54 = vrot.slane %v1828_v39, 6  ;;  %v1833_v15 = vrot.slane %v1831_v27, 7 }
 0x219   : > { %v1840_v21 = vrot.slane %v1838_v59, 6  ;;  %v1843_v24 = vrot.slane %v1841_v53, 7  ;;  %v1850_v4 = vrot.slane %v1848_v18, 6  ;;  %v1853_v50 = vrot.slane %v1851_v20, 7 }
 0x21a   : > { %v1858_v36 = vshrl.u32 %v1807_v47, 16  ;;  %v1861_v30 = vshll.u32 %v1807_v47, 16  ;;  %v4860_v48 = vor.u32 %v1833_v15, %v1830_v54  ;;  %v1868_v7 = vshrl.u32 %v1808_v34, 16 }
 0x21b   : > { %v1844_v37 = vor.u32 %v1843_v24, %v1840_v21  ;;  %v1871_v26 = vshll.u32 %v1808_v34, 16  ;;  %v1854_v25 = vor.u32 %v1853_v50, %v1850_v4  ;;  %v1878_v14 = vshrl.u32 %v1809_v61, 16 }
 0x21c   : > { %v1860_v35 = vrot.slane %v1858_v36, 6  ;;  %v1863_v56 = vrot.slane %v1861_v30, 7  ;;  %v1836_v63 = vrot.slane %v4860_v48, 4  ;;  %v1870_v55 = vrot.slane %v1868_v7, 6 }
 0x21d   : > { %v1846_v12 = vrot.slane %v1844_v37, 4  ;;  %v1873_v44 = vrot.slane %v1871_v26, 7  ;;  %v1856_v3 = vrot.slane %v1854_v25, 4  ;;  %v1880_v49 = vrot.slane %v1878_v14, 6 }
 0x21e   : > { %v1864_v43 = vor.u32 %v1863_v56, %v1860_v35  ;;  %v1881_v29 = vshll.u32 %v1809_v61, 16  ;;  %v1845_v60 = vsel %vm4864_vm4, %v1836_v63, %v1844_v37  ;;  %v1888_v45 = vshrl.u32 %v1810_v0, 16  ;;  %v2006_v35 = vld [vmem:[%s5581_s4] sm:$0xf] }
 0x21f   : > { %v1855_v2 = vsel %vm4864_vm4, %v1846_v12, %v1854_v25  ;;  %v1874_v41 = vor.u32 %v1873_v44, %v1870_v55  ;;  %v1891_v47 = vshll.u32 %v1810_v0, 16  ;;  %v1898_v46 = vshrl.u32 %v1811_v10, 16  ;;  %1966 = vst.msk [vmem:[#allocation2 + $0xc] sm:$0xf] %vm1630_vm5, %v1845_v60  ;;  %v2007_v25 = vld [vmem:[%s5581_s4 + $0x4] sm:$0xf] }
 0x220   : > { %v1865_v42 = vsel %vm4864_vm4, %v1856_v3, %v1864_v43  ;;  %v1866_v11 = vrot.slane %v1864_v43, 4  ;;  %v1883_v31 = vrot.slane %v1881_v29, 7  ;;  %1967 = vst.msk [vmem:[#allocation2 + $0x10] sm:$0xf] %vm1630_vm5, %v1855_v2  ;;  %v1890_v1 = vrot.slane %v1888_v45, 6 }
 0x221   : > { %v1876_v34 = vrot.slane %v1874_v41, 4  ;;  %v1901_v61 = vshll.u32 %v1811_v10, 16  ;;  %1968 = vst.msk [vmem:[#allocation2 + $0x14] sm:$0xf] %vm1630_vm5, %v1865_v42  ;;  %v1893_v59 = vrot.slane %v1891_v47, 7  ;;  %v1908_v53 = vshrl.u32 %v4848_v6, 16 }
 0x222   : > { %v1875_v39 = vsel %vm4864_vm4, %v1866_v11, %v1874_v41  ;;  %v1884_v27 = vor.u32 %v1883_v31, %v1880_v49  ;;  %v1900_v18 = vrot.slane %v1898_v46, 6  ;;  %v1911_v0 = vshll.u32 %v4848_v6, 16  ;;  %v2229_v3 = vld [vmem:[%s5581_s4 + $0x8] sm:$0xf]  ;;  %v2326_v2 = vld [vmem:[%s5581_s4 + $0xc] sm:$0xf] }
 0x223   : > { %v1903_v20 = vrot.slane %v1901_v61, 7  ;;  %v1918_v54 = vshrl.u32 %v4850_v19, 16  ;;  %1969 = vst.msk [vmem:[#allocation2 + $0x18] sm:$0xf] %vm1630_vm5, %v1875_v39  ;;  %v1894_v21 = vor.u32 %v1893_v59, %v1890_v1  ;;  %v1910_v24 = vrot.slane %v1908_v53, 6 }
 0x224   : > { %v1885_v10 = vsel %vm4864_vm4, %v1876_v34, %v1884_v27  ;;  %v1886_v15 = vrot.slane %v1884_v27, 4  ;;  %v1913_v50 = vrot.slane %v1911_v0, 7  ;;  %v1921_v30 = vshll.u32 %v4850_v19, 16  ;;  %v1792_v42 = vld [vmem:[#allocation2 + $0x4] sm:$0x3] }
 0x225   : > { %v1904_v4 = vor.u32 %v1903_v20, %v1900_v18  ;;  %v1920_v36 = vrot.slane %v1918_v54, 6  ;;  %1970 = vst.msk [vmem:[#allocation2 + $0x1c] sm:$0xf] %vm1630_vm5, %v1885_v10  ;;  %v1896_v37 = vrot.slane %v1894_v21, 4  ;;  %v1928_v7 = vshrl.u32 %v4852_v52, 16 }
 0x226   : > { %v1895_v6 = vsel %vm4864_vm4, %v1886_v15, %v1894_v21  ;;  %v1931_v26 = vshll.u32 %v4852_v52, 16  ;;  %v1914_v19 = vor.u32 %v1913_v50, %v1910_v24  ;;  %v1923_v14 = vrot.slane %v1921_v30, 7  ;;  %v2433_v1 = vld [vmem:[%s5581_s4 + $0x10] sm:$0xf] }
 0x227   : > { %v1906_v56 = vrot.slane %v1904_v4, 4  ;;  %v1938_v63 = vshrl.u32 %v4854_v28, 16  ;;  %1971 = vst.msk [vmem:[#allocation2 + $0x20] sm:$0xf] %vm1630_vm5, %v1895_v6  ;;  %v1905_v12 = vsel %vm4864_vm4, %v1896_v37, %v1904_v4  ;;  %v1930_v55 = vrot.slane %v1928_v7, 6 }
 0x228   : > { %v1933_v52 = vrot.slane %v1931_v26, 7  ;;  %v1941_v44 = vshll.u32 %v4854_v28, 16  ;;  %v1916_v49 = vrot.slane %v1914_v19, 4  ;;  %v1924_v29 = vor.u32 %v1923_v14, %v1920_v36  ;;  %1972 = vst.msk [vmem:[#allocation2 + $0x24] sm:$0xf] %vm1630_vm5, %v1905_v12 }
 0x229   : > { %v1915_v43 = vsel %vm4864_vm4, %v1906_v56, %v1914_v19  ;;  %v1940_v60 = vrot.slane %v1938_v63, 6  ;;  %vm1977_vm7 = vsmask.f32 3328  ;;  %v1979_v28 = vld [vmem:[#allocation2 + $0x34] sm:$0xf]  ;;  %vm2118_vm13 = vcmask 1043456  }
 0x22a   : > { %v1934_v41 = vor.u32 %v1933_v52, %v1930_v55  ;;  %v1943_v45 = vrot.slane %v1941_v44, 7  ;;  %1973 = vst.msk [vmem:[#allocation2 + $0x28] sm:$0xf] %vm1630_vm5, %v1915_v43  ;;  %v1925_v11 = vsel %vm4864_vm4, %v1916_v49, %v1924_v29  ;;  %v1926_v31 = vrot.slane %v1924_v29, 4  ;;  %vm4922_vm0 = vmand %vm1630_vm5, %vm1977_vm7  ;;  %v4949_v4 = vld [vmem:[#allocation2 + $0x14] sm:$0xff]  }
 0x22b   : > { %v2120_v47 = vsel %vm2118_vm13, %v2007_v25, 0  ;;  %v2184_v34 = vsel %vm2118_vm13, %v2006_v35, 0  ;;  %1974 = vst.msk [vmem:[#allocation2 + $0x2c] sm:$0xf] %vm1630_vm5, %v1925_v11  ;;  %v2268_v27 = vsel %vm2118_vm13, %v2229_v3, 0  ;;  %v3897_v53 = vmov 0  }
 0x22c   : > { %v1936_v46 = vrot.slane %v1934_v41, 4  ;;  %v1944_v61 = vor.u32 %v1943_v45, %v1940_v60  ;;  %2129 = vmatpush.bf16.msra.mxu1 %v2120_v47  ;;  %2193 = vmatpush.bf16.msrb.mxu2 %v2184_v34  ;;  %v1935_v59 = vsel %vm4864_vm4, %v1926_v31, %v1934_v41  ;;  %1788 = vst.msk [vmem:[#allocation2] sm:$0xf] %vm1630_vm5, %v3897_v53  ;;  %vm1789_vm2 = vcmask 58368   ;;  %v4956_v6 = vld [vmem:[#allocation2 + $0x18] sm:$0xff]  }
 0x22d   : > { %2277 = vmatpush.bf16.msrb.mxu3 %v2268_v27  ;;  %v1825_v18 = vor.u32 %v4858_v40, %v4856_v8  ;;  %1975 = vst.msk [vmem:[#allocation2 + $0x30] sm:$0xf] %vm1630_vm5, %v1935_v59  ;;  %vm1791_vm8 = vmand %vm1789_vm2, %vm1790_vm3  ;;  %v2375_v0 = vsel %vm2118_vm13, %v2326_v2, 0  ;;  %v2522_v54 = vsel %vm2118_vm13, %v2433_v1, 0  ;;  %vm1959_vm9 = vcmask 60417   ;;  %v4947_v40 = vld [vmem:[#allocation2 + $0x10] sm:$0xff]  }
 0x22e   : > { %v1945_v20 = vsel %vm4864_vm4, %v1936_v46, %v1944_v61  ;;  %v1793_v15 = vsel %vm1791_vm8, 0, %v1792_v42  ;;  %1802 = vst.msk [vmem:[#allocation2 + $0x3c] sm:$0xf] %vm1630_vm5, %v3897_v53  ;;  %2384 = vmatpush.bf16.msrb.mxu0 %v2375_v0  ;;  %vm1960_vm6 = vsmask.f32 7942  ;;  %v3696_v36 = vunpack.c.l.b16 %v4947_v40 }
 0x22f   : > { %v1980_v10 = vsel %vm4922_vm0, %v1945_v20, %v1979_v28  ;;  %v1826_v21 = vrot.slane %v1825_v18, 4  ;;  %1794 = vst [vmem:[#allocation2 + $0x4] sm:$0x3] %v1793_v15  ;;  %vm1961_vm11 = vmand %vm1959_vm9, %vm1960_vm6  ;;  %v2058_v30 = vshll.u32 %v4947_v40, 16  ;;  %v2062_v51 = vshrl.u32 %v4947_v40, 16  ;;  %v4961_v7 = vld [vmem:[#allocation2 + $0x20] sm:$0xff]  }
 0x230   : > { %2531 = vmatpush.bf16.msrb.mxu1 %v2522_v54  ;;  %1981 = vst [vmem:[#allocation2 + $0x34] sm:$0xf] %v1980_v10  ;;  %v2236_v35 = vrot.slane %v4947_v40, 1  ;;  %v5596_v56 = vrot.slane %v4949_v4, 1  ;;  %vm2041_vm12 = vsmask.f32 7424 }
 0x231   : > { %v1835_v8 = vsel %vm4864_vm4, %v1826_v21, %v4860_v48  ;;  %1801 = vst.msk [vmem:[#allocation2 + $0x38] sm:$0xf] %vm1630_vm5, %v3897_v53  ;;  %v2792_v63 = vrot.slane %v2058_v30, 3  ;;  %v2066_v12 = vshll.u32 %v4956_v6, 16  ;;  %v2791_v55 = vrot.slane %v2062_v51, 2 }
 0x232   : > { %1965 = vst.msk [vmem:[#allocation2 + $0x8] sm:$0xf] %vm1630_vm5, %v1835_v8  ;;  %v4966_v19 = vld [vmem:[#allocation2 + $0x28] sm:$0xff]   ;;  %v5595_v52 = vshrl.u32 %v4956_v6, 16  ;;  %v5594_v44 = vshll.u32 %v4961_v7, 16  ;;  %v5593_v3 = vshrl.u32 %v4961_v7, 16 }
 0x233   : > { %v3760_v49 = vld [vmem:[#allocation2] sm:$0xe]  ;;  %v5591_v2 = vshll.u32 %v4966_v19, 16  ;;  %v5590_v41 = vshrl.u32 %v4966_v19, 16  ;;  %v4989_v46 = vor.u32 %v2792_v63, %v2791_v55  ;;  %v5589_v53 = vrot.slane %v4947_v40, 2 }
 0x234   : > { %vm5652_vm10 = vcmask 1046528   ;;  %vm2437_vm14 = vsmask.f32 6400  ;;  %vm2782_vm4 = vsmask.f32 5376  ;;  %vm5656_vm8 = vcmask 1044480  }
 0x235   : > { %vm5653_vm3 = vmmov %vm5652_vm10 }
 0x236   : > { %v1962_v24 = vld [vmem:[#allocation2 + $0x4] sm:$0xe]  ;;  %vm5654_vm7 = vmmov %vm5653_vm3 }
 0x237   : > { %v1963_v50 = vsel %vm1961_vm11, %v1825_v18, %v1962_v24  ;;  %vm5655_vm0 = vmmov %vm5653_vm3 }
 0x238   : > { %1964 = vst [vmem:[#allocation2 + $0x4] sm:$0xe] %v1963_v50  ;;  %vm5657_vm9 = vmmov %vm5656_vm8 }
 0x239   : > { %v4954_v48 = vld [vmem:[#allocation2 + $0x8] sm:$0xff]   ;;  %vm5658_vm6 = vmmov %vm5655_vm0 }
 0x23a   : > { %v4959_v37 = vunpack.c.h.b16 %v4954_v48  ;;  %v2002_v26 = vld [vmem:[#allocation2 + $0x8] sm:$0xc]  ;;  %v2050_v25 = vshll.u32 %v4954_v48, 16  ;;  %v2234_v29 = vrot.slane %v4954_v48, 1  ;;  %v3692_v60 = vunpack.c.l.b16 %v4954_v48  ;;  %vm5660_vm11 = vmmov %vm5655_vm0 }
 0x23b   : > { %v2680_v43 = vunpack.c.l.b16 %v2002_v26 }
 0x23c   : > { %v4969_v14 = vpack.c.b16 %v3696_v36, %v4959_v37  ;;  %v4983_v45 = vrot.slane %v2050_v25, 1 }
 0x23d   : > { %v2682_v11 = vpack.c.b16 %v4959_v37, %v2680_v43 }
 0x23e   : > { %v2341_v28 = vrot.slane %v4969_v14, 1  ;;  %v2585_v42 = vrot.slane %v4969_v14, 2  ;;  %v2447_v1 = vshrl.u32 %v4969_v14, 16  ;;  %v2450_v54 = vshll.u32 %v4969_v14, 16 }
 0x23f   : > { %v3687_v31 = vld [vmem:[#allocation2] sm:$0xff]   ;;  %v2685_v0 = vrot.slane %v2682_v11, 2  ;;  %v2784_v26 = vshrl.u32 %v2682_v11, 16 }
 0x240   : > { %v3759_v47 = vld [vmem:[#allocation2] sm:$0xf0]  ;;  %v2045_v61 = vshll.u32 %v3687_v31, 16  ;;  %3559 = vmatmul.msk.bf16.vlgmr.msrb.gmra.mxu2 %vm1606_vm15, %v3687_v31  ;;  %v2043_v18 = vshrl.u32 %v3687_v31, 16  ;;  %v2449_v8 = vrot.slane %v2447_v1, 1  ;;  %v2452_v36 = vrot.slane %v2450_v54, 2 }
 0x241   : > { %v1997_v34 = vld [vmem:[#allocation2 + $0x4] sm:$0xe]  ;;  %v3761_v39 = vor.u32 %v3760_v49, %v3759_v47  ;;  %v4997_v50 = vsel %vm572_vm1, %v2685_v0, %v5589_v53  ;;  %v5008_v1 = vld [vmem:[#allocation2 + $0x1c] sm:$0xff]   ;;  %v2456_v54 = vshrl.u32 %v4949_v4, 16 }
 0x242   : > { %v2330_v27 = vunpack.c.l.b16 %v1997_v34  ;;  %v2001_v59 = vld [vmem:[#allocation2 + $0x4] sm:$0xc]  ;;  %v2047_v10 = vrot.slane %v2045_v61, 1 }
 0x243   : > { %v2582_v20 = vunpack.c.l.b16 %v2001_v59  ;;  %v2233_v15 = vrot.slane %v3761_v39, 1  ;;  %v2787_v39 = vshll.u32 %v2682_v11, 16 }
 0x244   : > { %v2333_v21 = vpack.c.b16 %v3692_v60, %v2330_v27  ;;  %v2048_v63 = vor.u32 %v2047_v10, %v2043_v18  ;;  %v2453_v18 = vor.u32 %v2452_v36, %v2449_v8  ;;  %v2459_v10 = vshll.u32 %v4949_v4, 16 }
 0x245   : > { %v2583_v24 = vpack.c.b16 %v3692_v60, %v2582_v20  ;;  %v2235_v25 = vsel %vm5652_vm10, %v2233_v15, %v2234_v29  ;;  %v2786_v60 = vrot.slane %v2784_v26, 2  ;;  %v2587_v20 = vrot.slane %v4949_v4, 2  ;;  %v5025_v26 = vld [vmem:[#allocation2 + $0x24] sm:$0xff]   ;;  %vm5662_vm10 = vmmov %vm5655_vm0 }
 0x246   : > { %v2340_v55 = vrot.slane %v2333_v21, 1  ;;  %v2439_v43 = vshrl.u32 %v2333_v21, 16  ;;  %3566 = vmatmul.msk.bf16.vlgmr.msrb.gmra.mxu3 %vm1606_vm15, %v2235_v25  ;;  %v2442_v31 = vshll.u32 %v2333_v21, 16  ;;  %v2053_v47 = vsel %vm2041_vm12, %v2048_v63, %v4983_v45 }
 0x247   : > { %v2584_v49 = vrot.slane %v2583_v24, 2  ;;  %3552 = vmatmul.msk.bf16.vlgmr.msra.gmra.mxu1 %vm1606_vm15, %v2053_v47  ;;  %v2789_v0 = vrot.slane %v2787_v39, 3  ;;  %v2795_v15 = vrot.slane %v5595_v52, 2  ;;  %v5021_v21 = vsel %vm572_vm1, %v2585_v42, %v2587_v20  ;;  %v5042_v39 = vld [vmem:[#allocation2 + $0x2c] sm:$0xff]  }
 0x248   : > { %v2342_v34 = vsel %vm5653_vm3, %v2340_v55, %v2341_v28  ;;  %v2441_v61 = vrot.slane %v2439_v43, 1  ;;  %v2444_v59 = vrot.slane %v2442_v31, 2  ;;  %v2796_v24 = vrot.slane %v2066_v12, 3  ;;  %vm5666_vm3 = vmmov %vm5655_vm0 }
 0x249   : > { %3573 = vmatmul.msk.bf16.vlgmr.msrb.gmra.mxu0 %vm1606_vm15, %v2342_v34  ;;  %v5013_v27 = vsel %vm572_vm1, %v2584_v49, %v2585_v42  ;;  %v2790_v8 = vor.u32 %v2789_v0, %v2786_v60  ;;  %v2458_v36 = vrot.slane %v2456_v54, 1  ;;  %v2461_v25 = vrot.slane %v2459_v10, 2 }
 0x24a   : > { %v2445_v11 = vor.u32 %v2444_v59, %v2441_v61  ;;  %v2589_v63 = vrot.slane %v5008_v1, 2  ;;  %v2054_v55 = vshrl.u32 %v4954_v48, 16  ;;  %v2797_v49 = vor.u32 %v2796_v24, %v2795_v15 }
 0x24b   : > { %v2465_v31 = vshrl.u32 %v5008_v1, 16  ;;  %v5035_v42 = vsel %vm2782_vm4, %v2790_v8, %v4989_v46  ;;  %v2462_v47 = vor.u32 %v2461_v25, %v2458_v36  ;;  %v2468_v60 = vshll.u32 %v5008_v1, 16 }
 0x24c   : > { %v5030_v43 = vsel %vm2437_vm14, %v2445_v11, %v2453_v18  ;;  %v5038_v34 = vsel %vm572_vm1, %v2587_v20, %v2589_v63  ;;  %v2056_v61 = vor.u32 %v2054_v55, %v4983_v45  ;;  %v5046_v59 = vsel %vm2782_vm4, %v4989_v46, %v2797_v49 }
 0x24d   : > { %v2467_v0 = vrot.slane %v2465_v31, 1  ;;  %v2799_v54 = vrot.slane %v5593_v3, 2  ;;  %v5051_v10 = vsel %vm2437_vm14, %v2453_v18, %v2462_v47  ;;  %v2470_v15 = vrot.slane %v2468_v60, 2 }
 0x24e   : > { %v2800_v20 = vrot.slane %v5594_v44, 3  ;;  %v2591_v11 = vrot.slane %v5025_v26, 2  ;;  %v5058_v45 = vrot.slane %v2058_v30, 1  ;;  %v2474_v46 = vshrl.u32 %v5025_v26, 16 }
 0x24f   : > { %v2477_v24 = vshll.u32 %v5025_v26, 16  ;;  %v2803_v8 = vrot.slane %v5590_v41, 2  ;;  %v2471_v18 = vor.u32 %v2470_v15, %v2467_v0  ;;  %v2804_v55 = vrot.slane %v5591_v2, 3  ;;  %v5077_v41 = vld [vmem:[#allocation2 + $0x30] sm:$0xff]   ;;  %v2004_v2 = vld [vmem:[#allocation2 + $0x3c] sm:$0x1] }
 0x250   : > { %3560 = vmatmul.msk.bf16.gmra.mxu2 %vm1606_vm15, %v4954_v48  ;;  %v2801_v36 = vor.u32 %v2800_v20, %v2799_v54  ;;  %v5067_v25 = vsel %vm572_vm1, %v2589_v63, %v2591_v11  ;;  %v2237_v30 = vsel %vm5654_vm7, %v2234_v29, %v2236_v35  ;;  %v2476_v31 = vrot.slane %v2474_v46, 1  ;;  %vm5668_vm7 = vmmov %vm5655_vm0 }
 0x251   : > { %v2479_v60 = vrot.slane %v2477_v24, 2  ;;  %v5592_v53 = vrot.slane %v5042_v39, 2  ;;  %v2061_v0 = vsel %vm2041_vm12, %v2056_v61, %v5058_v45  ;;  %v5082_v63 = vsel %vm2437_vm14, %v2462_v47, %v2471_v18  ;;  %v2003_v24 = vld [vmem:[#allocation2 + $0x38] sm:$0xf] }
 0x252   : > { %v5085_v54 = vsel %vm2782_vm4, %v2797_v49, %v2801_v36  ;;  %v2805_v15 = vor.u32 %v2804_v55, %v2803_v8  ;;  %v2483_v29 = vshrl.u32 %v5042_v39, 16  ;;  %v2486_v46 = vshll.u32 %v5042_v39, 16  ;;  %v2005_v8 = vld [vmem:[#allocation2 + $0x8] sm:$0x8] }
 0x253   : > { %v2480_v20 = vor.u32 %v2479_v60, %v2476_v31  ;;  %v5090_v48 = vsel %vm572_vm1, %v2591_v11, %v5592_v53  ;;  %v2344_v49 = vsel %vm5655_vm0, %v2341_v28, %v5596_v56  ;;  %v2808_v61 = vshrl.u32 %v5077_v41, 16 }
 0x254   : > { %v5100_v47 = vsel %vm2782_vm4, %v2801_v36, %v2805_v15  ;;  %v2811_v11 = vshll.u32 %v5077_v41, 16  ;;  %v2485_v31 = vrot.slane %v2483_v29, 1  ;;  %v2488_v60 = vrot.slane %v2486_v46, 2 }
 0x255   : > { %v5106_v55 = vsel %vm2437_vm14, %v2471_v18, %v2480_v20  ;;  %v3713_v53 = vunpack.c.h.b16 %v5077_v41  ;;  %v2810_v14 = vrot.slane %v2808_v61, 2  ;;  %v5109_v28 = vunpack.c.l.b16 %v2003_v24 }
 0x256   : > { %3567 = vmatmul.msk.bf16.gmra.mxu3 %vm1606_vm15, %v2237_v30  ;;  %v2813_v3 = vrot.slane %v2811_v11, 3  ;;  %v2780_v36 = vunpack.c.l.b16 %v2004_v2  ;;  %v2489_v44 = vor.u32 %v2488_v60, %v2485_v31  ;;  %v2907_v30 = vunpack.c.l.b16 %v2005_v8 }
 0x257   : > { %3553 = vmatmul.msk.bf16.gmra.mxu1 %vm1606_vm15, %v2061_v0  ;;  %v5113_v52 = vpack.c.b16 %v3713_v53, %v3713_v53  ;;  %v2918_v11 = vrot.slane %v5077_v41, 3 }
 0x258   : > { %v5115_v56 = vor.u32 %v2813_v3, %v2810_v14  ;;  %v5118_v18 = vsel %vm2437_vm14, %v2480_v20, %v2489_v44  ;;  %v5127_v0 = vpack.c.b16 %v2780_v36, %v5109_v28  ;;  %v2910_v20 = vrot.slane %v4947_v40, 3 }
 0x259   : > { %3574 = vmatmul.msk.bf16.gmra.mxu0 %vm1606_vm15, %v2344_v49  ;;  %v2492_v29 = vshrl.u32 %v5113_v52, 16  ;;  %v2495_v46 = vshll.u32 %v5113_v52, 16  ;;  %v2908_v49 = vpack.c.b16 %v4959_v37, %v2907_v30  ;;  %v2238_v37 = vrot.slane %v4956_v6, 1 }
 0x25a   : > { %v5124_v2 = vsel %vm2782_vm4, %v2805_v15, %v5115_v56  ;;  %v5597_v8 = vrot.slane %v5127_v0, 3  ;;  %v2345_v14 = vrot.slane %v5008_v1, 1  ;;  %v2068_v30 = vrot.slane %v2066_v12, 1 }
 0x25b   : > { %v2494_v24 = vrot.slane %v2492_v29, 1  ;;  %v2497_v53 = vrot.slane %v2495_v46, 2  ;;  %v2909_v61 = vrot.slane %v2908_v49, 3  ;;  %v2239_v36 = vsel %vm5658_vm6, %v2236_v35, %v2238_v37 }
 0x25c   : > { %v5152_v60 = vsel %vm5657_vm9, %v2918_v11, %v5597_v8  ;;  %v5659_v46 = vrot.slane %v4949_v4, 1  ;;  %v5661_v35 = vshrl.u32 %v4956_v6, 16  ;;  %v2347_v1 = vrot.slane %v5025_v26, 1 }
 0x25d   : > { %v5130_v3 = vor.u32 %v2497_v53, %v2494_v24  ;;  %v5142_v31 = vsel %vm5656_vm8, %v2909_v61, %v2910_v20  ;;  %v5663_v4 = vshll.u32 %v4961_v7, 16  ;;  %v2242_v26 = vrot.slane %v4966_v19, 1  ;;  %vm5670_vm8 = vmmov %vm5655_vm0 }
 0x25e   : > { %v2346_v24 = vsel %vm5660_vm11, %v5659_v46, %v2345_v14  ;;  %v2072_v12 = vor.u32 %v5661_v35, %v2068_v30  ;;  %v5667_v46 = vshll.u32 %v4966_v19, 16 }
 0x25f   : > { %v5137_v15 = vsel %vm2437_vm14, %v2489_v44, %v5130_v3  ;;  %v2064_v44 = vor.u32 %v2062_v51, %v5058_v45  ;;  %v2240_v51 = vrot.slane %v4961_v7, 1  ;;  %v2076_v53 = vrot.slane %v5663_v4, 1  ;;  %vm5664_vm14 = vmmov %vm5655_vm0  ;;  %v2580_v4 = vld [vmem:[%s5581_s4 + $0x14] sm:$0xf] }
 0x260   : > { %3561 = vmatmul.msk.bf16.gmra.mxu2 %vm1606_vm15, %v4947_v40  ;;  %v2348_v61 = vsel %vm5664_vm14, %v2345_v14, %v2347_v1  ;;  %v2084_v14 = vrot.slane %v5667_v46, 1 }
 0x261   : > { %v2069_v29 = vsel %vm2041_vm12, %v2064_v44, %v2068_v30  ;;  %v2241_v45 = vsel %vm5662_vm10, %v2238_v37, %v2240_v51  ;;  %v2077_v49 = vsel %vm2041_vm12, %v2072_v12, %v2076_v53  ;;  %v5665_v37 = vshrl.u32 %v4961_v7, 16  ;;  %v1995_v30 = vld [vmem:[#allocation2 + $0x30] sm:$0x7] }
 0x262   : > { %v2033_v12 = vunpack.c.l.b16 %v1995_v30 }
 0x263   : > { %v2080_v44 = vor.u32 %v5665_v37, %v2076_v53  ;;  %v2619_v53 = vsel %vm2118_vm13, %v2580_v4, 0 }
 0x264   : > { %2628 = vmatpush.bf16.msra.mxu2 %v2619_v53 }
 0x266   : > { %3568 = vmatmul.msk.bf16.gmra.mxu3 %vm1606_vm15, %v2239_v36  ;;  %v2349_v36 = vrot.slane %v5042_v39, 1 }
 0x267   : > { %3554 = vmatmul.msk.bf16.gmra.mxu1 %vm1606_vm15, %v2069_v29  ;;  %v2243_v29 = vsel %vm5666_vm3, %v2240_v51, %v2242_v26  ;;  %v2677_v51 = vld [vmem:[%s5581_s4 + $0x18] sm:$0xf] }
 0x268   : > { %v2350_v35 = vsel %vm5668_vm7, %v2347_v1, %v2349_v36  ;;  %v2040_v1 = vpack.c.b16 %v2033_v12, %v2033_v12  ;;  %v2778_v12 = vld [vmem:[%s5581_s4 + $0x1c] sm:$0xf] }
 0x269   : > { %3575 = vmatmul.msk.bf16.gmra.mxu0 %vm1606_vm15, %v2346_v24  ;;  %v2085_v24 = vsel %vm2041_vm12, %v2080_v44, %v2084_v14 }
 0x26a   : > { %v2090_v37 = vshll.u32 %v2040_v1, 16  ;;  %v2244_v30 = vrot.slane %v2040_v1, 1 }
 0x270   : > { %3562 = vmatmul.msk.bf16.gmra.mxu2 %vm1606_vm15, %v4956_v6 }
 0x276   : > { %3569 = vmatmul.msk.bf16.gmra.mxu3 %vm1606_vm15, %v2241_v45  ;;  %v1999_v45 = vld [vmem:[#allocation2 + $0x34] sm:$0x7] }
 0x277   : > { %3555 = vmatmul.msk.bf16.gmra.mxu1 %vm1606_vm15, %v2077_v49  ;;  %v2720_v49 = vsel %vm2118_vm13, %v2677_v51, 0  ;;  %v2847_v51 = vsel %vm2118_vm13, %v2778_v12, 0 }
 0x278   : > { %2729 = vmatpush.bf16.msra.mxu3 %v2720_v49  ;;  %2856 = vmatpush.bf16.msra.mxu0 %v2847_v51 }
 0x279   : > { %3576 = vmatmul.msk.bf16.gmra.mxu0 %vm1606_vm15, %v2348_v61  ;;  %v2332_v61 = vunpack.c.l.b16 %v1999_v45 }
 0x27b   : > { %v2339_v44 = vpack.c.b16 %v2332_v61, %v2332_v61 }
 0x27d   : > { %v2351_v46 = vrot.slane %v2339_v44, 1 }
 0x27f   : > { %v2352_v4 = vsel %vm5670_vm8, %v2349_v36, %v2351_v46 }
 0x280   : > { %3563 = vmatmul.msk.bf16.gmra.mxu2 %vm1606_vm15, %v4961_v7 }
 0x286   : > { %3570 = vmatmul.msk.bf16.gmra.mxu3 %vm1606_vm15, %v2243_v29  ;;  %v2092_v29 = vrot.slane %v2090_v37, 1 }
 0x287   : > { %3556 = vmatmul.msk.bf16.gmra.mxu1 %vm1606_vm15, %v2085_v24  ;;  %v2245_v24 = vsel %vm5655_vm0, %v2242_v26, %v2244_v30  ;;  %v1994_v26 = vld [vmem:[#allocation2 + $0x30] sm:$0x3] }
 0x288   : > { %v2166_v49 = vunpack.c.l.b16 %v1994_v26 }
 0x289   : > { %3577 = vmatmul.msk.bf16.gmra.mxu0 %vm1606_vm15, %v2350_v35  ;;  %v5669_v35 = vshrl.u32 %v4966_v19, 16 }
 0x28a   : > { %v2167_v61 = vpack.c.b16 %v2166_v49, %v2166_v49 }
 0x28b   : > { %v2088_v8 = vor.u32 %v5669_v35, %v2084_v14  ;;  %v2905_v14 = vld [vmem:[%s5581_s4 + $0x20] sm:$0xf] }
 0x28c   : > { %v2944_v53 = vsel %vm2118_vm13, %v2905_v14, 0 }
 0x28d   : > { %v2093_v45 = vsel %vm2041_vm12, %v2088_v8, %v2092_v29  ;;  %2953 = vmatpush.bf16.msra.mxu1 %v2944_v53  ;;  %v2094_v8 = vshrl.u32 %v2040_v1, 16  ;;  %v2688_v1 = vrot.slane %v4956_v6, 2 }
 0x28f   : > { %v2096_v36 = vor.u32 %v2094_v8, %v2092_v29 }
 0x290   : > { %3564 = vmatmul.msk.bf16.gmra.mxu2 %vm1606_vm15, %v4966_v19 }
 0x296   : > { %3571 = vmatmul.msk.bf16.gmra.mxu3 %vm1606_vm15, %v2245_v24 }
 0x297   : > { %3557 = vmatmul.msk.bf16.gmra.mxu1 %vm1606_vm15, %v2093_v45 }
 0x299   : > { %3578 = vmatmul.msk.bf16.gmra.mxu0 %vm1606_vm15, %v2352_v4  ;;  %v2690_v4 = vrot.slane %v4961_v7, 2 }
 0x2a0   : > { %3565 = vmatmul.msk.bf16.gmra.mxu2 %vm1606_vm15, %v2167_v61 }
 0x2a6   : > { %3572 = vmatmul.msk.bf16.gmra.mxu3 %vm1606_vm15, %v2244_v30  ;;  %v5671_v30 = vrot.slane %v4947_v40, 2 }
 0x2a7   : > { %3558 = vmatmul.msk.bf16.gmra.mxu1 %vm1606_vm15, %v2096_v36 }
 0x2a9   : > { %3579 = vmatmul.msk.bf16.gmra.mxu0 %vm1606_vm15, %v2351_v46 }
 0x2b0   : > { %3587 = vmatmul.msk.bf16.vlgmr.msra.gmra.mxu2 %vm1606_vm15, %v5013_v27  ;;  %v2689_v27 = vsel %vm572_vm1, %v5671_v30, %v2688_v1 }
 0x2b6   : > { %3594 = vmatmul.msk.bf16.vlgmr.msra.gmra.mxu3 %vm1606_vm15, %v4997_v50 }
 0x2b7   : > { %3580 = vmatmul.msk.bf16.vlgmr.msrb.gmra.mxu1 %vm1606_vm15, %v5030_v43 }
 0x2b9   : > { %3601 = vmatmul.msk.bf16.vlgmr.msra.gmra.mxu0 %vm1606_vm15, %v5035_v42 }
 0x2c0   : > { %3588 = vmatmul.msk.bf16.gmra.mxu2 %vm1606_vm15, %v5021_v21 }
 0x2c3   : > { %v2195_v37 = vpop.f32.mrf.mxu2 }
 0x2c4   : > { %v2131_v44 = vpop.f32.mrf.mxu1 }
 0x2c5   : > { %v2196_v46 = vadd.f32 %v2195_v37, %v2131_v44 }
 0x2c6   : > { %v2386_v29 = vpop.f32.mrf.mxu0  ;;  %3595 = vmatmul.msk.bf16.gmra.mxu3 %vm1606_vm15, %v2689_v27 }
 0x2c7   : > { %3581 = vmatmul.msk.bf16.gmra.mxu1 %vm1606_vm15, %v5051_v10 }
 0x2c9   : > { %3602 = vmatmul.msk.bf16.gmra.mxu0 %vm1606_vm15, %v5046_v59  ;;  %v2279_v50 = vpop.f32.mrf.mxu3  ;;  %v2691_v59 = vsel %vm572_vm1, %v2688_v1, %v2690_v4  ;;  %v2692_v1 = vrot.slane %v4966_v19, 2 }
 0x2ca   : > { %v2313_v21 = vadd.f32 %v2279_v50, %v2196_v46 }
 0x2cb   : > { %v2197_v43 = vpop.f32.mrf.mxu2 }
 0x2cc   : > { %v5247_v42 = vadd.f32 %v2386_v29, %v2313_v21  ;;  %v2133_v24 = vpop.f32.mrf.mxu1 }
 0x2cd   : > { %v2198_v12 = vadd.f32 %v2197_v43, %v2133_v24 }
 0x2ce   : > { %v2388_v35 = vpop.f32.mrf.mxu0 }
 0x2d0   : > { %3589 = vmatmul.msk.bf16.gmra.mxu2 %vm1606_vm15, %v5038_v34 }
 0x2d1   : > { %v2281_v45 = vpop.f32.mrf.mxu3 }
 0x2d2   : > { %v2314_v51 = vadd.f32 %v2281_v45, %v2198_v12 }
 0x2d3   : > { %v2200_v26 = vpop.f32.mrf.mxu2 }
 0x2d4   : > { %v5252_v10 = vadd.f32 %v2388_v35, %v2314_v51  ;;  %v2136_v14 = vpop.f32.mrf.mxu1 }
 0x2d5   : > { %v2201_v49 = vadd.f32 %v2200_v26, %v2136_v14 }
 0x2d6   : > { %v2391_v53 = vpop.f32.mrf.mxu0  ;;  %3596 = vmatmul.msk.bf16.gmra.mxu3 %vm1606_vm15, %v2691_v59 }
 0x2d7   : > { %3582 = vmatmul.msk.bf16.gmra.mxu1 %vm1606_vm15, %v5082_v63 }
 0x2d9   : > { %3603 = vmatmul.msk.bf16.gmra.mxu0 %vm1606_vm15, %v5085_v54  ;;  %v2284_v34 = vpop.f32.mrf.mxu3  ;;  %v2693_v54 = vsel %vm572_vm1, %v2690_v4, %v2692_v1  ;;  %v2694_v4 = vrot.slane %v5077_v41, 2 }
 0x2da   : > { %v2315_v61 = vadd.f32 %v2284_v34, %v2201_v49 }
 0x2db   : > { %v2202_v8 = vpop.f32.mrf.mxu2 }
 0x2dc   : > { %v5260_v36 = vadd.f32 %v2391_v53, %v2315_v61  ;;  %v2138_v37 = vpop.f32.mrf.mxu1 }
 0x2dd   : > { %v2203_v30 = vadd.f32 %v2202_v8, %v2138_v37  ;;  %v2817_v37 = vshrl.u32 %v5127_v0, 16 }
 0x2de   : > { %v2393_v44 = vpop.f32.mrf.mxu0 }
 0x2e0   : > { %3590 = vmatmul.msk.bf16.gmra.mxu2 %vm1606_vm15, %v5067_v25 }
 0x2e1   : > { %v2286_v27 = vpop.f32.mrf.mxu3 }
 0x2e2   : > { %v2316_v29 = vadd.f32 %v2286_v27, %v2203_v30  ;;  %v2595_v27 = vrot.slane %v5113_v52, 2 }
 0x2e3   : > { %v2205_v46 = vpop.f32.mrf.mxu2 }
 0x2e4   : > { %v5265_v63 = vadd.f32 %v2393_v44, %v2316_v29  ;;  %v2141_v50 = vpop.f32.mrf.mxu1  ;;  %v2820_v44 = vshll.u32 %v5127_v0, 16 }
 0x2e5   : > { %v2206_v43 = vadd.f32 %v2205_v46, %v2141_v50  ;;  %v2684_v50 = vpack.c.b16 %v5109_v28, %v5109_v28 }
 0x2e6   : > { %v2396_v21 = vpop.f32.mrf.mxu0  ;;  %3597 = vmatmul.msk.bf16.gmra.mxu3 %vm1606_vm15, %v2693_v54  ;;  %v2819_v54 = vrot.slane %v2817_v37, 2 }
 0x2e7   : > { %3583 = vmatmul.msk.bf16.gmra.mxu1 %vm1606_vm15, %v5106_v55 }
 0x2e9   : > { %3604 = vmatmul.msk.bf16.gmra.mxu0 %vm1606_vm15, %v5100_v47  ;;  %v2289_v25 = vpop.f32.mrf.mxu3  ;;  %v2695_v47 = vsel %vm572_vm1, %v2692_v1, %v2694_v4 }
 0x2ea   : > { %v2317_v24 = vadd.f32 %v2289_v25, %v2206_v43 }
 0x2eb   : > { %v2207_v35 = vpop.f32.mrf.mxu2 }
 0x2ec   : > { %v5273_v12 = vadd.f32 %v2396_v21, %v2317_v24  ;;  %v2143_v45 = vpop.f32.mrf.mxu1  ;;  %v2822_v21 = vrot.slane %v2820_v44, 3  ;;  %v2696_v24 = vrot.slane %v2684_v50, 2 }
 0x2ed   : > { %v2208_v26 = vadd.f32 %v2207_v35, %v2143_v45 }
 0x2ee   : > { %v2398_v51 = vpop.f32.mrf.mxu0  ;;  %v2823_v52 = vor.u32 %v2822_v21, %v2819_v54 }
 0x2f0   : > { %3591 = vmatmul.msk.bf16.gmra.mxu2 %vm1606_vm15, %v5090_v48 }
 0x2f1   : > { %v2291_v14 = vpop.f32.mrf.mxu3 }
 0x2f2   : > { %v2318_v59 = vadd.f32 %v2291_v14, %v2208_v26  ;;  %v2697_v14 = vsel %vm572_vm1, %v2694_v4, %v2696_v24 }
 0x2f3   : > { %v2210_v53 = vpop.f32.mrf.mxu2 }
 0x2f4   : > { %v5278_v55 = vadd.f32 %v2398_v51, %v2318_v59  ;;  %v2146_v49 = vpop.f32.mrf.mxu1 }
 0x2f5   : > { %v2211_v61 = vadd.f32 %v2210_v53, %v2146_v49 }
 0x2f6   : > { %v2401_v34 = vpop.f32.mrf.mxu0  ;;  %3598 = vmatmul.msk.bf16.gmra.mxu3 %vm1606_vm15, %v2695_v47 }
 0x2f7   : > { %3584 = vmatmul.msk.bf16.gmra.mxu1 %vm1606_vm15, %v5118_v18 }
 0x2f9   : > { %3605 = vmatmul.msk.bf16.gmra.mxu0 %vm1606_vm15, %v5124_v2  ;;  %v2294_v48 = vpop.f32.mrf.mxu3  ;;  %v5672_v2 = vrot.slane %v5042_v39, 2  ;;  %v2824_v39 = vsel %vm2782_vm4, %v5115_v56, %v2823_v52 }
 0x2fa   : > { %v2319_v8 = vadd.f32 %v2294_v48, %v2211_v61 }
 0x2fb   : > { %v2212_v30 = vpop.f32.mrf.mxu2  ;;  %v2596_v43 = vsel %vm572_vm1, %v5672_v2, %v2595_v27  ;;  %vm5673_vm1 = vmmov %vm5657_vm9 }
 0x2fc   : > { %v5289_v1 = vadd.f32 %v2401_v34, %v2319_v8  ;;  %v2148_v29 = vpop.f32.mrf.mxu1  ;;  %vm5674_vm13 = vmmov %vm5673_vm1 }
 0x2fd   : > { %v2213_v18 = vadd.f32 %v2212_v30, %v2148_v29  ;;  %vm5675_vm12 = vmmov %vm5673_vm1 }
 0x2fe   : > { %v2403_v46 = vpop.f32.mrf.mxu0  ;;  %vm5676_vm4 = vmmov %vm5673_vm1 }
 0x300   : > { %3592 = vmatmul.msk.bf16.gmra.mxu2 %vm1606_vm15, %v2596_v43 }
 0x301   : > { %v2296_v25 = vpop.f32.mrf.mxu3 }
 0x302   : > { %v2320_v35 = vadd.f32 %v2296_v25, %v2213_v18 }
 0x303   : > { %v2215_v45 = vpop.f32.mrf.mxu2 }
 0x304   : > { %v5297_v51 = vadd.f32 %v2403_v46, %v2320_v35  ;;  %v2151_v26 = vpop.f32.mrf.mxu1 }
 0x305   : > { %v2216_v59 = vadd.f32 %v2215_v45, %v2151_v26 }
 0x306   : > { %v2406_v28 = vpop.f32.mrf.mxu0  ;;  %3599 = vmatmul.msk.bf16.gmra.mxu3 %vm1606_vm15, %v2697_v14 }
 0x307   : > { %3585 = vmatmul.msk.bf16.gmra.mxu1 %vm1606_vm15, %v5137_v15 }
 0x309   : > { %3606 = vmatmul.msk.bf16.gmra.mxu0 %vm1606_vm15, %v2824_v39  ;;  %v2299_v53 = vpop.f32.mrf.mxu3 }
 0x30a   : > { %v2321_v49 = vadd.f32 %v2299_v53, %v2216_v59 }
 0x30b   : > { %v2217_v47 = vpop.f32.mrf.mxu2 }
 0x30c   : > { %v5306_v34 = vadd.f32 %v2406_v28, %v2321_v49  ;;  %v2153_v61 = vpop.f32.mrf.mxu1 }
 0x30d   : > { %v2218_v4 = vadd.f32 %v2217_v47, %v2153_v61  ;;  %v2912_v47 = vrot.slane %v4956_v6, 3 }
 0x30e   : > { %v2408_v48 = vpop.f32.mrf.mxu0 }
 0x310   : > { %3593 = vmatmul.msk.bf16.gmra.mxu2 %vm1606_vm15, %v2595_v27 }
 0x311   : > { %v2301_v8 = vpop.f32.mrf.mxu3 }
 0x312   : > { %v2322_v37 = vadd.f32 %v2301_v8, %v2218_v4 }
 0x313   : > { %v2220_v44 = vpop.f32.mrf.mxu2 }
 0x314   : > { %v5309_v30 = vadd.f32 %v2408_v48, %v2322_v37  ;;  %v2156_v56 = vpop.f32.mrf.mxu1  ;;  %v2913_v37 = vsel %vm5673_vm1, %v2910_v20, %v2912_v47 }
 0x315   : > { %v2221_v15 = vadd.f32 %v2220_v44, %v2156_v56 }
 0x316   : > { %v2411_v29 = vpop.f32.mrf.mxu0  ;;  %3600 = vmatmul.msk.bf16.gmra.mxu3 %vm1606_vm15, %v2696_v24 }
 0x317   : > { %3586 = vmatmul.msk.bf16.gmra.mxu1 %vm1606_vm15, %v5130_v3 }
 0x319   : > { %3607 = vmatmul.msk.bf16.gmra.mxu0 %vm1606_vm15, %v2823_v52  ;;  %v2304_v46 = vpop.f32.mrf.mxu3 }
 0x31a   : > { %v2323_v50 = vadd.f32 %v2304_v46, %v2221_v15 }
 0x31b   : > { %v2222_v18 = vpop.f32.mrf.mxu2 }
 0x31c   : > { %v5315_v54 = vadd.f32 %v2411_v29, %v2323_v50  ;;  %v2158_v27 = vpop.f32.mrf.mxu1 }
 0x31d   : > { %v2223_v2 = vadd.f32 %v2222_v18, %v2158_v27 }
 0x31e   : > { %v2413_v21 = vpop.f32.mrf.mxu0 }
 0x321   : > { %v2306_v43 = vpop.f32.mrf.mxu3 }
 0x322   : > { %v2324_v25 = vadd.f32 %v2306_v43, %v2223_v2 }
 0x323   : > { %v2225_v35 = vpop.f32.mrf.mxu2 }
 0x324   : > { %v5317_v45 = vadd.f32 %v2413_v21, %v2324_v25  ;;  %v2161_v26 = vpop.f32.mrf.mxu1 }
 0x325   : > { %v2226_v14 = vadd.f32 %v2225_v35, %v2161_v26 }
 0x326   : > { %v2416_v24 = vpop.f32.mrf.mxu0 }
 0x327   : > { %3608 = vmatmul.msk.bf16.vlgmr.msra.gmra.mxu1 %vm1606_vm15, %v5142_v31 }
 0x329   : > { %v2309_v3 = vpop.f32.mrf.mxu3 }
 0x32a   : > { %v2325_v52 = vadd.f32 %v2309_v3, %v2226_v14 }
 0x32b   : > { %v2227_v28 = vpop.f32.mrf.mxu2 }
 0x32c   : > { %v5321_v59 = vadd.f32 %v2416_v24, %v2325_v52  ;;  %v2163_v39 = vpop.f32.mrf.mxu1 }
 0x32e   : > { %v2418_v53 = vpop.f32.mrf.mxu0 }
 0x331   : > { %v2311_v49 = vpop.f32.mrf.mxu3 }
 0x333   : > { %v2630_v61 = vpop.f32.mrf.mxu2 }
 0x334   : > { %v2533_v48 = vpop.f32.mrf.mxu1 }
 0x335   : > { %v2567_v8 = vadd.f32 %v2533_v48, %v5247_v42  ;;  %v2914_v42 = vrot.slane %v4961_v7, 3 }
 0x336   : > { %v2858_v4 = vpop.f32.mrf.mxu0 }
 0x337   : > { %3609 = vmatmul.msk.bf16.gmra.mxu1 %vm1606_vm15, %v2913_v37  ;;  %v2664_v31 = vadd.f32 %v2630_v61, %v2567_v8  ;;  %v2915_v35 = vsel %vm5674_vm13, %v2912_v47, %v2914_v42  ;;  %v2916_v61 = vrot.slane %v4966_v19, 3 }
 0x339   : > { %v2731_v44 = vpop.f32.mrf.mxu3  ;;  %v2917_v37 = vsel %vm5675_vm12, %v2914_v42, %v2916_v61 }
 0x33a   : > { %v2765_v56 = vadd.f32 %v2731_v44, %v2664_v31 }
 0x33b   : > { %v2632_v29 = vpop.f32.mrf.mxu2 }
 0x33c   : > { %v5329_v15 = vadd.f32 %v2858_v4, %v2765_v56  ;;  %v2535_v46 = vpop.f32.mrf.mxu1 }
 0x33d   : > { %v2568_v6 = vadd.f32 %v2535_v46, %v5252_v10 }
 0x33e   : > { %v2860_v50 = vpop.f32.mrf.mxu0 }
 0x33f   : > { %v2665_v18 = vadd.f32 %v2632_v29, %v2568_v6 }
 0x341   : > { %v2733_v27 = vpop.f32.mrf.mxu3 }
 0x342   : > { %v2766_v21 = vadd.f32 %v2733_v27, %v2665_v18 }
 0x343   : > { %v2635_v40 = vpop.f32.mrf.mxu2 }
 0x344   : > { %v5333_v2 = vadd.f32 %v2860_v50, %v2766_v21  ;;  %v2538_v20 = vpop.f32.mrf.mxu1 }
 0x345   : > { %v2569_v25 = vadd.f32 %v2538_v20, %v5260_v36 }
 0x346   : > { %v2863_v43 = vpop.f32.mrf.mxu0 }
 0x347   : > { %3610 = vmatmul.msk.bf16.gmra.mxu1 %vm1606_vm15, %v2915_v35  ;;  %v2666_v26 = vadd.f32 %v2635_v40, %v2569_v25 }
 0x349   : > { %v2736_v24 = vpop.f32.mrf.mxu3 }
 0x34a   : > { %v2767_v14 = vadd.f32 %v2736_v24, %v2666_v26 }
 0x34b   : > { %v2637_v10 = vpop.f32.mrf.mxu2 }
 0x34c   : > { %v5338_v3 = vadd.f32 %v2863_v43, %v2767_v14  ;;  %v2540_v52 = vpop.f32.mrf.mxu1  ;;  %v2919_v43 = vsel %vm5676_vm4, %v2916_v61, %v2918_v11 }
 0x34d   : > { %v2570_v7 = vadd.f32 %v2540_v52, %v5265_v63 }
 0x34e   : > { %v2865_v28 = vpop.f32.mrf.mxu0 }
 0x34f   : > { %v2667_v39 = vadd.f32 %v2637_v10, %v2570_v7 }
 0x351   : > { %v2738_v53 = vpop.f32.mrf.mxu3 }
 0x352   : > { %v2768_v49 = vadd.f32 %v2738_v53, %v2667_v39 }
 0x353   : > { %v2640_v36 = vpop.f32.mrf.mxu2 }
 0x354   : > { %v5342_v48 = vadd.f32 %v2865_v28, %v2768_v49  ;;  %v2543_v47 = vpop.f32.mrf.mxu1 }
 0x355   : > { %v2571_v8 = vadd.f32 %v2543_v47, %v5273_v12 }
 0x356   : > { %v2868_v4 = vpop.f32.mrf.mxu0 }
 0x357   : > { %3611 = vmatmul.msk.bf16.gmra.mxu1 %vm1606_vm15, %v2917_v37  ;;  %v2668_v31 = vadd.f32 %v2640_v36, %v2571_v8 }
 0x359   : > { %v2741_v44 = vpop.f32.mrf.mxu3 }
 0x35a   : > { %v2769_v56 = vadd.f32 %v2741_v44, %v2668_v31 }
 0x35b   : > { %v2642_v63 = vpop.f32.mrf.mxu2 }
 0x35c   : > { %v5347_v29 = vadd.f32 %v2868_v4, %v2769_v56  ;;  %v2545_v46 = vpop.f32.mrf.mxu1 }
 0x35d   : > { %v2572_v19 = vadd.f32 %v2545_v46, %v5278_v55 }
 0x35e   : > { %v2870_v50 = vpop.f32.mrf.mxu0 }
 0x35f   : > { %v2669_v6 = vadd.f32 %v2642_v63, %v2572_v19 }
 0x361   : > { %v2743_v18 = vpop.f32.mrf.mxu3 }
 0x362   : > { %v2770_v27 = vadd.f32 %v2743_v18, %v2669_v6  ;;  %v5677_v6 = vrot.slane %v5127_v0, 3 }
 0x363   : > { %v2645_v21 = vpop.f32.mrf.mxu2 }
 0x364   : > { %v5350_v40 = vadd.f32 %v2870_v50, %v2770_v27  ;;  %v2548_v12 = vpop.f32.mrf.mxu1 }
 0x365   : > { %v2573_v20 = vadd.f32 %v2548_v12, %v5289_v1 }
 0x366   : > { %v2873_v42 = vpop.f32.mrf.mxu0 }
 0x367   : > { %3612 = vmatmul.msk.bf16.gmra.mxu1 %vm1606_vm15, %v2919_v43  ;;  %v2670_v25 = vadd.f32 %v2645_v21, %v2573_v20 }
 0x369   : > { %v2746_v35 = vpop.f32.mrf.mxu3 }
 0x36a   : > { %v2771_v26 = vadd.f32 %v2746_v35, %v2670_v25 }
 0x36b   : > { %v2647_v55 = vpop.f32.mrf.mxu2 }
 0x36c   : > { %v5357_v24 = vadd.f32 %v2873_v42, %v2771_v26  ;;  %v2550_v14 = vpop.f32.mrf.mxu1 }
 0x36d   : > { %v2574_v52 = vadd.f32 %v2550_v14, %v5297_v51 }
 0x36e   : > { %v2875_v10 = vpop.f32.mrf.mxu0 }
 0x36f   : > { %v2671_v28 = vadd.f32 %v2647_v55, %v2574_v52 }
 0x371   : > { %v2748_v7 = vpop.f32.mrf.mxu3 }
 0x372   : > { %v2772_v39 = vadd.f32 %v2748_v7, %v2671_v28 }
 0x373   : > { %v2650_v1 = vpop.f32.mrf.mxu2 }
 0x374   : > { %v5360_v53 = vadd.f32 %v2875_v10, %v2772_v39  ;;  %v2553_v41 = vpop.f32.mrf.mxu1 }
 0x375   : > { %v2575_v49 = vadd.f32 %v2553_v41, %v5306_v34 }
 0x376   : > { %v2878_v11 = vpop.f32.mrf.mxu0 }
 0x377   : > { %3613 = vmatmul.msk.bf16.gmra.mxu1 %vm1606_vm15, %v5152_v60  ;;  %v2672_v61 = vadd.f32 %v2650_v1, %v2575_v49 }
 0x379   : > { %v2751_v36 = vpop.f32.mrf.mxu3 }
 0x37a   : > { %v2773_v47 = vadd.f32 %v2751_v36, %v2672_v61 }
 0x37b   : > { %v2652_v4 = vpop.f32.mrf.mxu2 }
 0x37c   : > { %v5365_v8 = vadd.f32 %v2878_v11, %v2773_v47  ;;  %v2555_v51 = vpop.f32.mrf.mxu1 }
 0x37d   : > { %v2576_v31 = vadd.f32 %v2555_v51, %v5309_v30 }
 0x37e   : > { %v2880_v37 = vpop.f32.mrf.mxu0 }
 0x37f   : > { %v2673_v44 = vadd.f32 %v2652_v4, %v2576_v31 }
 0x381   : > { %v2753_v56 = vpop.f32.mrf.mxu3 }
 0x382   : > { %v2774_v63 = vadd.f32 %v2753_v56, %v2673_v44 }
 0x383   : > { %v2655_v46 = vpop.f32.mrf.mxu2 }
 0x384   : > { %v5368_v50 = vadd.f32 %v2880_v37, %v2774_v63  ;;  %v2558_v34 = vpop.f32.mrf.mxu1 }
 0x385   : > { %v2577_v60 = vadd.f32 %v2558_v34, %v5315_v54 }
 0x386   : > { %v2883_v19 = vpop.f32.mrf.mxu0 }
 0x387   : > { %3614 = vmatmul.msk.bf16.gmra.mxu1 %vm1606_vm15, %v5677_v6  ;;  %v2674_v18 = vadd.f32 %v2655_v46, %v2577_v60 }
 0x389   : > { %v2756_v27 = vpop.f32.mrf.mxu3 }
 0x38a   : > { %v2775_v21 = vadd.f32 %v2756_v27, %v2674_v18 }
 0x38b   : > { %v2657_v12 = vpop.f32.mrf.mxu2 }
 0x38c   : > { %v5374_v42 = vadd.f32 %v2883_v19, %v2775_v21  ;;  %v2560_v30 = vpop.f32.mrf.mxu1 }
 0x38d   : > { %v2578_v43 = vadd.f32 %v2560_v30, %v5317_v45 }
 0x38e   : > { %v2885_v20 = vpop.f32.mrf.mxu0 }
 0x38f   : > { %v2675_v25 = vadd.f32 %v2657_v12, %v2578_v43 }
 0x391   : > { %v2758_v35 = vpop.f32.mrf.mxu3 }
 0x392   : > { %v2776_v26 = vadd.f32 %v2758_v35, %v2675_v25 }
 0x393   : > { %v2660_v55 = vpop.f32.mrf.mxu2 }
 0x394   : > { %v5377_v14 = vadd.f32 %v2885_v20, %v2776_v26  ;;  %v2563_v54 = vpop.f32.mrf.mxu1 }
 0x395   : > { %v2579_v10 = vadd.f32 %v2563_v54, %v5321_v59 }
 0x396   : > { %v2888_v0 = vpop.f32.mrf.mxu0 }
 0x397   : > { %v2676_v52 = vadd.f32 %v2660_v55, %v2579_v10 }
 0x399   : > { %v2761_v28 = vpop.f32.mrf.mxu3 }
 0x39a   : > { %v2777_v7 = vadd.f32 %v2761_v28, %v2676_v52 }
 0x39b   : > { %v2662_v1 = vpop.f32.mrf.mxu2 }
 0x39c   : > { %v5380_v39 = vadd.f32 %v2888_v0, %v2777_v7  ;;  %v2565_v41 = vpop.f32.mrf.mxu1 }
 0x39e   : > { %v2890_v11 = vpop.f32.mrf.mxu0 }
 0x3a1   : > { %v2763_v49 = vpop.f32.mrf.mxu3 }
 0x3a4   : > { %v2955_v45 = vpop.f32.mrf.mxu1 }
 0x3a5   : > { %v5383_v61 = vadd.f32 %v2955_v45, %v5329_v15 }
 0x3a7   : > { %v3003_v47 = vmul.f32 %v4526_v9, %v5383_v61 }
 0x3a9   : > { %v3016_v51 = vsel %vm1606_vm15, %v3003_v47, 0.0 }
 0x3ac   : > { %v2957_v36 = vpop.f32.mrf.mxu1 }
 0x3ad   : > { %v5388_v4 = vadd.f32 %v2957_v36, %v5333_v2 }
 0x3af   : > { %v3004_v59 = vmul.f32 %v4477_v33, %v5388_v4 }
 0x3b1   : > { %v3017_v37 = vsel %vm1606_vm15, %v3004_v59, 0.0 }
 0x3b2   : > { %v3018_v31 = vadd.f32 %v3017_v37, %v3016_v51 }
 0x3b4   : > { %v2960_v44 = vpop.f32.mrf.mxu1 }
 0x3b5   : > { %v5395_v56 = vadd.f32 %v2960_v44, %v5338_v3 }
 0x3b7   : > { %v3005_v15 = vmul.f32 %v4541_v16, %v5395_v56 }
 0x3b9   : > { %v3019_v63 = vsel %vm1606_vm15, %v3005_v15, 0.0 }
 0x3ba   : > { %v3020_v46 = vadd.f32 %v3019_v63, %v3018_v31 }
 0x3bc   : > { %v2962_v2 = vpop.f32.mrf.mxu1 }
 0x3bd   : > { %v2992_v34 = vadd.f32 %v2962_v2, %v5342_v48 }
 0x3bf   : > { %v3006_v19 = vmul.f32 %v4563_v32, %v2992_v34 }
 0x3c1   : > { %v3021_v60 = vsel %vm1606_vm15, %v3006_v19, 0.0 }
 0x3c2   : > { %v3022_v6 = vadd.f32 %v3021_v60, %v3020_v46 }
 0x3c4   : > { %v2965_v18 = vpop.f32.mrf.mxu1 }
 0x3c5   : > { %v2993_v27 = vadd.f32 %v2965_v18, %v5347_v29 }
 0x3c7   : > { %v3007_v3 = vmul.f32 %v4598_v57, %v2993_v27 }
 0x3c9   : > { %v3023_v21 = vsel %vm1606_vm15, %v3007_v3, 0.0 }
 0x3ca   : > { %v3024_v12 = vadd.f32 %v3023_v21, %v3022_v6 }
 0x3cc   : > { %v2967_v30 = vpop.f32.mrf.mxu1 }
 0x3cd   : > { %v2994_v20 = vadd.f32 %v2967_v30, %v5350_v40 }
 0x3cf   : > { %v3008_v43 = vmul.f32 %v4619_v38, %v2994_v20 }
 0x3d1   : > { %v3025_v48 = vsel %vm1606_vm15, %v3008_v43, 0.0 }
 0x3d2   : > { %v3026_v25 = vadd.f32 %v3025_v48, %v3024_v12 }
 0x3d4   : > { %v2970_v35 = vpop.f32.mrf.mxu1 }
 0x3d5   : > { %v2995_v26 = vadd.f32 %v2970_v35, %v5357_v24 }
 0x3d7   : > { %v3009_v55 = vmul.f32 %v4635_v17, %v2995_v26 }
 0x3d9   : > { %v3027_v29 = vsel %vm1606_vm15, %v3009_v55, 0.0 }
 0x3da   : > { %v3028_v54 = vadd.f32 %v3027_v29, %v3026_v25 }
 0x3dc   : > { %v2972_v0 = vpop.f32.mrf.mxu1 }
 0x3dd   : > { %v2996_v10 = vadd.f32 %v2972_v0, %v5360_v53 }
 0x3df   : > { %v3010_v52 = vmul.f32 %v4638_v22, %v2996_v10 }
 0x3e1   : > { %v3029_v40 = vsel %vm1606_vm15, %v3010_v52, 0.0 }
 0x3e2   : > { %v3030_v28 = vadd.f32 %v3029_v40, %v3028_v54 }
 0x3e4   : > { %v2975_v7 = vpop.f32.mrf.mxu1 }
 0x3e5   : > { %v2997_v1 = vadd.f32 %v2975_v7, %v5365_v8 }
 0x3e7   : > { %v3011_v41 = vmul.f32 %v4674_v23, %v2997_v1 }
 0x3e9   : > { %v3031_v24 = vsel %vm1606_vm15, %v3011_v41, 0.0 }
 0x3ea   : > { %v3032_v11 = vadd.f32 %v3031_v24, %v3030_v28 }
 0x3ec   : > { %v2977_v49 = vpop.f32.mrf.mxu1 }
 0x3ed   : > { %v2998_v45 = vadd.f32 %v2977_v49, %v5368_v50 }
 0x3ef   : > { %v3012_v36 = vmul.f32 %v4694_v5, %v2998_v45 }
 0x3f1   : > { %v3033_v53 = vsel %vm1606_vm15, %v3012_v36, 0.0 }
 0x3f2   : > { %v3034_v47 = vadd.f32 %v3033_v53, %v3032_v11 }
 0x3f4   : > { %v2980_v59 = vpop.f32.mrf.mxu1 }
 0x3f5   : > { %v2999_v51 = vadd.f32 %v2980_v59, %v5374_v42 }
 0x3f7   : > { %v3013_v37 = vmul.f32 %v4710_v13, %v2999_v51 }
 0x3f9   : > { %v3035_v8 = vsel %vm1606_vm15, %v3013_v37, 0.0 }
 0x3fa   : > { %v3036_v31 = vadd.f32 %v3035_v8, %v3034_v47 }
 0x3fc   : > { %v2982_v44 = vpop.f32.mrf.mxu1 }
 0x3fd   : > { %v3000_v15 = vadd.f32 %v2982_v44, %v5377_v14 }
 0x3ff   : > { %v3014_v63 = vmul.f32 %v4720_v58, %v3000_v15 }
 0x401   : > { %v3037_v50 = vsel %vm1606_vm15, %v3014_v63, 0.0 }
 0x402   : > { %v3038_v46 = vadd.f32 %v3037_v50, %v3036_v31 }
 0x404   : > { %v2985_v2 = vpop.f32.mrf.mxu1 }
 0x405   : > { %v3001_v19 = vadd.f32 %v2985_v2, %v5380_v39 }
 0x407   : > { %v3015_v60 = vmul.f32 %v4728_v62, %v3001_v19 }
 0x409   : > { %v3039_v42 = vsel %vm1630_vm5, %v3015_v60, 0.0 }
 0x40a   : > { %v3040_v6 = vadd.f32 %v3039_v42, %v3038_v46 }
 0x40c   : > { %v3041_v18 = vrot.slane %v3040_v6, 4  ;;  %v2987_v3 = vpop.f32.mrf.mxu1 }
 0x40e   : > { %v3042_v21 = vadd.f32 %v3041_v18, %v3040_v6 }
 0x410   : > { %v3043_v12 = vrot.slane %v3042_v21, 2 }
 0x412   : > { %v3044_v30 = vadd.f32 %v3043_v12, %v3042_v21 }
 0x414   : > { %v3045_v43 = vrot.slane %v3044_v30, 1 }
 0x416   : > { %v3046_v14 = vadd.f32 %v3045_v43, %v3044_v30 }
 0x418   : > { %v3047_v48 = vmul.f32 0.015625, %v3046_v14 }
 0x41a   : > { %v5431_v25 = vsub.f32 %v5383_v61, %v3047_v48  ;;  %v5434_v35 = vsub.f32 %v5388_v4, %v3047_v48  ;;  %v5437_v39 = vsub.f32 %v5395_v56, %v3047_v48  ;;  %v5439_v55 = vsub.f32 %v2992_v34, %v3047_v48 }
 0x41b   : > { %v5441_v29 = vsub.f32 %v2993_v27, %v3047_v48  ;;  %v5443_v54 = vsub.f32 %v2994_v20, %v3047_v48  ;;  %v5445_v0 = vsub.f32 %v2995_v26, %v3047_v48  ;;  %v5447_v52 = vsub.f32 %v2996_v10, %v3047_v48 }
 0x41c   : > { %v5449_v40 = vsub.f32 %v2997_v1, %v3047_v48  ;;  %v5451_v61 = vsub.f32 %v2998_v45, %v3047_v48  ;;  %v5453_v28 = vsub.f32 %v2999_v51, %v3047_v48  ;;  %v5455_v4 = vsub.f32 %v3000_v15, %v3047_v48 }
 0x41d   : > { %v5457_v56 = vsub.f32 %v3001_v19, %v3047_v48  ;;  %v3061_v34 = vmul.f32 %v4526_v9, %v5431_v25  ;;  %v3062_v27 = vmul.f32 %v4477_v33, %v5434_v35  ;;  %v3063_v20 = vmul.f32 %v4541_v16, %v5437_v39 }
 0x41e   : > { %v3064_v26 = vmul.f32 %v4563_v32, %v5439_v55  ;;  %v3065_v1 = vmul.f32 %v4598_v57, %v5441_v29  ;;  %v3066_v11 = vmul.f32 %v4619_v38, %v5443_v54  ;;  %v3067_v53 = vmul.f32 %v4635_v17, %v5445_v0 }
 0x41f   : > { %v3074_v10 = vmul.f32 %v3061_v34, %v3061_v34  ;;  %v3075_v7 = vmul.f32 %v3062_v27, %v3062_v27  ;;  %v3076_v41 = vmul.f32 %v3063_v20, %v3063_v20  ;;  %v3068_v37 = vmul.f32 %v4638_v22, %v5447_v52 }
 0x420   : > { %v3077_v49 = vmul.f32 %v3064_v26, %v3064_v26  ;;  %v3078_v47 = vmul.f32 %v3065_v1, %v3065_v1  ;;  %v3079_v8 = vmul.f32 %v3066_v11, %v3066_v11  ;;  %v3069_v15 = vmul.f32 %v4674_v23, %v5449_v40 }
 0x421   : > { %v3087_v24 = vsel %vm1606_vm15, %v3074_v10, 0.0  ;;  %v3088_v45 = vsel %vm1606_vm15, %v3075_v7, 0.0  ;;  %v3090_v59 = vsel %vm1606_vm15, %v3076_v41, 0.0  ;;  %v3080_v63 = vmul.f32 %v3067_v53, %v3067_v53 }
 0x422   : > { %v3089_v36 = vadd.f32 %v3088_v45, %v3087_v24  ;;  %v3092_v31 = vsel %vm1606_vm15, %v3077_v49, 0.0  ;;  %v3094_v50 = vsel %vm1606_vm15, %v3078_v47, 0.0  ;;  %v3070_v2 = vmul.f32 %v4694_v5, %v5451_v61 }
 0x423   : > { %v3081_v19 = vmul.f32 %v3068_v37, %v3068_v37  ;;  %v3096_v60 = vsel %vm1606_vm15, %v3079_v8, 0.0  ;;  %v3071_v6 = vmul.f32 %v4710_v13, %v5453_v28  ;;  %v3082_v18 = vmul.f32 %v3069_v15, %v3069_v15  ;;  %v5498_v15 = vpop.permute.xlu1 %3198 }
 0x424   : > { %v3091_v51 = vadd.f32 %v3090_v59, %v3089_v36  ;;  %v3098_v3 = vsel %vm1606_vm15, %v3080_v63, 0.0  ;;  %v3072_v12 = vmul.f32 %v4720_v58, %v5455_v4  ;;  %v3083_v30 = vmul.f32 %v3070_v2, %v3070_v2  ;;  %v5500_v2 = vpop.permute.xlu2 %3202 }
 0x425   : > { %v3100_v43 = vsel %vm1606_vm15, %v3081_v19, 0.0  ;;  %v3073_v48 = vmul.f32 %v4728_v62, %v5457_v56  ;;  %v3084_v34 = vmul.f32 %v3071_v6, %v3071_v6  ;;  %v3102_v27 = vsel %vm1606_vm15, %v3082_v18, 0.0 }
 0x426   : > { %v3093_v44 = vadd.f32 %v3092_v31, %v3091_v51  ;;  %v3085_v26 = vmul.f32 %v3072_v12, %v3072_v12  ;;  %v3104_v10 = vsel %vm1606_vm15, %v3083_v30, 0.0 }
 0x427   : > { %v3086_v1 = vmul.f32 %v3073_v48, %v3073_v48  ;;  %v3106_v41 = vsel %vm1606_vm15, %v3084_v34, 0.0 }
 0x428   : > { %v3095_v46 = vadd.f32 %v3094_v50, %v3093_v44  ;;  %v3108_v11 = vsel %vm1606_vm15, %v3085_v26, 0.0 }
 0x429   : > { %v3110_v45 = vsel %vm1630_vm5, %v3086_v1, 0.0 }
 0x42a   : > { %v3097_v42 = vadd.f32 %v3096_v60, %v3095_v46  ;;  %v3197_v60 = vpop.permute.xlu0 %3196 }
 0x42b   : > { %v3201_v6 = vpop.permute.xlu1 %3200 }
 0x42c   : > { %v3099_v21 = vadd.f32 %v3098_v3, %v3097_v42 }
 0x42e   : > { %v3101_v14 = vadd.f32 %v3100_v43, %v3099_v21 }
 0x430   : > { %v3103_v20 = vadd.f32 %v3102_v27, %v3101_v14 }
 0x432   : > { %v3105_v7 = vadd.f32 %v3104_v10, %v3103_v20  ;;  %v3205_v20 = vpop.permute.xlu2 %3204 }
 0x434   : > { %v3107_v24 = vadd.f32 %v3106_v41, %v3105_v7  ;;  %v3156_v7 = vstv %s3615_s23 }
 0x436   : > { %v3109_v49 = vadd.f32 %v3108_v11, %v3107_v24 }
 0x438   : > { %v3111_v36 = vadd.f32 %v3110_v45, %v3109_v49 }
 0x43a   : > { %v3112_v53 = vrot.slane %v3111_v36, 4  ;;  %v3211_v41 = vpop.permute.xlu2 %3210 }
 0x43c   : > { %v3113_v47 = vadd.f32 %v3112_v53, %v3111_v36 }
 0x43e   : > { %v3114_v59 = vrot.slane %v3113_v47, 2 }
 0x440   : > { %v3115_v51 = vadd.f32 %v3114_v59, %v3113_v47 }
 0x442   : > { %v3116_v37 = vrot.slane %v3115_v51, 1 }
 0x444   : > { %v3117_v8 = vadd.f32 %v3116_v37, %v3115_v51 }
 0x446   : > { %v3118_v31 = vmul.f32 0.015625, %v3117_v8 }
 0x448   : > { %v3119_v44 = vadd.f32 1e-05, %v3118_v31 }
 0x44a   : > { %3859 = vrsqrt.f32 %v3119_v44  ;;  %vm3126_vm9 = vweird.f32 %v3119_v44 }
 0x450   : > { %v3860_v63 = vpop.eup %3859 }
 0x451   : > { %v3121_v50 = vmul.f32 %v3860_v63, %v3119_v44  ;;  %vm3127_vm15 = vweird.f32 %v3860_v63 }
 0x452   : > { %vm3128_vm6 = vmor %vm3126_vm9, %vm3127_vm15 }
 0x453   : > { %v3122_v46 = vmul.f32 %v3860_v63, %v3121_v50 }
 0x455   : > { %v3123_v19 = vmul.f32 0.5, %v3122_v46 }
 0x457   : > { %v3124_v42 = vsub.f32 1.5, %v3123_v19 }
 0x459   : > { %v3125_v18 = vmul.f32 %v3860_v63, %v3124_v42 }
 0x45b   : > { %v3129_v3 = vsel %vm3128_vm6, %v3860_v63, %v3125_v18 }
 0x45c   : > { %v3130_v21 = vmul.f32 %v3129_v3, %v5431_v25  ;;  %v3131_v12 = vmul.f32 %v3129_v3, %v5434_v35  ;;  %v3132_v30 = vmul.f32 %v3129_v3, %v5437_v39  ;;  %v3133_v43 = vmul.f32 %v3129_v3, %v5439_v55  ;;  %v3207_v39 = vpop.permute.xlu0 %3206 }
 0x45d   : > { %v3134_v14 = vmul.f32 %v3129_v3, %v5441_v29  ;;  %v3135_v48 = vmul.f32 %v3129_v3, %v5443_v54  ;;  %v3136_v34 = vmul.f32 %v3129_v3, %v5445_v0  ;;  %v3137_v27 = vmul.f32 %v3129_v3, %v5447_v52  ;;  %v3209_v29 = vpop.permute.xlu1 %3208 }
 0x45e   : > { %v3138_v26 = vmul.f32 %v3129_v3, %v5449_v40  ;;  %v3139_v10 = vmul.f32 %v3129_v3, %v5451_v61  ;;  %v3140_v25 = vmul.f32 %v3129_v3, %v5453_v28  ;;  %v3141_v35 = vmul.f32 %v3129_v3, %v5455_v4 }
 0x45f   : > { %v3142_v55 = vmul.f32 %v3129_v3, %v5457_v56  ;;  %vm3143_vm11 = vcmp.ge.f32.partialorder %v3130_v21, 0.0  ;;  %vm3144_vm10 = vcmp.ge.f32.partialorder %v3131_v12, 0.0  ;;  %vm3145_vm14 = vcmp.ge.f32.partialorder %v3132_v30, 0.0 }
 0x460   : > { %vm3146_vm3 = vcmp.ge.f32.partialorder %v3133_v43, 0.0  ;;  %vm3147_vm7 = vcmp.ge.f32.partialorder %v3134_v14, 0.0  ;;  %vm3148_vm0 = vcmp.ge.f32.partialorder %v3135_v48, 0.0  ;;  %v3157_v54 = vmul.f32 %v3156_v7, %v3130_v21 }
 0x461   : > { %v3158_v0 = vmul.f32 %v3156_v7, %v3131_v12  ;;  %v3159_v52 = vmul.f32 %v3156_v7, %v3132_v30  ;;  %v3160_v40 = vmul.f32 %v3156_v7, %v3133_v43  ;;  %v3161_v61 = vmul.f32 %v3156_v7, %v3134_v14 }
 0x462   : > { %v3162_v1 = vmul.f32 %v3156_v7, %v3135_v48  ;;  %vm3149_vm8 = vcmp.ge.f32.partialorder %v3136_v34, 0.0  ;;  %vm3150_vm1 = vcmp.ge.f32.partialorder %v3137_v27, 0.0  ;;  %v3163_v28 = vmul.f32 %v3156_v7, %v3136_v34 }
 0x463   : > { %v3164_v4 = vmul.f32 %v3156_v7, %v3137_v27  ;;  %vm3151_vm13 = vcmp.ge.f32.partialorder %v3138_v26, 0.0  ;;  %vm3152_vm12 = vcmp.ge.f32.partialorder %v3139_v10, 0.0  ;;  %vm3153_vm4 = vcmp.ge.f32.partialorder %v3140_v25, 0.0 }
 0x464   : > { %v3165_v56 = vmul.f32 %v3156_v7, %v3138_v26  ;;  %v3170_v24 = vsel %vm3143_vm11, %v3130_v21, %v3157_v54  ;;  %v3171_v11 = vsel %vm3144_vm10, %v3131_v12, %v3158_v0  ;;  %v3172_v49 = vsel %vm3145_vm14, %v3132_v30, %v3159_v52  ;;  %v3213_v36 = vpop.permute.xlu0 %3212 }
 0x465   : > { %v3173_v45 = vsel %vm3146_vm3, %v3133_v43, %v3160_v40  ;;  %v3166_v53 = vmul.f32 %v3156_v7, %v3139_v10  ;;  %v3167_v47 = vmul.f32 %v3156_v7, %v3140_v25  ;;  %v3174_v59 = vsel %vm3147_vm7, %v3134_v14, %v3161_v61  ;;  %v3215_v37 = vpop.permute.xlu1 %3214 }
 0x466   : > { %v3175_v51 = vsel %vm3148_vm0, %v3135_v48, %v3162_v1  ;;  %vm3154_vm15 = vcmp.ge.f32.partialorder %v3141_v35, 0.0  ;;  %v3168_v8 = vmul.f32 %v3156_v7, %v3141_v35  ;;  %v3176_v31 = vsel %vm3149_vm8, %v3136_v34, %v3163_v28 }
 0x467   : > { %v3177_v44 = vsel %vm3150_vm1, %v3137_v27, %v3164_v4  ;;  %v3235_v63 = vadd.f32 %v3197_v60, %v3170_v24  ;;  %v3236_v50 = vadd.f32 %v5498_v15, %v3171_v11  ;;  %v3237_v46 = vadd.f32 %v3201_v6, %v3172_v49 }
 0x468   : > { %v3238_v19 = vadd.f32 %v5500_v2, %v3173_v45  ;;  %v3169_v42 = vmul.f32 %v3156_v7, %v3142_v55  ;;  %v3178_v18 = vsel %vm3151_vm13, %v3138_v26, %v3165_v56  ;;  %v3239_v3 = vadd.f32 %v3205_v20, %v3174_v59  ;;  %v3217_v20 = vpop.permute.xlu2 %3216 }
 0x469   : > { %v3240_v21 = vadd.f32 %v3207_v39, %v3175_v51  ;;  %vm3155_vm9 = vcmp.ge.f32.partialorder %v3142_v55, 0.0  ;;  %v3179_v12 = vsel %vm3152_vm12, %v3139_v10, %v3166_v53  ;;  %v3180_v30 = vsel %vm3153_vm4, %v3140_v25, %v3167_v47 }
 0x46a   : > { %v3241_v43 = vadd.f32 %v3209_v29, %v3176_v31  ;;  %v3242_v14 = vadd.f32 %v3211_v41, %v3177_v44  ;;  %v3248_v60 = vmul.f32 %v4526_v9, %v3235_v63  ;;  %v3249_v15 = vmul.f32 %v4477_v33, %v3236_v50 }
 0x46b   : > { %v3250_v6 = vmul.f32 %v4541_v16, %v3237_v46  ;;  %v3181_v2 = vsel %vm3154_vm15, %v3141_v35, %v3168_v8  ;;  %v3243_v48 = vadd.f32 %v3213_v36, %v3178_v18  ;;  %v3251_v34 = vmul.f32 %v4563_v32, %v3238_v19 }
 0x46c   : > { %v3252_v27 = vmul.f32 %v4598_v57, %v3239_v3  ;;  %v3182_v26 = vsel %vm3155_vm9, %v3142_v55, %v3169_v42  ;;  %v3244_v9 = vadd.f32 %v3215_v37, %v3179_v12  ;;  %v3253_v33 = vmul.f32 %v4619_v38, %v3240_v21  ;;  %v3219_v10 = vpop.permute.xlu0 %3218 }
 0x46d   : > { %v3245_v16 = vadd.f32 %v3217_v20, %v3180_v30  ;;  %v3254_v25 = vmul.f32 %v4635_v17, %v3241_v43  ;;  %v3261_v35 = vpack.c.bf16 %v3248_v60, %v3248_v60  ;;  %v3262_v32 = vpack.c.bf16 %v3249_v15, %v3249_v15  ;;  %v3221_v57 = vpop.permute.xlu1 %3220 }
 0x46e   : > { %v3246_v39 = vadd.f32 %v3219_v10, %v3181_v2  ;;  %v3255_v7 = vmul.f32 %v4638_v22, %v3242_v14  ;;  %v3263_v29 = vpack.c.bf16 %v3250_v6, %v3250_v6  ;;  %v3264_v54 = vpack.c.bf16 %v3251_v34, %v3251_v34 }
 0x46f   : > { %v3247_v55 = vadd.f32 %v3221_v57, %v3182_v26  ;;  %v3256_v0 = vmul.f32 %v4674_v23, %v3243_v48  ;;  %v3265_v38 = vpack.c.bf16 %v3252_v27, %v3252_v27  ;;  %3274 = vst.msk [vmem:[%s5538_s26] sm:$0xf] %vm1630_vm5, %v3261_v35  ;;  %v3257_v17 = vmul.f32 %v4694_v5, %v3244_v9 }
 0x470   : > { %v3266_v52 = vpack.c.bf16 %v3253_v33, %v3253_v33  ;;  %3275 = vst.msk [vmem:[%s5538_s26 + $0x4] sm:$0xf] %vm1630_vm5, %v3262_v32  ;;  %v3258_v40 = vmul.f32 %v4710_v13, %v3245_v16  ;;  %v3267_v22 = vpack.c.bf16 %v3254_v25, %v3254_v25  ;;  %v3259_v23 = vmul.f32 %v4720_v58, %v3246_v39 }
 0x471   : > { %3276 = vst.msk [vmem:[%s5538_s26 + $0x8] sm:$0xf] %vm1630_vm5, %v3263_v29  ;;  %v3268_v61 = vpack.c.bf16 %v3255_v7, %v3255_v7  ;;  %v3260_v5 = vmul.f32 %v4728_v62, %v3247_v55  ;;  %v3269_v1 = vpack.c.bf16 %v3256_v0, %v3256_v0  ;;  %v3270_v28 = vpack.c.bf16 %v3257_v17, %v3257_v17 }
 0x472   : > { %3277 = vst.msk [vmem:[%s5538_s26 + $0xc] sm:$0xf] %vm1630_vm5, %v3264_v54  ;;  %v3271_v13 = vpack.c.bf16 %v3258_v40, %v3258_v40  ;;  %v3272_v4 = vpack.c.bf16 %v3259_v23, %v3259_v23 }
 0x473   : > { %3278 = vst.msk [vmem:[%s5538_s26 + $0x10] sm:$0xf] %vm1630_vm5, %v3265_v38  ;;  %v3273_v58 = vpack.c.bf16 %v3260_v5, %v3260_v5 }
 0x474   : > { %3279 = vst.msk [vmem:[%s5538_s26 + $0x14] sm:$0xf] %vm1630_vm5, %v3266_v52 }
 0x475   : > { %3280 = vst.msk [vmem:[%s5538_s26 + $0x18] sm:$0xf] %vm1630_vm5, %v3267_v22 }
 0x476   : > { %3281 = vst.msk [vmem:[%s5538_s26 + $0x1c] sm:$0xf] %vm1630_vm5, %v3268_v61 }
 0x477   : > { %3282 = vst.msk [vmem:[%s5538_s26 + $0x20] sm:$0xf] %vm1630_vm5, %v3269_v1 }
 0x478   : > { %3283 = vst.msk [vmem:[%s5538_s26 + $0x24] sm:$0xf] %vm1630_vm5, %v3270_v28 }
 0x479   : > { %3284 = vst.msk [vmem:[%s5538_s26 + $0x28] sm:$0xf] %vm1630_vm5, %v3271_v13 }
 0x47a   : > { %3285 = vst.msk [vmem:[%s5538_s26 + $0x2c] sm:$0xf] %vm1630_vm5, %v3272_v4 }
 0x47b   : > { %3287 = vst.msk [vmem:[%s5538_s26 + $0x30] sm:$0x3] %vm1789_vm2, %v3273_v58 }
 0x47c PF: > { %s16_s18 = sadd.s32 1, %s3891_s18  }
 0x47d   : > { %p13_p7 = scmp.ge.s32.totalorder %s16_s18, 4  }
 0x47f   :  { %15 = sbr.rel (!%p13_p7) target bundleno = 1 (0x1), region = 75 }
 0x484   :  { %3309 = vsyncpa [#allocation4], 1 }
 0x485   :  { %3311 = vsyncpa [#allocation4 + $0x1], 1 }

// kernel: _lambda_.4
= control target key start
LH: loop header
LB: loop body
LE: loop exit
PB: predicated region body
PF: predicated region fallthrough
CT: control target
= control target key end

     0   :  { %10 = vsyncpa [#allocation4], 0  ;;  %s2096_s18 = smov 0   ;;  %s2531_s0 = inlined_call_operand.vmem [shape: f32[1,2], index: 0, kind: input, shape index: {}]   ;;  %s2532_s1 = inlined_call_operand.vmem [shape: bf16[2,252,8], index: 1, kind: input, shape index: {}]   ;;  %s2533_s2 = inlined_call_operand.vmem [shape: bf16[72,32], index: 2, kind: input, shape index: {}]   ;;  %s2534_s3 = inlined_call_operand.vmem [shape: f32[1,16], index: 3, kind: input, shape index: {}]   ;;  %s2535_s4 = inlined_call_operand.vmem [shape: bf16[144,16], index: 4, kind: input, shape index: {}]   ;;  %s2536_s5 = inlined_call_operand.vmem [shape: bf16[2,36,16], index: 5, kind: output, shape index: {}]  }
   0x1 LB: > { %s1787_s19 = sadd.s32 4294967295, %s2059_s18   ;;  %p1789_p0 = scmp.ge.s32.totalorder %s2059_s18, 1  ;;  %s2059_s18 = sphi %s2096_s18, %s16_s18  }
   0x2   : > { %p157_p1 = scmp.lt.s32.totalorder %s2059_s18, 3  ;;  %s169_s22 = sshll.u32 %s2531_s0, 4  ;;  %s170_s22 = int_to_ptr.vmem [resolvable:$true] %s169_s22 }
   0x3   : > { %p2007_p3 = scmp.eq.s32.totalorder %s1787_s19, 0  ;;  %s2061_s23 = smov [#allocation3]  }
   0x4   : > { %p158_p2 = pnand %p1789_p0, %p157_p1 }
   0x6   : > { %p2003_p4 = pneg %p158_p2  ;;  %199 = sbr.rel (%p158_p2) target bundleno = 720 (0x2d0), region = 40 }
   0x8   : > { %p2004_p5 = pnand %p2007_p3, %p2003_p4 }
   0xa   : > { %2006 = dma.vmem_to_smem (!%p2004_p5), %s170_s22, 16, %s2061_s23, [#allocation4]  }
   0xb   : > { %2047 = dma.done.wait (%p2007_p3), [#allocation4], 16  }
   0xc   : > { %2049 = vsyncadd (%p2007_p3), [#allocation4], 4294967280 }
   0xd   : > { %206 = sfence }
   0xe   : > { %v359_v0 = vld [vmem:[%s2533_s2] sm:$0xf]  ;;  %vm390_vm0 = vcmask 1043456   ;;  %p229_p6 = scmp.lt.s32.totalorder %s1787_s19, 1  ;;  %v360_v2 = vld [vmem:[%s2533_s2 + $0x4] sm:$0xf] }
   0xf   : > { %v440_v1 = vsel %vm390_vm0, %v359_v0, 0  ;;  %v465_v3 = vld [vmem:[%s2533_s2 + $0x8] sm:$0xf]  ;;  %v392_v4 = vsel %vm390_vm0, %v360_v2, 0  ;;  %v525_v6 = vld [vmem:[%s2533_s2 + $0xc] sm:$0xf] }
  0x10   : > { %1996 = vmatpush.bf16.msra.mxu3 %v440_v1  ;;  %s2542_s19 = smov (!%p229_p6, %s1787_s19), 1  ;;  %v495_v5 = vsel %vm390_vm0, %v465_v3, 0  ;;  %449 = vmatpush.bf16.msra.mxu1 %v440_v1  ;;  %v557_v7 = vsel %vm390_vm0, %v525_v6, 0  ;;  %v587_v8 = vld [vmem:[%s2533_s2 + $0x10] sm:$0xf]  ;;  %vm380_vm1 = vcmask 64512  }
  0x11   : > { %1995 = vmatpush.bf16.msra.mxu2 %v392_v4  ;;  %401 = vmatpush.bf16.msra.mxu0 %v392_v4  ;;  %s1935_s9 = sshll.u32 %s2542_s19, 7  ;;  %v616_v9 = vsel %vm390_vm0, %v587_v8, 0  ;;  %vm374_vm2 = vcmask 1045504   ;;  %v700_v27 = vld [vmem:[%s2533_s2 + $0x18] sm:$0xf]  ;;  %vm479_vm3 = vcmask 1046528  }
  0x12   : > { %s2133_s12 = scalar_lea.vmem %s2532_s1, %s1935_s9  ;;  %v754_v28 = vld [vmem:[%s2533_s2 + $0x1c] sm:$0xf]  ;;  %v724_v29 = vsel %vm390_vm0, %v700_v27, 0  ;;  %v646_v32 = vld [vmem:[%s2533_s2 + $0x14] sm:$0xf]  ;;  %vm541_vm4 = vcmask 1044480  }
  0x13   : > { %v2136_v10 = vld [vmem:[%s2133_s12 + $0x8] sm:$0xff]  ;;  %v1979_v11 = vld [vmem:[%s2133_s12 + $0x30] sm:$0xff]   ;;  %v330_v12 = vld [vmem:[%s2133_s12 + $0x38] sm:$0xf]  ;;  %v777_v31 = vsel %vm390_vm0, %v754_v28, 0  ;;  %v670_v35 = vsel %vm390_vm0, %v646_v32, 0 }
  0x14   : > { %566 = vmatpush.bf16.msrb.mxu3 %v557_v7  ;;  %v1962_v13 = vunpack.c.h.b16 %v1979_v11  ;;  %v370_v14 = vunpack.c.l.b16 %v330_v12  ;;  %v1804_v15 = vld [vmem:[%s2133_s12 + $0x28] sm:$0xc]  ;;  %v1956_v16 = vld [vmem:[%s2133_s12] sm:$0xff]   ;;  %v1937_v17 = vld [vmem:[%s2133_s12 + $0x28] sm:$0xf0]  ;;  %v376_v19 = vrot.slane %v1979_v11, 2  ;;  %679 = vmatpush.bf16.msrb.mxu1 %v670_v35 }
  0x15   : > { %504 = vmatpush.bf16.msrb.mxu2 %v495_v5  ;;  %625 = vmatpush.bf16.msrb.mxu0 %v616_v9  ;;  %v1805_v21 = vor.u32 %v1937_v17, %v1804_v15  ;;  %v325_v25 = vld [vmem:[%s2133_s12 + $0x10] sm:$0x3]  ;;  %v1836_v30 = vld [vmem:[%s2133_s12 + $0x68] sm:$0xe]  ;;  %v1941_v34 = vld [vmem:[%s2133_s12 + $0x68] sm:$0xf0] }
  0x16   : > { %1814 = vmatmul.msk.bf16.vlgmr.msra.gmra.mxu3 %vm380_vm1, %v2136_v10  ;;  %1813 = vmatmul.msk.bf16.vlgmr.msra.gmra.mxu1 %vm380_vm1, %v1956_v16  ;;  %v373_v18 = vpack.c.b16 %v370_v14, %v370_v14  ;;  %v2146_v20 = vpack.c.b16 %v370_v14, %v1962_v13  ;;  %v426_v33 = vunpack.c.l.b16 %v325_v25  ;;  %v807_v36 = vld [vmem:[%s2533_s2 + $0x20] sm:$0xf]  ;;  %v1942_v38 = vld [vmem:[%s2133_s12 + $0x70] sm:$0xff]  ;;  %v1837_v39 = vor.u32 %v1941_v34, %v1836_v30  ;;  %v1821_v44 = vld [vmem:[%s2133_s12 + $0x3c] sm:$0x8]  ;;  %s2062_s25 = smov 16  }
  0x17   : > { %v375_v23 = vrot.slane %v1805_v21, 2  ;;  %v825_v37 = vsel %vm390_vm0, %v807_v36, 0  ;;  %v602_v42 = vrot.slane %v1942_v38, 1  ;;  %v1943_v43 = vld [vmem:[%s2133_s12 + $0x54] sm:$0xff]  ;;  %v1938_v45 = vld [vmem:[%s2133_s12 + $0x3c] sm:$0xf0] }
  0x18   : > { %v378_v22 = vrot.slane %v373_v18, 2  ;;  %786 = vmatpush.bf16.msra.mxu3 %v777_v31  ;;  %v429_v40 = vpack.c.b16 %v426_v33, %v426_v33  ;;  %v601_v41 = vrot.slane %v1837_v39, 1  ;;  %v1980_v47 = vld [vmem:[%s2133_s12 + $0x18] sm:$0xff]   ;;  %v2181_v49 = vld [vmem:[%s2133_s12 + $0x20] sm:$0xff]   ;;  %v1822_v53 = vor.u32 %v1938_v45, %v1821_v44  ;;  %v1993_v55 = vld [vmem:[%s2133_s12 + $0x14] sm:$0xe] }
  0x19   : > { %v377_v26 = vsel %vm374_vm2, %v375_v23, %v376_v19  ;;  %v2055_v48 = vld [vmem:[%s2133_s12 + $0x1c] sm:$0xf]  ;;  %v2056_v50 = vld [vmem:[%s2133_s12 + $0x1c] sm:$0xf0]   ;;  %v346_v51 = vld [vmem:[%s2133_s12 + $0x78] sm:$0x7] }
  0x1a   : > { %v379_v24 = vsel %vm374_vm2, %v376_v19, %v378_v22  ;;  %1806 = vmatmul.msk.bf16.vlgmr.msra.gmra.mxu0 %vm380_vm1, %v377_v26  ;;  %v603_v46 = vsel %vm479_vm3, %v601_v41, %v602_v42  ;;  %v1939_v52 = vld [vmem:[%s2133_s12 + $0x44] sm:$0xff]  ;;  %v597_v54 = vunpack.c.l.b16 %v346_v51  ;;  %v1997_v56 = vld [vmem:[%s2133_s12 + $0x14] sm:$0xf0]   ;;  %v542_v57 = vrot.slane %v1822_v53, 3  ;;  %v1944_v2 = vld [vmem:[%s2133_s12 + $0x5c] sm:$0xff]  ;;  %s2063_s26 = smov 112  }
  0x1b   : > { %1807 = vmatmul.msk.bf16.vlgmr.msra.gmra.mxu2 %vm380_vm1, %v379_v24  ;;  %834 = vmatpush.bf16.msra.mxu0 %v825_v37  ;;  %v543_v58 = vrot.slane %v1939_v52, 3  ;;  %v1994_v59 = vor.u32 %v1997_v56, %v1993_v55  ;;  %v2054_v60 = vor.u32 %v2056_v50, %v2055_v48  ;;  %v1829_v3 = vld [vmem:[%s2133_s12 + $0x4c] sm:$0xf]  ;;  %v1940_v4 = vld [vmem:[%s2133_s12 + $0x4c] sm:$0x10]  ;;  %v763_v27 = vrot.slane %v2146_v20, 1 }
  0x1c   : > { %733 = vmatpush.bf16.msra.mxu2 %v724_v29  ;;  %v600_v61 = vpack.c.b16 %v597_v54, %v597_v54  ;;  %v335_v7 = vld [vmem:[%s2133_s12 + $0x24] sm:$0x7]  ;;  %v1830_v8 = vor.u32 %v1940_v4, %v1829_v3  ;;  %v1990_v19 = vld [vmem:[%s2133_s12 + $0x2c] sm:$0xf0]   ;;  %v1986_v21 = vld [vmem:[%s2133_s12 + $0x2c] sm:$0xe] }
  0x1d   : > { %v544_v62 = vsel %vm541_vm4, %v542_v57, %v543_v58  ;;  %v480_v63 = vrot.slane %v1994_v59, 1  ;;  %v481_v0 = vrot.slane %v2054_v60, 1  ;;  %v475_v9 = vunpack.c.l.b16 %v335_v7  ;;  %v351_v14 = vld [vmem:[%s2133_s12 + $0x64] sm:$0x3]  ;;  %v2022_v23 = vld [vmem:[%s2534_s3] ss:$0 sm:$0xff] }
  0x1e   : > { %v604_v1 = vrot.slane %v600_v61, 1  ;;  %v545_v11 = vrot.slane %v1830_v8, 3  ;;  %v656_v15 = vunpack.c.l.b16 %v351_v14  ;;  %v1981_v24 = vld [vmem:[%s2133_s12] sm:$0xf0]  ;;  %v1982_v25 = vld [vmem:[%s2133_s12] sm:$0x8]  ;;  %858 = vrot.lane.b32.xlu0 %v2022_v23, %s2062_s25  ;;  %v240_v23 = vlaneseq }
  0x1f   : > { %v482_v5 = vsel %vm479_vm3, %v480_v63, %v481_v0  ;;  %v478_v12 = vpack.c.b16 %v475_v9, %v475_v9  ;;  %v1983_v28 = vor.u32 %v1982_v25, %v1981_v24  ;;  %v356_v30 = vld [vmem:[%s2133_s12 + $0x3c] sm:$0x7]  ;;  %v710_v31 = vrot.slane %v2136_v10, 3  ;;  %v1858_v20 = vld [vmem:[%s2133_s12 + $0x10] sm:$0xf]  ;;  %s866_s27 = sld [smem:[#allocation3]] }
  0x20   : > { %v605_v6 = vsel %vm479_vm3, %v602_v42, %v604_v1  ;;  %v546_v13 = vsel %vm541_vm4, %v543_v58, %v545_v11  ;;  %v659_v17 = vpack.c.b16 %v656_v15, %v656_v15  ;;  %v758_v33 = vunpack.c.l.b16 %v356_v30  ;;  %v1945_v36 = vld [vmem:[%s2133_s12 + $0x10] sm:$0x10]  ;;  %v358_v39 = vld [vmem:[%s2133_s12 + $0x28] sm:$0x3]  ;;  %s1932_s23 = sld [smem:[#allocation3 + $0x1]]  ;;  %s1998_s24 = smul.u32 20, %s2542_s19 }
  0x21   : > { %v483_v16 = vrot.slane %v478_v12, 1  ;;  %v709_v32 = vrot.slane %v1983_v28, 3  ;;  %v1859_v38 = vor.u32 %v1945_v36, %v1858_v20  ;;  %v811_v10 = vunpack.c.l.b16 %v358_v39 }
  0x22   : > { %v761_v35 = vpack.c.b16 %v758_v33, %v758_v33  ;;  %v241_v28 = vshrl.u32 %v240_v23, 7  ;;  %s238_s19 = scalar_lea.vmem %s2536_s5, %s1998_s24 }
  0x23   : > { %v484_v18 = vsel %vm479_vm3, %v481_v0, %v483_v16  ;;  %v711_v34 = vsel %vm541_vm4, %v709_v32, %v710_v31  ;;  %v712_v41 = vrot.slane %v1859_v38, 3  ;;  %v814_v42 = vpack.c.b16 %v811_v10, %v811_v10 }
  0x24   : > { %v765_v37 = vrot.slane %v761_v35, 1  ;;  %v242_v30 = vadd.s32 8, %v241_v28  ;;  %v246_v35 = vcvt.s32.f32 %v241_v28 }
  0x26   : > { %1815 = vmatmul.msk.bf16.gmra.mxu3 %vm380_vm1, %v429_v40  ;;  %1853 = vmatmul.msk.bf16.vlgmr.msrb.gmra.mxu1 %vm380_vm1, %v1943_v43  ;;  %v766_v40 = vsel %vm479_vm3, %v763_v27, %v765_v37  ;;  %v713_v43 = vsel %vm541_vm4, %v710_v31, %v712_v41 }
  0x2a   : > { %1842 = vmatmul.msk.bf16.vlgmr.msrb.gmra.mxu0 %vm380_vm1, %v603_v46 }
  0x2b   : > { %1808 = vmatmul.msk.bf16.gmra.mxu2 %vm380_vm1, %v378_v22  ;;  %v1987_v22 = vor.u32 %v1990_v19, %v1986_v21 }
  0x2d   : > { %v762_v26 = vrot.slane %v1987_v22, 1 }
  0x2f   : > { %v764_v29 = vsel %vm479_vm3, %v762_v26, %v763_v27 }
  0x36   : > { %1831 = vmatmul.msk.bf16.vlgmr.msrb.gmra.mxu3 %vm380_vm1, %v544_v62  ;;  %1854 = vmatmul.msk.bf16.gmra.mxu1 %vm380_vm1, %v1944_v2 }
  0x3a   : > { %1843 = vmatmul.msk.bf16.gmra.mxu0 %vm380_vm1, %v605_v6 }
  0x3b   : > { %1816 = vmatmul.msk.bf16.vlgmr.msrb.gmra.mxu2 %vm380_vm1, %v482_v5 }
  0x46   : > { %1832 = vmatmul.msk.bf16.gmra.mxu3 %vm380_vm1, %v546_v13  ;;  %1855 = vmatmul.msk.bf16.gmra.mxu1 %vm380_vm1, %v659_v17 }
  0x4a   : > { %1844 = vmatmul.msk.bf16.gmra.mxu0 %vm380_vm1, %v604_v1 }
  0x4b   : > { %1817 = vmatmul.msk.bf16.gmra.mxu2 %vm380_vm1, %v484_v18 }
  0x56   : > { %1833 = vmatmul.msk.bf16.gmra.mxu3 %vm380_vm1, %v545_v11 }
  0x5a   : > { %1866 = vmatmul.msk.bf16.vlgmr.msra.gmra.mxu0 %vm380_vm1, %v1980_v47 }
  0x5b   : > { %1818 = vmatmul.msk.bf16.gmra.mxu2 %vm380_vm1, %v483_v16 }
  0x66   : > { %1863 = vmatmul.msk.bf16.vlgmr.msra.gmra.mxu3 %vm380_vm1, %v764_v29 }
  0x6a   : > { %1867 = vmatmul.msk.bf16.gmra.mxu0 %vm380_vm1, %v2181_v49 }
  0x6b   : > { %1860 = vmatmul.msk.bf16.vlgmr.msra.gmra.mxu2 %vm380_vm1, %v711_v34 }
  0x76   : > { %1864 = vmatmul.msk.bf16.gmra.mxu3 %vm380_vm1, %v766_v40  ;;  %v251_v40 = vadd.f32 0.5, %v246_v35 }
  0x7a   : > { %1868 = vmatmul.msk.bf16.gmra.mxu0 %vm380_vm1, %v814_v42  ;;  %v243_v42 = vadd.s32 16, %v241_v28 }
  0x7b   : > { %1861 = vmatmul.msk.bf16.gmra.mxu2 %vm380_vm1, %v713_v43 }
  0x86   : > { %1865 = vmatmul.msk.bf16.gmra.mxu3 %vm380_vm1, %v765_v37  ;;  %v247_v37 = vcvt.s32.f32 %v242_v30 }
  0x88   : > { %v252_v10 = vadd.f32 0.5, %v247_v37 }
  0x8b   : > { %1862 = vmatmul.msk.bf16.gmra.mxu2 %vm380_vm1, %v712_v41 }
  0x93   : > { %v451_v44 = vpop.f32.mrf.mxu1 }
  0x97   : > { %v403_v46 = vpop.f32.mrf.mxu0 }
  0x98   : > { %v452_v47 = vadd.f32 %v451_v44, %v403_v46 }
  0x99   : > { %v456_v45 = vpop.f32.mrf.mxu3 }
  0x9b   : > { %v453_v48 = vpop.f32.mrf.mxu1 }
  0x9e   : > { %v408_v49 = vpop.f32.mrf.mxu2 }
  0x9f   : > { %v457_v50 = vadd.f32 %v456_v45, %v408_v49  ;;  %v405_v52 = vpop.f32.mrf.mxu0  ;;  %v256_v45 = vmul.f32 0.16666667, %v251_v40 }
  0xa0   : > { %v454_v11 = vadd.f32 %v453_v48, %v405_v52  ;;  %v257_v48 = vmul.f32 0.16666667, %v252_v10 }
  0xa1   : > { %v458_v51 = vpop.f32.mrf.mxu3  ;;  %v261_v52 = vfloor.f32 %v256_v45 }
  0xa3   : > { %v681_v53 = vpop.f32.mrf.mxu1  ;;  %vm276_vm5 = vcmp.ge.f32.partialorder %v261_v52, 1.0  ;;  %vm281_vm6 = vcmp.le.f32.partialorder %v261_v52, 4.0 }
  0xa4   : > { %vm286_vm9 = vmand %vm276_vm5, %vm281_vm6 }
  0xa6   : > { %v410_v54 = vpop.f32.mrf.mxu2 }
  0xa7   : > { %v627_v56 = vpop.f32.mrf.mxu0  ;;  %v459_v31 = vadd.f32 %v458_v51, %v410_v54 }
  0xa9   : > { %v461_v55 = vpop.f32.mrf.mxu3 }
  0xab   : > { %v683_v57 = vpop.f32.mrf.mxu1 }
  0xae   : > { %v413_v58 = vpop.f32.mrf.mxu2 }
  0xaf   : > { %v462_v59 = vadd.f32 %v461_v55, %v413_v58  ;;  %v629_v61 = vpop.f32.mrf.mxu0  ;;  %v266_v58 = vmul.f32 6.0, %v261_v52 }
  0xb1   : > { %v463_v60 = vpop.f32.mrf.mxu3 }
  0xb3   : > { %v686_v62 = vpop.f32.mrf.mxu1 }
  0xb6   : > { %v415_v63 = vpop.f32.mrf.mxu2 }
  0xb7   : > { %v632_v1 = vpop.f32.mrf.mxu0 }
  0xb9   : > { %v568_v0 = vpop.f32.mrf.mxu3 }
  0xbb   : > { %v688_v2 = vpop.f32.mrf.mxu1 }
  0xbe   : > { %v506_v3 = vpop.f32.mrf.mxu2 }
  0xbf   : > { %v520_v4 = vadd.f32 %v506_v3, %v452_v47  ;;  %v634_v6 = vpop.f32.mrf.mxu0 }
  0xc1   : > { %v570_v5 = vpop.f32.mrf.mxu3  ;;  %v582_v7 = vadd.f32 %v568_v0, %v520_v4  ;;  %v271_v0 = vsub.f32 %v246_v35, %v266_v58  ;;  %v2254_v4 = vadd.s32 32, %v241_v28 }
  0xc3   : > { %v641_v8 = vadd.f32 %v627_v56, %v582_v7  ;;  %v691_v9 = vpop.f32.mrf.mxu1  ;;  %v2249_v56 = vadd.s32 24, %v241_v28  ;;  %vm291_vm10 = vcmp.ge.f32.partialorder %v271_v0, 1.0  ;;  %vm301_vm14 = vcmp.le.f32.partialorder %v271_v0, 4.0 }
  0xc4   : > { %vm296_vm13 = vmand %vm286_vm9, %vm291_vm10  ;;  %vm872_vm10 = vcmask 130048  }
  0xc5   : > { %v2237_v12 = vadd.f32 %v681_v53, %v641_v8  ;;  %v262_v53 = vfloor.f32 %v257_v48  ;;  %v249_v63 = vcvt.s32.f32 %v2249_v56  ;;  %vm306_vm1 = vmand %vm296_vm13, %vm301_vm14 }
  0xc6   : > { %v508_v13 = vpop.f32.mrf.mxu2 }
  0xc7   : > { %v521_v14 = vadd.f32 %v508_v13, %v454_v11  ;;  %v637_v16 = vpop.f32.mrf.mxu0  ;;  %v254_v3 = vadd.f32 0.5, %v249_v63  ;;  %vm277_vm7 = vcmp.ge.f32.partialorder %v262_v53, 1.0  ;;  %vm282_vm8 = vcmp.le.f32.partialorder %v262_v53, 4.0 }
  0xc8   : > { %vm287_vm12 = vmand %vm277_vm7, %vm282_vm8 }
  0xc9   : > { %v573_v15 = vpop.f32.mrf.mxu3  ;;  %v583_v17 = vadd.f32 %v570_v5, %v521_v14  ;;  %v259_v13 = vmul.f32 0.16666667, %v254_v3  ;;  %v250_v14 = vcvt.s32.f32 %v2254_v4 }
  0xcb   : > { %v642_v18 = vadd.f32 %v629_v61, %v583_v17  ;;  %v693_v19 = vpop.f32.mrf.mxu1  ;;  %v267_v61 = vmul.f32 6.0, %v262_v53 }
  0xcc   : > { %v255_v19 = vadd.f32 0.5, %v250_v14 }
  0xcd   : > { %v2239_v21 = vadd.f32 %v683_v57, %v642_v18  ;;  %v264_v18 = vfloor.f32 %v259_v13 }
  0xce   : > { %v511_v22 = vpop.f32.mrf.mxu2  ;;  %v260_v30 = vmul.f32 0.16666667, %v255_v19 }
  0xcf   : > { %v522_v24 = vadd.f32 %v511_v22, %v457_v50  ;;  %v639_v26 = vpop.f32.mrf.mxu0  ;;  %v248_v50 = vcvt.s32.f32 %v243_v42  ;;  %vm279_vm13 = vcmp.ge.f32.partialorder %v264_v18, 1.0  ;;  %vm284_vm14 = vcmp.le.f32.partialorder %v264_v18, 4.0 }
  0xd1   : > { %v575_v25 = vpop.f32.mrf.mxu3  ;;  %v584_v27 = vadd.f32 %v573_v15, %v522_v24  ;;  %v253_v55 = vadd.f32 0.5, %v248_v50  ;;  %v2260_v15 = vpop.permute.xlu0 %858  ;;  %v2064_v24 = vmov 0.0  }
  0xd3   : > { %v643_v29 = vadd.f32 %v632_v1, %v584_v27  ;;  %v272_v1 = vsub.f32 %v247_v37, %v267_v61 }
  0xd5   : > { %v2241_v32 = vadd.f32 %v686_v62, %v643_v29  ;;  %v258_v62 = vmul.f32 0.16666667, %v253_v55  ;;  %vm292_vm11 = vcmp.ge.f32.partialorder %v272_v1, 1.0  ;;  %vm302_vm0 = vcmp.le.f32.partialorder %v272_v1, 4.0 }
  0xd6   : > { %v513_v33 = vpop.f32.mrf.mxu2  ;;  %vm297_vm15 = vmand %vm287_vm12, %vm292_vm11  ;;  %v269_v29 = vmul.f32 6.0, %v264_v18 }
  0xd7   : > { %v523_v34 = vadd.f32 %v513_v33, %v459_v31  ;;  %v836_v36 = vpop.f32.mrf.mxu0  ;;  %vm307_vm7 = vmand %vm297_vm15, %vm302_vm0 }
  0xd8   : > { %v2274_v31 = vsel %vm307_vm7, 1.0, %v2064_v24  ;;  %vm289_vm0 = vmand %vm279_vm13, %vm284_vm14 }
  0xd9   : > { %v578_v20 = vpop.f32.mrf.mxu3  ;;  %v585_v38 = vadd.f32 %v575_v25, %v523_v34  ;;  %v2269_v25 = vsel %vm306_vm1, 1.0, %v2064_v24 }
  0xdb   : > { %v644_v39 = vadd.f32 %v634_v6, %v585_v38 }
  0xdd   : > { %v2243_v41 = vadd.f32 %v688_v2, %v644_v39  ;;  %v263_v2 = vfloor.f32 %v258_v62 }
  0xde   : > { %v516_v43 = vpop.f32.mrf.mxu2 }
  0xdf   : > { %v524_v44 = vadd.f32 %v516_v43, %v462_v59  ;;  %v2245_v47 = vpop.f32.mrf.mxu0  ;;  %v268_v11 = vmul.f32 6.0, %v263_v2  ;;  %vm278_vm5 = vcmp.ge.f32.partialorder %v263_v2, 1.0  ;;  %vm283_vm6 = vcmp.le.f32.partialorder %v263_v2, 4.0 }
  0xe0   : > { %vm288_vm8 = vmand %vm278_vm5, %vm283_vm6 }
  0xe1   : > { %v580_v46 = vpop.f32.mrf.mxu3  ;;  %v586_v49 = vadd.f32 %v578_v20, %v524_v44  ;;  %v273_v17 = vsub.f32 %v248_v50, %v268_v11  ;;  %v274_v20 = vsub.f32 %v249_v63, %v269_v29 }
  0xe3   : > { %v645_v51 = vadd.f32 %v637_v16, %v586_v49  ;;  %vm293_vm9 = vcmp.ge.f32.partialorder %v273_v17, 1.0  ;;  %vm303_vm12 = vcmp.le.f32.partialorder %v273_v17, 4.0  ;;  %vm294_vm1 = vcmp.ge.f32.partialorder %v274_v20, 1.0 }
  0xe4   : > { %vm298_vm11 = vmand %vm288_vm8, %vm293_vm9  ;;  %vm304_vm6 = vcmp.le.f32.partialorder %v274_v20, 4.0 }
  0xe5   : > { %v2247_v54 = vadd.f32 %v691_v9, %v645_v51  ;;  %vm308_vm15 = vmand %vm298_vm11, %vm303_vm12 }
  0xe6   : > { %v518_v57 = vpop.f32.mrf.mxu2  ;;  %v2290_v46 = vsel %vm308_vm15, 1.0, %v2064_v24  ;;  %vm299_vm5 = vmand %vm289_vm0, %vm294_vm1  ;;  %vm880_vm0 = vcmask 125952   ;;  %vm959_vm1 = vsmask.f32 3328 }
  0xe7   : > { %v2251_v59 = vpop.f32.mrf.mxu0  ;;  %vm309_vm9 = vmand %vm299_vm5, %vm304_vm6  ;;  %vm964_vm6 = vcmask 125953  }
  0xe8   : > { %v2299_v57 = vsel %vm309_vm9, 1.0, %v2064_v24  ;;  %vm960_vm5 = vmand %vm880_vm0, %vm959_vm1 }
  0xe9   : > { %v788_v60 = vpop.f32.mrf.mxu3 }
  0xee   : > { %v735_v5 = vpop.f32.mrf.mxu2 }
  0xef   : > { %v749_v6 = vadd.f32 %v735_v5, %v2237_v12  ;;  %v2257_v8 = vpop.f32.mrf.mxu0 }
  0xf1   : > { %v790_v7 = vpop.f32.mrf.mxu3  ;;  %v802_v9 = vadd.f32 %v788_v60, %v749_v6 }
  0xf3   : > { %v2262_v16 = vadd.f32 %v836_v36, %v802_v9  ;;  %v265_v36 = vfloor.f32 %v260_v30 }
  0xf5   : > { %v861_v12 = vadd.f32 %v2260_v15, %v2262_v16  ;;  %v270_v45 = vmul.f32 6.0, %v265_v36  ;;  %vm280_vm7 = vcmp.ge.f32.partialorder %v265_v36, 1.0  ;;  %vm285_vm8 = vcmp.le.f32.partialorder %v265_v36, 4.0 }
  0xf6   : > { %v737_v22 = vpop.f32.mrf.mxu2  ;;  %vm290_vm11 = vmand %vm280_vm7, %vm285_vm8  ;;  %vm965_vm7 = vsmask.f32 7942 }
  0xf7   : > { %v750_v23 = vadd.f32 %v737_v22, %v2239_v21  ;;  %1684 = vrot.lane.b32.xlu0 %v861_v12, %s2063_s26  ;;  %v2271_v27 = vpop.f32.mrf.mxu0  ;;  %v867_v21 = vmul.f32 %v2269_v25, %v2262_v16  ;;  %v275_v49 = vsub.f32 %v250_v14, %v270_v45  ;;  %vm966_vm8 = vmand %vm964_vm6, %vm965_vm7  ;;  %vm976_vm7 = vsmask.f32 7440 }
  0xf9   : > { %v793_v26 = vpop.f32.mrf.mxu3  ;;  %v803_v28 = vadd.f32 %v790_v7, %v750_v23  ;;  %v873_v38 = vsel %vm872_vm10, %v867_v21, 0.0  ;;  %vm295_vm12 = vcmp.ge.f32.partialorder %v275_v49, 1.0  ;;  %vm305_vm14 = vcmp.le.f32.partialorder %v275_v49, 4.0 }
  0xfa   : > { %vm300_vm13 = vmand %vm290_vm11, %vm295_vm12 }
  0xfb   : > { %v2279_v33 = vadd.f32 %v2245_v47, %v803_v28  ;;  %vm310_vm15 = vmand %vm300_vm13, %vm305_vm14 }
  0xfc   : > { %v2308_v2 = vsel %vm310_vm15, 1.0, %v2064_v24 }
  0xfd   : > { %v868_v34 = vmul.f32 %v2274_v31, %v2279_v33  ;;  %v862_v35 = vadd.f32 %v2260_v15, %v2279_v33 }
  0xfe   : > { %v740_v37 = vpop.f32.mrf.mxu2 }
  0xff   : > { %v874_v39 = vsel %vm872_vm10, %v868_v34, 0.0  ;;  %v751_v40 = vadd.f32 %v740_v37, %v2241_v32  ;;  %1686 = vrot.lane.b32.xlu1 %v862_v35, %s2063_s26  ;;  %v848_v43 = vpop.f32.mrf.mxu0 }
 0x100   : > { %v875_v10 = vadd.f32 %v874_v39, %v873_v38 }
 0x101   : > { %v795_v42 = vpop.f32.mrf.mxu3  ;;  %v804_v44 = vadd.f32 %v793_v26, %v751_v40 }
 0x103   : > { %v852_v47 = vadd.f32 %v2251_v59, %v804_v44 }
 0x105   : > { %v869_v48 = vmul.f32 %v2290_v46, %v852_v47  ;;  %v863_v32 = vadd.f32 %v2260_v15, %v852_v47 }
 0x106   : > { %v742_v50 = vpop.f32.mrf.mxu2 }
 0x107   : > { %v876_v51 = vsel %vm872_vm10, %v869_v48, 0.0  ;;  %v752_v52 = vadd.f32 %v742_v50, %v2243_v41  ;;  %1688 = vrot.lane.b32.xlu1 %v863_v32, %s2063_s26  ;;  %v961_v48 = vld [vmem:[#allocation2] sm:$0xf] }
 0x108   : > { %v877_v53 = vadd.f32 %v876_v51, %v875_v10  ;;  %v962_v49 = vsel %vm960_vm5, 0, %v961_v48  ;;  %v967_v51 = vld [vmem:[#allocation2 + $0x14] sm:$0xe] }
 0x109   : > { %v798_v55 = vpop.f32.mrf.mxu3  ;;  %v805_v56 = vadd.f32 %v795_v42, %v752_v52  ;;  %963 = vst [vmem:[#allocation2] sm:$0xf] %v962_v49  ;;  %v968_v52 = vsel %vm966_vm8, 0, %v967_v51  ;;  %vm1033_vm8 = vcmask 125955  }
 0x10a   : > { %969 = vst [vmem:[#allocation2 + $0x14] sm:$0xe] %v968_v52 }
 0x10b   : > { %v853_v58 = vadd.f32 %v2257_v8, %v805_v56 }
 0x10d   : > { %v870_v60 = vmul.f32 %v2299_v57, %v853_v58  ;;  %v864_v61 = vadd.f32 %v2260_v15, %v853_v58 }
 0x10e   : > { %v745_v59 = vpop.f32.mrf.mxu2 }
 0x10f   : > { %v878_v41 = vsel %vm872_vm10, %v870_v60, 0.0  ;;  %v753_v62 = vadd.f32 %v745_v59, %v2247_v54  ;;  %1690 = vrot.lane.b32.xlu2 %v864_v61, %s2063_s26  ;;  %v1947_v61 = vld [vmem:[%s2535_s4 + $0x8] sm:$0xff]  ;;  %v1946_v59 = vld [vmem:[%s2535_s4] sm:$0xff] }
 0x110   : > { %v879_v63 = vadd.f32 %v878_v41, %v877_v53  ;;  %v1948_v41 = vld [vmem:[%s2535_s4 + $0x10] sm:$0xff]  ;;  %1127 = vmatpush.bf16.msra.mxu1 %v1947_v61  ;;  %1166 = vmatpush.bf16.msrb.mxu2 %v1946_v59 }
 0x111   : > { %v800_v0 = vpop.f32.mrf.mxu3  ;;  %v806_v1 = vadd.f32 %v798_v55, %v753_v62  ;;  %1214 = vmatpush.bf16.msrb.mxu3 %v1948_v41 }
 0x113   : > { %v854_v3 = vadd.f32 %v2271_v27, %v806_v1  ;;  %v1949_v1 = vld [vmem:[%s2535_s4 + $0x18] sm:$0xff] }
 0x114   : > { %1272 = vmatpush.bf16.msrb.mxu0 %v1949_v1 }
 0x115   : > { %v871_v4 = vmul.f32 %v2308_v2, %v854_v3  ;;  %v865_v5 = vadd.f32 %v2260_v15, %v854_v3 }
 0x116   : > { %v747_v6 = vpop.f32.mrf.mxu2 }
 0x117   : > { %v881_v7 = vsel %vm880_vm0, %v871_v4, 0.0  ;;  %1692 = vrot.lane.b32.xlu2 %v865_v5, %s2063_s26  ;;  %v942_v4 = vstv %s866_s27 }
 0x118   : > { %v882_v54 = vadd.f32 %v881_v7, %v879_v63 }
 0x11a   : > { %v883_v8 = vrot.slane %v882_v54, 4 }
 0x11c   : > { %v884_v9 = vadd.f32 %v883_v8, %v882_v54  ;;  %v2065_v8 = vmov 0  }
 0x11d   : > { %970 = vst.msk [vmem:[#allocation2 + $0x18] sm:$0xf] %vm880_vm0, %v2065_v8 }
 0x11e   : > { %v885_v11 = vrot.slane %v884_v9, 2 }
 0x120   : > { %v886_v13 = vadd.f32 %v885_v11, %v884_v9 }
 0x122   : > { %v887_v14 = vrot.slane %v886_v13, 1 }
 0x124   : > { %v888_v12 = vadd.f32 %v887_v14, %v886_v13 }
 0x126   : > { %v889_v17 = vmul.f32 0.0625, %v888_v12  ;;  %v1950_v12 = vld [vmem:[%s2535_s4 + $0x20] sm:$0xff] }
 0x127   : > { %1342 = vmatpush.bf16.msrb.mxu1 %v1950_v12 }
 0x128   : > { %v2316_v18 = vsub.f32 %v2262_v16, %v889_v17  ;;  %v2319_v19 = vsub.f32 %v2279_v33, %v889_v17  ;;  %v2321_v15 = vsub.f32 %v852_v47, %v889_v17  ;;  %v2323_v22 = vsub.f32 %v853_v58, %v889_v17 }
 0x129   : > { %v2325_v23 = vsub.f32 %v854_v3, %v889_v17 }
 0x12a   : > { %v895_v24 = vmul.f32 %v2269_v25, %v2316_v18  ;;  %v896_v26 = vmul.f32 %v2274_v31, %v2319_v19  ;;  %v897_v27 = vmul.f32 %v2290_v46, %v2321_v15  ;;  %v898_v16 = vmul.f32 %v2299_v57, %v2323_v22 }
 0x12b   : > { %v899_v28 = vmul.f32 %v2308_v2, %v2325_v23 }
 0x12c   : > { %v900_v29 = vmul.f32 %v895_v24, %v895_v24  ;;  %v901_v30 = vmul.f32 %v896_v26, %v896_v26  ;;  %v902_v21 = vmul.f32 %v897_v27, %v897_v27  ;;  %v903_v33 = vmul.f32 %v898_v16, %v898_v16 }
 0x12d   : > { %v904_v36 = vmul.f32 %v899_v28, %v899_v28 }
 0x12e   : > { %v905_v34 = vsel %vm872_vm10, %v900_v29, 0.0  ;;  %v906_v35 = vsel %vm872_vm10, %v901_v30, 0.0  ;;  %v908_v37 = vsel %vm872_vm10, %v902_v21, 0.0  ;;  %v910_v39 = vsel %vm872_vm10, %v903_v33, 0.0 }
 0x12f   : > { %v907_v20 = vadd.f32 %v906_v35, %v905_v34  ;;  %v912_v10 = vsel %vm880_vm0, %v904_v36, 0.0 }
 0x131   : > { %v909_v38 = vadd.f32 %v908_v37, %v907_v20 }
 0x133   : > { %v911_v40 = vadd.f32 %v910_v39, %v909_v38 }
 0x135   : > { %v913_v42 = vadd.f32 %v912_v10, %v911_v40 }
 0x137   : > { %v914_v43 = vrot.slane %v913_v42, 4 }
 0x139   : > { %v915_v44 = vadd.f32 %v914_v43, %v913_v42 }
 0x13b   : > { %v916_v45 = vrot.slane %v915_v44, 2 }
 0x13d   : > { %v917_v47 = vadd.f32 %v916_v45, %v915_v44 }
 0x13f   : > { %v918_v32 = vrot.slane %v917_v47, 1 }
 0x141   : > { %v919_v50 = vadd.f32 %v918_v32, %v917_v47  ;;  %v1036_v32 = vld [vmem:[#allocation2] sm:$0x8] }
 0x143   : > { %v920_v53 = vmul.f32 0.0625, %v919_v50 }
 0x145   : > { %v921_v55 = vadd.f32 1e-05, %v920_v53 }
 0x147   : > { %2023 = vrsqrt.f32 %v921_v55  ;;  %vm928_vm11 = vweird.f32 %v921_v55 }
 0x14d   : > { %v2024_v56 = vpop.eup %2023 }
 0x14e   : > { %v923_v58 = vmul.f32 %v2024_v56, %v921_v55  ;;  %vm929_vm9 = vweird.f32 %v2024_v56 }
 0x14f   : > { %vm930_vm12 = vmor %vm928_vm11, %vm929_vm9  ;;  %vm1034_vm9 = vsmask.f32 7950  ;;  %vm1043_vm11 = vcmask 123904  }
 0x150   : > { %v924_v60 = vmul.f32 %v2024_v56, %v923_v58 }
 0x152   : > { %v925_v62 = vmul.f32 0.5, %v924_v60 }
 0x154   : > { %v926_v63 = vsub.f32 1.5, %v925_v62 }
 0x156   : > { %v927_v0 = vmul.f32 %v2024_v56, %v926_v63 }
 0x158   : > { %v931_v3 = vsel %vm930_vm12, %v2024_v56, %v927_v0  ;;  %vm2372_vm12 = vmand %vm1033_vm8, %vm1034_vm9 }
 0x159   : > { %v932_v5 = vmul.f32 %v931_v3, %v2316_v18  ;;  %v933_v6 = vmul.f32 %v931_v3, %v2319_v19  ;;  %v934_v7 = vmul.f32 %v931_v3, %v2321_v15  ;;  %v935_v54 = vmul.f32 %v931_v3, %v2323_v22 }
 0x15a   : > { %v936_v9 = vmul.f32 %v931_v3, %v2325_v23 }
 0x15b   : > { %vm937_vm13 = vcmp.ge.f32.partialorder %v932_v5, 0.0  ;;  %vm938_vm14 = vcmp.ge.f32.partialorder %v933_v6, 0.0  ;;  %vm939_vm15 = vcmp.ge.f32.partialorder %v934_v7, 0.0  ;;  %vm940_vm5 = vcmp.ge.f32.partialorder %v935_v54, 0.0 }
 0x15c   : > { %vm941_vm6 = vcmp.ge.f32.partialorder %v936_v9, 0.0  ;;  %v943_v11 = vmul.f32 %v942_v4, %v932_v5  ;;  %v944_v13 = vmul.f32 %v942_v4, %v933_v6  ;;  %v945_v14 = vmul.f32 %v942_v4, %v934_v7 }
 0x15d   : > { %v946_v17 = vmul.f32 %v942_v4, %v935_v54  ;;  %v947_v18 = vmul.f32 %v942_v4, %v936_v9 }
 0x15e   : > { %v948_v19 = vsel %vm937_vm13, %v932_v5, %v943_v11  ;;  %v949_v15 = vsel %vm938_vm14, %v933_v6, %v944_v13  ;;  %v950_v22 = vsel %vm939_vm15, %v934_v7, %v945_v14  ;;  %vm2378_vm13 = vmor %vm959_vm1, %vm976_vm7  ;;  %vm1044_vm14 = vsmask.f32 1280 }
 0x15f   : > { %v951_v24 = vsel %vm940_vm5, %v935_v54, %v946_v17  ;;  %v952_v23 = vsel %vm941_vm6, %v936_v9, %v947_v18  ;;  %v953_v26 = vmul.f32 %v2269_v25, %v948_v19  ;;  %v954_v27 = vmul.f32 %v2274_v31, %v949_v15  ;;  %vm1045_vm1 = vmand %vm1043_vm11, %vm1044_vm14  ;;  %v1046_v9 = vld [vmem:[#allocation2 + $0x14] sm:$0x3] }
 0x160   : > { %v955_v16 = vmul.f32 %v2290_v46, %v950_v22  ;;  %v956_v28 = vmul.f32 %v2299_v57, %v951_v24  ;;  %v957_v29 = vmul.f32 %v2308_v2, %v952_v23  ;;  %vm1081_vm15 = vsmask.f32 7424 }
 0x161   : > { %v971_v30 = vpack.c.bf16 %v953_v26, %v953_v26  ;;  %v972_v21 = vpack.c.bf16 %v954_v27, %v954_v27  ;;  %vm1472_vm5 = vsmask.f32 5376 }
 0x162   : > { %v973_v33 = vpack.c.bf16 %v955_v16, %v955_v16  ;;  %v974_v34 = vpack.c.bf16 %v956_v28, %v956_v28  ;;  %v975_v35 = vpack.c.bf16 %v957_v29, %v957_v29 }
 0x163   : > { %v979_v20 = vshll.u32 %v971_v30, 16  ;;  %v982_v36 = vshrl.u32 %v971_v30, 16  ;;  %v988_v37 = vshll.u32 %v972_v21, 16  ;;  %v992_v38 = vshrl.u32 %v972_v21, 16 }
 0x164   : > { %v998_v39 = vshll.u32 %v973_v33, 16  ;;  %v1002_v40 = vshrl.u32 %v973_v33, 16  ;;  %v1008_v10 = vshll.u32 %v974_v34, 16  ;;  %v1012_v42 = vshrl.u32 %v974_v34, 16 }
 0x165   : > { %v981_v43 = vrot.slane %v979_v20, 5  ;;  %v984_v44 = vrot.slane %v982_v36, 4  ;;  %v990_v45 = vrot.slane %v988_v37, 5  ;;  %v994_v47 = vrot.slane %v992_v38, 4 }
 0x166   : > { %v1000_v49 = vrot.slane %v998_v39, 5  ;;  %v1004_v50 = vrot.slane %v1002_v40, 4  ;;  %v1010_v51 = vrot.slane %v1008_v10, 5  ;;  %v1014_v52 = vrot.slane %v1012_v42, 4  ;;  %v1951_v42 = vld [vmem:[%s2535_s4 + $0x28] sm:$0xff] }
 0x167   : > { %v985_v53 = vor.u32 %v984_v44, %v981_v43  ;;  %v995_v55 = vor.u32 %v994_v47, %v990_v45  ;;  %v1018_v56 = vshll.u32 %v975_v35, 16  ;;  %v1022_v58 = vshrl.u32 %v975_v35, 16  ;;  %1390 = vmatpush.bf16.msra.mxu2 %v1951_v42 }
 0x168   : > { %v1005_v61 = vor.u32 %v1004_v50, %v1000_v49  ;;  %v1015_v59 = vor.u32 %v1014_v52, %v1010_v51  ;;  %v1037_v41 = vsel %vm2372_vm12, %v981_v43, %v1036_v32  ;;  %v1952_v43 = vld [vmem:[%s2535_s4 + $0x30] sm:$0xff] }
 0x169   : > { %v986_v62 = vrot.slane %v985_v53, 4  ;;  %v996_v63 = vrot.slane %v995_v55, 4  ;;  %v1020_v0 = vrot.slane %v1018_v56, 5  ;;  %v1024_v1 = vrot.slane %v1022_v58, 4  ;;  %1038 = vst [vmem:[#allocation2] sm:$0x8] %v1037_v41  ;;  %1446 = vmatpush.bf16.msra.mxu3 %v1952_v43 }
 0x16a   : > { %v1006_v3 = vrot.slane %v1005_v61, 4  ;;  %v1016_v4 = vrot.slane %v1015_v59, 4  ;;  %v1954_v59 = vld [vmem:[%s2535_s4 + $0x40] sm:$0xff] }
 0x16b   : > { %v991_v5 = vsel %vm2378_vm13, %v986_v62, %v990_v45  ;;  %v1001_v6 = vsel %vm2378_vm13, %v996_v63, %v1000_v49  ;;  %v1025_v7 = vor.u32 %v1024_v1, %v1020_v0  ;;  %v1953_v49 = vld [vmem:[%s2535_s4 + $0x38] sm:$0xff] }
 0x16c   : > { %v1011_v54 = vsel %vm2378_vm13, %v1006_v3, %v1010_v51  ;;  %v1021_v8 = vsel %vm2378_vm13, %v1016_v4, %v1020_v0  ;;  %1039 = vst.msk [vmem:[#allocation2 + $0x4] sm:$0xf] %vm880_vm0, %v991_v5  ;;  %1520 = vmatpush.bf16.msra.mxu0 %v1953_v49 }
 0x16d   : > { %v1026_v11 = vrot.slane %v1025_v7, 4  ;;  %1040 = vst.msk [vmem:[#allocation2 + $0x8] sm:$0xf] %vm880_vm0, %v1001_v6 }
 0x16e   : > { %1041 = vst.msk [vmem:[#allocation2 + $0xc] sm:$0xf] %vm880_vm0, %v1011_v54 }
 0x16f   : > { %1042 = vst.msk [vmem:[#allocation2 + $0x10] sm:$0xf] %vm880_vm0, %v1021_v8  ;;  %v1047_v13 = vsel %vm1045_vm1, %v1026_v11, %v1046_v9 }
 0x170   : > { %1048 = vst [vmem:[#allocation2 + $0x14] sm:$0x3] %v1047_v13  ;;  %v1056_v14 = vld [vmem:[#allocation2] sm:$0x8] }
 0x171   : > { %v1055_v12 = vld [vmem:[#allocation2] sm:$0xe]  ;;  %v1240_v15 = vunpack.c.l.b16 %v1056_v14 }
 0x172   : > { %v1185_v22 = vunpack.c.l.b16 %v1055_v12 }
 0x173   : > { %v1968_v17 = vld [vmem:[#allocation2] sm:$0xff]  }
 0x174   : > { %v2397_v18 = vunpack.c.h.b16 %v1968_v17  ;;  %v1085_v19 = vshll.u32 %v1968_v17, 16  ;;  %1880 = vmatmul.msk.bf16.vlgmr.msrb.gmra.mxu2 %vm872_vm10, %v1968_v17  ;;  %v1083_v24 = vshrl.u32 %v1968_v17, 16  ;;  %v1060_v63 = vld [vmem:[#allocation2 + $0x4] sm:$0xc] }
 0x175   : > { %v2400_v23 = vld [vmem:[#allocation2 + $0x8] sm:$0xff]   ;;  %v1415_v4 = vunpack.c.l.b16 %v1060_v63 }
 0x176   : > { %v1087_v26 = vrot.slane %v1085_v19, 1  ;;  %v2403_v27 = vpack.c.b16 %v2397_v18, %v1240_v15  ;;  %v1090_v16 = vshll.u32 %v2400_v23, 16  ;;  %v1186_v28 = vpack.c.b16 %v2397_v18, %v1185_v22  ;;  %v1054_v21 = vld [vmem:[#allocation2 + $0x10] sm:$0x7] }
 0x177   : > { %v1188_v29 = vrot.slane %v2400_v23, 1  ;;  %v1246_v30 = vrot.slane %v2400_v23, 3  ;;  %v1077_v39 = vunpack.c.l.b16 %v1054_v21  ;;  %v2417_v40 = vld [vmem:[#allocation2 + $0x10] sm:$0xff]   ;;  %v1094_v50 = vshrl.u32 %v2400_v23, 16 }
 0x178   : > { %v1088_v33 = vor.u32 %v1087_v26, %v1083_v24  ;;  %v1092_v34 = vrot.slane %v1090_v16, 1  ;;  %v1187_v35 = vrot.slane %v1186_v28, 1  ;;  %v1245_v20 = vrot.slane %v2403_v27, 3  ;;  %v1058_v10 = vld [vmem:[#allocation2 + $0x14] sm:$0x1] }
 0x179   : > { %v1080_v44 = vpack.c.b16 %v1077_v39, %v1077_v39  ;;  %v2427_v45 = vunpack.c.l.b16 %v2417_v40  ;;  %v1242_v47 = vunpack.c.l.b16 %v1058_v10  ;;  %v1053_v61 = vld [vmem:[#allocation2 + $0x10] sm:$0x3]  ;;  %v1974_v0 = vunpack.c.h.b16 %v2400_v23  ;;  %v1059_v28 = vld [vmem:[#allocation2 + $0x14] sm:$0x3] }
 0x17a   : > { %v1093_v36 = vsel %vm1081_vm15, %v1088_v33, %v1092_v34  ;;  %v1189_v37 = vsel %vm479_vm3, %v1187_v35, %v1188_v29  ;;  %v1247_v38 = vsel %vm541_vm4, %v1245_v20, %v1246_v30  ;;  %v1096_v55 = vor.u32 %v1094_v50, %v1092_v34 }
 0x17b   : > { %1873 = vmatmul.msk.bf16.vlgmr.msra.gmra.mxu1 %vm872_vm10, %v1093_v36  ;;  %1887 = vmatmul.msk.bf16.vlgmr.msrb.gmra.mxu3 %vm872_vm10, %v1189_v37  ;;  %v1098_v48 = vshll.u32 %v1080_v44, 16  ;;  %v1244_v32 = vpack.c.b16 %v1242_v47, %v2427_v45  ;;  %v1190_v52 = vrot.slane %v1080_v44, 1  ;;  %v1144_v41 = vunpack.c.l.b16 %v1053_v61  ;;  %v1063_v61 = vld [vmem:[#allocation2 + $0x4] sm:$0x8] }
 0x17c   : > { %1894 = vmatmul.msk.bf16.vlgmr.msrb.gmra.mxu0 %vm872_vm10, %v1247_v38  ;;  %1573 = vmatpush.bf16.msra.mxu1 %v1954_v59  ;;  %v1102_v1 = vshrl.u32 %v1080_v44, 16  ;;  %v2448_v3 = vunpack.c.l.b16 %v2400_v23  ;;  %v2451_v6 = vpack.c.b16 %v2427_v45, %v1974_v0  ;;  %v1300_v54 = vshrl.u32 %v2403_v27, 16 }
 0x17d   : > { %v1100_v51 = vrot.slane %v1098_v48, 1  ;;  %v1248_v53 = vrot.slane %v1244_v32, 3  ;;  %v1191_v58 = vsel %vm479_vm3, %v1188_v29, %v1190_v52  ;;  %v1145_v62 = vpack.c.b16 %v1144_v41, %v1144_v41 }
 0x17e   : > { %v1417_v7 = vpack.c.b16 %v2448_v3, %v1415_v4  ;;  %v1303_v8 = vshll.u32 %v2403_v27, 16  ;;  %v1481_v13 = vshrl.u32 %v2451_v6, 16  ;;  %v1484_v14 = vshll.u32 %v2451_v6, 16 }
 0x17f   : > { %v1101_v56 = vsel %vm1081_vm15, %v1096_v55, %v1100_v51  ;;  %v1249_v60 = vsel %vm541_vm4, %v1246_v30, %v1248_v53  ;;  %v1104_v5 = vor.u32 %v1102_v1, %v1100_v51  ;;  %v1365_v12 = vpack.c.b16 %v2448_v3, %v2397_v18  ;;  %v1062_v30 = vld [vmem:[#allocation2 + $0x18] sm:$0x1] }
 0x180   : > { %v1474_v9 = vshrl.u32 %v1417_v7, 16  ;;  %v1477_v11 = vshll.u32 %v1417_v7, 16  ;;  %v1302_v17 = vrot.slane %v1300_v54, 3  ;;  %v1305_v19 = vrot.slane %v1303_v8, 4 }
 0x181   : > { %v1483_v24 = vrot.slane %v1481_v13, 2  ;;  %v1486_v26 = vrot.slane %v1484_v14, 3  ;;  %v1307_v29 = vrot.slane %v1094_v50, 3  ;;  %v1308_v27 = vrot.slane %v1090_v16, 4 }
 0x182   : > { %v1476_v15 = vrot.slane %v1474_v9, 2  ;;  %v1479_v22 = vrot.slane %v1477_v11, 3  ;;  %vm1298_vm3 = vsmask.f32 4352  ;;  %v1306_v21 = vor.u32 %v1305_v19, %v1302_v17 }
 0x183   : > { %v1419_v33 = vrot.slane %v1417_v7, 2  ;;  %v1420_v34 = vrot.slane %v2451_v6, 2  ;;  %v1296_v18 = vunpack.c.l.b16 %v1059_v28  ;;  %v1487_v20 = vor.u32 %v1486_v26, %v1483_v24 }
 0x184   : > { %1881 = vmatmul.msk.bf16.gmra.mxu2 %vm872_vm10, %v2400_v23  ;;  %v1480_v35 = vor.u32 %v1479_v22, %v1476_v15  ;;  %v1978_v36 = vunpack.c.h.b16 %v2417_v40  ;;  %v1470_v37 = vunpack.c.l.b16 %v1062_v30  ;;  %v1309_v38 = vor.u32 %v1308_v27, %v1307_v29 }
 0x185   : > { %v1421_v10 = vsel %vm374_vm2, %v1419_v33, %v1420_v34  ;;  %v1297_v23 = vpack.c.b16 %v1296_v18, %v2427_v45  ;;  %v1544_v59 = vunpack.c.l.b16 %v1063_v61  ;;  %v1547_v63 = vrot.slane %v2451_v6, 3 }
 0x186   : > { %v1310_v39 = vsel %vm1298_vm3, %v1306_v21, %v1309_v38  ;;  %v1488_v16 = vsel %vm1472_vm5, %v1480_v35, %v1487_v20  ;;  %v1471_v42 = vpack.c.b16 %v1470_v37, %v1978_v36  ;;  %v1418_v49 = vpack.c.b16 %v1978_v36, %v1978_v36 }
 0x187   : > { %v1312_v43 = vshrl.u32 %v1297_v23, 16  ;;  %v1315_v40 = vshll.u32 %v1297_v23, 16  ;;  %v1545_v41 = vpack.c.b16 %v2448_v3, %v1544_v59 }
 0x188   : > { %v1490_v44 = vshrl.u32 %v1471_v42, 16  ;;  %v1493_v47 = vshll.u32 %v1471_v42, 16  ;;  %v1549_v1 = vrot.slane %v1471_v42, 3 }
 0x189   : > { %v1314_v48 = vrot.slane %v1312_v43, 3  ;;  %v1317_v32 = vrot.slane %v1315_v40, 4 }
 0x18a   : > { %v1492_v50 = vrot.slane %v1490_v44, 2  ;;  %v1495_v51 = vrot.slane %v1493_v47, 3  ;;  %v1550_v4 = vsel %vm541_vm4, %v1547_v63, %v1549_v1 }
 0x18b   : > { %1874 = vmatmul.msk.bf16.gmra.mxu1 %vm872_vm10, %v1101_v56  ;;  %1888 = vmatmul.msk.bf16.gmra.mxu3 %vm872_vm10, %v1191_v58  ;;  %v1318_v45 = vor.u32 %v1317_v32, %v1314_v48 }
 0x18c   : > { %1895 = vmatmul.msk.bf16.gmra.mxu0 %vm872_vm10, %v1249_v60  ;;  %v1367_v60 = vpack.c.b16 %v1296_v18, %v1296_v18 }
 0x18d   : > { %v1319_v55 = vsel %vm1298_vm3, %v1309_v38, %v1318_v45 }
 0x194   : > { %1882 = vmatmul.msk.bf16.gmra.mxu2 %vm872_vm10, %v1145_v62  ;;  %v1546_v62 = vrot.slane %v1545_v41, 3 }
 0x196   : > { %v1548_v0 = vsel %vm541_vm4, %v1546_v62, %v1547_v63 }
 0x19b   : > { %1875 = vmatmul.msk.bf16.gmra.mxu1 %vm872_vm10, %v1104_v5  ;;  %1889 = vmatmul.msk.bf16.gmra.mxu3 %vm872_vm10, %v1190_v52  ;;  %v1422_v52 = vrot.slane %v1418_v49, 2 }
 0x19c   : > { %1896 = vmatmul.msk.bf16.gmra.mxu0 %vm872_vm10, %v1248_v53  ;;  %v1496_v53 = vor.u32 %v1495_v51, %v1492_v50 }
 0x19d   : > { %v1423_v56 = vsel %vm374_vm2, %v1420_v34, %v1422_v52 }
 0x19e   : > { %v1497_v58 = vsel %vm1472_vm5, %v1487_v20, %v1496_v53 }
 0x1a4   : > { %1908 = vmatmul.msk.bf16.vlgmr.msra.gmra.mxu2 %vm872_vm10, %v1365_v12 }
 0x1ab   : > { %1901 = vmatmul.msk.bf16.vlgmr.msrb.gmra.mxu1 %vm872_vm10, %v1310_v39  ;;  %1915 = vmatmul.msk.bf16.vlgmr.msra.gmra.mxu3 %vm872_vm10, %v1421_v10 }
 0x1ac   : > { %1922 = vmatmul.msk.bf16.vlgmr.msra.gmra.mxu0 %vm872_vm10, %v1488_v16 }
 0x1b4   : > { %1909 = vmatmul.msk.bf16.gmra.mxu2 %vm872_vm10, %v2451_v6 }
 0x1bb   : > { %1902 = vmatmul.msk.bf16.gmra.mxu1 %vm872_vm10, %v1319_v55  ;;  %1916 = vmatmul.msk.bf16.gmra.mxu3 %vm872_vm10, %v1423_v56 }
 0x1bc   : > { %1923 = vmatmul.msk.bf16.gmra.mxu0 %vm872_vm10, %v1497_v58 }
 0x1c4   : > { %1910 = vmatmul.msk.bf16.gmra.mxu2 %vm872_vm10, %v1367_v60 }
 0x1cb   : > { %1903 = vmatmul.msk.bf16.gmra.mxu1 %vm872_vm10, %v1318_v45  ;;  %1917 = vmatmul.msk.bf16.gmra.mxu3 %vm872_vm10, %v1422_v52 }
 0x1cc   : > { %1924 = vmatmul.msk.bf16.gmra.mxu0 %vm872_vm10, %v1496_v53 }
 0x1db   : > { %1929 = vmatmul.msk.bf16.vlgmr.msra.gmra.mxu1 %vm872_vm10, %v1548_v0 }
 0x1eb   : > { %1930 = vmatmul.msk.bf16.gmra.mxu1 %vm872_vm10, %v1550_v4 }
 0x1f7   : > { %v1168_v5 = vpop.f32.mrf.mxu2 }
 0x1f8   : > { %v1129_v7 = vpop.f32.mrf.mxu1 }
 0x1f9   : > { %v1169_v54 = vadd.f32 %v1168_v5, %v1129_v7  ;;  %v1274_v8 = vpop.f32.mrf.mxu0 }
 0x1fb   : > { %1931 = vmatmul.msk.bf16.gmra.mxu1 %vm872_vm10, %v1549_v1 }
 0x1fe   : > { %v1216_v9 = vpop.f32.mrf.mxu3 }
 0x1ff   : > { %v1230_v3 = vadd.f32 %v1216_v9, %v1169_v54  ;;  %v1170_v11 = vpop.f32.mrf.mxu2 }
 0x200   : > { %v1131_v13 = vpop.f32.mrf.mxu1 }
 0x201   : > { %v1171_v6 = vadd.f32 %v1170_v11, %v1131_v13  ;;  %v1276_v14 = vpop.f32.mrf.mxu0  ;;  %v1288_v12 = vadd.f32 %v1274_v8, %v1230_v3 }
 0x206   : > { %v1218_v17 = vpop.f32.mrf.mxu3 }
 0x207   : > { %v1231_v19 = vadd.f32 %v1218_v17, %v1171_v6  ;;  %v1173_v15 = vpop.f32.mrf.mxu2 }
 0x208   : > { %v1134_v22 = vpop.f32.mrf.mxu1 }
 0x209   : > { %v1174_v24 = vadd.f32 %v1173_v15, %v1134_v22  ;;  %v1279_v26 = vpop.f32.mrf.mxu0  ;;  %v1289_v28 = vadd.f32 %v1276_v14, %v1231_v19 }
 0x20e   : > { %v1221_v29 = vpop.f32.mrf.mxu3 }
 0x20f   : > { %v1232_v27 = vadd.f32 %v1221_v29, %v1174_v24  ;;  %v1175_v30 = vpop.f32.mrf.mxu2 }
 0x210   : > { %v1136_v21 = vpop.f32.mrf.mxu1 }
 0x211   : > { %v1176_v33 = vadd.f32 %v1175_v30, %v1136_v21  ;;  %v1281_v34 = vpop.f32.mrf.mxu0  ;;  %v1290_v18 = vadd.f32 %v1279_v26, %v1232_v27 }
 0x216   : > { %v1223_v35 = vpop.f32.mrf.mxu3 }
 0x217   : > { %v1233_v20 = vadd.f32 %v1223_v35, %v1176_v33  ;;  %v1178_v36 = vpop.f32.mrf.mxu2 }
 0x218   : > { %v1139_v37 = vpop.f32.mrf.mxu1 }
 0x219   : > { %v1179_v38 = vadd.f32 %v1178_v36, %v1139_v37  ;;  %v1284_v39 = vpop.f32.mrf.mxu0  ;;  %v1291_v10 = vadd.f32 %v1281_v34, %v1233_v20 }
 0x21e   : > { %v1226_v23 = vpop.f32.mrf.mxu3 }
 0x21f   : > { %v1234_v16 = vadd.f32 %v1226_v23, %v1179_v38  ;;  %v1180_v42 = vpop.f32.mrf.mxu2 }
 0x220   : > { %v1141_v43 = vpop.f32.mrf.mxu1 }
 0x221   : > { %v1286_v40 = vpop.f32.mrf.mxu0  ;;  %v1292_v44 = vadd.f32 %v1284_v39, %v1234_v16 }
 0x226   : > { %v1228_v47 = vpop.f32.mrf.mxu3 }
 0x227   : > { %v1392_v48 = vpop.f32.mrf.mxu2 }
 0x228   : > { %v1344_v32 = vpop.f32.mrf.mxu1 }
 0x229   : > { %v1358_v49 = vadd.f32 %v1344_v32, %v1288_v12  ;;  %v1522_v50 = vpop.f32.mrf.mxu0 }
 0x22b   : > { %v1406_v51 = vadd.f32 %v1392_v48, %v1358_v49 }
 0x22e   : > { %v1448_v45 = vpop.f32.mrf.mxu3 }
 0x22f   : > { %v1462_v52 = vadd.f32 %v1448_v45, %v1406_v51  ;;  %v1394_v53 = vpop.f32.mrf.mxu2 }
 0x230   : > { %v1346_v55 = vpop.f32.mrf.mxu1 }
 0x231   : > { %v1359_v56 = vadd.f32 %v1346_v55, %v1289_v28  ;;  %v1524_v58 = vpop.f32.mrf.mxu0  ;;  %v1536_v60 = vadd.f32 %v1522_v50, %v1462_v52 }
 0x233   : > { %v1407_v61 = vadd.f32 %v1394_v53, %v1359_v56 }
 0x236   : > { %v1450_v59 = vpop.f32.mrf.mxu3 }
 0x237   : > { %v1463_v41 = vadd.f32 %v1450_v59, %v1407_v61  ;;  %v1397_v62 = vpop.f32.mrf.mxu2 }
 0x238   : > { %v1349_v63 = vpop.f32.mrf.mxu1 }
 0x239   : > { %v1527_v0 = vpop.f32.mrf.mxu0  ;;  %v1537_v1 = vadd.f32 %v1524_v58, %v1463_v41  ;;  %v1360_v15 = vadd.f32 %v1349_v63, %v1290_v18 }
 0x23b   : > { %v1408_v26 = vadd.f32 %v1397_v62, %v1360_v15 }
 0x23e   : > { %v1453_v4 = vpop.f32.mrf.mxu3 }
 0x23f   : > { %v1399_v5 = vpop.f32.mrf.mxu2  ;;  %v1464_v27 = vadd.f32 %v1453_v4, %v1408_v26 }
 0x240   : > { %v1351_v7 = vpop.f32.mrf.mxu1 }
 0x241   : > { %v1529_v54 = vpop.f32.mrf.mxu0  ;;  %v1361_v21 = vadd.f32 %v1351_v7, %v1291_v10  ;;  %v1538_v20 = vadd.f32 %v1527_v0, %v1464_v27 }
 0x243   : > { %v1409_v37 = vadd.f32 %v1399_v5, %v1361_v21 }
 0x246   : > { %v1455_v8 = vpop.f32.mrf.mxu3 }
 0x247   : > { %v1402_v9 = vpop.f32.mrf.mxu2  ;;  %v1465_v18 = vadd.f32 %v1455_v8, %v1409_v37 }
 0x248   : > { %v1354_v3 = vpop.f32.mrf.mxu1 }
 0x249   : > { %v1532_v11 = vpop.f32.mrf.mxu0  ;;  %v1362_v23 = vadd.f32 %v1354_v3, %v1292_v44  ;;  %v1539_v43 = vadd.f32 %v1529_v54, %v1465_v18 }
 0x24b   : > { %v1410_v47 = vadd.f32 %v1402_v9, %v1362_v23 }
 0x24e   : > { %v1458_v13 = vpop.f32.mrf.mxu3 }
 0x24f   : > { %v1404_v6 = vpop.f32.mrf.mxu2  ;;  %v1466_v48 = vadd.f32 %v1458_v13, %v1410_v47 }
 0x250   : > { %v1356_v14 = vpop.f32.mrf.mxu1 }
 0x251   : > { %v1534_v12 = vpop.f32.mrf.mxu0  ;;  %v1540_v51 = vadd.f32 %v1532_v11, %v1466_v48  ;;  %v1668_v48 = vstv %s1932_s23 }
 0x256   : > { %v1460_v17 = vpop.f32.mrf.mxu3 }
 0x258   : > { %v1575_v19 = vpop.f32.mrf.mxu1 }
 0x259   : > { %v1589_v22 = vadd.f32 %v1575_v19, %v1536_v60 }
 0x25b   : > { %v1595_v28 = vmul.f32 %v2269_v25, %v1589_v22 }
 0x25d   : > { %v1600_v33 = vsel %vm872_vm10, %v1595_v28, 0.0 }
 0x260   : > { %v1577_v24 = vpop.f32.mrf.mxu1 }
 0x261   : > { %v1590_v29 = vadd.f32 %v1577_v24, %v1537_v1 }
 0x263   : > { %v1596_v30 = vmul.f32 %v2274_v31, %v1590_v29 }
 0x265   : > { %v1601_v34 = vsel %vm872_vm10, %v1596_v30, 0.0 }
 0x266   : > { %v1602_v35 = vadd.f32 %v1601_v34, %v1600_v33 }
 0x268   : > { %v1580_v36 = vpop.f32.mrf.mxu1 }
 0x269   : > { %v1591_v38 = vadd.f32 %v1580_v36, %v1538_v20 }
 0x26b   : > { %v1597_v39 = vmul.f32 %v2290_v46, %v1591_v38 }
 0x26d   : > { %v1603_v16 = vsel %vm872_vm10, %v1597_v39, 0.0 }
 0x26e   : > { %v1604_v42 = vadd.f32 %v1603_v16, %v1602_v35 }
 0x270   : > { %v1582_v40 = vpop.f32.mrf.mxu1 }
 0x271   : > { %v1592_v10 = vadd.f32 %v1582_v40, %v1539_v43  ;;  %v1691_v43 = vpop.permute.xlu2 %1690  ;;  %v1687_v40 = vpop.permute.xlu1 %1686 }
 0x273   : > { %v1598_v32 = vmul.f32 %v2299_v57, %v1592_v10 }
 0x275   : > { %v1605_v49 = vsel %vm872_vm10, %v1598_v32, 0.0 }
 0x276   : > { %v1606_v50 = vadd.f32 %v1605_v49, %v1604_v42 }
 0x278   : > { %v1585_v45 = vpop.f32.mrf.mxu1 }
 0x279   : > { %v1593_v52 = vadd.f32 %v1585_v45, %v1540_v51 }
 0x27b   : > { %v1599_v53 = vmul.f32 %v2308_v2, %v1593_v52 }
 0x27d   : > { %v1607_v44 = vsel %vm880_vm0, %v1599_v53, 0.0 }
 0x27e   : > { %v1608_v55 = vadd.f32 %v1607_v44, %v1606_v50 }
 0x280   : > { %v1609_v56 = vrot.slane %v1608_v55, 4  ;;  %v1587_v58 = vpop.f32.mrf.mxu1 }
 0x281   : > { %v1685_v58 = vpop.permute.xlu0 %1684 }
 0x282   : > { %v1610_v60 = vadd.f32 %v1609_v56, %v1608_v55 }
 0x284   : > { %v1611_v61 = vrot.slane %v1610_v60, 2 }
 0x286   : > { %v1612_v59 = vadd.f32 %v1611_v61, %v1610_v60 }
 0x288   : > { %v1613_v41 = vrot.slane %v1612_v59, 1 }
 0x28a   : > { %v1614_v62 = vadd.f32 %v1613_v41, %v1612_v59  ;;  %v1693_v41 = vpop.permute.xlu2 %1692 }
 0x28c   : > { %v1615_v63 = vmul.f32 0.0625, %v1614_v62  ;;  %v1689_v62 = vpop.permute.xlu1 %1688 }
 0x28e   : > { %v1616_v0 = vsub.f32 %v1589_v22, %v1615_v63  ;;  %v1617_v1 = vsub.f32 %v1590_v29, %v1615_v63  ;;  %v1618_v4 = vsub.f32 %v1591_v38, %v1615_v63  ;;  %v1619_v5 = vsub.f32 %v1592_v10, %v1615_v63 }
 0x28f   : > { %v1620_v7 = vsub.f32 %v1593_v52, %v1615_v63 }
 0x290   : > { %v1621_v54 = vmul.f32 %v2269_v25, %v1616_v0  ;;  %v1622_v8 = vmul.f32 %v2274_v31, %v1617_v1  ;;  %v1623_v9 = vmul.f32 %v2290_v46, %v1618_v4  ;;  %v1624_v3 = vmul.f32 %v2299_v57, %v1619_v5 }
 0x291   : > { %v1625_v11 = vmul.f32 %v2308_v2, %v1620_v7 }
 0x292   : > { %v1626_v13 = vmul.f32 %v1621_v54, %v1621_v54  ;;  %v1627_v6 = vmul.f32 %v1622_v8, %v1622_v8  ;;  %v1628_v14 = vmul.f32 %v1623_v9, %v1623_v9  ;;  %v1629_v12 = vmul.f32 %v1624_v3, %v1624_v3 }
 0x293   : > { %v1630_v22 = vmul.f32 %v1625_v11, %v1625_v11 }
 0x294   : > { %v1631_v17 = vsel %vm872_vm10, %v1626_v13, 0.0  ;;  %v1632_v19 = vsel %vm872_vm10, %v1627_v6, 0.0  ;;  %v1634_v24 = vsel %vm872_vm10, %v1628_v14, 0.0  ;;  %v1636_v28 = vsel %vm872_vm10, %v1629_v12, 0.0 }
 0x295   : > { %v1633_v15 = vadd.f32 %v1632_v19, %v1631_v17  ;;  %v1638_v27 = vsel %vm880_vm0, %v1630_v22, 0.0 }
 0x297   : > { %v1635_v26 = vadd.f32 %v1634_v24, %v1633_v15 }
 0x299   : > { %v1637_v29 = vadd.f32 %v1636_v28, %v1635_v26 }
 0x29b   : > { %v1639_v30 = vadd.f32 %v1638_v27, %v1637_v29 }
 0x29d   : > { %v1640_v21 = vrot.slane %v1639_v30, 4 }
 0x29f   : > { %v1641_v33 = vadd.f32 %v1640_v21, %v1639_v30 }
 0x2a1   : > { %v1642_v34 = vrot.slane %v1641_v33, 2 }
 0x2a3   : > { %v1643_v35 = vadd.f32 %v1642_v34, %v1641_v33 }
 0x2a5   : > { %v1644_v20 = vrot.slane %v1643_v35, 1 }
 0x2a7   : > { %v1645_v36 = vadd.f32 %v1644_v20, %v1643_v35 }
 0x2a9   : > { %v1646_v37 = vmul.f32 0.0625, %v1645_v36 }
 0x2ab   : > { %v1647_v38 = vadd.f32 1e-05, %v1646_v37 }
 0x2ad   : > { %2025 = vrsqrt.f32 %v1647_v38  ;;  %vm1654_vm4 = vweird.f32 %v1647_v38 }
 0x2b3   : > { %v2026_v18 = vpop.eup %2025 }
 0x2b4   : > { %v1649_v39 = vmul.f32 %v2026_v18, %v1647_v38  ;;  %vm1655_vm2 = vweird.f32 %v2026_v18 }
 0x2b5   : > { %vm1656_vm10 = vmor %vm1654_vm4, %vm1655_vm2 }
 0x2b6   : > { %v1650_v23 = vmul.f32 %v2026_v18, %v1649_v39 }
 0x2b8   : > { %v1651_v16 = vmul.f32 0.5, %v1650_v23 }
 0x2ba   : > { %v1652_v42 = vsub.f32 1.5, %v1651_v16 }
 0x2bc   : > { %v1653_v47 = vmul.f32 %v2026_v18, %v1652_v42 }
 0x2be   : > { %v1657_v10 = vsel %vm1656_vm10, %v2026_v18, %v1653_v47 }
 0x2bf   : > { %v1658_v32 = vmul.f32 %v1657_v10, %v1616_v0  ;;  %v1659_v49 = vmul.f32 %v1657_v10, %v1617_v1  ;;  %v1660_v50 = vmul.f32 %v1657_v10, %v1618_v4  ;;  %v1661_v51 = vmul.f32 %v1657_v10, %v1619_v5 }
 0x2c0   : > { %v1662_v45 = vmul.f32 %v1657_v10, %v1620_v7 }
 0x2c1   : > { %vm1663_vm6 = vcmp.ge.f32.partialorder %v1658_v32, 0.0  ;;  %vm1664_vm7 = vcmp.ge.f32.partialorder %v1659_v49, 0.0  ;;  %vm1665_vm8 = vcmp.ge.f32.partialorder %v1660_v50, 0.0  ;;  %vm1666_vm9 = vcmp.ge.f32.partialorder %v1661_v51, 0.0 }
 0x2c2   : > { %vm1667_vm12 = vcmp.ge.f32.partialorder %v1662_v45, 0.0  ;;  %v1669_v52 = vmul.f32 %v1668_v48, %v1658_v32  ;;  %v1670_v53 = vmul.f32 %v1668_v48, %v1659_v49  ;;  %v1671_v44 = vmul.f32 %v1668_v48, %v1660_v50 }
 0x2c3   : > { %v1672_v55 = vmul.f32 %v1668_v48, %v1661_v51  ;;  %v1673_v56 = vmul.f32 %v1668_v48, %v1662_v45 }
 0x2c4   : > { %v1674_v60 = vsel %vm1663_vm6, %v1658_v32, %v1669_v52  ;;  %v1675_v61 = vsel %vm1664_vm7, %v1659_v49, %v1670_v53  ;;  %v1676_v59 = vsel %vm1665_vm8, %v1660_v50, %v1671_v44 }
 0x2c5   : > { %v1677_v63 = vsel %vm1666_vm9, %v1661_v51, %v1672_v55  ;;  %v1678_v0 = vsel %vm1667_vm12, %v1662_v45, %v1673_v56  ;;  %v1699_v1 = vadd.f32 %v1685_v58, %v1674_v60  ;;  %v1700_v4 = vadd.f32 %v1687_v40, %v1675_v61 }
 0x2c6   : > { %v1701_v5 = vadd.f32 %v1689_v62, %v1676_v59  ;;  %v1702_v7 = vadd.f32 %v1691_v43, %v1677_v63  ;;  %v1703_v54 = vadd.f32 %v1693_v41, %v1678_v0 }
 0x2c7   : > { %v1704_v8 = vmul.f32 %v2269_v25, %v1699_v1  ;;  %v1705_v9 = vmul.f32 %v2274_v31, %v1700_v4 }
 0x2c8   : > { %v1706_v3 = vmul.f32 %v2290_v46, %v1701_v5  ;;  %v1707_v11 = vmul.f32 %v2299_v57, %v1702_v7  ;;  %v1708_v13 = vmul.f32 %v2308_v2, %v1703_v54 }
 0x2c9   : > { %v1709_v6 = vpack.c.bf16 %v1704_v8, %v1704_v8  ;;  %v1710_v14 = vpack.c.bf16 %v1705_v9, %v1705_v9 }
 0x2ca   : > { %v1711_v12 = vpack.c.bf16 %v1706_v3, %v1706_v3  ;;  %v1712_v17 = vpack.c.bf16 %v1707_v11, %v1707_v11  ;;  %v1713_v19 = vpack.c.bf16 %v1708_v13, %v1708_v13 }
 0x2cb   : > { %1714 = vst.msk [vmem:[%s238_s19] sm:$0xf] %vm880_vm0, %v1709_v6 }
 0x2cc   : > { %1715 = vst.msk [vmem:[%s238_s19 + $0x4] sm:$0xf] %vm880_vm0, %v1710_v14 }
 0x2cd   : > { %1716 = vst.msk [vmem:[%s238_s19 + $0x8] sm:$0xf] %vm880_vm0, %v1711_v12 }
 0x2ce   : > { %1717 = vst.msk [vmem:[%s238_s19 + $0xc] sm:$0xf] %vm880_vm0, %v1712_v17 }
 0x2cf   : > { %1719 = vst.msk [vmem:[%s238_s19 + $0x10] sm:$0x3] %vm1043_vm11, %v1713_v19 }
 0x2d0 PF: > { %s16_s18 = sadd.s32 1, %s2059_s18  }
 0x2d1   : > { %p13_p7 = scmp.ge.s32.totalorder %s16_s18, 4  }
 0x2d3   :  { %15 = sbr.rel (!%p13_p7) target bundleno = 1 (0x1), region = 75 }
 0x2d8   :  { %1741 = vsyncpa [#allocation4], 1 }
 0x2d9   :  { %1743 = vsyncpa [#allocation4 + $0x1], 1 }

// kernel: _lambda_.5
= control target key start
LH: loop header
LB: loop body
LE: loop exit
PB: predicated region body
PF: predicated region fallthrough
CT: control target
= control target key end

     0   :  { %10 = vsyncpa [#allocation4], 0  ;;  %s2235_s18 = smov 0   ;;  %s2698_s0 = inlined_call_operand.vmem [shape: f32[1,2], index: 0, kind: input, shape index: {}]   ;;  %s2699_s1 = inlined_call_operand.vmem [shape: bf16[2,144,16], index: 1, kind: input, shape index: {}]   ;;  %s2700_s2 = inlined_call_operand.vmem [shape: bf16[144,64], index: 2, kind: input, shape index: {}]   ;;  %s2701_s3 = inlined_call_operand.vmem [shape: f32[1,32], index: 3, kind: input, shape index: {}]   ;;  %s2702_s4 = inlined_call_operand.vmem [shape: bf16[288,32], index: 4, kind: input, shape index: {}]   ;;  %s2703_s5 = inlined_call_operand.vmem [shape: bf16[2,36,32], index: 5, kind: output, shape index: {}]  }
   0x1 LB: > { %s1868_s19 = sadd.s32 4294967295, %s2198_s18   ;;  %p1870_p0 = scmp.ge.s32.totalorder %s2198_s18, 1  ;;  %s2198_s18 = sphi %s2235_s18, %s16_s18  }
   0x2   : > { %p157_p1 = scmp.lt.s32.totalorder %s2198_s18, 3  ;;  %s169_s22 = sshll.u32 %s2698_s0, 4  ;;  %s170_s22 = int_to_ptr.vmem [resolvable:$true] %s169_s22 }
   0x3   : > { %p2153_p3 = scmp.eq.s32.totalorder %s1868_s19, 0  ;;  %s2200_s23 = smov [#allocation3]  }
   0x4   : > { %p158_p2 = pnand %p1870_p0, %p157_p1 }
   0x6   : > { %p2149_p4 = pneg %p158_p2  ;;  %199 = sbr.rel (%p158_p2) target bundleno = 714 (0x2ca), region = 40 }
   0x8   : > { %p2150_p5 = pnand %p2153_p3, %p2149_p4 }
   0xa   : > { %2152 = dma.vmem_to_smem (!%p2150_p5), %s170_s22, 16, %s2200_s23, [#allocation4]  }
   0xb   : > { %2193 = dma.done.wait (%p2153_p3), [#allocation4], 16  }
   0xc   : > { %2195 = vsyncadd (%p2153_p3), [#allocation4], 4294967280 }
   0xd   : > { %206 = sfence }
   0xe   : > { %v2048_v0 = vld [vmem:[%s2700_s2 + $0x8] sm:$0xff]  ;;  %v2047_v1 = vld [vmem:[%s2700_s2] sm:$0xff]  ;;  %p229_p6 = scmp.lt.s32.totalorder %s1868_s19, 1  ;;  %v2049_v2 = vld [vmem:[%s2700_s2 + $0x10] sm:$0xff]  ;;  %vm374_vm0 = vcmask 130048   ;;  %vm526_vm1 = vcmask 1044480  }
   0xf   : > { %v2050_v3 = vld [vmem:[%s2700_s2 + $0x18] sm:$0xff]  ;;  %v2051_v4 = vld [vmem:[%s2700_s2 + $0x20] sm:$0xff]  ;;  %2141 = vmatpush.bf16.msra.mxu2 %v2048_v0  ;;  %2142 = vmatpush.bf16.msra.mxu3 %v2047_v1  ;;  %v2053_v9 = vld [vmem:[%s2700_s2 + $0x30] sm:$0xff]  ;;  %vm700_vm2 = vcmask 1045504   ;;  %s2201_s25 = smov 32   ;;  %s2202_s26 = smov 96  }
  0x10   : > { %s2709_s19 = smov (!%p229_p6, %s1868_s19), 1  ;;  %391 = vmatpush.bf16.msra.mxu0 %v2048_v0  ;;  %442 = vmatpush.bf16.msra.mxu1 %v2047_v1  ;;  %v2054_v12 = vld [vmem:[%s2700_s2 + $0x38] sm:$0xff]  ;;  %v2052_v13 = vld [vmem:[%s2700_s2 + $0x28] sm:$0xff]  ;;  %v2055_v14 = vld [vmem:[%s2700_s2 + $0x40] sm:$0xff]  ;;  %s874_s29 = sld [smem:[#allocation3]] }
  0x11   : > { %s2143_s9 = smul.u32 72, %s2709_s19  ;;  %s2044_s16 = sld [smem:[#allocation3 + $0x1]] }
  0x12   : > { %s2144_s17 = smul.u32 20, %s2709_s19 }
  0x13   : > { %495 = vmatpush.bf16.msrb.mxu2 %v2049_v2  ;;  %554 = vmatpush.bf16.msrb.mxu3 %v2050_v3  ;;  %s2267_s12 = scalar_lea.vmem %s2699_s1, %s2143_s9 }
  0x14   : > { %612 = vmatpush.bf16.msrb.mxu0 %v2051_v4  ;;  %v2270_v5 = vld [vmem:[%s2267_s12 + $0x20] sm:$0xff]   ;;  %v2273_v6 = vld [vmem:[%s2267_s12 + $0x8] sm:$0xff]   ;;  %v2111_v7 = vld [vmem:[%s2267_s12 + $0x18] sm:$0xff]   ;;  %670 = vmatpush.bf16.msrb.mxu1 %v2052_v13  ;;  %s238_s19 = scalar_lea.vmem %s2703_s5, %s2144_s17 }
  0x15   : > { %1887 = vmatmul.msk.bf16.vlgmr.msra.gmra.mxu2 %vm374_vm0, %v2270_v5  ;;  %1894 = vmatmul.msk.bf16.vlgmr.msra.gmra.mxu3 %vm374_vm0, %v2273_v6  ;;  %v2075_v8 = vld [vmem:[%s2267_s12] sm:$0xff]   ;;  %v2118_v10 = vld [vmem:[%s2267_s12 + $0x18] sm:$0xf0]  ;;  %v2119_v11 = vld [vmem:[%s2267_s12 + $0x18] sm:$0x8]  ;;  %v586_v24 = vrot.slane %v2270_v5, 3  ;;  %v2081_v46 = vunpack.c.h.b16 %v2273_v6  ;;  %v2089_v63 = vunpack.c.h.b16 %v2270_v5 }
  0x16   : > { %1886 = vmatmul.msk.bf16.vlgmr.msra.gmra.mxu0 %vm374_vm0, %v2111_v7  ;;  %1893 = vmatmul.msk.bf16.vlgmr.msra.gmra.mxu1 %vm374_vm0, %v2075_v8  ;;  %v2121_v15 = vld [vmem:[%s2267_s12 + $0x30] sm:$0xf0]  ;;  %v330_v16 = vld [vmem:[%s2267_s12 + $0x28] sm:$0x3]  ;;  %v325_v17 = vld [vmem:[%s2267_s12 + $0x10] sm:$0x3]  ;;  %v2120_v19 = vor.u32 %v2119_v11, %v2118_v10 }
  0x17   : > { %728 = vmatpush.bf16.msra.mxu2 %v2053_v9  ;;  %785 = vmatpush.bf16.msra.mxu3 %v2054_v12  ;;  %v2122_v18 = vld [vmem:[%s2267_s12 + $0x30] sm:$0x8]  ;;  %v364_v21 = vunpack.c.l.b16 %v330_v16  ;;  %v416_v22 = vunpack.c.l.b16 %v325_v17  ;;  %v2302_v23 = vld [vmem:[%s2267_s12 + $0x38] sm:$0xff]   ;;  %v2307_v30 = vld [vmem:[%s2267_s12 + $0x28] sm:$0xff]   ;;  %v528_v47 = vrot.slane %v2273_v6, 3 }
  0x18   : > { %842 = vmatpush.bf16.msra.mxu0 %v2055_v14  ;;  %v2123_v20 = vor.u32 %v2122_v18, %v2121_v15  ;;  %v585_v25 = vrot.slane %v2120_v19, 3  ;;  %v644_v27 = vrot.slane %v2302_v23, 3  ;;  %v341_v33 = vld [vmem:[%s2267_s12 + $0x2c] sm:$0x1]  ;;  %v2315_v34 = vld [vmem:[%s2267_s12 + $0x40] sm:$0xff]   ;;  %v581_v38 = vunpack.c.l.b16 %v2307_v30  ;;  %v2325_v45 = vld [vmem:[%s2267_s12 + $0x10] sm:$0xff]  }
  0x19   : > { %v367_v28 = vpack.c.b16 %v364_v21, %v364_v21  ;;  %v419_v29 = vpack.c.b16 %v416_v22, %v416_v22  ;;  %v344_v35 = vld [vmem:[%s2267_s12 + $0x44] sm:$0x1]  ;;  %v2116_v37 = vld [vmem:[%s2267_s12] sm:$0x8]  ;;  %v582_v39 = vunpack.c.l.b16 %v341_v33  ;;  %v639_v40 = vunpack.c.l.b16 %v2315_v34  ;;  %v2113_v53 = vld [vmem:[%s2267_s12 + $0x30] sm:$0xff]  }
  0x1a   : > { %v643_v26 = vrot.slane %v2123_v20, 3  ;;  %v587_v31 = vsel %vm526_vm1, %v585_v25, %v586_v24  ;;  %v2115_v36 = vld [vmem:[%s2267_s12] sm:$0xf0]  ;;  %v640_v41 = vunpack.c.l.b16 %v344_v35  ;;  %v522_v49 = vunpack.c.l.b16 %v2325_v45  ;;  %v338_v55 = vld [vmem:[%s2267_s12 + $0x14] sm:$0x1] }
  0x1b   : > { %v2117_v42 = vor.u32 %v2116_v37, %v2115_v36  ;;  %v584_v43 = vpack.c.b16 %v582_v39, %v581_v38  ;;  %v2138_v58 = vld [vmem:[%s2267_s12 + $0x4] sm:$0xf0]   ;;  %v2126_v59 = vld [vmem:[%s2267_s12 + $0x4] sm:$0xc]  ;;  %v523_v61 = vunpack.c.l.b16 %v338_v55  ;;  %v756_v3 = vpack.c.b16 %v581_v38, %v2089_v63  ;;  %v2139_v6 = vld [vmem:[%s2267_s12 + $0x1c] sm:$0xf0]  }
  0x1c   : > { %v645_v32 = vsel %vm526_vm1, %v643_v26, %v644_v27  ;;  %v642_v44 = vpack.c.b16 %v640_v41, %v639_v40  ;;  %v2330_v52 = vpack.c.b16 %v522_v49, %v2081_v46  ;;  %v2127_v62 = vor.u32 %v2138_v58, %v2126_v59  ;;  %v2130_v7 = vld [vmem:[%s2267_s12 + $0x1c] sm:$0xc]  ;;  %v2140_v13 = vld [vmem:[%s2267_s12 + $0x34] sm:$0xf0]   ;;  %v2134_v14 = vld [vmem:[%s2267_s12 + $0x34] sm:$0xc] }
  0x1d   : > { %v527_v48 = vrot.slane %v2117_v42, 3  ;;  %v588_v50 = vrot.slane %v584_v43, 3  ;;  %v525_v1 = vpack.c.b16 %v523_v61, %v522_v49  ;;  %v759_v8 = vrot.slane %v756_v3, 2  ;;  %v335_v15 = vld [vmem:[%s2267_s12 + $0x40] sm:$0x3] }
  0x1e   : > { %v646_v51 = vrot.slane %v642_v44, 3  ;;  %v702_v60 = vrot.slane %v2330_v52, 2  ;;  %v701_v0 = vrot.slane %v2127_v62, 2  ;;  %v2131_v9 = vor.u32 %v2139_v6, %v2130_v7 }
  0x1f   : > { %v529_v54 = vsel %vm526_vm1, %v527_v48, %v528_v47  ;;  %v589_v56 = vsel %vm526_vm1, %v586_v24, %v588_v50  ;;  %v530_v4 = vrot.slane %v525_v1, 3  ;;  %v2097_v5 = vunpack.c.h.b16 %v2302_v23  ;;  %v2168_v24 = vld [vmem:[%s2701_s3] ss:$0 sm:$0xff] }
  0x20   : > { %v647_v57 = vsel %vm526_vm1, %v644_v27, %v646_v51  ;;  %v703_v2 = vsel %vm700_vm2, %v701_v0, %v702_v60  ;;  %v758_v11 = vrot.slane %v2131_v9, 2  ;;  %v2135_v16 = vor.u32 %v2140_v13, %v2134_v14  ;;  %866 = vrot.lane.b32.xlu0 %v2168_v24, %s2201_s25 }
  0x21   : > { %v531_v10 = vsel %vm526_vm1, %v528_v47, %v530_v4  ;;  %v813_v17 = vpack.c.b16 %v639_v40, %v2097_v5  ;;  %v469_v18 = vunpack.c.l.b16 %v335_v15  ;;  %v240_v5 = vlaneseq }
  0x22   : > { %v760_v12 = vsel %vm700_vm2, %v758_v11, %v759_v8  ;;  %v815_v19 = vrot.slane %v2135_v16, 2 }
  0x23   : > { %v816_v20 = vrot.slane %v813_v17, 2  ;;  %v472_v21 = vpack.c.b16 %v469_v18, %v469_v18  ;;  %v241_v16 = vshrl.u32 %v240_v5, 7 }
  0x25   : > { %1888 = vmatmul.msk.bf16.gmra.mxu2 %vm374_vm0, %v367_v28  ;;  %1895 = vmatmul.msk.bf16.gmra.mxu3 %vm374_vm0, %v419_v29  ;;  %v817_v22 = vsel %vm700_vm2, %v815_v19, %v816_v20  ;;  %v696_v28 = vunpack.c.h.b16 %v2325_v45  ;;  %v754_v29 = vunpack.c.h.b16 %v2307_v30  ;;  %v242_v19 = vadd.s32 8, %v241_v16 }
  0x26   : > { %1914 = vmatmul.msk.bf16.vlgmr.msrb.gmra.mxu0 %vm374_vm0, %v587_v31  ;;  %1921 = vmatmul.msk.bf16.vlgmr.msrb.gmra.mxu1 %vm374_vm0, %v645_v32 }
  0x27   : > { %v699_v31 = vpack.c.b16 %v696_v28, %v696_v28  ;;  %v757_v32 = vpack.c.b16 %v754_v29, %v754_v29 }
  0x29   : > { %v704_v33 = vrot.slane %v699_v31, 2  ;;  %v761_v35 = vrot.slane %v757_v32, 2 }
  0x2b   : > { %v762_v36 = vsel %vm700_vm2, %v759_v8, %v761_v35 }
  0x35   : > { %1900 = vmatmul.msk.bf16.vlgmr.msrb.gmra.mxu2 %vm374_vm0, %v2113_v53  ;;  %1907 = vmatmul.msk.bf16.vlgmr.msrb.gmra.mxu3 %vm374_vm0, %v529_v54 }
  0x36   : > { %1915 = vmatmul.msk.bf16.gmra.mxu0 %vm374_vm0, %v589_v56  ;;  %1922 = vmatmul.msk.bf16.gmra.mxu1 %vm374_vm0, %v647_v57 }
  0x45   : > { %1901 = vmatmul.msk.bf16.gmra.mxu2 %vm374_vm0, %v2302_v23  ;;  %1908 = vmatmul.msk.bf16.gmra.mxu3 %vm374_vm0, %v531_v10  ;;  %v811_v23 = vunpack.c.h.b16 %v2315_v34  ;;  %v705_v34 = vsel %vm700_vm2, %v702_v60, %v704_v33 }
  0x46   : > { %1916 = vmatmul.msk.bf16.gmra.mxu0 %vm374_vm0, %v588_v50  ;;  %1923 = vmatmul.msk.bf16.gmra.mxu1 %vm374_vm0, %v646_v51 }
  0x47   : > { %v814_v25 = vpack.c.b16 %v811_v23, %v811_v23 }
  0x49   : > { %v818_v26 = vrot.slane %v814_v25, 2  ;;  %v246_v25 = vcvt.s32.f32 %v241_v16 }
  0x4b   : > { %v819_v27 = vsel %vm700_vm2, %v816_v20, %v818_v26  ;;  %v251_v31 = vadd.f32 0.5, %v246_v25 }
  0x55   : > { %1902 = vmatmul.msk.bf16.gmra.mxu2 %vm374_vm0, %v472_v21  ;;  %1909 = vmatmul.msk.bf16.gmra.mxu3 %vm374_vm0, %v530_v4 }
  0x56   : > { %1942 = vmatmul.msk.bf16.vlgmr.msra.gmra.mxu0 %vm374_vm0, %v817_v22 }
  0x65   : > { %1928 = vmatmul.msk.bf16.vlgmr.msra.gmra.mxu2 %vm374_vm0, %v703_v2  ;;  %1935 = vmatmul.msk.bf16.vlgmr.msra.gmra.mxu3 %vm374_vm0, %v760_v12 }
  0x66   : > { %1943 = vmatmul.msk.bf16.gmra.mxu0 %vm374_vm0, %v819_v27 }
  0x75   : > { %1929 = vmatmul.msk.bf16.gmra.mxu2 %vm374_vm0, %v705_v34  ;;  %1936 = vmatmul.msk.bf16.gmra.mxu3 %vm374_vm0, %v762_v36 }
  0x76   : > { %1944 = vmatmul.msk.bf16.gmra.mxu0 %vm374_vm0, %v818_v26  ;;  %v247_v26 = vcvt.s32.f32 %v242_v19 }
  0x78   : > { %v252_v32 = vadd.f32 0.5, %v247_v26 }
  0x85   : > { %1930 = vmatmul.msk.bf16.gmra.mxu2 %vm374_vm0, %v704_v33  ;;  %1937 = vmatmul.msk.bf16.gmra.mxu3 %vm374_vm0, %v761_v35  ;;  %v243_v35 = vadd.s32 16, %v241_v16 }
  0x93   : > { %v393_v30 = vpop.f32.mrf.mxu0  ;;  %v444_v37 = vpop.f32.mrf.mxu1 }
  0x94   : > { %v445_v38 = vadd.f32 %v444_v37, %v393_v30  ;;  %v256_v37 = vmul.f32 0.16666667, %v251_v31 }
  0x98   : > { %v398_v39 = vpop.f32.mrf.mxu2  ;;  %v449_v40 = vpop.f32.mrf.mxu3 }
  0x99   : > { %v450_v41 = vadd.f32 %v449_v40, %v398_v39  ;;  %v248_v40 = vcvt.s32.f32 %v243_v35 }
  0x9b   : > { %v395_v42 = vpop.f32.mrf.mxu0  ;;  %v446_v43 = vpop.f32.mrf.mxu1 }
  0x9c   : > { %v447_v0 = vadd.f32 %v446_v43, %v395_v42  ;;  %v261_v43 = vfloor.f32 %v256_v37 }
  0x9e   : > { %vm276_vm3 = vcmp.ge.f32.partialorder %v261_v43, 1.0  ;;  %vm281_vm4 = vcmp.le.f32.partialorder %v261_v43, 4.0 }
  0x9f   : > { %vm286_vm7 = vmand %vm276_vm3, %vm281_vm4 }
  0xa0   : > { %v400_v44 = vpop.f32.mrf.mxu2  ;;  %v451_v45 = vpop.f32.mrf.mxu3 }
  0xa1   : > { %v452_v20 = vadd.f32 %v451_v45, %v400_v44 }
  0xa3   : > { %v614_v46 = vpop.f32.mrf.mxu0  ;;  %v672_v47 = vpop.f32.mrf.mxu1 }
  0xa8   : > { %v403_v48 = vpop.f32.mrf.mxu2  ;;  %v454_v49 = vpop.f32.mrf.mxu3 }
  0xa9   : > { %v455_v50 = vadd.f32 %v454_v49, %v403_v48 }
  0xab   : > { %v616_v51 = vpop.f32.mrf.mxu0  ;;  %v674_v52 = vpop.f32.mrf.mxu1 }
  0xb0   : > { %v405_v53 = vpop.f32.mrf.mxu2  ;;  %v456_v54 = vpop.f32.mrf.mxu3 }
  0xb3   : > { %v619_v55 = vpop.f32.mrf.mxu0  ;;  %v677_v56 = vpop.f32.mrf.mxu1 }
  0xb8   : > { %v497_v57 = vpop.f32.mrf.mxu2  ;;  %v556_v58 = vpop.f32.mrf.mxu3 }
  0xb9   : > { %v511_v59 = vadd.f32 %v497_v57, %v445_v38  ;;  %v257_v38 = vmul.f32 0.16666667, %v252_v32 }
  0xbb   : > { %v570_v60 = vadd.f32 %v556_v58, %v511_v59  ;;  %v621_v61 = vpop.f32.mrf.mxu0  ;;  %v679_v62 = vpop.f32.mrf.mxu1  ;;  %v262_v44 = vfloor.f32 %v257_v38  ;;  %v2397_v59 = vadd.s32 32, %v241_v16 }
  0xbd   : > { %v628_v63 = vadd.f32 %v614_v46, %v570_v60  ;;  %v253_v46 = vadd.f32 0.5, %v248_v40  ;;  %vm277_vm5 = vcmp.ge.f32.partialorder %v262_v44, 1.0  ;;  %vm282_vm6 = vcmp.le.f32.partialorder %v262_v44, 4.0 }
  0xbe   : > { %vm287_vm10 = vmand %vm277_vm5, %vm282_vm6 }
  0xbf   : > { %v2380_v1 = vadd.f32 %v672_v47, %v628_v63  ;;  %v2392_v47 = vadd.s32 24, %v241_v16  ;;  %v258_v53 = vmul.f32 0.16666667, %v253_v46 }
  0xc0   : > { %v499_v2 = vpop.f32.mrf.mxu2  ;;  %v558_v3 = vpop.f32.mrf.mxu3 }
  0xc1   : > { %v512_v4 = vadd.f32 %v499_v2, %v447_v0  ;;  %v263_v57 = vfloor.f32 %v258_v53 }
  0xc3   : > { %v571_v6 = vadd.f32 %v558_v3, %v512_v4  ;;  %v624_v7 = vpop.f32.mrf.mxu0  ;;  %v682_v8 = vpop.f32.mrf.mxu1  ;;  %v268_v0 = vmul.f32 6.0, %v263_v57  ;;  %v250_v3 = vcvt.s32.f32 %v2397_v59  ;;  %vm278_vm0 = vcmp.ge.f32.partialorder %v263_v57, 1.0 }
  0xc4   : > { %v2401_v4 = vpop.permute.xlu0 %866  ;;  %vm283_vm3 = vcmp.le.f32.partialorder %v263_v57, 4.0 }
  0xc5   : > { %v629_v9 = vadd.f32 %v616_v51, %v571_v6  ;;  %v266_v51 = vmul.f32 6.0, %v261_v43  ;;  %vm288_vm5 = vmand %vm278_vm0, %vm283_vm3 }
  0xc7   : > { %v2382_v10 = vadd.f32 %v674_v52, %v629_v9  ;;  %v267_v52 = vmul.f32 6.0, %v262_v44 }
  0xc8   : > { %v502_v11 = vpop.f32.mrf.mxu2  ;;  %v561_v12 = vpop.f32.mrf.mxu3 }
  0xc9   : > { %v513_v13 = vadd.f32 %v502_v11, %v450_v41  ;;  %v255_v11 = vadd.f32 0.5, %v250_v3 }
  0xcb   : > { %v572_v14 = vadd.f32 %v561_v12, %v513_v13  ;;  %v626_v15 = vpop.f32.mrf.mxu0  ;;  %v684_v17 = vpop.f32.mrf.mxu1 }
  0xcd   : > { %v630_v18 = vadd.f32 %v619_v55, %v572_v14  ;;  %v271_v55 = vsub.f32 %v246_v25, %v266_v51  ;;  %v2203_v14 = vmov 0.0  }
  0xcf   : > { %v2384_v21 = vadd.f32 %v677_v56, %v630_v18  ;;  %v272_v56 = vsub.f32 %v247_v26, %v267_v52  ;;  %vm291_vm8 = vcmp.ge.f32.partialorder %v271_v55, 1.0  ;;  %vm301_vm12 = vcmp.le.f32.partialorder %v271_v55, 4.0 }
  0xd0   : > { %v504_v22 = vpop.f32.mrf.mxu2  ;;  %v563_v24 = vpop.f32.mrf.mxu3  ;;  %vm296_vm11 = vmand %vm286_vm7, %vm291_vm8  ;;  %v260_v18 = vmul.f32 0.16666667, %v255_v11  ;;  %vm880_vm7 = vcmask 261120  }
  0xd1   : > { %v514_v23 = vadd.f32 %v504_v22, %v452_v20  ;;  %vm292_vm9 = vcmp.ge.f32.partialorder %v272_v56, 1.0  ;;  %vm302_vm14 = vcmp.le.f32.partialorder %v272_v56, 4.0  ;;  %vm306_vm15 = vmand %vm296_vm11, %vm301_vm12 }
  0xd2   : > { %vm297_vm13 = vmand %vm287_vm10, %vm292_vm9  ;;  %v2412_v15 = vsel %vm306_vm15, 1.0, %v2203_v14  ;;  %v265_v26 = vfloor.f32 %v260_v18 }
  0xd3   : > { %v573_v27 = vadd.f32 %v563_v24, %v514_v23  ;;  %v844_v28 = vpop.f32.mrf.mxu0  ;;  %vm307_vm4 = vmand %vm297_vm13, %vm302_vm14 }
  0xd4   : > { %v2415_v19 = vsel %vm307_vm4, 1.0, %v2203_v14  ;;  %vm280_vm3 = vcmp.ge.f32.partialorder %v265_v26, 1.0  ;;  %vm285_vm4 = vcmp.le.f32.partialorder %v265_v26, 4.0 }
  0xd5   : > { %v631_v29 = vadd.f32 %v621_v61, %v573_v27 }
  0xd7   : > { %v2386_v33 = vadd.f32 %v679_v62, %v631_v29 }
  0xd8   : > { %v507_v34 = vpop.f32.mrf.mxu2  ;;  %v566_v36 = vpop.f32.mrf.mxu3 }
  0xd9   : > { %v515_v30 = vadd.f32 %v507_v34, %v455_v50  ;;  %v249_v50 = vcvt.s32.f32 %v2392_v47 }
  0xdb   : > { %v574_v39 = vadd.f32 %v566_v36, %v515_v30  ;;  %v2388_v41 = vpop.f32.mrf.mxu0  ;;  %v254_v58 = vadd.f32 0.5, %v249_v50  ;;  %v270_v36 = vmul.f32 6.0, %v265_v26 }
  0xdd   : > { %v632_v42 = vadd.f32 %v624_v7, %v574_v39  ;;  %v259_v2 = vmul.f32 0.16666667, %v254_v58 }
  0xdf   : > { %v2390_v45 = vadd.f32 %v682_v8, %v632_v42  ;;  %v273_v8 = vsub.f32 %v248_v40, %v268_v0  ;;  %v264_v9 = vfloor.f32 %v259_v2  ;;  %v275_v40 = vsub.f32 %v250_v3, %v270_v36 }
  0xe0   : > { %v509_v48 = vpop.f32.mrf.mxu2  ;;  %v568_v49 = vpop.f32.mrf.mxu3 }
  0xe1   : > { %vm293_vm6 = vcmp.ge.f32.partialorder %v273_v8, 1.0  ;;  %v269_v17 = vmul.f32 6.0, %v264_v9  ;;  %vm303_vm9 = vcmp.le.f32.partialorder %v273_v8, 4.0  ;;  %vm279_vm10 = vcmp.ge.f32.partialorder %v264_v9, 1.0 }
  0xe2   : > { %vm298_vm8 = vmand %vm288_vm5, %vm293_vm6  ;;  %vm284_vm11 = vcmp.le.f32.partialorder %v264_v9, 4.0 }
  0xe3   : > { %v2395_v54 = vpop.f32.mrf.mxu0  ;;  %v274_v25 = vsub.f32 %v249_v50, %v269_v17  ;;  %vm308_vm12 = vmand %vm298_vm8, %vm303_vm9  ;;  %vm295_vm8 = vcmp.ge.f32.partialorder %v275_v40, 1.0 }
  0xe4   : > { %vm289_vm13 = vmand %vm279_vm10, %vm284_vm11  ;;  %v2431_v30 = vsel %vm308_vm12, 1.0, %v2203_v14  ;;  %vm305_vm10 = vcmp.le.f32.partialorder %v275_v40, 4.0  ;;  %vm888_vm12 = vcmask 257024  }
  0xe5   : > { %vm294_vm14 = vcmp.ge.f32.partialorder %v274_v25, 1.0  ;;  %vm304_vm0 = vcmp.le.f32.partialorder %v274_v25, 4.0  ;;  %vm290_vm6 = vmand %vm280_vm3, %vm285_vm4 }
  0xe6   : > { %vm299_vm15 = vmand %vm289_vm13, %vm294_vm14  ;;  %vm967_vm13 = vsmask.f32 3328 }
  0xe7   : > { %vm309_vm5 = vmand %vm299_vm15, %vm304_vm0  ;;  %vm972_vm15 = vcmask 257025   ;;  %vm973_vm0 = vsmask.f32 7942 }
  0xe8   : > { %v730_v60 = vpop.f32.mrf.mxu2  ;;  %v787_v61 = vpop.f32.mrf.mxu3  ;;  %v2440_v48 = vsel %vm309_vm5, 1.0, %v2203_v14  ;;  %vm300_vm9 = vmand %vm290_vm6, %vm295_vm8 }
  0xe9   : > { %v744_v62 = vadd.f32 %v730_v60, %v2380_v1  ;;  %vm310_vm11 = vmand %vm300_vm9, %vm305_vm10 }
  0xea   : > { %v2449_v57 = vsel %vm310_vm11, 1.0, %v2203_v14  ;;  %vm968_vm14 = vmand %vm888_vm12, %vm967_vm13 }
  0xeb   : > { %v801_v63 = vadd.f32 %v787_v61, %v744_v62  ;;  %v2403_v6 = vpop.f32.mrf.mxu0  ;;  %vm974_vm3 = vmand %vm972_vm15, %vm973_vm0  ;;  %vm984_vm15 = vsmask.f32 7440  ;;  %vm1041_vm0 = vcmask 257027  }
  0xed   : > { %v2405_v7 = vadd.f32 %v844_v28, %v801_v63 }
  0xef   : > { %v869_v1 = vadd.f32 %v2401_v4, %v2405_v7 }
  0xf0   : > { %v732_v12 = vpop.f32.mrf.mxu2  ;;  %v789_v5 = vpop.f32.mrf.mxu3 }
  0xf1   : > { %v745_v13 = vadd.f32 %v732_v12, %v2382_v10  ;;  %1765 = vrot.lane.b32.xlu0 %v869_v1, %s2202_s26  ;;  %v875_v10 = vmul.f32 %v2412_v15, %v2405_v7 }
  0xf3   : > { %v802_v16 = vadd.f32 %v789_v5, %v745_v13  ;;  %v854_v20 = vpop.f32.mrf.mxu0  ;;  %v881_v29 = vsel %vm880_vm7, %v875_v10, 0.0 }
  0xf5   : > { %v2420_v22 = vadd.f32 %v2388_v41, %v802_v16 }
  0xf7   : > { %v876_v24 = vmul.f32 %v2415_v19, %v2420_v22  ;;  %v870_v23 = vadd.f32 %v2401_v4, %v2420_v22 }
  0xf8   : > { %v735_v27 = vpop.f32.mrf.mxu2  ;;  %v792_v28 = vpop.f32.mrf.mxu3 }
  0xf9   : > { %v882_v31 = vsel %vm880_vm7, %v876_v24, 0.0  ;;  %v746_v32 = vadd.f32 %v735_v27, %v2384_v21  ;;  %1767 = vrot.lane.b32.xlu1 %v870_v23, %s2202_s26 }
  0xfa   : > { %v883_v35 = vadd.f32 %v882_v31, %v881_v29 }
  0xfb   : > { %v803_v34 = vadd.f32 %v792_v28, %v746_v32  ;;  %v856_v37 = vpop.f32.mrf.mxu0 }
  0xfd   : > { %v860_v38 = vadd.f32 %v2395_v54, %v803_v34 }
  0xff   : > { %v877_v39 = vmul.f32 %v2431_v30, %v860_v38  ;;  %v871_v21 = vadd.f32 %v2401_v4, %v860_v38 }
 0x100   : > { %v737_v41 = vpop.f32.mrf.mxu2  ;;  %v794_v42 = vpop.f32.mrf.mxu3 }
 0x101   : > { %v884_v43 = vsel %vm880_vm7, %v877_v39, 0.0  ;;  %v747_v44 = vadd.f32 %v737_v41, %v2386_v33  ;;  %1769 = vrot.lane.b32.xlu1 %v871_v21, %s2202_s26  ;;  %v969_v21 = vld [vmem:[#allocation2] sm:$0xf] }
 0x102   : > { %v885_v46 = vadd.f32 %v884_v43, %v883_v35  ;;  %v970_v41 = vsel %vm968_vm14, 0, %v969_v21  ;;  %v975_v43 = vld [vmem:[#allocation2 + $0x14] sm:$0xe] }
 0x103   : > { %v804_v47 = vadd.f32 %v794_v42, %v747_v44  ;;  %971 = vst [vmem:[#allocation2] sm:$0xf] %v970_v41  ;;  %v976_v44 = vsel %vm974_vm3, 0, %v975_v43  ;;  %vm1042_vm3 = vsmask.f32 7950 }
 0x104   : > { %977 = vst [vmem:[#allocation2 + $0x14] sm:$0xe] %v976_v44 }
 0x105   : > { %v861_v49 = vadd.f32 %v2403_v6, %v804_v47 }
 0x107   : > { %v878_v51 = vmul.f32 %v2440_v48, %v861_v49  ;;  %v872_v52 = vadd.f32 %v2401_v4, %v861_v49 }
 0x108   : > { %v740_v53 = vpop.f32.mrf.mxu2  ;;  %v797_v33 = vpop.f32.mrf.mxu3 }
 0x109   : > { %v886_v50 = vsel %vm880_vm7, %v878_v51, 0.0  ;;  %v748_v54 = vadd.f32 %v740_v53, %v2390_v45  ;;  %1771 = vrot.lane.b32.xlu2 %v872_v52, %s2202_s26  ;;  %v2057_v52 = vld [vmem:[%s2702_s4 + $0x8] sm:$0xff] }
 0x10a   : > { %v887_v55 = vadd.f32 %v886_v50, %v885_v46  ;;  %1189 = vmatpush.bf16.msrb.mxu2 %v2057_v52  ;;  %v2056_v50 = vld [vmem:[%s2702_s4] sm:$0xff] }
 0x10b   : > { %v805_v56 = vadd.f32 %v797_v33, %v748_v54  ;;  %v2059_v33 = vld [vmem:[%s2702_s4 + $0x18] sm:$0xff]  ;;  %v2061_v54 = vld [vmem:[%s2702_s4 + $0x28] sm:$0xff]  ;;  %v1044_v44 = vld [vmem:[#allocation2] sm:$0x8] }
 0x10c   : > { %1144 = vmatpush.bf16.msra.mxu1 %v2059_v33  ;;  %1246 = vmatpush.bf16.msrb.mxu3 %v2061_v54 }
 0x10d   : > { %v862_v58 = vadd.f32 %v854_v20, %v805_v56  ;;  %v2058_v56 = vld [vmem:[%s2702_s4 + $0x10] sm:$0xff] }
 0x10e   : > { %1190 = vmatpush.bf16.msrb.mxu2 %v2056_v50 }
 0x10f   : > { %v879_v59 = vmul.f32 %v2449_v57, %v862_v58  ;;  %v873_v60 = vadd.f32 %v2401_v4, %v862_v58 }
 0x110   : > { %v742_v61 = vpop.f32.mrf.mxu2  ;;  %v799_v62 = vpop.f32.mrf.mxu3  ;;  %1145 = vmatpush.bf16.msra.mxu1 %v2058_v56 }
 0x111   : > { %v889_v63 = vsel %vm888_vm12, %v879_v59, 0.0  ;;  %1773 = vrot.lane.b32.xlu2 %v873_v60, %s2202_s26  ;;  %v2063_v60 = vld [vmem:[%s2702_s4 + $0x38] sm:$0xff]  ;;  %v2060_v61 = vld [vmem:[%s2702_s4 + $0x20] sm:$0xff] }
 0x112   : > { %v890_v45 = vadd.f32 %v889_v63, %v887_v55  ;;  %v950_v63 = vstv %s874_s29  ;;  %1312 = vmatpush.bf16.msrb.mxu0 %v2063_v60  ;;  %1247 = vmatpush.bf16.msrb.mxu3 %v2060_v61 }
 0x114   : > { %v891_v0 = vrot.slane %v890_v45, 4 }
 0x116   : > { %v892_v2 = vadd.f32 %v891_v0, %v890_v45  ;;  %v2062_v45 = vld [vmem:[%s2702_s4 + $0x30] sm:$0xff] }
 0x117   : > { %1313 = vmatpush.bf16.msrb.mxu0 %v2062_v45 }
 0x118   : > { %v893_v3 = vrot.slane %v892_v2, 2 }
 0x11a   : > { %v894_v6 = vadd.f32 %v893_v3, %v892_v2 }
 0x11c   : > { %v895_v1 = vrot.slane %v894_v6, 1 }
 0x11e   : > { %v896_v8 = vadd.f32 %v895_v1, %v894_v6  ;;  %v2204_v1 = vmov 0  }
 0x11f   : > { %978 = vst.msk [vmem:[#allocation2 + $0x18] sm:$0xf] %vm888_vm12, %v2204_v1 }
 0x120   : > { %v897_v9 = vmul.f32 0.0625, %v896_v8 }
 0x122   : > { %v2456_v11 = vsub.f32 %v2405_v7, %v897_v9  ;;  %v2459_v12 = vsub.f32 %v2420_v22, %v897_v9  ;;  %v2461_v4 = vsub.f32 %v860_v38, %v897_v9  ;;  %v2463_v5 = vsub.f32 %v861_v49, %v897_v9 }
 0x123   : > { %v2465_v13 = vsub.f32 %v862_v58, %v897_v9 }
 0x124   : > { %v903_v14 = vmul.f32 %v2412_v15, %v2456_v11  ;;  %v904_v16 = vmul.f32 %v2415_v19, %v2459_v12  ;;  %v905_v17 = vmul.f32 %v2431_v30, %v2461_v4  ;;  %v906_v7 = vmul.f32 %v2440_v48, %v2463_v5 }
 0x125   : > { %v907_v18 = vmul.f32 %v2449_v57, %v2465_v13 }
 0x126   : > { %v908_v20 = vmul.f32 %v903_v14, %v903_v14  ;;  %v909_v10 = vmul.f32 %v904_v16, %v904_v16  ;;  %v910_v22 = vmul.f32 %v905_v17, %v905_v17  ;;  %v911_v24 = vmul.f32 %v906_v7, %v906_v7 }
 0x127   : > { %v912_v27 = vmul.f32 %v907_v18, %v907_v18 }
 0x128   : > { %v913_v23 = vsel %vm880_vm7, %v908_v20, 0.0  ;;  %v914_v25 = vsel %vm880_vm7, %v909_v10, 0.0  ;;  %v916_v28 = vsel %vm880_vm7, %v910_v22, 0.0  ;;  %v918_v31 = vsel %vm880_vm7, %v911_v24, 0.0 }
 0x129   : > { %v915_v26 = vadd.f32 %v914_v25, %v913_v23  ;;  %v920_v35 = vsel %vm888_vm12, %v912_v27, 0.0 }
 0x12b   : > { %v917_v29 = vadd.f32 %v916_v28, %v915_v26 }
 0x12d   : > { %v919_v32 = vadd.f32 %v918_v31, %v917_v29 }
 0x12f   : > { %v921_v34 = vadd.f32 %v920_v35, %v919_v32 }
 0x131   : > { %v922_v36 = vrot.slane %v921_v34, 4 }
 0x133   : > { %v923_v37 = vadd.f32 %v922_v36, %v921_v34 }
 0x135   : > { %v924_v38 = vrot.slane %v923_v37, 2 }
 0x137   : > { %v925_v39 = vadd.f32 %v924_v38, %v923_v37 }
 0x139   : > { %v926_v40 = vrot.slane %v925_v39, 1 }
 0x13b   : > { %v927_v42 = vadd.f32 %v926_v40, %v925_v39 }
 0x13d   : > { %v928_v46 = vmul.f32 0.0625, %v927_v42 }
 0x13f   : > { %v929_v47 = vadd.f32 1e-05, %v928_v46 }
 0x141   : > { %2169 = vrsqrt.f32 %v929_v47  ;;  %vm936_vm5 = vweird.f32 %v929_v47 }
 0x147   : > { %v2170_v49 = vpop.eup %2169 }
 0x148   : > { %v931_v51 = vmul.f32 %v2170_v49, %v929_v47  ;;  %vm937_vm4 = vweird.f32 %v2170_v49 }
 0x149   : > { %vm938_vm6 = vmor %vm936_vm5, %vm937_vm4  ;;  %vm1051_vm4 = vcmask 254976  }
 0x14a   : > { %v932_v53 = vmul.f32 %v2170_v49, %v931_v51  ;;  %vm2524_vm5 = vmand %vm1041_vm0, %vm1042_vm3 }
 0x14c   : > { %v933_v55 = vmul.f32 0.5, %v932_v53 }
 0x14e   : > { %v934_v58 = vsub.f32 1.5, %v933_v55 }
 0x150   : > { %v935_v59 = vmul.f32 %v2170_v49, %v934_v58 }
 0x152   : > { %v939_v62 = vsel %vm938_vm6, %v2170_v49, %v935_v59  ;;  %vm2530_vm6 = vmor %vm967_vm13, %vm984_vm15 }
 0x153   : > { %v940_v0 = vmul.f32 %v939_v62, %v2456_v11  ;;  %v941_v2 = vmul.f32 %v939_v62, %v2459_v12  ;;  %v942_v3 = vmul.f32 %v939_v62, %v2461_v4  ;;  %v943_v6 = vmul.f32 %v939_v62, %v2463_v5  ;;  %v2065_v11 = vld [vmem:[%s2702_s4 + $0x48] sm:$0xff] }
 0x154   : > { %v944_v8 = vmul.f32 %v939_v62, %v2465_v13  ;;  %1390 = vmatpush.bf16.msrb.mxu1 %v2065_v11 }
 0x155   : > { %vm945_vm8 = vcmp.ge.f32.partialorder %v940_v0, 0.0  ;;  %vm946_vm9 = vcmp.ge.f32.partialorder %v941_v2, 0.0  ;;  %vm947_vm10 = vcmp.ge.f32.partialorder %v942_v3, 0.0  ;;  %vm948_vm11 = vcmp.ge.f32.partialorder %v943_v6, 0.0 }
 0x156   : > { %vm949_vm14 = vcmp.ge.f32.partialorder %v944_v8, 0.0  ;;  %v951_v9 = vmul.f32 %v950_v63, %v940_v0  ;;  %v952_v14 = vmul.f32 %v950_v63, %v941_v2  ;;  %v953_v16 = vmul.f32 %v950_v63, %v942_v3 }
 0x157   : > { %v954_v12 = vmul.f32 %v950_v63, %v943_v6  ;;  %v955_v4 = vmul.f32 %v950_v63, %v944_v8 }
 0x158   : > { %v956_v5 = vsel %vm945_vm8, %v940_v0, %v951_v9  ;;  %v957_v17 = vsel %vm946_vm9, %v941_v2, %v952_v14  ;;  %v958_v7 = vsel %vm947_vm10, %v942_v3, %v953_v16  ;;  %vm1052_vm8 = vsmask.f32 1280  ;;  %v2064_v9 = vld [vmem:[%s2702_s4 + $0x40] sm:$0xff] }
 0x159   : > { %v959_v13 = vsel %vm948_vm11, %v943_v6, %v954_v12  ;;  %v960_v18 = vsel %vm949_vm14, %v944_v8, %v955_v4  ;;  %v961_v20 = vmul.f32 %v2412_v15, %v956_v5  ;;  %v962_v10 = vmul.f32 %v2415_v19, %v957_v17  ;;  %vm1053_vm13 = vmand %vm1051_vm4, %vm1052_vm8  ;;  %v1054_v8 = vld [vmem:[#allocation2 + $0x14] sm:$0x3]  ;;  %1391 = vmatpush.bf16.msrb.mxu1 %v2064_v9 }
 0x15a   : > { %v963_v22 = vmul.f32 %v2431_v30, %v958_v7  ;;  %v964_v24 = vmul.f32 %v2440_v48, %v959_v13  ;;  %v965_v23 = vmul.f32 %v2449_v57, %v960_v18  ;;  %vm1093_vm9 = vsmask.f32 7424 }
 0x15b   : > { %v979_v25 = vpack.c.bf16 %v961_v20, %v961_v20  ;;  %v980_v26 = vpack.c.bf16 %v962_v10, %v962_v10  ;;  %vm1213_vm10 = vcmask 1046528   ;;  %vm1341_vm11 = vsmask.f32 4352 }
 0x15c   : > { %v981_v27 = vpack.c.bf16 %v963_v22, %v963_v22  ;;  %v982_v28 = vpack.c.bf16 %v964_v24, %v964_v24  ;;  %v983_v29 = vpack.c.bf16 %v965_v23, %v965_v23  ;;  %vm1539_vm14 = vsmask.f32 5376 }
 0x15d   : > { %v987_v31 = vshll.u32 %v979_v25, 16  ;;  %v990_v32 = vshrl.u32 %v979_v25, 16  ;;  %v996_v35 = vshll.u32 %v980_v26, 16  ;;  %v1000_v34 = vshrl.u32 %v980_v26, 16 }
 0x15e   : > { %v1006_v36 = vshll.u32 %v981_v27, 16  ;;  %v1010_v37 = vshrl.u32 %v981_v27, 16  ;;  %v1016_v38 = vshll.u32 %v982_v28, 16  ;;  %v1020_v39 = vshrl.u32 %v982_v28, 16 }
 0x15f   : > { %v989_v21 = vrot.slane %v987_v31, 5  ;;  %v992_v40 = vrot.slane %v990_v32, 4  ;;  %v998_v41 = vrot.slane %v996_v35, 5  ;;  %v1002_v42 = vrot.slane %v1000_v34, 4 }
 0x160   : > { %v1008_v46 = vrot.slane %v1006_v36, 5  ;;  %v1012_v47 = vrot.slane %v1010_v37, 4  ;;  %v1018_v49 = vrot.slane %v1016_v38, 5  ;;  %v1022_v51 = vrot.slane %v1020_v39, 4 }
 0x161   : > { %v993_v52 = vor.u32 %v992_v40, %v989_v21  ;;  %v1003_v53 = vor.u32 %v1002_v42, %v998_v41  ;;  %v1026_v33 = vshll.u32 %v983_v29, 16  ;;  %v1030_v50 = vshrl.u32 %v983_v29, 16  ;;  %v2069_v40 = vld [vmem:[%s2702_s4 + $0x68] sm:$0xff]  ;;  %v2066_v42 = vld [vmem:[%s2702_s4 + $0x50] sm:$0xff] }
 0x162   : > { %v1013_v55 = vor.u32 %v1012_v47, %v1008_v46  ;;  %v1023_v56 = vor.u32 %v1022_v51, %v1018_v49  ;;  %v1045_v58 = vsel %vm2524_vm5, %v989_v21, %v1044_v44  ;;  %v2067_v21 = vld [vmem:[%s2702_s4 + $0x58] sm:$0xff]  ;;  %1510 = vmatpush.bf16.msra.mxu3 %v2069_v40  ;;  %v2068_v51 = vld [vmem:[%s2702_s4 + $0x60] sm:$0xff] }
 0x163   : > { %v994_v59 = vrot.slane %v993_v52, 4  ;;  %v1004_v60 = vrot.slane %v1003_v53, 4  ;;  %v1028_v61 = vrot.slane %v1026_v33, 5  ;;  %v1032_v62 = vrot.slane %v1030_v50, 4  ;;  %1046 = vst [vmem:[#allocation2] sm:$0x8] %v1045_v58  ;;  %1446 = vmatpush.bf16.msra.mxu2 %v2067_v21 }
 0x164   : > { %v1014_v63 = vrot.slane %v1013_v55, 4  ;;  %v1024_v45 = vrot.slane %v1023_v56, 4  ;;  %v2070_v50 = vld [vmem:[%s2702_s4 + $0x70] sm:$0xff] }
 0x165   : > { %v999_v0 = vsel %vm2530_vm6, %v994_v59, %v998_v41  ;;  %v1009_v2 = vsel %vm2530_vm6, %v1004_v60, %v1008_v46  ;;  %v1033_v3 = vor.u32 %v1032_v62, %v1028_v61 }
 0x166   : > { %v1019_v6 = vsel %vm2530_vm6, %v1014_v63, %v1018_v49  ;;  %v1029_v1 = vsel %vm2530_vm6, %v1024_v45, %v1028_v61  ;;  %1047 = vst.msk [vmem:[#allocation2 + $0x4] sm:$0xf] %vm888_vm12, %v999_v0  ;;  %v2071_v49 = vld [vmem:[%s2702_s4 + $0x78] sm:$0xff]  ;;  %1511 = vmatpush.bf16.msra.mxu3 %v2068_v51  ;;  %v2073_v61 = vld [vmem:[%s2702_s4 + $0x88] sm:$0xff] }
 0x167   : > { %v1034_v14 = vrot.slane %v1033_v3, 4  ;;  %1048 = vst.msk [vmem:[#allocation2 + $0x8] sm:$0xf] %vm888_vm12, %v1009_v2  ;;  %1447 = vmatpush.bf16.msra.mxu2 %v2066_v42  ;;  %1592 = vmatpush.bf16.msra.mxu0 %v2071_v49 }
 0x168   : > { %1049 = vst.msk [vmem:[#allocation2 + $0xc] sm:$0xf] %vm888_vm12, %v1019_v6 }
 0x169   : > { %1050 = vst.msk [vmem:[#allocation2 + $0x10] sm:$0xf] %vm888_vm12, %v1029_v1  ;;  %v1055_v16 = vsel %vm1053_vm13, %v1034_v14, %v1054_v8  ;;  %v2072_v14 = vld [vmem:[%s2702_s4 + $0x80] sm:$0xff] }
 0x16a   : > { %1056 = vst [vmem:[#allocation2 + $0x14] sm:$0x3] %v1055_v16  ;;  %v1064_v11 = vld [vmem:[#allocation2] sm:$0x8] }
 0x16b   : > { %v1063_v12 = vld [vmem:[#allocation2] sm:$0xe]  ;;  %v1275_v7 = vunpack.c.l.b16 %v1064_v11  ;;  %1593 = vmatpush.bf16.msra.mxu0 %v2070_v50 }
 0x16c   : > { %v1211_v13 = vunpack.c.l.b16 %v1063_v12 }
 0x16d   : > { %v2099_v4 = vld [vmem:[#allocation2] sm:$0xff]  }
 0x16e   : > { %v2552_v5 = vunpack.c.h.b16 %v2099_v4  ;;  %v1097_v17 = vshll.u32 %v2099_v4, 16  ;;  %1964 = vmatmul.msk.bf16.vlgmr.msrb.gmra.mxu2 %vm880_vm7, %v2099_v4  ;;  %v1095_v18 = vshrl.u32 %v2099_v4, 16  ;;  %v1068_v45 = vld [vmem:[#allocation2 + $0x4] sm:$0xc] }
 0x16f   : > { %v2555_v20 = vld [vmem:[#allocation2 + $0x8] sm:$0xff]   ;;  %v1474_v6 = vunpack.c.l.b16 %v1068_v45 }
 0x170   : > { %v1099_v10 = vrot.slane %v1097_v17, 1  ;;  %v2558_v22 = vpack.c.b16 %v2552_v5, %v1275_v7  ;;  %v1102_v24 = vshll.u32 %v2555_v20, 16  ;;  %v1212_v23 = vpack.c.b16 %v2552_v5, %v1211_v13  ;;  %v1062_v27 = vld [vmem:[#allocation2 + $0x10] sm:$0x7] }
 0x171   : > { %v1215_v25 = vrot.slane %v2555_v20, 1  ;;  %v1281_v26 = vrot.slane %v2555_v20, 3  ;;  %v1089_v37 = vunpack.c.l.b16 %v1062_v27  ;;  %v2572_v38 = vld [vmem:[#allocation2 + $0x10] sm:$0xff]   ;;  %v1106_v52 = vshrl.u32 %v2555_v20, 16 }
 0x172   : > { %v1100_v28 = vor.u32 %v1099_v10, %v1095_v18  ;;  %v1104_v29 = vrot.slane %v1102_v24, 1  ;;  %v1214_v31 = vrot.slane %v1212_v23, 1  ;;  %v1280_v32 = vrot.slane %v2558_v22, 3  ;;  %v1066_v39 = vld [vmem:[#allocation2 + $0x14] sm:$0x1] }
 0x173   : > { %v1092_v41 = vpack.c.b16 %v1089_v37, %v1089_v37  ;;  %v2585_v43 = vunpack.c.l.b16 %v2572_v38  ;;  %v1277_v44 = vunpack.c.l.b16 %v1066_v39  ;;  %v1061_v60 = vld [vmem:[#allocation2 + $0x10] sm:$0x3]  ;;  %v2105_v0 = vunpack.c.h.b16 %v2555_v20 }
 0x174   : > { %v1105_v35 = vsel %vm1093_vm9, %v1100_v28, %v1104_v29  ;;  %v1216_v34 = vsel %vm1213_vm10, %v1214_v31, %v1215_v25  ;;  %v1282_v36 = vsel %vm526_vm1, %v1280_v32, %v1281_v26  ;;  %v1108_v55 = vor.u32 %v1106_v52, %v1104_v29  ;;  %v1067_v28 = vld [vmem:[#allocation2 + $0x14] sm:$0x3]  ;;  %v1070_v31 = vld [vmem:[#allocation2 + $0x18] sm:$0x1] }
 0x175   : > { %1953 = vmatmul.msk.bf16.vlgmr.msra.gmra.mxu1 %vm880_vm7, %v1105_v35  ;;  %1975 = vmatmul.msk.bf16.vlgmr.msrb.gmra.mxu3 %vm880_vm7, %v1216_v34  ;;  %v1110_v46 = vshll.u32 %v1092_v41, 16  ;;  %v1279_v47 = vpack.c.b16 %v1277_v44, %v2585_v43  ;;  %v1217_v33 = vrot.slane %v1092_v41, 1  ;;  %v1162_v62 = vunpack.c.l.b16 %v1061_v60 }
 0x176   : > { %1986 = vmatmul.msk.bf16.vlgmr.msrb.gmra.mxu0 %vm880_vm7, %v1282_v36  ;;  %1653 = vmatpush.bf16.msra.mxu1 %v2073_v61  ;;  %v1114_v2 = vshrl.u32 %v1092_v41, 16  ;;  %v2612_v3 = vunpack.c.l.b16 %v2555_v20  ;;  %v2615_v8 = vpack.c.b16 %v2585_v43, %v2105_v0  ;;  %v1343_v16 = vshrl.u32 %v2558_v22, 16  ;;  %v1071_v61 = vld [vmem:[#allocation2 + $0x4] sm:$0x8] }
 0x177   : > { %v1112_v53 = vrot.slane %v1110_v46, 1  ;;  %v1283_v54 = vrot.slane %v1279_v47, 3  ;;  %v1218_v58 = vsel %vm1213_vm10, %v1215_v25, %v1217_v33  ;;  %v1163_v63 = vpack.c.b16 %v1162_v62, %v1162_v62 }
 0x178   : > { %v1476_v9 = vpack.c.b16 %v2612_v3, %v1474_v6  ;;  %v1346_v11 = vshll.u32 %v2558_v22, 16  ;;  %v1548_v17 = vshrl.u32 %v2615_v8, 16  ;;  %v1551_v7 = vshll.u32 %v2615_v8, 16 }
 0x179   : > { %v1113_v56 = vsel %vm1093_vm9, %v1108_v55, %v1112_v53  ;;  %v1284_v59 = vsel %vm526_vm1, %v1281_v26, %v1283_v54  ;;  %v1116_v1 = vor.u32 %v1114_v2, %v1112_v53  ;;  %v1416_v13 = vpack.c.b16 %v2612_v3, %v2552_v5 }
 0x17a   : > { %1654 = vmatpush.bf16.msra.mxu1 %v2072_v14  ;;  %v1541_v12 = vshrl.u32 %v1476_v9, 16  ;;  %v1544_v4 = vshll.u32 %v1476_v9, 16  ;;  %v1345_v18 = vrot.slane %v1343_v16, 3  ;;  %v1348_v10 = vrot.slane %v1346_v11, 4 }
 0x17b   : > { %v1550_v26 = vrot.slane %v1548_v17, 2  ;;  %v1553_v27 = vrot.slane %v1551_v7, 3  ;;  %v1350_v29 = vrot.slane %v1106_v52, 3  ;;  %v1351_v22 = vrot.slane %v1102_v24, 4 }
 0x17c   : > { %v1543_v23 = vrot.slane %v1541_v12, 2  ;;  %v1546_v25 = vrot.slane %v1544_v4, 3  ;;  %v1349_v32 = vor.u32 %v1348_v10, %v1345_v18  ;;  %v1478_v35 = vrot.slane %v1476_v9, 2 }
 0x17d   : > { %v1479_v34 = vrot.slane %v2615_v8, 2  ;;  %v1339_v5 = vunpack.c.l.b16 %v1067_v28  ;;  %v1554_v37 = vor.u32 %v1553_v27, %v1550_v26  ;;  %v2109_v39 = vunpack.c.h.b16 %v2572_v38 }
 0x17e   : > { %1965 = vmatmul.msk.bf16.gmra.mxu2 %vm880_vm7, %v2555_v20  ;;  %v1547_v36 = vor.u32 %v1546_v25, %v1543_v23  ;;  %v1537_v21 = vunpack.c.l.b16 %v1070_v31  ;;  %v1352_v40 = vor.u32 %v1351_v22, %v1350_v29  ;;  %v1619_v62 = vunpack.c.l.b16 %v1071_v61 }
 0x17f   : > { %v1480_v42 = vsel %vm700_vm2, %v1478_v35, %v1479_v34  ;;  %v1340_v20 = vpack.c.b16 %v1339_v5, %v2585_v43  ;;  %v1477_v53 = vpack.c.b16 %v2109_v39, %v2109_v39  ;;  %v1418_v60 = vpack.c.b16 %v1339_v5, %v1339_v5 }
 0x180   : > { %v1353_v41 = vsel %vm1341_vm11, %v1349_v32, %v1352_v40  ;;  %v1555_v24 = vsel %vm1539_vm14, %v1547_v36, %v1554_v37  ;;  %v1538_v44 = vpack.c.b16 %v1537_v21, %v2109_v39  ;;  %v1622_v0 = vrot.slane %v2615_v8, 3 }
 0x181   : > { %v1355_v46 = vshrl.u32 %v1340_v20, 16  ;;  %v1358_v38 = vshll.u32 %v1340_v20, 16 }
 0x182   : > { %v1557_v47 = vshrl.u32 %v1538_v44, 16  ;;  %v1560_v49 = vshll.u32 %v1538_v44, 16  ;;  %v1624_v6 = vrot.slane %v1538_v44, 3 }
 0x183   : > { %v1357_v51 = vrot.slane %v1355_v46, 3  ;;  %v1360_v52 = vrot.slane %v1358_v38, 4 }
 0x184   : > { %v1562_v50 = vrot.slane %v1560_v49, 3 }
 0x185   : > { %1954 = vmatmul.msk.bf16.gmra.mxu1 %vm880_vm7, %v1113_v56  ;;  %1976 = vmatmul.msk.bf16.gmra.mxu3 %vm880_vm7, %v1218_v58  ;;  %v1361_v43 = vor.u32 %v1360_v52, %v1357_v51 }
 0x186   : > { %1987 = vmatmul.msk.bf16.gmra.mxu0 %vm880_vm7, %v1284_v59 }
 0x187   : > { %v1362_v56 = vsel %vm1341_vm11, %v1352_v40, %v1361_v43 }
 0x18e   : > { %1966 = vmatmul.msk.bf16.gmra.mxu2 %vm880_vm7, %v1163_v63  ;;  %v1620_v63 = vpack.c.b16 %v2612_v3, %v1619_v62 }
 0x190   : > { %v1621_v45 = vrot.slane %v1620_v63, 3 }
 0x192   : > { %v1623_v2 = vsel %vm526_vm1, %v1621_v45, %v1622_v0 }
 0x195   : > { %1955 = vmatmul.msk.bf16.gmra.mxu1 %vm880_vm7, %v1116_v1  ;;  %1977 = vmatmul.msk.bf16.gmra.mxu3 %vm880_vm7, %v1217_v33  ;;  %v1559_v33 = vrot.slane %v1557_v47, 2  ;;  %v1625_v1 = vsel %vm526_vm1, %v1622_v0, %v1624_v6 }
 0x196   : > { %1988 = vmatmul.msk.bf16.gmra.mxu0 %vm880_vm7, %v1283_v54  ;;  %v1481_v54 = vrot.slane %v1477_v53, 2 }
 0x197   : > { %v1563_v55 = vor.u32 %v1562_v50, %v1559_v33 }
 0x198   : > { %v1482_v58 = vsel %vm700_vm2, %v1479_v34, %v1481_v54 }
 0x199   : > { %v1564_v59 = vsel %vm1539_vm14, %v1554_v37, %v1563_v55 }
 0x19e   : > { %2008 = vmatmul.msk.bf16.vlgmr.msra.gmra.mxu2 %vm880_vm7, %v1416_v13 }
 0x1a5   : > { %1997 = vmatmul.msk.bf16.vlgmr.msrb.gmra.mxu1 %vm880_vm7, %v1353_v41  ;;  %2019 = vmatmul.msk.bf16.vlgmr.msra.gmra.mxu3 %vm880_vm7, %v1480_v42 }
 0x1a6   : > { %2030 = vmatmul.msk.bf16.vlgmr.msra.gmra.mxu0 %vm880_vm7, %v1555_v24 }
 0x1ae   : > { %2009 = vmatmul.msk.bf16.gmra.mxu2 %vm880_vm7, %v2615_v8 }
 0x1b5   : > { %1998 = vmatmul.msk.bf16.gmra.mxu1 %vm880_vm7, %v1362_v56  ;;  %2020 = vmatmul.msk.bf16.gmra.mxu3 %vm880_vm7, %v1482_v58 }
 0x1b6   : > { %2031 = vmatmul.msk.bf16.gmra.mxu0 %vm880_vm7, %v1564_v59 }
 0x1be   : > { %2010 = vmatmul.msk.bf16.gmra.mxu2 %vm880_vm7, %v1418_v60 }
 0x1c5   : > { %1999 = vmatmul.msk.bf16.gmra.mxu1 %vm880_vm7, %v1361_v43  ;;  %2021 = vmatmul.msk.bf16.gmra.mxu3 %vm880_vm7, %v1481_v54 }
 0x1c6   : > { %2032 = vmatmul.msk.bf16.gmra.mxu0 %vm880_vm7, %v1563_v55 }
 0x1d5   : > { %2041 = vmatmul.msk.bf16.vlgmr.msra.gmra.mxu1 %vm880_vm7, %v1623_v2 }
 0x1e5   : > { %2042 = vmatmul.msk.bf16.gmra.mxu1 %vm880_vm7, %v1625_v1 }
 0x1f1   : > { %v1192_v9 = vpop.f32.mrf.mxu2 }
 0x1f2   : > { %v1147_v14 = vpop.f32.mrf.mxu1 }
 0x1f3   : > { %v1193_v16 = vadd.f32 %v1192_v9, %v1147_v14  ;;  %v1315_v11 = vpop.f32.mrf.mxu0 }
 0x1f5   : > { %2043 = vmatmul.msk.bf16.gmra.mxu1 %vm880_vm7, %v1624_v6 }
 0x1f8   : > { %v1249_v12 = vpop.f32.mrf.mxu3 }
 0x1f9   : > { %v1263_v3 = vadd.f32 %v1249_v12, %v1193_v16  ;;  %v1194_v4 = vpop.f32.mrf.mxu2 }
 0x1fa   : > { %v1149_v17 = vpop.f32.mrf.mxu1 }
 0x1fb   : > { %v1195_v8 = vadd.f32 %v1194_v4, %v1149_v17  ;;  %v1317_v7 = vpop.f32.mrf.mxu0  ;;  %v1329_v13 = vadd.f32 %v1315_v11, %v1263_v3 }
 0x200   : > { %v1251_v18 = vpop.f32.mrf.mxu3 }
 0x201   : > { %v1264_v10 = vadd.f32 %v1251_v18, %v1195_v8  ;;  %v1197_v23 = vpop.f32.mrf.mxu2 }
 0x202   : > { %v1152_v25 = vpop.f32.mrf.mxu1 }
 0x203   : > { %v1198_v26 = vadd.f32 %v1197_v23, %v1152_v25  ;;  %v1320_v27 = vpop.f32.mrf.mxu0  ;;  %v1330_v28 = vadd.f32 %v1317_v7, %v1264_v10 }
 0x208   : > { %v1254_v29 = vpop.f32.mrf.mxu3 }
 0x209   : > { %v1265_v22 = vadd.f32 %v1254_v29, %v1198_v26  ;;  %v1199_v31 = vpop.f32.mrf.mxu2 }
 0x20a   : > { %v1154_v32 = vpop.f32.mrf.mxu1 }
 0x20b   : > { %v1200_v35 = vadd.f32 %v1199_v31, %v1154_v32  ;;  %v1322_v34 = vpop.f32.mrf.mxu0  ;;  %v1331_v5 = vadd.f32 %v1320_v27, %v1265_v22 }
 0x210   : > { %v1256_v36 = vpop.f32.mrf.mxu3 }
 0x211   : > { %v1266_v37 = vadd.f32 %v1256_v36, %v1200_v35  ;;  %v1202_v39 = vpop.f32.mrf.mxu2 }
 0x212   : > { %v1157_v21 = vpop.f32.mrf.mxu1 }
 0x213   : > { %v1203_v40 = vadd.f32 %v1202_v39, %v1157_v21  ;;  %v1325_v41 = vpop.f32.mrf.mxu0  ;;  %v1332_v42 = vadd.f32 %v1322_v34, %v1266_v37 }
 0x218   : > { %v1259_v20 = vpop.f32.mrf.mxu3 }
 0x219   : > { %v1267_v24 = vadd.f32 %v1259_v20, %v1203_v40  ;;  %v1204_v44 = vpop.f32.mrf.mxu2 }
 0x21a   : > { %v1159_v46 = vpop.f32.mrf.mxu1 }
 0x21b   : > { %v1327_v38 = vpop.f32.mrf.mxu0  ;;  %v1333_v47 = vadd.f32 %v1325_v41, %v1267_v24 }
 0x220   : > { %v1261_v49 = vpop.f32.mrf.mxu3 }
 0x221   : > { %v1449_v51 = vpop.f32.mrf.mxu2 }
 0x222   : > { %v1393_v52 = vpop.f32.mrf.mxu1 }
 0x223   : > { %v1407_v53 = vadd.f32 %v1393_v52, %v1329_v13  ;;  %v1595_v33 = vpop.f32.mrf.mxu0 }
 0x225   : > { %v1463_v50 = vadd.f32 %v1449_v51, %v1407_v53 }
 0x228   : > { %v1513_v43 = vpop.f32.mrf.mxu3 }
 0x229   : > { %v1527_v54 = vadd.f32 %v1513_v43, %v1463_v50  ;;  %v1451_v55 = vpop.f32.mrf.mxu2 }
 0x22a   : > { %v1395_v56 = vpop.f32.mrf.mxu1 }
 0x22b   : > { %v1408_v58 = vadd.f32 %v1395_v56, %v1330_v28  ;;  %v1597_v59 = vpop.f32.mrf.mxu0  ;;  %v1609_v60 = vadd.f32 %v1595_v33, %v1527_v54 }
 0x22d   : > { %v1464_v61 = vadd.f32 %v1451_v55, %v1408_v58 }
 0x230   : > { %v1515_v62 = vpop.f32.mrf.mxu3 }
 0x231   : > { %v1528_v63 = vadd.f32 %v1515_v62, %v1464_v61  ;;  %v1454_v45 = vpop.f32.mrf.mxu2 }
 0x232   : > { %v1398_v0 = vpop.f32.mrf.mxu1 }
 0x233   : > { %v1600_v2 = vpop.f32.mrf.mxu0  ;;  %v1610_v6 = vadd.f32 %v1597_v59, %v1528_v63  ;;  %v1409_v23 = vadd.f32 %v1398_v0, %v1331_v5 }
 0x235   : > { %v1465_v27 = vadd.f32 %v1454_v45, %v1409_v23 }
 0x238   : > { %v1518_v1 = vpop.f32.mrf.mxu3 }
 0x239   : > { %v1456_v9 = vpop.f32.mrf.mxu2  ;;  %v1529_v22 = vadd.f32 %v1518_v1, %v1465_v27 }
 0x23a   : > { %v1400_v14 = vpop.f32.mrf.mxu1 }
 0x23b   : > { %v1602_v16 = vpop.f32.mrf.mxu0  ;;  %v1410_v32 = vadd.f32 %v1400_v14, %v1332_v42  ;;  %v1611_v37 = vadd.f32 %v1600_v2, %v1529_v22 }
 0x23d   : > { %v1466_v21 = vadd.f32 %v1456_v9, %v1410_v32 }
 0x240   : > { %v1520_v11 = vpop.f32.mrf.mxu3 }
 0x241   : > { %v1459_v12 = vpop.f32.mrf.mxu2  ;;  %v1530_v5 = vadd.f32 %v1520_v11, %v1466_v21 }
 0x242   : > { %v1403_v3 = vpop.f32.mrf.mxu1 }
 0x243   : > { %v1605_v4 = vpop.f32.mrf.mxu0  ;;  %v1411_v20 = vadd.f32 %v1403_v3, %v1333_v47  ;;  %v1612_v46 = vadd.f32 %v1602_v16, %v1530_v5 }
 0x245   : > { %v1467_v49 = vadd.f32 %v1459_v12, %v1411_v20 }
 0x248   : > { %v1523_v17 = vpop.f32.mrf.mxu3 }
 0x249   : > { %v1461_v8 = vpop.f32.mrf.mxu2  ;;  %v1531_v51 = vadd.f32 %v1523_v17, %v1467_v49 }
 0x24a   : > { %v1405_v7 = vpop.f32.mrf.mxu1 }
 0x24b   : > { %v1607_v13 = vpop.f32.mrf.mxu0  ;;  %v1613_v50 = vadd.f32 %v1605_v4, %v1531_v51  ;;  %v1749_v51 = vstv %s2044_s16 }
 0x250   : > { %v1525_v18 = vpop.f32.mrf.mxu3 }
 0x252   : > { %v1656_v10 = vpop.f32.mrf.mxu1 }
 0x253   : > { %v1670_v25 = vadd.f32 %v1656_v10, %v1609_v60 }
 0x255   : > { %v1676_v28 = vmul.f32 %v2412_v15, %v1670_v25 }
 0x257   : > { %v1681_v35 = vsel %vm880_vm7, %v1676_v28, 0.0 }
 0x25a   : > { %v1658_v26 = vpop.f32.mrf.mxu1 }
 0x25b   : > { %v1671_v29 = vadd.f32 %v1658_v26, %v1610_v6 }
 0x25d   : > { %v1677_v31 = vmul.f32 %v2415_v19, %v1671_v29 }
 0x25f   : > { %v1682_v34 = vsel %vm880_vm7, %v1677_v31, 0.0 }
 0x260   : > { %v1683_v36 = vadd.f32 %v1682_v34, %v1681_v35 }
 0x262   : > { %v1661_v39 = vpop.f32.mrf.mxu1 }
 0x263   : > { %v1672_v40 = vadd.f32 %v1661_v39, %v1611_v37 }
 0x265   : > { %v1678_v41 = vmul.f32 %v2431_v30, %v1672_v40 }
 0x267   : > { %v1684_v24 = vsel %vm880_vm7, %v1678_v41, 0.0 }
 0x268   : > { %v1685_v44 = vadd.f32 %v1684_v24, %v1683_v36 }
 0x26a   : > { %v1663_v38 = vpop.f32.mrf.mxu1 }
 0x26b   : > { %v1673_v42 = vadd.f32 %v1663_v38, %v1612_v46  ;;  %v1772_v46 = vpop.permute.xlu2 %1771  ;;  %v1768_v38 = vpop.permute.xlu1 %1767 }
 0x26d   : > { %v1679_v52 = vmul.f32 %v2440_v48, %v1673_v42 }
 0x26f   : > { %v1686_v53 = vsel %vm880_vm7, %v1679_v52, 0.0 }
 0x270   : > { %v1687_v33 = vadd.f32 %v1686_v53, %v1685_v44 }
 0x272   : > { %v1666_v43 = vpop.f32.mrf.mxu1 }
 0x273   : > { %v1674_v54 = vadd.f32 %v1666_v43, %v1613_v50 }
 0x275   : > { %v1680_v55 = vmul.f32 %v2449_v57, %v1674_v54 }
 0x277   : > { %v1688_v47 = vsel %vm888_vm12, %v1680_v55, 0.0 }
 0x278   : > { %v1689_v56 = vadd.f32 %v1688_v47, %v1687_v33 }
 0x27a   : > { %v1690_v58 = vrot.slane %v1689_v56, 4  ;;  %v1668_v59 = vpop.f32.mrf.mxu1 }
 0x27b   : > { %v1766_v59 = vpop.permute.xlu0 %1765 }
 0x27c   : > { %v1691_v60 = vadd.f32 %v1690_v58, %v1689_v56 }
 0x27e   : > { %v1692_v61 = vrot.slane %v1691_v60, 2 }
 0x280   : > { %v1693_v62 = vadd.f32 %v1692_v61, %v1691_v60 }
 0x282   : > { %v1694_v63 = vrot.slane %v1693_v62, 1 }
 0x284   : > { %v1695_v45 = vadd.f32 %v1694_v63, %v1693_v62  ;;  %v1774_v63 = vpop.permute.xlu2 %1773 }
 0x286   : > { %v1696_v0 = vmul.f32 0.0625, %v1695_v45  ;;  %v1770_v45 = vpop.permute.xlu1 %1769 }
 0x288   : > { %v1697_v2 = vsub.f32 %v1670_v25, %v1696_v0  ;;  %v1698_v6 = vsub.f32 %v1671_v29, %v1696_v0  ;;  %v1699_v1 = vsub.f32 %v1672_v40, %v1696_v0  ;;  %v1700_v9 = vsub.f32 %v1673_v42, %v1696_v0 }
 0x289   : > { %v1701_v14 = vsub.f32 %v1674_v54, %v1696_v0 }
 0x28a   : > { %v1702_v16 = vmul.f32 %v2412_v15, %v1697_v2  ;;  %v1703_v11 = vmul.f32 %v2415_v19, %v1698_v6  ;;  %v1704_v12 = vmul.f32 %v2431_v30, %v1699_v1  ;;  %v1705_v3 = vmul.f32 %v2440_v48, %v1700_v9 }
 0x28b   : > { %v1706_v4 = vmul.f32 %v2449_v57, %v1701_v14 }
 0x28c   : > { %v1707_v17 = vmul.f32 %v1702_v16, %v1702_v16  ;;  %v1708_v8 = vmul.f32 %v1703_v11, %v1703_v11  ;;  %v1709_v7 = vmul.f32 %v1704_v12, %v1704_v12  ;;  %v1710_v13 = vmul.f32 %v1705_v3, %v1705_v3 }
 0x28d   : > { %v1711_v25 = vmul.f32 %v1706_v4, %v1706_v4 }
 0x28e   : > { %v1712_v18 = vsel %vm880_vm7, %v1707_v17, 0.0  ;;  %v1713_v10 = vsel %vm880_vm7, %v1708_v8, 0.0  ;;  %v1715_v26 = vsel %vm880_vm7, %v1709_v7, 0.0  ;;  %v1717_v28 = vsel %vm880_vm7, %v1710_v13, 0.0 }
 0x28f   : > { %v1714_v23 = vadd.f32 %v1713_v10, %v1712_v18  ;;  %v1719_v22 = vsel %vm888_vm12, %v1711_v25, 0.0 }
 0x291   : > { %v1716_v27 = vadd.f32 %v1715_v26, %v1714_v23 }
 0x293   : > { %v1718_v29 = vadd.f32 %v1717_v28, %v1716_v27 }
 0x295   : > { %v1720_v31 = vadd.f32 %v1719_v22, %v1718_v29 }
 0x297   : > { %v1721_v32 = vrot.slane %v1720_v31, 4 }
 0x299   : > { %v1722_v35 = vadd.f32 %v1721_v32, %v1720_v31 }
 0x29b   : > { %v1723_v34 = vrot.slane %v1722_v35, 2 }
 0x29d   : > { %v1724_v36 = vadd.f32 %v1723_v34, %v1722_v35 }
 0x29f   : > { %v1725_v37 = vrot.slane %v1724_v36, 1 }
 0x2a1   : > { %v1726_v39 = vadd.f32 %v1725_v37, %v1724_v36 }
 0x2a3   : > { %v1727_v21 = vmul.f32 0.0625, %v1726_v39 }
 0x2a5   : > { %v1728_v40 = vadd.f32 1e-05, %v1727_v21 }
 0x2a7   : > { %2171 = vrsqrt.f32 %v1728_v40  ;;  %vm1735_vm2 = vweird.f32 %v1728_v40 }
 0x2ad   : > { %v2172_v5 = vpop.eup %2171 }
 0x2ae   : > { %v1730_v41 = vmul.f32 %v2172_v5, %v1728_v40  ;;  %vm1736_vm1 = vweird.f32 %v2172_v5 }
 0x2af   : > { %vm1737_vm7 = vmor %vm1735_vm2, %vm1736_vm1 }
 0x2b0   : > { %v1731_v20 = vmul.f32 %v2172_v5, %v1730_v41 }
 0x2b2   : > { %v1732_v24 = vmul.f32 0.5, %v1731_v20 }
 0x2b4   : > { %v1733_v44 = vsub.f32 1.5, %v1732_v24 }
 0x2b6   : > { %v1734_v49 = vmul.f32 %v2172_v5, %v1733_v44 }
 0x2b8   : > { %v1738_v42 = vsel %vm1737_vm7, %v2172_v5, %v1734_v49 }
 0x2b9   : > { %v1739_v52 = vmul.f32 %v1738_v42, %v1697_v2  ;;  %v1740_v53 = vmul.f32 %v1738_v42, %v1698_v6  ;;  %v1741_v33 = vmul.f32 %v1738_v42, %v1699_v1  ;;  %v1742_v50 = vmul.f32 %v1738_v42, %v1700_v9 }
 0x2ba   : > { %v1743_v43 = vmul.f32 %v1738_v42, %v1701_v14 }
 0x2bb   : > { %vm1744_vm15 = vcmp.ge.f32.partialorder %v1739_v52, 0.0  ;;  %vm1745_vm0 = vcmp.ge.f32.partialorder %v1740_v53, 0.0  ;;  %vm1746_vm3 = vcmp.ge.f32.partialorder %v1741_v33, 0.0  ;;  %vm1747_vm5 = vcmp.ge.f32.partialorder %v1742_v50, 0.0 }
 0x2bc   : > { %vm1748_vm6 = vcmp.ge.f32.partialorder %v1743_v43, 0.0  ;;  %v1750_v54 = vmul.f32 %v1749_v51, %v1739_v52  ;;  %v1751_v55 = vmul.f32 %v1749_v51, %v1740_v53  ;;  %v1752_v47 = vmul.f32 %v1749_v51, %v1741_v33 }
 0x2bd   : > { %v1753_v56 = vmul.f32 %v1749_v51, %v1742_v50  ;;  %v1754_v58 = vmul.f32 %v1749_v51, %v1743_v43 }
 0x2be   : > { %v1755_v60 = vsel %vm1744_vm15, %v1739_v52, %v1750_v54  ;;  %v1756_v61 = vsel %vm1745_vm0, %v1740_v53, %v1751_v55  ;;  %v1757_v62 = vsel %vm1746_vm3, %v1741_v33, %v1752_v47 }
 0x2bf   : > { %v1758_v0 = vsel %vm1747_vm5, %v1742_v50, %v1753_v56  ;;  %v1759_v2 = vsel %vm1748_vm6, %v1743_v43, %v1754_v58  ;;  %v1780_v6 = vadd.f32 %v1766_v59, %v1755_v60  ;;  %v1781_v1 = vadd.f32 %v1768_v38, %v1756_v61 }
 0x2c0   : > { %v1782_v9 = vadd.f32 %v1770_v45, %v1757_v62  ;;  %v1783_v14 = vadd.f32 %v1772_v46, %v1758_v0  ;;  %v1784_v16 = vadd.f32 %v1774_v63, %v1759_v2 }
 0x2c1   : > { %v1785_v11 = vmul.f32 %v2412_v15, %v1780_v6  ;;  %v1786_v12 = vmul.f32 %v2415_v19, %v1781_v1 }
 0x2c2   : > { %v1787_v3 = vmul.f32 %v2431_v30, %v1782_v9  ;;  %v1788_v4 = vmul.f32 %v2440_v48, %v1783_v14  ;;  %v1789_v17 = vmul.f32 %v2449_v57, %v1784_v16 }
 0x2c3   : > { %v1790_v8 = vpack.c.bf16 %v1785_v11, %v1785_v11  ;;  %v1791_v7 = vpack.c.bf16 %v1786_v12, %v1786_v12 }
 0x2c4   : > { %v1792_v13 = vpack.c.bf16 %v1787_v3, %v1787_v3  ;;  %v1793_v18 = vpack.c.bf16 %v1788_v4, %v1788_v4  ;;  %v1794_v10 = vpack.c.bf16 %v1789_v17, %v1789_v17 }
 0x2c5   : > { %1795 = vst.msk [vmem:[%s238_s19] sm:$0xf] %vm888_vm12, %v1790_v8 }
 0x2c6   : > { %1796 = vst.msk [vmem:[%s238_s19 + $0x4] sm:$0xf] %vm888_vm12, %v1791_v7 }
 0x2c7   : > { %1797 = vst.msk [vmem:[%s238_s19 + $0x8] sm:$0xf] %vm888_vm12, %v1792_v13 }
 0x2c8   : > { %1798 = vst.msk [vmem:[%s238_s19 + $0xc] sm:$0xf] %vm888_vm12, %v1793_v18 }
 0x2c9   : > { %1800 = vst.msk [vmem:[%s238_s19 + $0x10] sm:$0x3] %vm1051_vm4, %v1794_v10 }
 0x2ca PF: > { %s16_s18 = sadd.s32 1, %s2198_s18  }
 0x2cb   : > { %p13_p7 = scmp.ge.s32.totalorder %s16_s18, 4  }
 0x2cd   :  { %15 = sbr.rel (!%p13_p7) target bundleno = 1 (0x1), region = 75 }
 0x2d2   :  { %1822 = vsyncpa [#allocation4], 1 }
 0x2d3   :  { %1824 = vsyncpa [#allocation4 + $0x1], 1 }

</bundles_post_ra>
